<compile_context>
chip_gen: v5e
topology: v5e:2x2
jax: 0.10.0
libtpu: 0.0.40
codegen_flags: <defaults>
</compile_context>

<pallas_src>
import functools
import math

import jax
import jax.numpy as jnp
from jax.experimental import pallas as pl
from jax.experimental.pallas import tpu as pltpu


_PARAM_ORDER = (
    "wt", "bt", "wc", "bc", "wcol", "bcol",
    "wqkv", "bqkv", "wo", "bo",
    "w1", "b1", "w2", "b2",
    "g1", "be1", "g2", "be2",
)

_SEQ = 3            # texture / composition / color tokens
_TEX = 256
_COMP = 196
_COMP_PAD = 256     # lane-dense
_COL = 3
_COL_PAD = 128      # lane-dense
_EPS = 1e-5         # PyTorch layer_norm_eps default


# ----------------------------- Pallas kernel -----------------------------


def _encoder_kernel(
    tex_ref, comp_ref, col_ref,
    wt_ref, bt_ref, wc_ref, bc_ref, wcol_ref, bcol_ref,
    wqkv_ref, bqkv_ref, wo_ref, bo_ref,
    w1_ref, b1_ref, w2_ref, b2_ref,
    g1_ref, be1_ref, g2_ref, be2_ref,
    o_ref,
    *, num_layers, nhead, d_model, matmul_dtype):
    f32 = jnp.float32
    dh = d_model // nhead
    scale = 1.0 / math.sqrt(dh)

    def linear(x, w, b):
        # MXU matmul; operands optionally narrowed, accumulate in f32.
        y = jnp.dot(x.astype(matmul_dtype), w.astype(matmul_dtype),
                    preferred_element_type=f32)
        return y + b

    def layer_norm(x, gamma, beta):
        mu = jnp.mean(x, axis=-1, keepdims=True)
        xc = x - mu
        var = jnp.mean(xc * xc, axis=-1, keepdims=True)
        return xc * jax.lax.rsqrt(var + _EPS) * gamma + beta

    # --- input embeddings: 3 tokens, each (Bb, d_model), kept as 2-D tiles ---
    h = [
        linear(tex_ref[...], wt_ref[...], bt_ref[...]),
        linear(comp_ref[...], wc_ref[...], bc_ref[...]),
        linear(col_ref[...], wcol_ref[...], bcol_ref[...]),
    ]

    for l in range(num_layers):
        wqkv = wqkv_ref[l]        # (d, 3d)  pre-transposed
        bqkv = bqkv_ref[l]        # (1, 3d)
        wo = wo_ref[l]            # (d, d)
        bo = bo_ref[l]            # (1, d)

        # ---- multi-head self-attention over the 3 tokens ----
        qkv = [linear(h[s], wqkv, bqkv) for s in range(_SEQ)]       # (Bb, 3d)
        q = [qkv[s][:, 0:d_model] for s in range(_SEQ)]
        k = [qkv[s][:, d_model:2 * d_model] for s in range(_SEQ)]
        v = [qkv[s][:, 2 * d_model:3 * d_model] for s in range(_SEQ)]

        head_ctx = [[] for _ in range(_SEQ)]     # head_ctx[s]: list over heads
        for hh in range(nhead):
            lo = hh * dh
            qh = [q[s][:, lo:lo + dh] * scale for s in range(_SEQ)]
            kh = [k[s][:, lo:lo + dh] for s in range(_SEQ)]
            vh = [v[s][:, lo:lo + dh] for s in range(_SEQ)]
            for s in range(_SEQ):
                # scores of query token s against the 3 key tokens, (Bb, 1) each
                sc = [jnp.sum(qh[s] * kh[t], axis=-1, keepdims=True)
                      for t in range(_SEQ)]
                m = jnp.maximum(jnp.maximum(sc[0], sc[1]), sc[2])
                e = [jnp.exp(sc[t] - m) for t in range(_SEQ)]
                denom = e[0] + e[1] + e[2]
                ctx = (e[0] * vh[0] + e[1] * vh[1] + e[2] * vh[2]) / denom
                head_ctx[s].append(ctx)                              # (Bb, dh)

        for s in range(_SEQ):
            ctx = jnp.concatenate(head_ctx[s], axis=-1)              # (Bb, d)
            sa = linear(ctx, wo, bo)                                 # out_proj
            x1 = layer_norm(h[s] + sa, g1_ref[l], be1_ref[l])        # post-norm
            ff = jnp.maximum(linear(x1, w1_ref[l], b1_ref[l]), 0.0)  # ReLU
            ff = linear(ff, w2_ref[l], b2_ref[l])
            h[s] = layer_norm(x1 + ff, g2_ref[l], be2_ref[l])

    # torch.reshape((B, 3, d) -> (B, 3*d)) == feature-wise concat of the tokens
    o_ref[...] = jnp.concatenate(h, axis=-1).astype(o_ref.dtype)


# ------------------------------- wrapper ----------------------------------


def make_forward(d_model, nhead, dim_feedforward, num_layers,
                 batch_block=8, matmul_dtype=jnp.float32):
    del dim_feedforward  # inferred from parameter shapes
    out_f = _SEQ * d_model
    kernel = functools.partial(
        _encoder_kernel, num_layers=num_layers, nhead=nhead,
        d_model=d_model, matmul_dtype=matmul_dtype)

    def fwd(params, x):
        b = x.shape[0]
        x = x.astype(jnp.float32)
        tex = x[:, :_TEX]
        comp = jnp.pad(x[:, _TEX:_TEX + _COMP], ((0, 0), (0, _COMP_PAD - _COMP)))
        col = jnp.pad(x[:, _TEX + _COMP:], ((0, 0), (0, _COL_PAD - _COL)))
        bp = pl.cdiv(b, batch_block) * batch_block
        if bp != b:  # pad batch to a whole number of blocks (sliced off below)
            rows = ((0, bp - b), (0, 0))
            tex = jnp.pad(tex, rows)
            comp = jnp.pad(comp, rows)
            col = jnp.pad(col, rows)
        weights = [params[name] for name in _PARAM_ORDER]

        def whole(arr):
            nd = arr.ndim
            return pl.BlockSpec(arr.shape, lambda i, _nd=nd: (0,) * _nd)

        out = pl.pallas_call(
            kernel,
            out_shape=jax.ShapeDtypeStruct((bp, out_f), jnp.float32),
            grid=(bp // batch_block,),
            in_specs=[
                pl.BlockSpec((batch_block, _TEX), lambda i: (i, 0)),
                pl.BlockSpec((batch_block, _COMP_PAD), lambda i: (i, 0)),
                pl.BlockSpec((batch_block, _COL_PAD), lambda i: (i, 0)),
            ] + [whole(w) for w in weights],
            out_specs=pl.BlockSpec((batch_block, out_f), lambda i: (i, 0)),
            compiler_params=pltpu.CompilerParams(
                dimension_semantics=("parallel",)),
        )(tex, comp, col, *weights)
        return out[:b]

    return jax.jit(fwd)


# ----------------------------- parameters ---------------------------------


def init_params(key, d_model, nhead, dim_feedforward, num_layers):
    d, ff, nl = d_model, dim_feedforward, num_layers
    assert d % nhead == 0
    keys = iter(jax.random.split(key, 6 + 12 * nl))

    def uniform(shape, bound):
        return jax.random.uniform(next(keys), shape, jnp.float32, -bound, bound)

    def linear_pt(fan_in, fan_out):
        # PyTorch nn.Linear default init; stored pre-transposed as (in, out).
        bound = 1.0 / math.sqrt(fan_in)
        w = uniform((fan_out, fan_in), bound).T
        b = uniform((1, fan_out), bound)
        return w, b

    wt, bt = linear_pt(_TEX, d)
    wc, bc = linear_pt(_COMP, d)
    wcol, bcol = linear_pt(_COL, d)
    # zero-pad input-feature rows -> identical math, lane-dense kernel loads
    wc = jnp.pad(wc, ((0, _COMP_PAD - _COMP), (0, 0)))
    wcol = jnp.pad(wcol, ((0, _COL_PAD - _COL), (0, 0)))

    names = ("wqkv", "bqkv", "wo", "bo", "w1", "b1", "w2", "b2",
             "g1", "be1", "g2", "be2")
    stacks = {n: [] for n in names}
    for _ in range(nl):
        a = math.sqrt(6.0 / (d + 3 * d))                  # xavier_uniform(in_proj)
        stacks["wqkv"].append(uniform((3 * d, d), a).T)   # (d, 3d) pre-transposed
        stacks["bqkv"].append(uniform((1, 3 * d), 1.0 / math.sqrt(d)))
        wo_l, bo_l = linear_pt(d, d)
        w1_l, b1_l = linear_pt(d, ff)
        w2_l, b2_l = linear_pt(ff, d)
        stacks["wo"].append(wo_l); stacks["bo"].append(bo_l)
        stacks["w1"].append(w1_l); stacks["b1"].append(b1_l)
        stacks["w2"].append(w2_l); stacks["b2"].append(b2_l)
        stacks["g1"].append(1.0 + 0.1 * uniform((1, d), 1.0))
        stacks["be1"].append(0.1 * uniform((1, d), 1.0))
        stacks["g2"].append(1.0 + 0.1 * uniform((1, d), 1.0))
        stacks["be2"].append(0.1 * uniform((1, d), 1.0))

    params = dict(wt=wt, bt=bt, wc=wc, bc=bc, wcol=wcol, bcol=bcol)
    for n in names:
        params[n] = jnp.stack(stacks[n])   # leading (num_layers, ...) axis
    return params


# --------------------------- pure-JAX reference ----------------------------


def _layer_norm_ref(x, gamma, beta):
    mu = jnp.mean(x, axis=-1, keepdims=True)
    var = jnp.mean((x - mu) ** 2, axis=-1, keepdims=True)
    return (x - mu) / jnp.sqrt(var + _EPS) * gamma + beta


def reference_forward(params, x, *, d_model, nhead, num_layers):
    p = params
    d = d_model
    dh = d // nhead
    bsz = x.shape[0]
    x = x.astype(jnp.float32)
    tex = x[:, :_TEX]
    comp = jnp.pad(x[:, _TEX:_TEX + _COMP], ((0, 0), (0, _COMP_PAD - _COMP)))
    col = jnp.pad(x[:, _TEX + _COMP:], ((0, 0), (0, _COL_PAD - _COL)))
    t = tex @ p["wt"] + p["bt"]
    c = comp @ p["wc"] + p["bc"]
    co = col @ p["wcol"] + p["bcol"]
    h = jnp.stack([t, c, co], axis=1)                       # (B, 3, d)
    scale = 1.0 / math.sqrt(dh)
    for l in range(num_layers):
        qkv = h @ p["wqkv"][l] + p["bqkv"][l]               # (B, 3, 3d)
        q, k, v = jnp.split(qkv, 3, axis=-1)

        def heads(z):
            return z.reshape(bsz, _SEQ, nhead, dh).transpose(0, 2, 1, 3)

        qh, kh, vh = heads(q), heads(k), heads(v)           # (B, H, 3, dh)
        sc = jnp.einsum("bhqd,bhkd->bhqk", qh * scale, kh)
        w = jax.nn.softmax(sc, axis=-1)
        ctx = jnp.einsum("bhqk,bhkd->bhqd", w, vh)
        ctx = ctx.transpose(0, 2, 1, 3).reshape(bsz, _SEQ, d)
        sa = ctx @ p["wo"][l] + p["bo"][l]
        x1 = _layer_norm_ref(h + sa, p["g1"][l], p["be1"][l])
        ff = jnp.maximum(x1 @ p["w1"][l] + p["b1"][l], 0.0)
        ff = ff @ p["w2"][l] + p["b2"][l]
        h = _layer_norm_ref(x1 + ff, p["g2"][l], p["be2"][l])
    return h.reshape(bsz, _SEQ * d)


# --------------------------------- main ------------------------------------


if __name__ == "__main__":
    d_model, nhead, dim_feedforward, num_layers = 128, 4, 256, 2
    batch = 16

    key = jax.random.PRNGKey(0)
    kp, kx = jax.random.split(key)
    params = init_params(kp, d_model, nhead, dim_feedforward, num_layers)
    x = jax.random.normal(kx, (batch, _TEX + _COMP + _COL), jnp.float32)  # (16, 455)

    fwd = make_forward(d_model, nhead, dim_feedforward, num_layers, batch_block=8)
    out = jax.block_until_ready(fwd(params, x))

    ref = reference_forward(params, x, d_model=d_model, nhead=nhead,
                            num_layers=num_layers)
    assert out.shape == (batch, _SEQ * d_model), out.shape
    # tolerance covers MXU f32-matmul path differences vs the XLA reference
    assert jnp.allclose(out, ref, atol=5e-2, rtol=5e-2), \
        float(jnp.max(jnp.abs(out - ref)))
    print("KERNEL_OK")
</pallas_src>

<mosaic_0001>
module attributes {stable_mosaic.version = 11 : i64} {
  func.func @_encoder_kernel(%arg0: i32, %arg1: memref<8x256xf32, #tpu.memory_space<vmem>>, %arg2: memref<8x256xf32, #tpu.memory_space<vmem>>, %arg3: memref<8x128xf32, #tpu.memory_space<vmem>>, %arg4: memref<256x128xf32, #tpu.memory_space<vmem>>, %arg5: memref<1x128xf32, #tpu.memory_space<vmem>>, %arg6: memref<256x128xf32, #tpu.memory_space<vmem>>, %arg7: memref<1x128xf32, #tpu.memory_space<vmem>>, %arg8: memref<128x128xf32, #tpu.memory_space<vmem>>, %arg9: memref<1x128xf32, #tpu.memory_space<vmem>>, %arg10: memref<2x128x384xf32, #tpu.memory_space<vmem>>, %arg11: memref<2x1x384xf32, #tpu.memory_space<vmem>>, %arg12: memref<2x128x128xf32, #tpu.memory_space<vmem>>, %arg13: memref<2x1x128xf32, #tpu.memory_space<vmem>>, %arg14: memref<2x128x256xf32, #tpu.memory_space<vmem>>, %arg15: memref<2x1x256xf32, #tpu.memory_space<vmem>>, %arg16: memref<2x256x128xf32, #tpu.memory_space<vmem>>, %arg17: memref<2x1x128xf32, #tpu.memory_space<vmem>>, %arg18: memref<2x1x128xf32, #tpu.memory_space<vmem>>, %arg19: memref<2x1x128xf32, #tpu.memory_space<vmem>>, %arg20: memref<2x1x128xf32, #tpu.memory_space<vmem>>, %arg21: memref<2x1x128xf32, #tpu.memory_space<vmem>>, %arg22: memref<8x384xf32, #tpu.memory_space<vmem>>) attributes {dimension_semantics = [#tpu.dimension_semantics<parallel>], iteration_bounds = array<i64: 2>, scalar_prefetch = 0 : i64, scratch_operands = 0 : i64, tpu.core_type = #tpu.core_type<tc>, window_params = [{transform_indices = @transform_0, window_bounds = array<i64: 8, 256>}, {transform_indices = @transform_1, window_bounds = array<i64: 8, 256>}, {transform_indices = @transform_2, window_bounds = array<i64: 8, 128>}, {pipeline_mode = #tpu.pipeline_mode<synchronous>, transform_indices = @transform_3, window_bounds = array<i64: 256, 128>}, {pipeline_mode = #tpu.pipeline_mode<synchronous>, transform_indices = @transform_4, window_bounds = array<i64: 1, 128>}, {pipeline_mode = #tpu.pipeline_mode<synchronous>, transform_indices = @transform_5, window_bounds = array<i64: 256, 128>}, {pipeline_mode = #tpu.pipeline_mode<synchronous>, transform_indices = @transform_6, window_bounds = array<i64: 1, 128>}, {pipeline_mode = #tpu.pipeline_mode<synchronous>, transform_indices = @transform_7, window_bounds = array<i64: 128, 128>}, {pipeline_mode = #tpu.pipeline_mode<synchronous>, transform_indices = @transform_8, window_bounds = array<i64: 1, 128>}, {pipeline_mode = #tpu.pipeline_mode<synchronous>, transform_indices = @transform_9, window_bounds = array<i64: 2, 128, 384>}, {pipeline_mode = #tpu.pipeline_mode<synchronous>, transform_indices = @transform_10, window_bounds = array<i64: 2, 1, 384>}, {pipeline_mode = #tpu.pipeline_mode<synchronous>, transform_indices = @transform_11, window_bounds = array<i64: 2, 128, 128>}, {pipeline_mode = #tpu.pipeline_mode<synchronous>, transform_indices = @transform_12, window_bounds = array<i64: 2, 1, 128>}, {pipeline_mode = #tpu.pipeline_mode<synchronous>, transform_indices = @transform_13, window_bounds = array<i64: 2, 128, 256>}, {pipeline_mode = #tpu.pipeline_mode<synchronous>, transform_indices = @transform_14, window_bounds = array<i64: 2, 1, 256>}, {pipeline_mode = #tpu.pipeline_mode<synchronous>, transform_indices = @transform_15, window_bounds = array<i64: 2, 256, 128>}, {pipeline_mode = #tpu.pipeline_mode<synchronous>, transform_indices = @transform_16, window_bounds = array<i64: 2, 1, 128>}, {pipeline_mode = #tpu.pipeline_mode<synchronous>, transform_indices = @transform_17, window_bounds = array<i64: 2, 1, 128>}, {pipeline_mode = #tpu.pipeline_mode<synchronous>, transform_indices = @transform_18, window_bounds = array<i64: 2, 1, 128>}, {pipeline_mode = #tpu.pipeline_mode<synchronous>, transform_indices = @transform_19, window_bounds = array<i64: 2, 1, 128>}, {pipeline_mode = #tpu.pipeline_mode<synchronous>, transform_indices = @transform_20, window_bounds = array<i64: 2, 1, 128>}, {transform_indices = @transform_21, window_bounds = array<i64: 8, 384>}]} {
    %c0 = arith.constant 0 : index
    %c0_0 = arith.constant 0 : index
    %0 = vector.load %arg1[%c0, %c0_0] : memref<8x256xf32, #tpu.memory_space<vmem>>, vector<8x256xf32>
    %c0_1 = arith.constant 0 : index
    %c0_2 = arith.constant 0 : index
    %1 = vector.load %arg4[%c0_1, %c0_2] : memref<256x128xf32, #tpu.memory_space<vmem>>, vector<256x128xf32>
    %c0_3 = arith.constant 0 : index
    %c0_4 = arith.constant 0 : index
    %2 = vector.load %arg5[%c0_3, %c0_4] : memref<1x128xf32, #tpu.memory_space<vmem>>, vector<1x128xf32>
    %cst = arith.constant dense<0.000000e+00> : vector<8x128xf32>
    %3 = tpu.matmul %0, %1, %cst {dimension_numbers = #tpu.dot_dimension_numbers<[1], [0], [0], [1], [0, 0, 1, 1], [], []>} : vector<8x256xf32>, vector<256x128xf32>, vector<8x128xf32> -> vector<8x128xf32>
    %4 = vector.broadcast %2 : vector<1x128xf32> to vector<8x128xf32>
    %5 = arith.addf %3, %4 : vector<8x128xf32>
    %c0_5 = arith.constant 0 : index
    %c0_6 = arith.constant 0 : index
    %6 = vector.load %arg2[%c0_5, %c0_6] : memref<8x256xf32, #tpu.memory_space<vmem>>, vector<8x256xf32>
    %c0_7 = arith.constant 0 : index
    %c0_8 = arith.constant 0 : index
    %7 = vector.load %arg6[%c0_7, %c0_8] : memref<256x128xf32, #tpu.memory_space<vmem>>, vector<256x128xf32>
    %c0_9 = arith.constant 0 : index
    %c0_10 = arith.constant 0 : index
    %8 = vector.load %arg7[%c0_9, %c0_10] : memref<1x128xf32, #tpu.memory_space<vmem>>, vector<1x128xf32>
    %cst_11 = arith.constant dense<0.000000e+00> : vector<8x128xf32>
    %9 = tpu.matmul %6, %7, %cst_11 {dimension_numbers = #tpu.dot_dimension_numbers<[1], [0], [0], [1], [0, 0, 1, 1], [], []>} : vector<8x256xf32>, vector<256x128xf32>, vector<8x128xf32> -> vector<8x128xf32>
    %10 = vector.broadcast %8 : vector<1x128xf32> to vector<8x128xf32>
    %11 = arith.addf %9, %10 : vector<8x128xf32>
    %c0_12 = arith.constant 0 : index
    %c0_13 = arith.constant 0 : index
    %12 = vector.load %arg3[%c0_12, %c0_13] : memref<8x128xf32, #tpu.memory_space<vmem>>, vector<8x128xf32>
    %c0_14 = arith.constant 0 : index
    %c0_15 = arith.constant 0 : index
    %13 = vector.load %arg8[%c0_14, %c0_15] : memref<128x128xf32, #tpu.memory_space<vmem>>, vector<128x128xf32>
    %c0_16 = arith.constant 0 : index
    %c0_17 = arith.constant 0 : index
    %14 = vector.load %arg9[%c0_16, %c0_17] : memref<1x128xf32, #tpu.memory_space<vmem>>, vector<1x128xf32>
    %cst_18 = arith.constant dense<0.000000e+00> : vector<8x128xf32>
    %15 = tpu.matmul %12, %13, %cst_18 {dimension_numbers = #tpu.dot_dimension_numbers<[1], [0], [0], [1], [0, 0, 1, 1], [], []>} : vector<8x128xf32>, vector<128x128xf32>, vector<8x128xf32> -> vector<8x128xf32>
    %16 = vector.broadcast %14 : vector<1x128xf32> to vector<8x128xf32>
    %17 = arith.addf %15, %16 : vector<8x128xf32>
    %c0_19 = arith.constant 0 : index
    %c0_20 = arith.constant 0 : index
    %c0_21 = arith.constant 0 : index
    %18 = vector.load %arg10[%c0_19, %c0_20, %c0_21] : memref<2x128x384xf32, #tpu.memory_space<vmem>>, vector<1x128x384xf32>
    %19 = vector.shape_cast %18 : vector<1x128x384xf32> to vector<128x384xf32>
    %c0_22 = arith.constant 0 : index
    %c0_23 = arith.constant 0 : index
    %c0_24 = arith.constant 0 : index
    %20 = vector.load %arg11[%c0_22, %c0_23, %c0_24] : memref<2x1x384xf32, #tpu.memory_space<vmem>>, vector<1x1x384xf32>
    %21 = vector.shape_cast %20 : vector<1x1x384xf32> to vector<1x384xf32>
    %c0_25 = arith.constant 0 : index
    %c0_26 = arith.constant 0 : index
    %c0_27 = arith.constant 0 : index
    %22 = vector.load %arg12[%c0_25, %c0_26, %c0_27] : memref<2x128x128xf32, #tpu.memory_space<vmem>>, vector<1x128x128xf32>
    %23 = vector.shape_cast %22 : vector<1x128x128xf32> to vector<128x128xf32>
    %c0_28 = arith.constant 0 : index
    %c0_29 = arith.constant 0 : index
    %c0_30 = arith.constant 0 : index
    %24 = vector.load %arg13[%c0_28, %c0_29, %c0_30] : memref<2x1x128xf32, #tpu.memory_space<vmem>>, vector<1x1x128xf32>
    %25 = vector.shape_cast %24 : vector<1x1x128xf32> to vector<1x128xf32>
    %cst_31 = arith.constant dense<0.000000e+00> : vector<8x384xf32>
    %26 = tpu.matmul %5, %19, %cst_31 {dimension_numbers = #tpu.dot_dimension_numbers<[1], [0], [0], [1], [0, 0, 1, 1], [], []>} : vector<8x128xf32>, vector<128x384xf32>, vector<8x384xf32> -> vector<8x384xf32>
    %27 = vector.broadcast %21 : vector<1x384xf32> to vector<8x384xf32>
    %28 = arith.addf %26, %27 : vector<8x384xf32>
    %cst_32 = arith.constant dense<0.000000e+00> : vector<8x384xf32>
    %29 = tpu.matmul %11, %19, %cst_32 {dimension_numbers = #tpu.dot_dimension_numbers<[1], [0], [0], [1], [0, 0, 1, 1], [], []>} : vector<8x128xf32>, vector<128x384xf32>, vector<8x384xf32> -> vector<8x384xf32>
    %30 = vector.broadcast %21 : vector<1x384xf32> to vector<8x384xf32>
    %31 = arith.addf %29, %30 : vector<8x384xf32>
    %cst_33 = arith.constant dense<0.000000e+00> : vector<8x384xf32>
    %32 = tpu.matmul %17, %19, %cst_33 {dimension_numbers = #tpu.dot_dimension_numbers<[1], [0], [0], [1], [0, 0, 1, 1], [], []>} : vector<8x128xf32>, vector<128x384xf32>, vector<8x384xf32> -> vector<8x384xf32>
    %33 = vector.broadcast %21 : vector<1x384xf32> to vector<8x384xf32>
    %34 = arith.addf %32, %33 : vector<8x384xf32>
    %35 = vector.extract_strided_slice %28 {offsets = [0, 0], sizes = [8, 128], strides = [1, 1]} : vector<8x384xf32> to vector<8x128xf32>
    %36 = vector.extract_strided_slice %31 {offsets = [0, 0], sizes = [8, 128], strides = [1, 1]} : vector<8x384xf32> to vector<8x128xf32>
    %37 = vector.extract_strided_slice %34 {offsets = [0, 0], sizes = [8, 128], strides = [1, 1]} : vector<8x384xf32> to vector<8x128xf32>
    %38 = vector.extract_strided_slice %28 {offsets = [0, 128], sizes = [8, 128], strides = [1, 1]} : vector<8x384xf32> to vector<8x128xf32>
    %39 = vector.extract_strided_slice %31 {offsets = [0, 128], sizes = [8, 128], strides = [1, 1]} : vector<8x384xf32> to vector<8x128xf32>
    %40 = vector.extract_strided_slice %34 {offsets = [0, 128], sizes = [8, 128], strides = [1, 1]} : vector<8x384xf32> to vector<8x128xf32>
    %41 = vector.extract_strided_slice %28 {offsets = [0, 256], sizes = [8, 128], strides = [1, 1]} : vector<8x384xf32> to vector<8x128xf32>
    %42 = vector.extract_strided_slice %31 {offsets = [0, 256], sizes = [8, 128], strides = [1, 1]} : vector<8x384xf32> to vector<8x128xf32>
    %43 = vector.extract_strided_slice %34 {offsets = [0, 256], sizes = [8, 128], strides = [1, 1]} : vector<8x384xf32> to vector<8x128xf32>
    %44 = vector.extract_strided_slice %35 {offsets = [0, 0], sizes = [8, 32], strides = [1, 1]} : vector<8x128xf32> to vector<8x32xf32>
    %cst_34 = arith.constant 0.176776692 : f32
    %45 = vector.broadcast %cst_34 : f32 to vector<8x32xf32>
    %46 = arith.mulf %44, %45 : vector<8x32xf32>
    %47 = vector.extract_strided_slice %36 {offsets = [0, 0], sizes = [8, 32], strides = [1, 1]} : vector<8x128xf32> to vector<8x32xf32>
    %cst_35 = arith.constant 0.176776692 : f32
    %48 = vector.broadcast %cst_35 : f32 to vector<8x32xf32>
    %49 = arith.mulf %47, %48 : vector<8x32xf32>
    %50 = vector.extract_strided_slice %37 {offsets = [0, 0], sizes = [8, 32], strides = [1, 1]} : vector<8x128xf32> to vector<8x32xf32>
    %cst_36 = arith.constant 0.176776692 : f32
    %51 = vector.broadcast %cst_36 : f32 to vector<8x32xf32>
    %52 = arith.mulf %50, %51 : vector<8x32xf32>
    %53 = vector.extract_strided_slice %38 {offsets = [0, 0], sizes = [8, 32], strides = [1, 1]} : vector<8x128xf32> to vector<8x32xf32>
    %54 = vector.extract_strided_slice %39 {offsets = [0, 0], sizes = [8, 32], strides = [1, 1]} : vector<8x128xf32> to vector<8x32xf32>
    %55 = vector.extract_strided_slice %40 {offsets = [0, 0], sizes = [8, 32], strides = [1, 1]} : vector<8x128xf32> to vector<8x32xf32>
    %56 = vector.extract_strided_slice %41 {offsets = [0, 0], sizes = [8, 32], strides = [1, 1]} : vector<8x128xf32> to vector<8x32xf32>
    %57 = vector.extract_strided_slice %42 {offsets = [0, 0], sizes = [8, 32], strides = [1, 1]} : vector<8x128xf32> to vector<8x32xf32>
    %58 = vector.extract_strided_slice %43 {offsets = [0, 0], sizes = [8, 32], strides = [1, 1]} : vector<8x128xf32> to vector<8x32xf32>
    %59 = arith.mulf %46, %53 : vector<8x32xf32>
    %cst_37 = arith.constant dense<0.000000e+00> : vector<8xf32>
    %60 = vector.multi_reduction <add>, %59, %cst_37 [1] : vector<8x32xf32> to vector<8xf32>
    %61 = vector.shape_cast %60 : vector<8xf32> to vector<8x1xf32>
    %62 = arith.mulf %46, %54 : vector<8x32xf32>
    %cst_38 = arith.constant dense<0.000000e+00> : vector<8xf32>
    %63 = vector.multi_reduction <add>, %62, %cst_38 [1] : vector<8x32xf32> to vector<8xf32>
    %64 = vector.shape_cast %63 : vector<8xf32> to vector<8x1xf32>
    %65 = arith.mulf %46, %55 : vector<8x32xf32>
    %cst_39 = arith.constant dense<0.000000e+00> : vector<8xf32>
    %66 = vector.multi_reduction <add>, %65, %cst_39 [1] : vector<8x32xf32> to vector<8xf32>
    %67 = vector.shape_cast %66 : vector<8xf32> to vector<8x1xf32>
    %68 = arith.maximumf %61, %64 : vector<8x1xf32>
    %69 = arith.maximumf %68, %67 : vector<8x1xf32>
    %70 = arith.subf %61, %69 : vector<8x1xf32>
    %71 = math.exp %70 : vector<8x1xf32>
    %72 = arith.subf %64, %69 : vector<8x1xf32>
    %73 = math.exp %72 : vector<8x1xf32>
    %74 = arith.subf %67, %69 : vector<8x1xf32>
    %75 = math.exp %74 : vector<8x1xf32>
    %76 = arith.addf %71, %73 : vector<8x1xf32>
    %77 = arith.addf %76, %75 : vector<8x1xf32>
    %78 = vector.broadcast %71 : vector<8x1xf32> to vector<8x32xf32>
    %79 = arith.mulf %78, %56 : vector<8x32xf32>
    %80 = vector.broadcast %73 : vector<8x1xf32> to vector<8x32xf32>
    %81 = arith.mulf %80, %57 : vector<8x32xf32>
    %82 = arith.addf %79, %81 : vector<8x32xf32>
    %83 = vector.broadcast %75 : vector<8x1xf32> to vector<8x32xf32>
    %84 = arith.mulf %83, %58 : vector<8x32xf32>
    %85 = arith.addf %82, %84 : vector<8x32xf32>
    %86 = vector.broadcast %77 : vector<8x1xf32> to vector<8x32xf32>
    %87 = arith.divf %85, %86 : vector<8x32xf32>
    %88 = arith.mulf %49, %53 : vector<8x32xf32>
    %cst_40 = arith.constant dense<0.000000e+00> : vector<8xf32>
    %89 = vector.multi_reduction <add>, %88, %cst_40 [1] : vector<8x32xf32> to vector<8xf32>
    %90 = vector.shape_cast %89 : vector<8xf32> to vector<8x1xf32>
    %91 = arith.mulf %49, %54 : vector<8x32xf32>
    %cst_41 = arith.constant dense<0.000000e+00> : vector<8xf32>
    %92 = vector.multi_reduction <add>, %91, %cst_41 [1] : vector<8x32xf32> to vector<8xf32>
    %93 = vector.shape_cast %92 : vector<8xf32> to vector<8x1xf32>
    %94 = arith.mulf %49, %55 : vector<8x32xf32>
    %cst_42 = arith.constant dense<0.000000e+00> : vector<8xf32>
    %95 = vector.multi_reduction <add>, %94, %cst_42 [1] : vector<8x32xf32> to vector<8xf32>
    %96 = vector.shape_cast %95 : vector<8xf32> to vector<8x1xf32>
    %97 = arith.maximumf %90, %93 : vector<8x1xf32>
    %98 = arith.maximumf %97, %96 : vector<8x1xf32>
    %99 = arith.subf %90, %98 : vector<8x1xf32>
    %100 = math.exp %99 : vector<8x1xf32>
    %101 = arith.subf %93, %98 : vector<8x1xf32>
    %102 = math.exp %101 : vector<8x1xf32>
    %103 = arith.subf %96, %98 : vector<8x1xf32>
    %104 = math.exp %103 : vector<8x1xf32>
    %105 = arith.addf %100, %102 : vector<8x1xf32>
    %106 = arith.addf %105, %104 : vector<8x1xf32>
    %107 = vector.broadcast %100 : vector<8x1xf32> to vector<8x32xf32>
    %108 = arith.mulf %107, %56 : vector<8x32xf32>
    %109 = vector.broadcast %102 : vector<8x1xf32> to vector<8x32xf32>
    %110 = arith.mulf %109, %57 : vector<8x32xf32>
    %111 = arith.addf %108, %110 : vector<8x32xf32>
    %112 = vector.broadcast %104 : vector<8x1xf32> to vector<8x32xf32>
    %113 = arith.mulf %112, %58 : vector<8x32xf32>
    %114 = arith.addf %111, %113 : vector<8x32xf32>
    %115 = vector.broadcast %106 : vector<8x1xf32> to vector<8x32xf32>
    %116 = arith.divf %114, %115 : vector<8x32xf32>
    %117 = arith.mulf %52, %53 : vector<8x32xf32>
    %cst_43 = arith.constant dense<0.000000e+00> : vector<8xf32>
    %118 = vector.multi_reduction <add>, %117, %cst_43 [1] : vector<8x32xf32> to vector<8xf32>
    %119 = vector.shape_cast %118 : vector<8xf32> to vector<8x1xf32>
    %120 = arith.mulf %52, %54 : vector<8x32xf32>
    %cst_44 = arith.constant dense<0.000000e+00> : vector<8xf32>
    %121 = vector.multi_reduction <add>, %120, %cst_44 [1] : vector<8x32xf32> to vector<8xf32>
    %122 = vector.shape_cast %121 : vector<8xf32> to vector<8x1xf32>
    %123 = arith.mulf %52, %55 : vector<8x32xf32>
    %cst_45 = arith.constant dense<0.000000e+00> : vector<8xf32>
    %124 = vector.multi_reduction <add>, %123, %cst_45 [1] : vector<8x32xf32> to vector<8xf32>
    %125 = vector.shape_cast %124 : vector<8xf32> to vector<8x1xf32>
    %126 = arith.maximumf %119, %122 : vector<8x1xf32>
    %127 = arith.maximumf %126, %125 : vector<8x1xf32>
    %128 = arith.subf %119, %127 : vector<8x1xf32>
    %129 = math.exp %128 : vector<8x1xf32>
    %130 = arith.subf %122, %127 : vector<8x1xf32>
    %131 = math.exp %130 : vector<8x1xf32>
    %132 = arith.subf %125, %127 : vector<8x1xf32>
    %133 = math.exp %132 : vector<8x1xf32>
    %134 = arith.addf %129, %131 : vector<8x1xf32>
    %135 = arith.addf %134, %133 : vector<8x1xf32>
    %136 = vector.broadcast %129 : vector<8x1xf32> to vector<8x32xf32>
    %137 = arith.mulf %136, %56 : vector<8x32xf32>
    %138 = vector.broadcast %131 : vector<8x1xf32> to vector<8x32xf32>
    %139 = arith.mulf %138, %57 : vector<8x32xf32>
    %140 = arith.addf %137, %139 : vector<8x32xf32>
    %141 = vector.broadcast %133 : vector<8x1xf32> to vector<8x32xf32>
    %142 = arith.mulf %141, %58 : vector<8x32xf32>
    %143 = arith.addf %140, %142 : vector<8x32xf32>
    %144 = vector.broadcast %135 : vector<8x1xf32> to vector<8x32xf32>
    %145 = arith.divf %143, %144 : vector<8x32xf32>
    %146 = vector.extract_strided_slice %35 {offsets = [0, 32], sizes = [8, 32], strides = [1, 1]} : vector<8x128xf32> to vector<8x32xf32>
    %cst_46 = arith.constant 0.176776692 : f32
    %147 = vector.broadcast %cst_46 : f32 to vector<8x32xf32>
    %148 = arith.mulf %146, %147 : vector<8x32xf32>
    %149 = vector.extract_strided_slice %36 {offsets = [0, 32], sizes = [8, 32], strides = [1, 1]} : vector<8x128xf32> to vector<8x32xf32>
    %cst_47 = arith.constant 0.176776692 : f32
    %150 = vector.broadcast %cst_47 : f32 to vector<8x32xf32>
    %151 = arith.mulf %149, %150 : vector<8x32xf32>
    %152 = vector.extract_strided_slice %37 {offsets = [0, 32], sizes = [8, 32], strides = [1, 1]} : vector<8x128xf32> to vector<8x32xf32>
    %cst_48 = arith.constant 0.176776692 : f32
    %153 = vector.broadcast %cst_48 : f32 to vector<8x32xf32>
    %154 = arith.mulf %152, %153 : vector<8x32xf32>
    %155 = vector.extract_strided_slice %38 {offsets = [0, 32], sizes = [8, 32], strides = [1, 1]} : vector<8x128xf32> to vector<8x32xf32>
    %156 = vector.extract_strided_slice %39 {offsets = [0, 32], sizes = [8, 32], strides = [1, 1]} : vector<8x128xf32> to vector<8x32xf32>
    %157 = vector.extract_strided_slice %40 {offsets = [0, 32], sizes = [8, 32], strides = [1, 1]} : vector<8x128xf32> to vector<8x32xf32>
    %158 = vector.extract_strided_slice %41 {offsets = [0, 32], sizes = [8, 32], strides = [1, 1]} : vector<8x128xf32> to vector<8x32xf32>
    %159 = vector.extract_strided_slice %42 {offsets = [0, 32], sizes = [8, 32], strides = [1, 1]} : vector<8x128xf32> to vector<8x32xf32>
    %160 = vector.extract_strided_slice %43 {offsets = [0, 32], sizes = [8, 32], strides = [1, 1]} : vector<8x128xf32> to vector<8x32xf32>
    %161 = arith.mulf %148, %155 : vector<8x32xf32>
    %cst_49 = arith.constant dense<0.000000e+00> : vector<8xf32>
    %162 = vector.multi_reduction <add>, %161, %cst_49 [1] : vector<8x32xf32> to vector<8xf32>
    %163 = vector.shape_cast %162 : vector<8xf32> to vector<8x1xf32>
    %164 = arith.mulf %148, %156 : vector<8x32xf32>
    %cst_50 = arith.constant dense<0.000000e+00> : vector<8xf32>
    %165 = vector.multi_reduction <add>, %164, %cst_50 [1] : vector<8x32xf32> to vector<8xf32>
    %166 = vector.shape_cast %165 : vector<8xf32> to vector<8x1xf32>
    %167 = arith.mulf %148, %157 : vector<8x32xf32>
    %cst_51 = arith.constant dense<0.000000e+00> : vector<8xf32>
    %168 = vector.multi_reduction <add>, %167, %cst_51 [1] : vector<8x32xf32> to vector<8xf32>
    %169 = vector.shape_cast %168 : vector<8xf32> to vector<8x1xf32>
    %170 = arith.maximumf %163, %166 : vector<8x1xf32>
    %171 = arith.maximumf %170, %169 : vector<8x1xf32>
    %172 = arith.subf %163, %171 : vector<8x1xf32>
    %173 = math.exp %172 : vector<8x1xf32>
    %174 = arith.subf %166, %171 : vector<8x1xf32>
    %175 = math.exp %174 : vector<8x1xf32>
    %176 = arith.subf %169, %171 : vector<8x1xf32>
    %177 = math.exp %176 : vector<8x1xf32>
    %178 = arith.addf %173, %175 : vector<8x1xf32>
    %179 = arith.addf %178, %177 : vector<8x1xf32>
    %180 = vector.broadcast %173 : vector<8x1xf32> to vector<8x32xf32>
    %181 = arith.mulf %180, %158 : vector<8x32xf32>
    %182 = vector.broadcast %175 : vector<8x1xf32> to vector<8x32xf32>
    %183 = arith.mulf %182, %159 : vector<8x32xf32>
    %184 = arith.addf %181, %183 : vector<8x32xf32>
    %185 = vector.broadcast %177 : vector<8x1xf32> to vector<8x32xf32>
    %186 = arith.mulf %185, %160 : vector<8x32xf32>
    %187 = arith.addf %184, %186 : vector<8x32xf32>
    %188 = vector.broadcast %179 : vector<8x1xf32> to vector<8x32xf32>
    %189 = arith.divf %187, %188 : vector<8x32xf32>
    %190 = arith.mulf %151, %155 : vector<8x32xf32>
    %cst_52 = arith.constant dense<0.000000e+00> : vector<8xf32>
    %191 = vector.multi_reduction <add>, %190, %cst_52 [1] : vector<8x32xf32> to vector<8xf32>
    %192 = vector.shape_cast %191 : vector<8xf32> to vector<8x1xf32>
    %193 = arith.mulf %151, %156 : vector<8x32xf32>
    %cst_53 = arith.constant dense<0.000000e+00> : vector<8xf32>
    %194 = vector.multi_reduction <add>, %193, %cst_53 [1] : vector<8x32xf32> to vector<8xf32>
    %195 = vector.shape_cast %194 : vector<8xf32> to vector<8x1xf32>
    %196 = arith.mulf %151, %157 : vector<8x32xf32>
    %cst_54 = arith.constant dense<0.000000e+00> : vector<8xf32>
    %197 = vector.multi_reduction <add>, %196, %cst_54 [1] : vector<8x32xf32> to vector<8xf32>
    %198 = vector.shape_cast %197 : vector<8xf32> to vector<8x1xf32>
    %199 = arith.maximumf %192, %195 : vector<8x1xf32>
    %200 = arith.maximumf %199, %198 : vector<8x1xf32>
    %201 = arith.subf %192, %200 : vector<8x1xf32>
    %202 = math.exp %201 : vector<8x1xf32>
    %203 = arith.subf %195, %200 : vector<8x1xf32>
    %204 = math.exp %203 : vector<8x1xf32>
    %205 = arith.subf %198, %200 : vector<8x1xf32>
    %206 = math.exp %205 : vector<8x1xf32>
    %207 = arith.addf %202, %204 : vector<8x1xf32>
    %208 = arith.addf %207, %206 : vector<8x1xf32>
    %209 = vector.broadcast %202 : vector<8x1xf32> to vector<8x32xf32>
    %210 = arith.mulf %209, %158 : vector<8x32xf32>
    %211 = vector.broadcast %204 : vector<8x1xf32> to vector<8x32xf32>
    %212 = arith.mulf %211, %159 : vector<8x32xf32>
    %213 = arith.addf %210, %212 : vector<8x32xf32>
    %214 = vector.broadcast %206 : vector<8x1xf32> to vector<8x32xf32>
    %215 = arith.mulf %214, %160 : vector<8x32xf32>
    %216 = arith.addf %213, %215 : vector<8x32xf32>
    %217 = vector.broadcast %208 : vector<8x1xf32> to vector<8x32xf32>
    %218 = arith.divf %216, %217 : vector<8x32xf32>
    %219 = arith.mulf %154, %155 : vector<8x32xf32>
    %cst_55 = arith.constant dense<0.000000e+00> : vector<8xf32>
    %220 = vector.multi_reduction <add>, %219, %cst_55 [1] : vector<8x32xf32> to vector<8xf32>
    %221 = vector.shape_cast %220 : vector<8xf32> to vector<8x1xf32>
    %222 = arith.mulf %154, %156 : vector<8x32xf32>
    %cst_56 = arith.constant dense<0.000000e+00> : vector<8xf32>
    %223 = vector.multi_reduction <add>, %222, %cst_56 [1] : vector<8x32xf32> to vector<8xf32>
    %224 = vector.shape_cast %223 : vector<8xf32> to vector<8x1xf32>
    %225 = arith.mulf %154, %157 : vector<8x32xf32>
    %cst_57 = arith.constant dense<0.000000e+00> : vector<8xf32>
    %226 = vector.multi_reduction <add>, %225, %cst_57 [1] : vector<8x32xf32> to vector<8xf32>
    %227 = vector.shape_cast %226 : vector<8xf32> to vector<8x1xf32>
    %228 = arith.maximumf %221, %224 : vector<8x1xf32>
    %229 = arith.maximumf %228, %227 : vector<8x1xf32>
    %230 = arith.subf %221, %229 : vector<8x1xf32>
    %231 = math.exp %230 : vector<8x1xf32>
    %232 = arith.subf %224, %229 : vector<8x1xf32>
    %233 = math.exp %232 : vector<8x1xf32>
    %234 = arith.subf %227, %229 : vector<8x1xf32>
    %235 = math.exp %234 : vector<8x1xf32>
    %236 = arith.addf %231, %233 : vector<8x1xf32>
    %237 = arith.addf %236, %235 : vector<8x1xf32>
    %238 = vector.broadcast %231 : vector<8x1xf32> to vector<8x32xf32>
    %239 = arith.mulf %238, %158 : vector<8x32xf32>
    %240 = vector.broadcast %233 : vector<8x1xf32> to vector<8x32xf32>
    %241 = arith.mulf %240, %159 : vector<8x32xf32>
    %242 = arith.addf %239, %241 : vector<8x32xf32>
    %243 = vector.broadcast %235 : vector<8x1xf32> to vector<8x32xf32>
    %244 = arith.mulf %243, %160 : vector<8x32xf32>
    %245 = arith.addf %242, %244 : vector<8x32xf32>
    %246 = vector.broadcast %237 : vector<8x1xf32> to vector<8x32xf32>
    %247 = arith.divf %245, %246 : vector<8x32xf32>
    %248 = vector.extract_strided_slice %35 {offsets = [0, 64], sizes = [8, 32], strides = [1, 1]} : vector<8x128xf32> to vector<8x32xf32>
    %cst_58 = arith.constant 0.176776692 : f32
    %249 = vector.broadcast %cst_58 : f32 to vector<8x32xf32>
    %250 = arith.mulf %248, %249 : vector<8x32xf32>
    %251 = vector.extract_strided_slice %36 {offsets = [0, 64], sizes = [8, 32], strides = [1, 1]} : vector<8x128xf32> to vector<8x32xf32>
    %cst_59 = arith.constant 0.176776692 : f32
    %252 = vector.broadcast %cst_59 : f32 to vector<8x32xf32>
    %253 = arith.mulf %251, %252 : vector<8x32xf32>
    %254 = vector.extract_strided_slice %37 {offsets = [0, 64], sizes = [8, 32], strides = [1, 1]} : vector<8x128xf32> to vector<8x32xf32>
    %cst_60 = arith.constant 0.176776692 : f32
    %255 = vector.broadcast %cst_60 : f32 to vector<8x32xf32>
    %256 = arith.mulf %254, %255 : vector<8x32xf32>
    %257 = vector.extract_strided_slice %38 {offsets = [0, 64], sizes = [8, 32], strides = [1, 1]} : vector<8x128xf32> to vector<8x32xf32>
    %258 = vector.extract_strided_slice %39 {offsets = [0, 64], sizes = [8, 32], strides = [1, 1]} : vector<8x128xf32> to vector<8x32xf32>
    %259 = vector.extract_strided_slice %40 {offsets = [0, 64], sizes = [8, 32], strides = [1, 1]} : vector<8x128xf32> to vector<8x32xf32>
    %260 = vector.extract_strided_slice %41 {offsets = [0, 64], sizes = [8, 32], strides = [1, 1]} : vector<8x128xf32> to vector<8x32xf32>
    %261 = vector.extract_strided_slice %42 {offsets = [0, 64], sizes = [8, 32], strides = [1, 1]} : vector<8x128xf32> to vector<8x32xf32>
    %262 = vector.extract_strided_slice %43 {offsets = [0, 64], sizes = [8, 32], strides = [1, 1]} : vector<8x128xf32> to vector<8x32xf32>
    %263 = arith.mulf %250, %257 : vector<8x32xf32>
    %cst_61 = arith.constant dense<0.000000e+00> : vector<8xf32>
    %264 = vector.multi_reduction <add>, %263, %cst_61 [1] : vector<8x32xf32> to vector<8xf32>
    %265 = vector.shape_cast %264 : vector<8xf32> to vector<8x1xf32>
    %266 = arith.mulf %250, %258 : vector<8x32xf32>
    %cst_62 = arith.constant dense<0.000000e+00> : vector<8xf32>
    %267 = vector.multi_reduction <add>, %266, %cst_62 [1] : vector<8x32xf32> to vector<8xf32>
    %268 = vector.shape_cast %267 : vector<8xf32> to vector<8x1xf32>
    %269 = arith.mulf %250, %259 : vector<8x32xf32>
    %cst_63 = arith.constant dense<0.000000e+00> : vector<8xf32>
    %270 = vector.multi_reduction <add>, %269, %cst_63 [1] : vector<8x32xf32> to vector<8xf32>
    %271 = vector.shape_cast %270 : vector<8xf32> to vector<8x1xf32>
    %272 = arith.maximumf %265, %268 : vector<8x1xf32>
    %273 = arith.maximumf %272, %271 : vector<8x1xf32>
    %274 = arith.subf %265, %273 : vector<8x1xf32>
    %275 = math.exp %274 : vector<8x1xf32>
    %276 = arith.subf %268, %273 : vector<8x1xf32>
    %277 = math.exp %276 : vector<8x1xf32>
    %278 = arith.subf %271, %273 : vector<8x1xf32>
    %279 = math.exp %278 : vector<8x1xf32>
    %280 = arith.addf %275, %277 : vector<8x1xf32>
    %281 = arith.addf %280, %279 : vector<8x1xf32>
    %282 = vector.broadcast %275 : vector<8x1xf32> to vector<8x32xf32>
    %283 = arith.mulf %282, %260 : vector<8x32xf32>
    %284 = vector.broadcast %277 : vector<8x1xf32> to vector<8x32xf32>
    %285 = arith.mulf %284, %261 : vector<8x32xf32>
    %286 = arith.addf %283, %285 : vector<8x32xf32>
    %287 = vector.broadcast %279 : vector<8x1xf32> to vector<8x32xf32>
    %288 = arith.mulf %287, %262 : vector<8x32xf32>
    %289 = arith.addf %286, %288 : vector<8x32xf32>
    %290 = vector.broadcast %281 : vector<8x1xf32> to vector<8x32xf32>
    %291 = arith.divf %289, %290 : vector<8x32xf32>
    %292 = arith.mulf %253, %257 : vector<8x32xf32>
    %cst_64 = arith.constant dense<0.000000e+00> : vector<8xf32>
    %293 = vector.multi_reduction <add>, %292, %cst_64 [1] : vector<8x32xf32> to vector<8xf32>
    %294 = vector.shape_cast %293 : vector<8xf32> to vector<8x1xf32>
    %295 = arith.mulf %253, %258 : vector<8x32xf32>
    %cst_65 = arith.constant dense<0.000000e+00> : vector<8xf32>
    %296 = vector.multi_reduction <add>, %295, %cst_65 [1] : vector<8x32xf32> to vector<8xf32>
    %297 = vector.shape_cast %296 : vector<8xf32> to vector<8x1xf32>
    %298 = arith.mulf %253, %259 : vector<8x32xf32>
    %cst_66 = arith.constant dense<0.000000e+00> : vector<8xf32>
    %299 = vector.multi_reduction <add>, %298, %cst_66 [1] : vector<8x32xf32> to vector<8xf32>
    %300 = vector.shape_cast %299 : vector<8xf32> to vector<8x1xf32>
    %301 = arith.maximumf %294, %297 : vector<8x1xf32>
    %302 = arith.maximumf %301, %300 : vector<8x1xf32>
    %303 = arith.subf %294, %302 : vector<8x1xf32>
    %304 = math.exp %303 : vector<8x1xf32>
    %305 = arith.subf %297, %302 : vector<8x1xf32>
    %306 = math.exp %305 : vector<8x1xf32>
    %307 = arith.subf %300, %302 : vector<8x1xf32>
    %308 = math.exp %307 : vector<8x1xf32>
    %309 = arith.addf %304, %306 : vector<8x1xf32>
    %310 = arith.addf %309, %308 : vector<8x1xf32>
    %311 = vector.broadcast %304 : vector<8x1xf32> to vector<8x32xf32>
    %312 = arith.mulf %311, %260 : vector<8x32xf32>
    %313 = vector.broadcast %306 : vector<8x1xf32> to vector<8x32xf32>
    %314 = arith.mulf %313, %261 : vector<8x32xf32>
    %315 = arith.addf %312, %314 : vector<8x32xf32>
    %316 = vector.broadcast %308 : vector<8x1xf32> to vector<8x32xf32>
    %317 = arith.mulf %316, %262 : vector<8x32xf32>
    %318 = arith.addf %315, %317 : vector<8x32xf32>
    %319 = vector.broadcast %310 : vector<8x1xf32> to vector<8x32xf32>
    %320 = arith.divf %318, %319 : vector<8x32xf32>
    %321 = arith.mulf %256, %257 : vector<8x32xf32>
    %cst_67 = arith.constant dense<0.000000e+00> : vector<8xf32>
    %322 = vector.multi_reduction <add>, %321, %cst_67 [1] : vector<8x32xf32> to vector<8xf32>
    %323 = vector.shape_cast %322 : vector<8xf32> to vector<8x1xf32>
    %324 = arith.mulf %256, %258 : vector<8x32xf32>
    %cst_68 = arith.constant dense<0.000000e+00> : vector<8xf32>
    %325 = vector.multi_reduction <add>, %324, %cst_68 [1] : vector<8x32xf32> to vector<8xf32>
    %326 = vector.shape_cast %325 : vector<8xf32> to vector<8x1xf32>
    %327 = arith.mulf %256, %259 : vector<8x32xf32>
    %cst_69 = arith.constant dense<0.000000e+00> : vector<8xf32>
    %328 = vector.multi_reduction <add>, %327, %cst_69 [1] : vector<8x32xf32> to vector<8xf32>
    %329 = vector.shape_cast %328 : vector<8xf32> to vector<8x1xf32>
    %330 = arith.maximumf %323, %326 : vector<8x1xf32>
    %331 = arith.maximumf %330, %329 : vector<8x1xf32>
    %332 = arith.subf %323, %331 : vector<8x1xf32>
    %333 = math.exp %332 : vector<8x1xf32>
    %334 = arith.subf %326, %331 : vector<8x1xf32>
    %335 = math.exp %334 : vector<8x1xf32>
    %336 = arith.subf %329, %331 : vector<8x1xf32>
    %337 = math.exp %336 : vector<8x1xf32>
    %338 = arith.addf %333, %335 : vector<8x1xf32>
    %339 = arith.addf %338, %337 : vector<8x1xf32>
    %340 = vector.broadcast %333 : vector<8x1xf32> to vector<8x32xf32>
    %341 = arith.mulf %340, %260 : vector<8x32xf32>
    %342 = vector.broadcast %335 : vector<8x1xf32> to vector<8x32xf32>
    %343 = arith.mulf %342, %261 : vector<8x32xf32>
    %344 = arith.addf %341, %343 : vector<8x32xf32>
    %345 = vector.broadcast %337 : vector<8x1xf32> to vector<8x32xf32>
    %346 = arith.mulf %345, %262 : vector<8x32xf32>
    %347 = arith.addf %344, %346 : vector<8x32xf32>
    %348 = vector.broadcast %339 : vector<8x1xf32> to vector<8x32xf32>
    %349 = arith.divf %347, %348 : vector<8x32xf32>
    %350 = vector.extract_strided_slice %35 {offsets = [0, 96], sizes = [8, 32], strides = [1, 1]} : vector<8x128xf32> to vector<8x32xf32>
    %cst_70 = arith.constant 0.176776692 : f32
    %351 = vector.broadcast %cst_70 : f32 to vector<8x32xf32>
    %352 = arith.mulf %350, %351 : vector<8x32xf32>
    %353 = vector.extract_strided_slice %36 {offsets = [0, 96], sizes = [8, 32], strides = [1, 1]} : vector<8x128xf32> to vector<8x32xf32>
    %cst_71 = arith.constant 0.176776692 : f32
    %354 = vector.broadcast %cst_71 : f32 to vector<8x32xf32>
    %355 = arith.mulf %353, %354 : vector<8x32xf32>
    %356 = vector.extract_strided_slice %37 {offsets = [0, 96], sizes = [8, 32], strides = [1, 1]} : vector<8x128xf32> to vector<8x32xf32>
    %cst_72 = arith.constant 0.176776692 : f32
    %357 = vector.broadcast %cst_72 : f32 to vector<8x32xf32>
    %358 = arith.mulf %356, %357 : vector<8x32xf32>
    %359 = vector.extract_strided_slice %38 {offsets = [0, 96], sizes = [8, 32], strides = [1, 1]} : vector<8x128xf32> to vector<8x32xf32>
    %360 = vector.extract_strided_slice %39 {offsets = [0, 96], sizes = [8, 32], strides = [1, 1]} : vector<8x128xf32> to vector<8x32xf32>
    %361 = vector.extract_strided_slice %40 {offsets = [0, 96], sizes = [8, 32], strides = [1, 1]} : vector<8x128xf32> to vector<8x32xf32>
    %362 = vector.extract_strided_slice %41 {offsets = [0, 96], sizes = [8, 32], strides = [1, 1]} : vector<8x128xf32> to vector<8x32xf32>
    %363 = vector.extract_strided_slice %42 {offsets = [0, 96], sizes = [8, 32], strides = [1, 1]} : vector<8x128xf32> to vector<8x32xf32>
    %364 = vector.extract_strided_slice %43 {offsets = [0, 96], sizes = [8, 32], strides = [1, 1]} : vector<8x128xf32> to vector<8x32xf32>
    %365 = arith.mulf %352, %359 : vector<8x32xf32>
    %cst_73 = arith.constant dense<0.000000e+00> : vector<8xf32>
    %366 = vector.multi_reduction <add>, %365, %cst_73 [1] : vector<8x32xf32> to vector<8xf32>
    %367 = vector.shape_cast %366 : vector<8xf32> to vector<8x1xf32>
    %368 = arith.mulf %352, %360 : vector<8x32xf32>
    %cst_74 = arith.constant dense<0.000000e+00> : vector<8xf32>
    %369 = vector.multi_reduction <add>, %368, %cst_74 [1] : vector<8x32xf32> to vector<8xf32>
    %370 = vector.shape_cast %369 : vector<8xf32> to vector<8x1xf32>
    %371 = arith.mulf %352, %361 : vector<8x32xf32>
    %cst_75 = arith.constant dense<0.000000e+00> : vector<8xf32>
    %372 = vector.multi_reduction <add>, %371, %cst_75 [1] : vector<8x32xf32> to vector<8xf32>
    %373 = vector.shape_cast %372 : vector<8xf32> to vector<8x1xf32>
    %374 = arith.maximumf %367, %370 : vector<8x1xf32>
    %375 = arith.maximumf %374, %373 : vector<8x1xf32>
    %376 = arith.subf %367, %375 : vector<8x1xf32>
    %377 = math.exp %376 : vector<8x1xf32>
    %378 = arith.subf %370, %375 : vector<8x1xf32>
    %379 = math.exp %378 : vector<8x1xf32>
    %380 = arith.subf %373, %375 : vector<8x1xf32>
    %381 = math.exp %380 : vector<8x1xf32>
    %382 = arith.addf %377, %379 : vector<8x1xf32>
    %383 = arith.addf %382, %381 : vector<8x1xf32>
    %384 = vector.broadcast %377 : vector<8x1xf32> to vector<8x32xf32>
    %385 = arith.mulf %384, %362 : vector<8x32xf32>
    %386 = vector.broadcast %379 : vector<8x1xf32> to vector<8x32xf32>
    %387 = arith.mulf %386, %363 : vector<8x32xf32>
    %388 = arith.addf %385, %387 : vector<8x32xf32>
    %389 = vector.broadcast %381 : vector<8x1xf32> to vector<8x32xf32>
    %390 = arith.mulf %389, %364 : vector<8x32xf32>
    %391 = arith.addf %388, %390 : vector<8x32xf32>
    %392 = vector.broadcast %383 : vector<8x1xf32> to vector<8x32xf32>
    %393 = arith.divf %391, %392 : vector<8x32xf32>
    %394 = arith.mulf %355, %359 : vector<8x32xf32>
    %cst_76 = arith.constant dense<0.000000e+00> : vector<8xf32>
    %395 = vector.multi_reduction <add>, %394, %cst_76 [1] : vector<8x32xf32> to vector<8xf32>
    %396 = vector.shape_cast %395 : vector<8xf32> to vector<8x1xf32>
    %397 = arith.mulf %355, %360 : vector<8x32xf32>
    %cst_77 = arith.constant dense<0.000000e+00> : vector<8xf32>
    %398 = vector.multi_reduction <add>, %397, %cst_77 [1] : vector<8x32xf32> to vector<8xf32>
    %399 = vector.shape_cast %398 : vector<8xf32> to vector<8x1xf32>
    %400 = arith.mulf %355, %361 : vector<8x32xf32>
    %cst_78 = arith.constant dense<0.000000e+00> : vector<8xf32>
    %401 = vector.multi_reduction <add>, %400, %cst_78 [1] : vector<8x32xf32> to vector<8xf32>
    %402 = vector.shape_cast %401 : vector<8xf32> to vector<8x1xf32>
    %403 = arith.maximumf %396, %399 : vector<8x1xf32>
    %404 = arith.maximumf %403, %402 : vector<8x1xf32>
    %405 = arith.subf %396, %404 : vector<8x1xf32>
    %406 = math.exp %405 : vector<8x1xf32>
    %407 = arith.subf %399, %404 : vector<8x1xf32>
    %408 = math.exp %407 : vector<8x1xf32>
    %409 = arith.subf %402, %404 : vector<8x1xf32>
    %410 = math.exp %409 : vector<8x1xf32>
    %411 = arith.addf %406, %408 : vector<8x1xf32>
    %412 = arith.addf %411, %410 : vector<8x1xf32>
    %413 = vector.broadcast %406 : vector<8x1xf32> to vector<8x32xf32>
    %414 = arith.mulf %413, %362 : vector<8x32xf32>
    %415 = vector.broadcast %408 : vector<8x1xf32> to vector<8x32xf32>
    %416 = arith.mulf %415, %363 : vector<8x32xf32>
    %417 = arith.addf %414, %416 : vector<8x32xf32>
    %418 = vector.broadcast %410 : vector<8x1xf32> to vector<8x32xf32>
    %419 = arith.mulf %418, %364 : vector<8x32xf32>
    %420 = arith.addf %417, %419 : vector<8x32xf32>
    %421 = vector.broadcast %412 : vector<8x1xf32> to vector<8x32xf32>
    %422 = arith.divf %420, %421 : vector<8x32xf32>
    %423 = arith.mulf %358, %359 : vector<8x32xf32>
    %cst_79 = arith.constant dense<0.000000e+00> : vector<8xf32>
    %424 = vector.multi_reduction <add>, %423, %cst_79 [1] : vector<8x32xf32> to vector<8xf32>
    %425 = vector.shape_cast %424 : vector<8xf32> to vector<8x1xf32>
    %426 = arith.mulf %358, %360 : vector<8x32xf32>
    %cst_80 = arith.constant dense<0.000000e+00> : vector<8xf32>
    %427 = vector.multi_reduction <add>, %426, %cst_80 [1] : vector<8x32xf32> to vector<8xf32>
    %428 = vector.shape_cast %427 : vector<8xf32> to vector<8x1xf32>
    %429 = arith.mulf %358, %361 : vector<8x32xf32>
    %cst_81 = arith.constant dense<0.000000e+00> : vector<8xf32>
    %430 = vector.multi_reduction <add>, %429, %cst_81 [1] : vector<8x32xf32> to vector<8xf32>
    %431 = vector.shape_cast %430 : vector<8xf32> to vector<8x1xf32>
    %432 = arith.maximumf %425, %428 : vector<8x1xf32>
    %433 = arith.maximumf %432, %431 : vector<8x1xf32>
    %434 = arith.subf %425, %433 : vector<8x1xf32>
    %435 = math.exp %434 : vector<8x1xf32>
    %436 = arith.subf %428, %433 : vector<8x1xf32>
    %437 = math.exp %436 : vector<8x1xf32>
    %438 = arith.subf %431, %433 : vector<8x1xf32>
    %439 = math.exp %438 : vector<8x1xf32>
    %440 = arith.addf %435, %437 : vector<8x1xf32>
    %441 = arith.addf %440, %439 : vector<8x1xf32>
    %442 = vector.broadcast %435 : vector<8x1xf32> to vector<8x32xf32>
    %443 = arith.mulf %442, %362 : vector<8x32xf32>
    %444 = vector.broadcast %437 : vector<8x1xf32> to vector<8x32xf32>
    %445 = arith.mulf %444, %363 : vector<8x32xf32>
    %446 = arith.addf %443, %445 : vector<8x32xf32>
    %447 = vector.broadcast %439 : vector<8x1xf32> to vector<8x32xf32>
    %448 = arith.mulf %447, %364 : vector<8x32xf32>
    %449 = arith.addf %446, %448 : vector<8x32xf32>
    %450 = vector.broadcast %441 : vector<8x1xf32> to vector<8x32xf32>
    %451 = arith.divf %449, %450 : vector<8x32xf32>
    %452 = tpu.concatenate %87, %189, %291, %393 in 1 : vector<8x32xf32>, vector<8x32xf32>, vector<8x32xf32>, vector<8x32xf32> -> vector<8x128xf32>
    %cst_82 = arith.constant dense<0.000000e+00> : vector<8x128xf32>
    %453 = tpu.matmul %452, %23, %cst_82 {dimension_numbers = #tpu.dot_dimension_numbers<[1], [0], [0], [1], [0, 0, 1, 1], [], []>} : vector<8x128xf32>, vector<128x128xf32>, vector<8x128xf32> -> vector<8x128xf32>
    %454 = vector.broadcast %25 : vector<1x128xf32> to vector<8x128xf32>
    %455 = arith.addf %453, %454 : vector<8x128xf32>
    %456 = arith.addf %5, %455 : vector<8x128xf32>
    %c0_83 = arith.constant 0 : index
    %c0_84 = arith.constant 0 : index
    %c0_85 = arith.constant 0 : index
    %457 = vector.load %arg18[%c0_83, %c0_84, %c0_85] : memref<2x1x128xf32, #tpu.memory_space<vmem>>, vector<1x1x128xf32>
    %458 = vector.shape_cast %457 : vector<1x1x128xf32> to vector<1x128xf32>
    %c0_86 = arith.constant 0 : index
    %c0_87 = arith.constant 0 : index
    %c0_88 = arith.constant 0 : index
    %459 = vector.load %arg19[%c0_86, %c0_87, %c0_88] : memref<2x1x128xf32, #tpu.memory_space<vmem>>, vector<1x1x128xf32>
    %460 = vector.shape_cast %459 : vector<1x1x128xf32> to vector<1x128xf32>
    %cst_89 = arith.constant dense<0.000000e+00> : vector<8xf32>
    %461 = vector.multi_reduction <add>, %456, %cst_89 [1] : vector<8x128xf32> to vector<8xf32>
    %462 = vector.shape_cast %461 : vector<8xf32> to vector<8x1xf32>
    %cst_90 = arith.constant 1.280000e+02 : f32
    %463 = vector.broadcast %cst_90 : f32 to vector<8x1xf32>
    %464 = arith.divf %462, %463 : vector<8x1xf32>
    %465 = vector.broadcast %464 : vector<8x1xf32> to vector<8x128xf32>
    %466 = arith.subf %456, %465 : vector<8x128xf32>
    %467 = arith.mulf %466, %466 : vector<8x128xf32>
    %cst_91 = arith.constant dense<0.000000e+00> : vector<8xf32>
    %468 = vector.multi_reduction <add>, %467, %cst_91 [1] : vector<8x128xf32> to vector<8xf32>
    %469 = vector.shape_cast %468 : vector<8xf32> to vector<8x1xf32>
    %cst_92 = arith.constant 1.280000e+02 : f32
    %470 = vector.broadcast %cst_92 : f32 to vector<8x1xf32>
    %471 = arith.divf %469, %470 : vector<8x1xf32>
    %cst_93 = arith.constant 9.99999974E-6 : f32
    %472 = vector.broadcast %cst_93 : f32 to vector<8x1xf32>
    %473 = arith.addf %471, %472 : vector<8x1xf32>
    %474 = math.rsqrt %473 : vector<8x1xf32>
    %475 = vector.broadcast %474 : vector<8x1xf32> to vector<8x128xf32>
    %476 = arith.mulf %466, %475 : vector<8x128xf32>
    %477 = vector.broadcast %458 : vector<1x128xf32> to vector<8x128xf32>
    %478 = arith.mulf %476, %477 : vector<8x128xf32>
    %479 = vector.broadcast %460 : vector<1x128xf32> to vector<8x128xf32>
    %480 = arith.addf %478, %479 : vector<8x128xf32>
    %c0_94 = arith.constant 0 : index
    %c0_95 = arith.constant 0 : index
    %c0_96 = arith.constant 0 : index
    %481 = vector.load %arg14[%c0_94, %c0_95, %c0_96] : memref<2x128x256xf32, #tpu.memory_space<vmem>>, vector<1x128x256xf32>
    %482 = vector.shape_cast %481 : vector<1x128x256xf32> to vector<128x256xf32>
    %c0_97 = arith.constant 0 : index
    %c0_98 = arith.constant 0 : index
    %c0_99 = arith.constant 0 : index
    %483 = vector.load %arg15[%c0_97, %c0_98, %c0_99] : memref<2x1x256xf32, #tpu.memory_space<vmem>>, vector<1x1x256xf32>
    %484 = vector.shape_cast %483 : vector<1x1x256xf32> to vector<1x256xf32>
    %cst_100 = arith.constant dense<0.000000e+00> : vector<8x256xf32>
    %485 = tpu.matmul %480, %482, %cst_100 {dimension_numbers = #tpu.dot_dimension_numbers<[1], [0], [0], [1], [0, 0, 1, 1], [], []>} : vector<8x128xf32>, vector<128x256xf32>, vector<8x256xf32> -> vector<8x256xf32>
    %486 = vector.broadcast %484 : vector<1x256xf32> to vector<8x256xf32>
    %487 = arith.addf %485, %486 : vector<8x256xf32>
    %cst_101 = arith.constant 0.000000e+00 : f32
    %488 = vector.broadcast %cst_101 : f32 to vector<8x256xf32>
    %489 = arith.maximumf %487, %488 : vector<8x256xf32>
    %c0_102 = arith.constant 0 : index
    %c0_103 = arith.constant 0 : index
    %c0_104 = arith.constant 0 : index
    %490 = vector.load %arg16[%c0_102, %c0_103, %c0_104] : memref<2x256x128xf32, #tpu.memory_space<vmem>>, vector<1x256x128xf32>
    %491 = vector.shape_cast %490 : vector<1x256x128xf32> to vector<256x128xf32>
    %c0_105 = arith.constant 0 : index
    %c0_106 = arith.constant 0 : index
    %c0_107 = arith.constant 0 : index
    %492 = vector.load %arg17[%c0_105, %c0_106, %c0_107] : memref<2x1x128xf32, #tpu.memory_space<vmem>>, vector<1x1x128xf32>
    %493 = vector.shape_cast %492 : vector<1x1x128xf32> to vector<1x128xf32>
    %cst_108 = arith.constant dense<0.000000e+00> : vector<8x128xf32>
    %494 = tpu.matmul %489, %491, %cst_108 {dimension_numbers = #tpu.dot_dimension_numbers<[1], [0], [0], [1], [0, 0, 1, 1], [], []>} : vector<8x256xf32>, vector<256x128xf32>, vector<8x128xf32> -> vector<8x128xf32>
    %495 = vector.broadcast %493 : vector<1x128xf32> to vector<8x128xf32>
    %496 = arith.addf %494, %495 : vector<8x128xf32>
    %497 = arith.addf %480, %496 : vector<8x128xf32>
    %c0_109 = arith.constant 0 : index
    %c0_110 = arith.constant 0 : index
    %c0_111 = arith.constant 0 : index
    %498 = vector.load %arg20[%c0_109, %c0_110, %c0_111] : memref<2x1x128xf32, #tpu.memory_space<vmem>>, vector<1x1x128xf32>
    %499 = vector.shape_cast %498 : vector<1x1x128xf32> to vector<1x128xf32>
    %c0_112 = arith.constant 0 : index
    %c0_113 = arith.constant 0 : index
    %c0_114 = arith.constant 0 : index
    %500 = vector.load %arg21[%c0_112, %c0_113, %c0_114] : memref<2x1x128xf32, #tpu.memory_space<vmem>>, vector<1x1x128xf32>
    %501 = vector.shape_cast %500 : vector<1x1x128xf32> to vector<1x128xf32>
    %cst_115 = arith.constant dense<0.000000e+00> : vector<8xf32>
    %502 = vector.multi_reduction <add>, %497, %cst_115 [1] : vector<8x128xf32> to vector<8xf32>
    %503 = vector.shape_cast %502 : vector<8xf32> to vector<8x1xf32>
    %cst_116 = arith.constant 1.280000e+02 : f32
    %504 = vector.broadcast %cst_116 : f32 to vector<8x1xf32>
    %505 = arith.divf %503, %504 : vector<8x1xf32>
    %506 = vector.broadcast %505 : vector<8x1xf32> to vector<8x128xf32>
    %507 = arith.subf %497, %506 : vector<8x128xf32>
    %508 = arith.mulf %507, %507 : vector<8x128xf32>
    %cst_117 = arith.constant dense<0.000000e+00> : vector<8xf32>
    %509 = vector.multi_reduction <add>, %508, %cst_117 [1] : vector<8x128xf32> to vector<8xf32>
    %510 = vector.shape_cast %509 : vector<8xf32> to vector<8x1xf32>
    %cst_118 = arith.constant 1.280000e+02 : f32
    %511 = vector.broadcast %cst_118 : f32 to vector<8x1xf32>
    %512 = arith.divf %510, %511 : vector<8x1xf32>
    %cst_119 = arith.constant 9.99999974E-6 : f32
    %513 = vector.broadcast %cst_119 : f32 to vector<8x1xf32>
    %514 = arith.addf %512, %513 : vector<8x1xf32>
    %515 = math.rsqrt %514 : vector<8x1xf32>
    %516 = vector.broadcast %515 : vector<8x1xf32> to vector<8x128xf32>
    %517 = arith.mulf %507, %516 : vector<8x128xf32>
    %518 = vector.broadcast %499 : vector<1x128xf32> to vector<8x128xf32>
    %519 = arith.mulf %517, %518 : vector<8x128xf32>
    %520 = vector.broadcast %501 : vector<1x128xf32> to vector<8x128xf32>
    %521 = arith.addf %519, %520 : vector<8x128xf32>
    %522 = tpu.concatenate %116, %218, %320, %422 in 1 : vector<8x32xf32>, vector<8x32xf32>, vector<8x32xf32>, vector<8x32xf32> -> vector<8x128xf32>
    %cst_120 = arith.constant dense<0.000000e+00> : vector<8x128xf32>
    %523 = tpu.matmul %522, %23, %cst_120 {dimension_numbers = #tpu.dot_dimension_numbers<[1], [0], [0], [1], [0, 0, 1, 1], [], []>} : vector<8x128xf32>, vector<128x128xf32>, vector<8x128xf32> -> vector<8x128xf32>
    %524 = vector.broadcast %25 : vector<1x128xf32> to vector<8x128xf32>
    %525 = arith.addf %523, %524 : vector<8x128xf32>
    %526 = arith.addf %11, %525 : vector<8x128xf32>
    %c0_121 = arith.constant 0 : index
    %c0_122 = arith.constant 0 : index
    %c0_123 = arith.constant 0 : index
    %527 = vector.load %arg18[%c0_121, %c0_122, %c0_123] : memref<2x1x128xf32, #tpu.memory_space<vmem>>, vector<1x1x128xf32>
    %528 = vector.shape_cast %527 : vector<1x1x128xf32> to vector<1x128xf32>
    %c0_124 = arith.constant 0 : index
    %c0_125 = arith.constant 0 : index
    %c0_126 = arith.constant 0 : index
    %529 = vector.load %arg19[%c0_124, %c0_125, %c0_126] : memref<2x1x128xf32, #tpu.memory_space<vmem>>, vector<1x1x128xf32>
    %530 = vector.shape_cast %529 : vector<1x1x128xf32> to vector<1x128xf32>
    %cst_127 = arith.constant dense<0.000000e+00> : vector<8xf32>
    %531 = vector.multi_reduction <add>, %526, %cst_127 [1] : vector<8x128xf32> to vector<8xf32>
    %532 = vector.shape_cast %531 : vector<8xf32> to vector<8x1xf32>
    %cst_128 = arith.constant 1.280000e+02 : f32
    %533 = vector.broadcast %cst_128 : f32 to vector<8x1xf32>
    %534 = arith.divf %532, %533 : vector<8x1xf32>
    %535 = vector.broadcast %534 : vector<8x1xf32> to vector<8x128xf32>
    %536 = arith.subf %526, %535 : vector<8x128xf32>
    %537 = arith.mulf %536, %536 : vector<8x128xf32>
    %cst_129 = arith.constant dense<0.000000e+00> : vector<8xf32>
    %538 = vector.multi_reduction <add>, %537, %cst_129 [1] : vector<8x128xf32> to vector<8xf32>
    %539 = vector.shape_cast %538 : vector<8xf32> to vector<8x1xf32>
    %cst_130 = arith.constant 1.280000e+02 : f32
    %540 = vector.broadcast %cst_130 : f32 to vector<8x1xf32>
    %541 = arith.divf %539, %540 : vector<8x1xf32>
    %cst_131 = arith.constant 9.99999974E-6 : f32
    %542 = vector.broadcast %cst_131 : f32 to vector<8x1xf32>
    %543 = arith.addf %541, %542 : vector<8x1xf32>
    %544 = math.rsqrt %543 : vector<8x1xf32>
    %545 = vector.broadcast %544 : vector<8x1xf32> to vector<8x128xf32>
    %546 = arith.mulf %536, %545 : vector<8x128xf32>
    %547 = vector.broadcast %528 : vector<1x128xf32> to vector<8x128xf32>
    %548 = arith.mulf %546, %547 : vector<8x128xf32>
    %549 = vector.broadcast %530 : vector<1x128xf32> to vector<8x128xf32>
    %550 = arith.addf %548, %549 : vector<8x128xf32>
    %c0_132 = arith.constant 0 : index
    %c0_133 = arith.constant 0 : index
    %c0_134 = arith.constant 0 : index
    %551 = vector.load %arg14[%c0_132, %c0_133, %c0_134] : memref<2x128x256xf32, #tpu.memory_space<vmem>>, vector<1x128x256xf32>
    %552 = vector.shape_cast %551 : vector<1x128x256xf32> to vector<128x256xf32>
    %c0_135 = arith.constant 0 : index
    %c0_136 = arith.constant 0 : index
    %c0_137 = arith.constant 0 : index
    %553 = vector.load %arg15[%c0_135, %c0_136, %c0_137] : memref<2x1x256xf32, #tpu.memory_space<vmem>>, vector<1x1x256xf32>
    %554 = vector.shape_cast %553 : vector<1x1x256xf32> to vector<1x256xf32>
    %cst_138 = arith.constant dense<0.000000e+00> : vector<8x256xf32>
    %555 = tpu.matmul %550, %552, %cst_138 {dimension_numbers = #tpu.dot_dimension_numbers<[1], [0], [0], [1], [0, 0, 1, 1], [], []>} : vector<8x128xf32>, vector<128x256xf32>, vector<8x256xf32> -> vector<8x256xf32>
    %556 = vector.broadcast %554 : vector<1x256xf32> to vector<8x256xf32>
    %557 = arith.addf %555, %556 : vector<8x256xf32>
    %cst_139 = arith.constant 0.000000e+00 : f32
    %558 = vector.broadcast %cst_139 : f32 to vector<8x256xf32>
    %559 = arith.maximumf %557, %558 : vector<8x256xf32>
    %c0_140 = arith.constant 0 : index
    %c0_141 = arith.constant 0 : index
    %c0_142 = arith.constant 0 : index
    %560 = vector.load %arg16[%c0_140, %c0_141, %c0_142] : memref<2x256x128xf32, #tpu.memory_space<vmem>>, vector<1x256x128xf32>
    %561 = vector.shape_cast %560 : vector<1x256x128xf32> to vector<256x128xf32>
    %c0_143 = arith.constant 0 : index
    %c0_144 = arith.constant 0 : index
    %c0_145 = arith.constant 0 : index
    %562 = vector.load %arg17[%c0_143, %c0_144, %c0_145] : memref<2x1x128xf32, #tpu.memory_space<vmem>>, vector<1x1x128xf32>
    %563 = vector.shape_cast %562 : vector<1x1x128xf32> to vector<1x128xf32>
    %cst_146 = arith.constant dense<0.000000e+00> : vector<8x128xf32>
    %564 = tpu.matmul %559, %561, %cst_146 {dimension_numbers = #tpu.dot_dimension_numbers<[1], [0], [0], [1], [0, 0, 1, 1], [], []>} : vector<8x256xf32>, vector<256x128xf32>, vector<8x128xf32> -> vector<8x128xf32>
    %565 = vector.broadcast %563 : vector<1x128xf32> to vector<8x128xf32>
    %566 = arith.addf %564, %565 : vector<8x128xf32>
    %567 = arith.addf %550, %566 : vector<8x128xf32>
    %c0_147 = arith.constant 0 : index
    %c0_148 = arith.constant 0 : index
    %c0_149 = arith.constant 0 : index
    %568 = vector.load %arg20[%c0_147, %c0_148, %c0_149] : memref<2x1x128xf32, #tpu.memory_space<vmem>>, vector<1x1x128xf32>
    %569 = vector.shape_cast %568 : vector<1x1x128xf32> to vector<1x128xf32>
    %c0_150 = arith.constant 0 : index
    %c0_151 = arith.constant 0 : index
    %c0_152 = arith.constant 0 : index
    %570 = vector.load %arg21[%c0_150, %c0_151, %c0_152] : memref<2x1x128xf32, #tpu.memory_space<vmem>>, vector<1x1x128xf32>
    %571 = vector.shape_cast %570 : vector<1x1x128xf32> to vector<1x128xf32>
    %cst_153 = arith.constant dense<0.000000e+00> : vector<8xf32>
    %572 = vector.multi_reduction <add>, %567, %cst_153 [1] : vector<8x128xf32> to vector<8xf32>
    %573 = vector.shape_cast %572 : vector<8xf32> to vector<8x1xf32>
    %cst_154 = arith.constant 1.280000e+02 : f32
    %574 = vector.broadcast %cst_154 : f32 to vector<8x1xf32>
    %575 = arith.divf %573, %574 : vector<8x1xf32>
    %576 = vector.broadcast %575 : vector<8x1xf32> to vector<8x128xf32>
    %577 = arith.subf %567, %576 : vector<8x128xf32>
    %578 = arith.mulf %577, %577 : vector<8x128xf32>
    %cst_155 = arith.constant dense<0.000000e+00> : vector<8xf32>
    %579 = vector.multi_reduction <add>, %578, %cst_155 [1] : vector<8x128xf32> to vector<8xf32>
    %580 = vector.shape_cast %579 : vector<8xf32> to vector<8x1xf32>
    %cst_156 = arith.constant 1.280000e+02 : f32
    %581 = vector.broadcast %cst_156 : f32 to vector<8x1xf32>
    %582 = arith.divf %580, %581 : vector<8x1xf32>
    %cst_157 = arith.constant 9.99999974E-6 : f32
    %583 = vector.broadcast %cst_157 : f32 to vector<8x1xf32>
    %584 = arith.addf %582, %583 : vector<8x1xf32>
    %585 = math.rsqrt %584 : vector<8x1xf32>
    %586 = vector.broadcast %585 : vector<8x1xf32> to vector<8x128xf32>
    %587 = arith.mulf %577, %586 : vector<8x128xf32>
    %588 = vector.broadcast %569 : vector<1x128xf32> to vector<8x128xf32>
    %589 = arith.mulf %587, %588 : vector<8x128xf32>
    %590 = vector.broadcast %571 : vector<1x128xf32> to vector<8x128xf32>
    %591 = arith.addf %589, %590 : vector<8x128xf32>
    %592 = tpu.concatenate %145, %247, %349, %451 in 1 : vector<8x32xf32>, vector<8x32xf32>, vector<8x32xf32>, vector<8x32xf32> -> vector<8x128xf32>
    %cst_158 = arith.constant dense<0.000000e+00> : vector<8x128xf32>
    %593 = tpu.matmul %592, %23, %cst_158 {dimension_numbers = #tpu.dot_dimension_numbers<[1], [0], [0], [1], [0, 0, 1, 1], [], []>} : vector<8x128xf32>, vector<128x128xf32>, vector<8x128xf32> -> vector<8x128xf32>
    %594 = vector.broadcast %25 : vector<1x128xf32> to vector<8x128xf32>
    %595 = arith.addf %593, %594 : vector<8x128xf32>
    %596 = arith.addf %17, %595 : vector<8x128xf32>
    %c0_159 = arith.constant 0 : index
    %c0_160 = arith.constant 0 : index
    %c0_161 = arith.constant 0 : index
    %597 = vector.load %arg18[%c0_159, %c0_160, %c0_161] : memref<2x1x128xf32, #tpu.memory_space<vmem>>, vector<1x1x128xf32>
    %598 = vector.shape_cast %597 : vector<1x1x128xf32> to vector<1x128xf32>
    %c0_162 = arith.constant 0 : index
    %c0_163 = arith.constant 0 : index
    %c0_164 = arith.constant 0 : index
    %599 = vector.load %arg19[%c0_162, %c0_163, %c0_164] : memref<2x1x128xf32, #tpu.memory_space<vmem>>, vector<1x1x128xf32>
    %600 = vector.shape_cast %599 : vector<1x1x128xf32> to vector<1x128xf32>
    %cst_165 = arith.constant dense<0.000000e+00> : vector<8xf32>
    %601 = vector.multi_reduction <add>, %596, %cst_165 [1] : vector<8x128xf32> to vector<8xf32>
    %602 = vector.shape_cast %601 : vector<8xf32> to vector<8x1xf32>
    %cst_166 = arith.constant 1.280000e+02 : f32
    %603 = vector.broadcast %cst_166 : f32 to vector<8x1xf32>
    %604 = arith.divf %602, %603 : vector<8x1xf32>
    %605 = vector.broadcast %604 : vector<8x1xf32> to vector<8x128xf32>
    %606 = arith.subf %596, %605 : vector<8x128xf32>
    %607 = arith.mulf %606, %606 : vector<8x128xf32>
    %cst_167 = arith.constant dense<0.000000e+00> : vector<8xf32>
    %608 = vector.multi_reduction <add>, %607, %cst_167 [1] : vector<8x128xf32> to vector<8xf32>
    %609 = vector.shape_cast %608 : vector<8xf32> to vector<8x1xf32>
    %cst_168 = arith.constant 1.280000e+02 : f32
    %610 = vector.broadcast %cst_168 : f32 to vector<8x1xf32>
    %611 = arith.divf %609, %610 : vector<8x1xf32>
    %cst_169 = arith.constant 9.99999974E-6 : f32
    %612 = vector.broadcast %cst_169 : f32 to vector<8x1xf32>
    %613 = arith.addf %611, %612 : vector<8x1xf32>
    %614 = math.rsqrt %613 : vector<8x1xf32>
    %615 = vector.broadcast %614 : vector<8x1xf32> to vector<8x128xf32>
    %616 = arith.mulf %606, %615 : vector<8x128xf32>
    %617 = vector.broadcast %598 : vector<1x128xf32> to vector<8x128xf32>
    %618 = arith.mulf %616, %617 : vector<8x128xf32>
    %619 = vector.broadcast %600 : vector<1x128xf32> to vector<8x128xf32>
    %620 = arith.addf %618, %619 : vector<8x128xf32>
    %c0_170 = arith.constant 0 : index
    %c0_171 = arith.constant 0 : index
    %c0_172 = arith.constant 0 : index
    %621 = vector.load %arg14[%c0_170, %c0_171, %c0_172] : memref<2x128x256xf32, #tpu.memory_space<vmem>>, vector<1x128x256xf32>
    %622 = vector.shape_cast %621 : vector<1x128x256xf32> to vector<128x256xf32>
    %c0_173 = arith.constant 0 : index
    %c0_174 = arith.constant 0 : index
    %c0_175 = arith.constant 0 : index
    %623 = vector.load %arg15[%c0_173, %c0_174, %c0_175] : memref<2x1x256xf32, #tpu.memory_space<vmem>>, vector<1x1x256xf32>
    %624 = vector.shape_cast %623 : vector<1x1x256xf32> to vector<1x256xf32>
    %cst_176 = arith.constant dense<0.000000e+00> : vector<8x256xf32>
    %625 = tpu.matmul %620, %622, %cst_176 {dimension_numbers = #tpu.dot_dimension_numbers<[1], [0], [0], [1], [0, 0, 1, 1], [], []>} : vector<8x128xf32>, vector<128x256xf32>, vector<8x256xf32> -> vector<8x256xf32>
    %626 = vector.broadcast %624 : vector<1x256xf32> to vector<8x256xf32>
    %627 = arith.addf %625, %626 : vector<8x256xf32>
    %cst_177 = arith.constant 0.000000e+00 : f32
    %628 = vector.broadcast %cst_177 : f32 to vector<8x256xf32>
    %629 = arith.maximumf %627, %628 : vector<8x256xf32>
    %c0_178 = arith.constant 0 : index
    %c0_179 = arith.constant 0 : index
    %c0_180 = arith.constant 0 : index
    %630 = vector.load %arg16[%c0_178, %c0_179, %c0_180] : memref<2x256x128xf32, #tpu.memory_space<vmem>>, vector<1x256x128xf32>
    %631 = vector.shape_cast %630 : vector<1x256x128xf32> to vector<256x128xf32>
    %c0_181 = arith.constant 0 : index
    %c0_182 = arith.constant 0 : index
    %c0_183 = arith.constant 0 : index
    %632 = vector.load %arg17[%c0_181, %c0_182, %c0_183] : memref<2x1x128xf32, #tpu.memory_space<vmem>>, vector<1x1x128xf32>
    %633 = vector.shape_cast %632 : vector<1x1x128xf32> to vector<1x128xf32>
    %cst_184 = arith.constant dense<0.000000e+00> : vector<8x128xf32>
    %634 = tpu.matmul %629, %631, %cst_184 {dimension_numbers = #tpu.dot_dimension_numbers<[1], [0], [0], [1], [0, 0, 1, 1], [], []>} : vector<8x256xf32>, vector<256x128xf32>, vector<8x128xf32> -> vector<8x128xf32>
    %635 = vector.broadcast %633 : vector<1x128xf32> to vector<8x128xf32>
    %636 = arith.addf %634, %635 : vector<8x128xf32>
    %637 = arith.addf %620, %636 : vector<8x128xf32>
    %c0_185 = arith.constant 0 : index
    %c0_186 = arith.constant 0 : index
    %c0_187 = arith.constant 0 : index
    %638 = vector.load %arg20[%c0_185, %c0_186, %c0_187] : memref<2x1x128xf32, #tpu.memory_space<vmem>>, vector<1x1x128xf32>
    %639 = vector.shape_cast %638 : vector<1x1x128xf32> to vector<1x128xf32>
    %c0_188 = arith.constant 0 : index
    %c0_189 = arith.constant 0 : index
    %c0_190 = arith.constant 0 : index
    %640 = vector.load %arg21[%c0_188, %c0_189, %c0_190] : memref<2x1x128xf32, #tpu.memory_space<vmem>>, vector<1x1x128xf32>
    %641 = vector.shape_cast %640 : vector<1x1x128xf32> to vector<1x128xf32>
    %cst_191 = arith.constant dense<0.000000e+00> : vector<8xf32>
    %642 = vector.multi_reduction <add>, %637, %cst_191 [1] : vector<8x128xf32> to vector<8xf32>
    %643 = vector.shape_cast %642 : vector<8xf32> to vector<8x1xf32>
    %cst_192 = arith.constant 1.280000e+02 : f32
    %644 = vector.broadcast %cst_192 : f32 to vector<8x1xf32>
    %645 = arith.divf %643, %644 : vector<8x1xf32>
    %646 = vector.broadcast %645 : vector<8x1xf32> to vector<8x128xf32>
    %647 = arith.subf %637, %646 : vector<8x128xf32>
    %648 = arith.mulf %647, %647 : vector<8x128xf32>
    %cst_193 = arith.constant dense<0.000000e+00> : vector<8xf32>
    %649 = vector.multi_reduction <add>, %648, %cst_193 [1] : vector<8x128xf32> to vector<8xf32>
    %650 = vector.shape_cast %649 : vector<8xf32> to vector<8x1xf32>
    %cst_194 = arith.constant 1.280000e+02 : f32
    %651 = vector.broadcast %cst_194 : f32 to vector<8x1xf32>
    %652 = arith.divf %650, %651 : vector<8x1xf32>
    %cst_195 = arith.constant 9.99999974E-6 : f32
    %653 = vector.broadcast %cst_195 : f32 to vector<8x1xf32>
    %654 = arith.addf %652, %653 : vector<8x1xf32>
    %655 = math.rsqrt %654 : vector<8x1xf32>
    %656 = vector.broadcast %655 : vector<8x1xf32> to vector<8x128xf32>
    %657 = arith.mulf %647, %656 : vector<8x128xf32>
    %658 = vector.broadcast %639 : vector<1x128xf32> to vector<8x128xf32>
    %659 = arith.mulf %657, %658 : vector<8x128xf32>
    %660 = vector.broadcast %641 : vector<1x128xf32> to vector<8x128xf32>
    %661 = arith.addf %659, %660 : vector<8x128xf32>
    %c1 = arith.constant 1 : index
    %c0_196 = arith.constant 0 : index
    %c0_197 = arith.constant 0 : index
    %662 = vector.load %arg10[%c1, %c0_196, %c0_197] : memref<2x128x384xf32, #tpu.memory_space<vmem>>, vector<1x128x384xf32>
    %663 = vector.shape_cast %662 : vector<1x128x384xf32> to vector<128x384xf32>
    %c1_198 = arith.constant 1 : index
    %c0_199 = arith.constant 0 : index
    %c0_200 = arith.constant 0 : index
    %664 = vector.load %arg11[%c1_198, %c0_199, %c0_200] : memref<2x1x384xf32, #tpu.memory_space<vmem>>, vector<1x1x384xf32>
    %665 = vector.shape_cast %664 : vector<1x1x384xf32> to vector<1x384xf32>
    %c1_201 = arith.constant 1 : index
    %c0_202 = arith.constant 0 : index
    %c0_203 = arith.constant 0 : index
    %666 = vector.load %arg12[%c1_201, %c0_202, %c0_203] : memref<2x128x128xf32, #tpu.memory_space<vmem>>, vector<1x128x128xf32>
    %667 = vector.shape_cast %666 : vector<1x128x128xf32> to vector<128x128xf32>
    %c1_204 = arith.constant 1 : index
    %c0_205 = arith.constant 0 : index
    %c0_206 = arith.constant 0 : index
    %668 = vector.load %arg13[%c1_204, %c0_205, %c0_206] : memref<2x1x128xf32, #tpu.memory_space<vmem>>, vector<1x1x128xf32>
    %669 = vector.shape_cast %668 : vector<1x1x128xf32> to vector<1x128xf32>
    %cst_207 = arith.constant dense<0.000000e+00> : vector<8x384xf32>
    %670 = tpu.matmul %521, %663, %cst_207 {dimension_numbers = #tpu.dot_dimension_numbers<[1], [0], [0], [1], [0, 0, 1, 1], [], []>} : vector<8x128xf32>, vector<128x384xf32>, vector<8x384xf32> -> vector<8x384xf32>
    %671 = vector.broadcast %665 : vector<1x384xf32> to vector<8x384xf32>
    %672 = arith.addf %670, %671 : vector<8x384xf32>
    %cst_208 = arith.constant dense<0.000000e+00> : vector<8x384xf32>
    %673 = tpu.matmul %591, %663, %cst_208 {dimension_numbers = #tpu.dot_dimension_numbers<[1], [0], [0], [1], [0, 0, 1, 1], [], []>} : vector<8x128xf32>, vector<128x384xf32>, vector<8x384xf32> -> vector<8x384xf32>
    %674 = vector.broadcast %665 : vector<1x384xf32> to vector<8x384xf32>
    %675 = arith.addf %673, %674 : vector<8x384xf32>
    %cst_209 = arith.constant dense<0.000000e+00> : vector<8x384xf32>
    %676 = tpu.matmul %661, %663, %cst_209 {dimension_numbers = #tpu.dot_dimension_numbers<[1], [0], [0], [1], [0, 0, 1, 1], [], []>} : vector<8x128xf32>, vector<128x384xf32>, vector<8x384xf32> -> vector<8x384xf32>
    %677 = vector.broadcast %665 : vector<1x384xf32> to vector<8x384xf32>
    %678 = arith.addf %676, %677 : vector<8x384xf32>
    %679 = vector.extract_strided_slice %672 {offsets = [0, 0], sizes = [8, 128], strides = [1, 1]} : vector<8x384xf32> to vector<8x128xf32>
    %680 = vector.extract_strided_slice %675 {offsets = [0, 0], sizes = [8, 128], strides = [1, 1]} : vector<8x384xf32> to vector<8x128xf32>
    %681 = vector.extract_strided_slice %678 {offsets = [0, 0], sizes = [8, 128], strides = [1, 1]} : vector<8x384xf32> to vector<8x128xf32>
    %682 = vector.extract_strided_slice %672 {offsets = [0, 128], sizes = [8, 128], strides = [1, 1]} : vector<8x384xf32> to vector<8x128xf32>
    %683 = vector.extract_strided_slice %675 {offsets = [0, 128], sizes = [8, 128], strides = [1, 1]} : vector<8x384xf32> to vector<8x128xf32>
    %684 = vector.extract_strided_slice %678 {offsets = [0, 128], sizes = [8, 128], strides = [1, 1]} : vector<8x384xf32> to vector<8x128xf32>
    %685 = vector.extract_strided_slice %672 {offsets = [0, 256], sizes = [8, 128], strides = [1, 1]} : vector<8x384xf32> to vector<8x128xf32>
    %686 = vector.extract_strided_slice %675 {offsets = [0, 256], sizes = [8, 128], strides = [1, 1]} : vector<8x384xf32> to vector<8x128xf32>
    %687 = vector.extract_strided_slice %678 {offsets = [0, 256], sizes = [8, 128], strides = [1, 1]} : vector<8x384xf32> to vector<8x128xf32>
    %688 = vector.extract_strided_slice %679 {offsets = [0, 0], sizes = [8, 32], strides = [1, 1]} : vector<8x128xf32> to vector<8x32xf32>
    %cst_210 = arith.constant 0.176776692 : f32
    %689 = vector.broadcast %cst_210 : f32 to vector<8x32xf32>
    %690 = arith.mulf %688, %689 : vector<8x32xf32>
    %691 = vector.extract_strided_slice %680 {offsets = [0, 0], sizes = [8, 32], strides = [1, 1]} : vector<8x128xf32> to vector<8x32xf32>
    %cst_211 = arith.constant 0.176776692 : f32
    %692 = vector.broadcast %cst_211 : f32 to vector<8x32xf32>
    %693 = arith.mulf %691, %692 : vector<8x32xf32>
    %694 = vector.extract_strided_slice %681 {offsets = [0, 0], sizes = [8, 32], strides = [1, 1]} : vector<8x128xf32> to vector<8x32xf32>
    %cst_212 = arith.constant 0.176776692 : f32
    %695 = vector.broadcast %cst_212 : f32 to vector<8x32xf32>
    %696 = arith.mulf %694, %695 : vector<8x32xf32>
    %697 = vector.extract_strided_slice %682 {offsets = [0, 0], sizes = [8, 32], strides = [1, 1]} : vector<8x128xf32> to vector<8x32xf32>
    %698 = vector.extract_strided_slice %683 {offsets = [0, 0], sizes = [8, 32], strides = [1, 1]} : vector<8x128xf32> to vector<8x32xf32>
    %699 = vector.extract_strided_slice %684 {offsets = [0, 0], sizes = [8, 32], strides = [1, 1]} : vector<8x128xf32> to vector<8x32xf32>
    %700 = vector.extract_strided_slice %685 {offsets = [0, 0], sizes = [8, 32], strides = [1, 1]} : vector<8x128xf32> to vector<8x32xf32>
    %701 = vector.extract_strided_slice %686 {offsets = [0, 0], sizes = [8, 32], strides = [1, 1]} : vector<8x128xf32> to vector<8x32xf32>
    %702 = vector.extract_strided_slice %687 {offsets = [0, 0], sizes = [8, 32], strides = [1, 1]} : vector<8x128xf32> to vector<8x32xf32>
    %703 = arith.mulf %690, %697 : vector<8x32xf32>
    %cst_213 = arith.constant dense<0.000000e+00> : vector<8xf32>
    %704 = vector.multi_reduction <add>, %703, %cst_213 [1] : vector<8x32xf32> to vector<8xf32>
    %705 = vector.shape_cast %704 : vector<8xf32> to vector<8x1xf32>
    %706 = arith.mulf %690, %698 : vector<8x32xf32>
    %cst_214 = arith.constant dense<0.000000e+00> : vector<8xf32>
    %707 = vector.multi_reduction <add>, %706, %cst_214 [1] : vector<8x32xf32> to vector<8xf32>
    %708 = vector.shape_cast %707 : vector<8xf32> to vector<8x1xf32>
    %709 = arith.mulf %690, %699 : vector<8x32xf32>
    %cst_215 = arith.constant dense<0.000000e+00> : vector<8xf32>
    %710 = vector.multi_reduction <add>, %709, %cst_215 [1] : vector<8x32xf32> to vector<8xf32>
    %711 = vector.shape_cast %710 : vector<8xf32> to vector<8x1xf32>
    %712 = arith.maximumf %705, %708 : vector<8x1xf32>
    %713 = arith.maximumf %712, %711 : vector<8x1xf32>
    %714 = arith.subf %705, %713 : vector<8x1xf32>
    %715 = math.exp %714 : vector<8x1xf32>
    %716 = arith.subf %708, %713 : vector<8x1xf32>
    %717 = math.exp %716 : vector<8x1xf32>
    %718 = arith.subf %711, %713 : vector<8x1xf32>
    %719 = math.exp %718 : vector<8x1xf32>
    %720 = arith.addf %715, %717 : vector<8x1xf32>
    %721 = arith.addf %720, %719 : vector<8x1xf32>
    %722 = vector.broadcast %715 : vector<8x1xf32> to vector<8x32xf32>
    %723 = arith.mulf %722, %700 : vector<8x32xf32>
    %724 = vector.broadcast %717 : vector<8x1xf32> to vector<8x32xf32>
    %725 = arith.mulf %724, %701 : vector<8x32xf32>
    %726 = arith.addf %723, %725 : vector<8x32xf32>
    %727 = vector.broadcast %719 : vector<8x1xf32> to vector<8x32xf32>
    %728 = arith.mulf %727, %702 : vector<8x32xf32>
    %729 = arith.addf %726, %728 : vector<8x32xf32>
    %730 = vector.broadcast %721 : vector<8x1xf32> to vector<8x32xf32>
    %731 = arith.divf %729, %730 : vector<8x32xf32>
    %732 = arith.mulf %693, %697 : vector<8x32xf32>
    %cst_216 = arith.constant dense<0.000000e+00> : vector<8xf32>
    %733 = vector.multi_reduction <add>, %732, %cst_216 [1] : vector<8x32xf32> to vector<8xf32>
    %734 = vector.shape_cast %733 : vector<8xf32> to vector<8x1xf32>
    %735 = arith.mulf %693, %698 : vector<8x32xf32>
    %cst_217 = arith.constant dense<0.000000e+00> : vector<8xf32>
    %736 = vector.multi_reduction <add>, %735, %cst_217 [1] : vector<8x32xf32> to vector<8xf32>
    %737 = vector.shape_cast %736 : vector<8xf32> to vector<8x1xf32>
    %738 = arith.mulf %693, %699 : vector<8x32xf32>
    %cst_218 = arith.constant dense<0.000000e+00> : vector<8xf32>
    %739 = vector.multi_reduction <add>, %738, %cst_218 [1] : vector<8x32xf32> to vector<8xf32>
    %740 = vector.shape_cast %739 : vector<8xf32> to vector<8x1xf32>
    %741 = arith.maximumf %734, %737 : vector<8x1xf32>
    %742 = arith.maximumf %741, %740 : vector<8x1xf32>
    %743 = arith.subf %734, %742 : vector<8x1xf32>
    %744 = math.exp %743 : vector<8x1xf32>
    %745 = arith.subf %737, %742 : vector<8x1xf32>
    %746 = math.exp %745 : vector<8x1xf32>
    %747 = arith.subf %740, %742 : vector<8x1xf32>
    %748 = math.exp %747 : vector<8x1xf32>
    %749 = arith.addf %744, %746 : vector<8x1xf32>
    %750 = arith.addf %749, %748 : vector<8x1xf32>
    %751 = vector.broadcast %744 : vector<8x1xf32> to vector<8x32xf32>
    %752 = arith.mulf %751, %700 : vector<8x32xf32>
    %753 = vector.broadcast %746 : vector<8x1xf32> to vector<8x32xf32>
    %754 = arith.mulf %753, %701 : vector<8x32xf32>
    %755 = arith.addf %752, %754 : vector<8x32xf32>
    %756 = vector.broadcast %748 : vector<8x1xf32> to vector<8x32xf32>
    %757 = arith.mulf %756, %702 : vector<8x32xf32>
    %758 = arith.addf %755, %757 : vector<8x32xf32>
    %759 = vector.broadcast %750 : vector<8x1xf32> to vector<8x32xf32>
    %760 = arith.divf %758, %759 : vector<8x32xf32>
    %761 = arith.mulf %696, %697 : vector<8x32xf32>
    %cst_219 = arith.constant dense<0.000000e+00> : vector<8xf32>
    %762 = vector.multi_reduction <add>, %761, %cst_219 [1] : vector<8x32xf32> to vector<8xf32>
    %763 = vector.shape_cast %762 : vector<8xf32> to vector<8x1xf32>
    %764 = arith.mulf %696, %698 : vector<8x32xf32>
    %cst_220 = arith.constant dense<0.000000e+00> : vector<8xf32>
    %765 = vector.multi_reduction <add>, %764, %cst_220 [1] : vector<8x32xf32> to vector<8xf32>
    %766 = vector.shape_cast %765 : vector<8xf32> to vector<8x1xf32>
    %767 = arith.mulf %696, %699 : vector<8x32xf32>
    %cst_221 = arith.constant dense<0.000000e+00> : vector<8xf32>
    %768 = vector.multi_reduction <add>, %767, %cst_221 [1] : vector<8x32xf32> to vector<8xf32>
    %769 = vector.shape_cast %768 : vector<8xf32> to vector<8x1xf32>
    %770 = arith.maximumf %763, %766 : vector<8x1xf32>
    %771 = arith.maximumf %770, %769 : vector<8x1xf32>
    %772 = arith.subf %763, %771 : vector<8x1xf32>
    %773 = math.exp %772 : vector<8x1xf32>
    %774 = arith.subf %766, %771 : vector<8x1xf32>
    %775 = math.exp %774 : vector<8x1xf32>
    %776 = arith.subf %769, %771 : vector<8x1xf32>
    %777 = math.exp %776 : vector<8x1xf32>
    %778 = arith.addf %773, %775 : vector<8x1xf32>
    %779 = arith.addf %778, %777 : vector<8x1xf32>
    %780 = vector.broadcast %773 : vector<8x1xf32> to vector<8x32xf32>
    %781 = arith.mulf %780, %700 : vector<8x32xf32>
    %782 = vector.broadcast %775 : vector<8x1xf32> to vector<8x32xf32>
    %783 = arith.mulf %782, %701 : vector<8x32xf32>
    %784 = arith.addf %781, %783 : vector<8x32xf32>
    %785 = vector.broadcast %777 : vector<8x1xf32> to vector<8x32xf32>
    %786 = arith.mulf %785, %702 : vector<8x32xf32>
    %787 = arith.addf %784, %786 : vector<8x32xf32>
    %788 = vector.broadcast %779 : vector<8x1xf32> to vector<8x32xf32>
    %789 = arith.divf %787, %788 : vector<8x32xf32>
    %790 = vector.extract_strided_slice %679 {offsets = [0, 32], sizes = [8, 32], strides = [1, 1]} : vector<8x128xf32> to vector<8x32xf32>
    %cst_222 = arith.constant 0.176776692 : f32
    %791 = vector.broadcast %cst_222 : f32 to vector<8x32xf32>
    %792 = arith.mulf %790, %791 : vector<8x32xf32>
    %793 = vector.extract_strided_slice %680 {offsets = [0, 32], sizes = [8, 32], strides = [1, 1]} : vector<8x128xf32> to vector<8x32xf32>
    %cst_223 = arith.constant 0.176776692 : f32
    %794 = vector.broadcast %cst_223 : f32 to vector<8x32xf32>
    %795 = arith.mulf %793, %794 : vector<8x32xf32>
    %796 = vector.extract_strided_slice %681 {offsets = [0, 32], sizes = [8, 32], strides = [1, 1]} : vector<8x128xf32> to vector<8x32xf32>
    %cst_224 = arith.constant 0.176776692 : f32
    %797 = vector.broadcast %cst_224 : f32 to vector<8x32xf32>
    %798 = arith.mulf %796, %797 : vector<8x32xf32>
    %799 = vector.extract_strided_slice %682 {offsets = [0, 32], sizes = [8, 32], strides = [1, 1]} : vector<8x128xf32> to vector<8x32xf32>
    %800 = vector.extract_strided_slice %683 {offsets = [0, 32], sizes = [8, 32], strides = [1, 1]} : vector<8x128xf32> to vector<8x32xf32>
    %801 = vector.extract_strided_slice %684 {offsets = [0, 32], sizes = [8, 32], strides = [1, 1]} : vector<8x128xf32> to vector<8x32xf32>
    %802 = vector.extract_strided_slice %685 {offsets = [0, 32], sizes = [8, 32], strides = [1, 1]} : vector<8x128xf32> to vector<8x32xf32>
    %803 = vector.extract_strided_slice %686 {offsets = [0, 32], sizes = [8, 32], strides = [1, 1]} : vector<8x128xf32> to vector<8x32xf32>
    %804 = vector.extract_strided_slice %687 {offsets = [0, 32], sizes = [8, 32], strides = [1, 1]} : vector<8x128xf32> to vector<8x32xf32>
    %805 = arith.mulf %792, %799 : vector<8x32xf32>
    %cst_225 = arith.constant dense<0.000000e+00> : vector<8xf32>
    %806 = vector.multi_reduction <add>, %805, %cst_225 [1] : vector<8x32xf32> to vector<8xf32>
    %807 = vector.shape_cast %806 : vector<8xf32> to vector<8x1xf32>
    %808 = arith.mulf %792, %800 : vector<8x32xf32>
    %cst_226 = arith.constant dense<0.000000e+00> : vector<8xf32>
    %809 = vector.multi_reduction <add>, %808, %cst_226 [1] : vector<8x32xf32> to vector<8xf32>
    %810 = vector.shape_cast %809 : vector<8xf32> to vector<8x1xf32>
    %811 = arith.mulf %792, %801 : vector<8x32xf32>
    %cst_227 = arith.constant dense<0.000000e+00> : vector<8xf32>
    %812 = vector.multi_reduction <add>, %811, %cst_227 [1] : vector<8x32xf32> to vector<8xf32>
    %813 = vector.shape_cast %812 : vector<8xf32> to vector<8x1xf32>
    %814 = arith.maximumf %807, %810 : vector<8x1xf32>
    %815 = arith.maximumf %814, %813 : vector<8x1xf32>
    %816 = arith.subf %807, %815 : vector<8x1xf32>
    %817 = math.exp %816 : vector<8x1xf32>
    %818 = arith.subf %810, %815 : vector<8x1xf32>
    %819 = math.exp %818 : vector<8x1xf32>
    %820 = arith.subf %813, %815 : vector<8x1xf32>
    %821 = math.exp %820 : vector<8x1xf32>
    %822 = arith.addf %817, %819 : vector<8x1xf32>
    %823 = arith.addf %822, %821 : vector<8x1xf32>
    %824 = vector.broadcast %817 : vector<8x1xf32> to vector<8x32xf32>
    %825 = arith.mulf %824, %802 : vector<8x32xf32>
    %826 = vector.broadcast %819 : vector<8x1xf32> to vector<8x32xf32>
    %827 = arith.mulf %826, %803 : vector<8x32xf32>
    %828 = arith.addf %825, %827 : vector<8x32xf32>
    %829 = vector.broadcast %821 : vector<8x1xf32> to vector<8x32xf32>
    %830 = arith.mulf %829, %804 : vector<8x32xf32>
    %831 = arith.addf %828, %830 : vector<8x32xf32>
    %832 = vector.broadcast %823 : vector<8x1xf32> to vector<8x32xf32>
    %833 = arith.divf %831, %832 : vector<8x32xf32>
    %834 = arith.mulf %795, %799 : vector<8x32xf32>
    %cst_228 = arith.constant dense<0.000000e+00> : vector<8xf32>
    %835 = vector.multi_reduction <add>, %834, %cst_228 [1] : vector<8x32xf32> to vector<8xf32>
    %836 = vector.shape_cast %835 : vector<8xf32> to vector<8x1xf32>
    %837 = arith.mulf %795, %800 : vector<8x32xf32>
    %cst_229 = arith.constant dense<0.000000e+00> : vector<8xf32>
    %838 = vector.multi_reduction <add>, %837, %cst_229 [1] : vector<8x32xf32> to vector<8xf32>
    %839 = vector.shape_cast %838 : vector<8xf32> to vector<8x1xf32>
    %840 = arith.mulf %795, %801 : vector<8x32xf32>
    %cst_230 = arith.constant dense<0.000000e+00> : vector<8xf32>
    %841 = vector.multi_reduction <add>, %840, %cst_230 [1] : vector<8x32xf32> to vector<8xf32>
    %842 = vector.shape_cast %841 : vector<8xf32> to vector<8x1xf32>
    %843 = arith.maximumf %836, %839 : vector<8x1xf32>
    %844 = arith.maximumf %843, %842 : vector<8x1xf32>
    %845 = arith.subf %836, %844 : vector<8x1xf32>
    %846 = math.exp %845 : vector<8x1xf32>
    %847 = arith.subf %839, %844 : vector<8x1xf32>
    %848 = math.exp %847 : vector<8x1xf32>
    %849 = arith.subf %842, %844 : vector<8x1xf32>
    %850 = math.exp %849 : vector<8x1xf32>
    %851 = arith.addf %846, %848 : vector<8x1xf32>
    %852 = arith.addf %851, %850 : vector<8x1xf32>
    %853 = vector.broadcast %846 : vector<8x1xf32> to vector<8x32xf32>
    %854 = arith.mulf %853, %802 : vector<8x32xf32>
    %855 = vector.broadcast %848 : vector<8x1xf32> to vector<8x32xf32>
    %856 = arith.mulf %855, %803 : vector<8x32xf32>
    %857 = arith.addf %854, %856 : vector<8x32xf32>
    %858 = vector.broadcast %850 : vector<8x1xf32> to vector<8x32xf32>
    %859 = arith.mulf %858, %804 : vector<8x32xf32>
    %860 = arith.addf %857, %859 : vector<8x32xf32>
    %861 = vector.broadcast %852 : vector<8x1xf32> to vector<8x32xf32>
    %862 = arith.divf %860, %861 : vector<8x32xf32>
    %863 = arith.mulf %798, %799 : vector<8x32xf32>
    %cst_231 = arith.constant dense<0.000000e+00> : vector<8xf32>
    %864 = vector.multi_reduction <add>, %863, %cst_231 [1] : vector<8x32xf32> to vector<8xf32>
    %865 = vector.shape_cast %864 : vector<8xf32> to vector<8x1xf32>
    %866 = arith.mulf %798, %800 : vector<8x32xf32>
    %cst_232 = arith.constant dense<0.000000e+00> : vector<8xf32>
    %867 = vector.multi_reduction <add>, %866, %cst_232 [1] : vector<8x32xf32> to vector<8xf32>
    %868 = vector.shape_cast %867 : vector<8xf32> to vector<8x1xf32>
    %869 = arith.mulf %798, %801 : vector<8x32xf32>
    %cst_233 = arith.constant dense<0.000000e+00> : vector<8xf32>
    %870 = vector.multi_reduction <add>, %869, %cst_233 [1] : vector<8x32xf32> to vector<8xf32>
    %871 = vector.shape_cast %870 : vector<8xf32> to vector<8x1xf32>
    %872 = arith.maximumf %865, %868 : vector<8x1xf32>
    %873 = arith.maximumf %872, %871 : vector<8x1xf32>
    %874 = arith.subf %865, %873 : vector<8x1xf32>
    %875 = math.exp %874 : vector<8x1xf32>
    %876 = arith.subf %868, %873 : vector<8x1xf32>
    %877 = math.exp %876 : vector<8x1xf32>
    %878 = arith.subf %871, %873 : vector<8x1xf32>
    %879 = math.exp %878 : vector<8x1xf32>
    %880 = arith.addf %875, %877 : vector<8x1xf32>
    %881 = arith.addf %880, %879 : vector<8x1xf32>
    %882 = vector.broadcast %875 : vector<8x1xf32> to vector<8x32xf32>
    %883 = arith.mulf %882, %802 : vector<8x32xf32>
    %884 = vector.broadcast %877 : vector<8x1xf32> to vector<8x32xf32>
    %885 = arith.mulf %884, %803 : vector<8x32xf32>
    %886 = arith.addf %883, %885 : vector<8x32xf32>
    %887 = vector.broadcast %879 : vector<8x1xf32> to vector<8x32xf32>
    %888 = arith.mulf %887, %804 : vector<8x32xf32>
    %889 = arith.addf %886, %888 : vector<8x32xf32>
    %890 = vector.broadcast %881 : vector<8x1xf32> to vector<8x32xf32>
    %891 = arith.divf %889, %890 : vector<8x32xf32>
    %892 = vector.extract_strided_slice %679 {offsets = [0, 64], sizes = [8, 32], strides = [1, 1]} : vector<8x128xf32> to vector<8x32xf32>
    %cst_234 = arith.constant 0.176776692 : f32
    %893 = vector.broadcast %cst_234 : f32 to vector<8x32xf32>
    %894 = arith.mulf %892, %893 : vector<8x32xf32>
    %895 = vector.extract_strided_slice %680 {offsets = [0, 64], sizes = [8, 32], strides = [1, 1]} : vector<8x128xf32> to vector<8x32xf32>
    %cst_235 = arith.constant 0.176776692 : f32
    %896 = vector.broadcast %cst_235 : f32 to vector<8x32xf32>
    %897 = arith.mulf %895, %896 : vector<8x32xf32>
    %898 = vector.extract_strided_slice %681 {offsets = [0, 64], sizes = [8, 32], strides = [1, 1]} : vector<8x128xf32> to vector<8x32xf32>
    %cst_236 = arith.constant 0.176776692 : f32
    %899 = vector.broadcast %cst_236 : f32 to vector<8x32xf32>
    %900 = arith.mulf %898, %899 : vector<8x32xf32>
    %901 = vector.extract_strided_slice %682 {offsets = [0, 64], sizes = [8, 32], strides = [1, 1]} : vector<8x128xf32> to vector<8x32xf32>
    %902 = vector.extract_strided_slice %683 {offsets = [0, 64], sizes = [8, 32], strides = [1, 1]} : vector<8x128xf32> to vector<8x32xf32>
    %903 = vector.extract_strided_slice %684 {offsets = [0, 64], sizes = [8, 32], strides = [1, 1]} : vector<8x128xf32> to vector<8x32xf32>
    %904 = vector.extract_strided_slice %685 {offsets = [0, 64], sizes = [8, 32], strides = [1, 1]} : vector<8x128xf32> to vector<8x32xf32>
    %905 = vector.extract_strided_slice %686 {offsets = [0, 64], sizes = [8, 32], strides = [1, 1]} : vector<8x128xf32> to vector<8x32xf32>
    %906 = vector.extract_strided_slice %687 {offsets = [0, 64], sizes = [8, 32], strides = [1, 1]} : vector<8x128xf32> to vector<8x32xf32>
    %907 = arith.mulf %894, %901 : vector<8x32xf32>
    %cst_237 = arith.constant dense<0.000000e+00> : vector<8xf32>
    %908 = vector.multi_reduction <add>, %907, %cst_237 [1] : vector<8x32xf32> to vector<8xf32>
    %909 = vector.shape_cast %908 : vector<8xf32> to vector<8x1xf32>
    %910 = arith.mulf %894, %902 : vector<8x32xf32>
    %cst_238 = arith.constant dense<0.000000e+00> : vector<8xf32>
    %911 = vector.multi_reduction <add>, %910, %cst_238 [1] : vector<8x32xf32> to vector<8xf32>
    %912 = vector.shape_cast %911 : vector<8xf32> to vector<8x1xf32>
    %913 = arith.mulf %894, %903 : vector<8x32xf32>
    %cst_239 = arith.constant dense<0.000000e+00> : vector<8xf32>
    %914 = vector.multi_reduction <add>, %913, %cst_239 [1] : vector<8x32xf32> to vector<8xf32>
    %915 = vector.shape_cast %914 : vector<8xf32> to vector<8x1xf32>
    %916 = arith.maximumf %909, %912 : vector<8x1xf32>
    %917 = arith.maximumf %916, %915 : vector<8x1xf32>
    %918 = arith.subf %909, %917 : vector<8x1xf32>
    %919 = math.exp %918 : vector<8x1xf32>
    %920 = arith.subf %912, %917 : vector<8x1xf32>
    %921 = math.exp %920 : vector<8x1xf32>
    %922 = arith.subf %915, %917 : vector<8x1xf32>
    %923 = math.exp %922 : vector<8x1xf32>
    %924 = arith.addf %919, %921 : vector<8x1xf32>
    %925 = arith.addf %924, %923 : vector<8x1xf32>
    %926 = vector.broadcast %919 : vector<8x1xf32> to vector<8x32xf32>
    %927 = arith.mulf %926, %904 : vector<8x32xf32>
    %928 = vector.broadcast %921 : vector<8x1xf32> to vector<8x32xf32>
    %929 = arith.mulf %928, %905 : vector<8x32xf32>
    %930 = arith.addf %927, %929 : vector<8x32xf32>
    %931 = vector.broadcast %923 : vector<8x1xf32> to vector<8x32xf32>
    %932 = arith.mulf %931, %906 : vector<8x32xf32>
    %933 = arith.addf %930, %932 : vector<8x32xf32>
    %934 = vector.broadcast %925 : vector<8x1xf32> to vector<8x32xf32>
    %935 = arith.divf %933, %934 : vector<8x32xf32>
    %936 = arith.mulf %897, %901 : vector<8x32xf32>
    %cst_240 = arith.constant dense<0.000000e+00> : vector<8xf32>
    %937 = vector.multi_reduction <add>, %936, %cst_240 [1] : vector<8x32xf32> to vector<8xf32>
    %938 = vector.shape_cast %937 : vector<8xf32> to vector<8x1xf32>
    %939 = arith.mulf %897, %902 : vector<8x32xf32>
    %cst_241 = arith.constant dense<0.000000e+00> : vector<8xf32>
    %940 = vector.multi_reduction <add>, %939, %cst_241 [1] : vector<8x32xf32> to vector<8xf32>
    %941 = vector.shape_cast %940 : vector<8xf32> to vector<8x1xf32>
    %942 = arith.mulf %897, %903 : vector<8x32xf32>
    %cst_242 = arith.constant dense<0.000000e+00> : vector<8xf32>
    %943 = vector.multi_reduction <add>, %942, %cst_242 [1] : vector<8x32xf32> to vector<8xf32>
    %944 = vector.shape_cast %943 : vector<8xf32> to vector<8x1xf32>
    %945 = arith.maximumf %938, %941 : vector<8x1xf32>
    %946 = arith.maximumf %945, %944 : vector<8x1xf32>
    %947 = arith.subf %938, %946 : vector<8x1xf32>
    %948 = math.exp %947 : vector<8x1xf32>
    %949 = arith.subf %941, %946 : vector<8x1xf32>
    %950 = math.exp %949 : vector<8x1xf32>
    %951 = arith.subf %944, %946 : vector<8x1xf32>
    %952 = math.exp %951 : vector<8x1xf32>
    %953 = arith.addf %948, %950 : vector<8x1xf32>
    %954 = arith.addf %953, %952 : vector<8x1xf32>
    %955 = vector.broadcast %948 : vector<8x1xf32> to vector<8x32xf32>
    %956 = arith.mulf %955, %904 : vector<8x32xf32>
    %957 = vector.broadcast %950 : vector<8x1xf32> to vector<8x32xf32>
    %958 = arith.mulf %957, %905 : vector<8x32xf32>
    %959 = arith.addf %956, %958 : vector<8x32xf32>
    %960 = vector.broadcast %952 : vector<8x1xf32> to vector<8x32xf32>
    %961 = arith.mulf %960, %906 : vector<8x32xf32>
    %962 = arith.addf %959, %961 : vector<8x32xf32>
    %963 = vector.broadcast %954 : vector<8x1xf32> to vector<8x32xf32>
    %964 = arith.divf %962, %963 : vector<8x32xf32>
    %965 = arith.mulf %900, %901 : vector<8x32xf32>
    %cst_243 = arith.constant dense<0.000000e+00> : vector<8xf32>
    %966 = vector.multi_reduction <add>, %965, %cst_243 [1] : vector<8x32xf32> to vector<8xf32>
    %967 = vector.shape_cast %966 : vector<8xf32> to vector<8x1xf32>
    %968 = arith.mulf %900, %902 : vector<8x32xf32>
    %cst_244 = arith.constant dense<0.000000e+00> : vector<8xf32>
    %969 = vector.multi_reduction <add>, %968, %cst_244 [1] : vector<8x32xf32> to vector<8xf32>
    %970 = vector.shape_cast %969 : vector<8xf32> to vector<8x1xf32>
    %971 = arith.mulf %900, %903 : vector<8x32xf32>
    %cst_245 = arith.constant dense<0.000000e+00> : vector<8xf32>
    %972 = vector.multi_reduction <add>, %971, %cst_245 [1] : vector<8x32xf32> to vector<8xf32>
    %973 = vector.shape_cast %972 : vector<8xf32> to vector<8x1xf32>
    %974 = arith.maximumf %967, %970 : vector<8x1xf32>
    %975 = arith.maximumf %974, %973 : vector<8x1xf32>
    %976 = arith.subf %967, %975 : vector<8x1xf32>
    %977 = math.exp %976 : vector<8x1xf32>
    %978 = arith.subf %970, %975 : vector<8x1xf32>
    %979 = math.exp %978 : vector<8x1xf32>
    %980 = arith.subf %973, %975 : vector<8x1xf32>
    %981 = math.exp %980 : vector<8x1xf32>
    %982 = arith.addf %977, %979 : vector<8x1xf32>
    %983 = arith.addf %982, %981 : vector<8x1xf32>
    %984 = vector.broadcast %977 : vector<8x1xf32> to vector<8x32xf32>
    %985 = arith.mulf %984, %904 : vector<8x32xf32>
    %986 = vector.broadcast %979 : vector<8x1xf32> to vector<8x32xf32>
    %987 = arith.mulf %986, %905 : vector<8x32xf32>
    %988 = arith.addf %985, %987 : vector<8x32xf32>
    %989 = vector.broadcast %981 : vector<8x1xf32> to vector<8x32xf32>
    %990 = arith.mulf %989, %906 : vector<8x32xf32>
    %991 = arith.addf %988, %990 : vector<8x32xf32>
    %992 = vector.broadcast %983 : vector<8x1xf32> to vector<8x32xf32>
    %993 = arith.divf %991, %992 : vector<8x32xf32>
    %994 = vector.extract_strided_slice %679 {offsets = [0, 96], sizes = [8, 32], strides = [1, 1]} : vector<8x128xf32> to vector<8x32xf32>
    %cst_246 = arith.constant 0.176776692 : f32
    %995 = vector.broadcast %cst_246 : f32 to vector<8x32xf32>
    %996 = arith.mulf %994, %995 : vector<8x32xf32>
    %997 = vector.extract_strided_slice %680 {offsets = [0, 96], sizes = [8, 32], strides = [1, 1]} : vector<8x128xf32> to vector<8x32xf32>
    %cst_247 = arith.constant 0.176776692 : f32
    %998 = vector.broadcast %cst_247 : f32 to vector<8x32xf32>
    %999 = arith.mulf %997, %998 : vector<8x32xf32>
    %1000 = vector.extract_strided_slice %681 {offsets = [0, 96], sizes = [8, 32], strides = [1, 1]} : vector<8x128xf32> to vector<8x32xf32>
    %cst_248 = arith.constant 0.176776692 : f32
    %1001 = vector.broadcast %cst_248 : f32 to vector<8x32xf32>
    %1002 = arith.mulf %1000, %1001 : vector<8x32xf32>
    %1003 = vector.extract_strided_slice %682 {offsets = [0, 96], sizes = [8, 32], strides = [1, 1]} : vector<8x128xf32> to vector<8x32xf32>
    %1004 = vector.extract_strided_slice %683 {offsets = [0, 96], sizes = [8, 32], strides = [1, 1]} : vector<8x128xf32> to vector<8x32xf32>
    %1005 = vector.extract_strided_slice %684 {offsets = [0, 96], sizes = [8, 32], strides = [1, 1]} : vector<8x128xf32> to vector<8x32xf32>
    %1006 = vector.extract_strided_slice %685 {offsets = [0, 96], sizes = [8, 32], strides = [1, 1]} : vector<8x128xf32> to vector<8x32xf32>
    %1007 = vector.extract_strided_slice %686 {offsets = [0, 96], sizes = [8, 32], strides = [1, 1]} : vector<8x128xf32> to vector<8x32xf32>
    %1008 = vector.extract_strided_slice %687 {offsets = [0, 96], sizes = [8, 32], strides = [1, 1]} : vector<8x128xf32> to vector<8x32xf32>
    %1009 = arith.mulf %996, %1003 : vector<8x32xf32>
    %cst_249 = arith.constant dense<0.000000e+00> : vector<8xf32>
    %1010 = vector.multi_reduction <add>, %1009, %cst_249 [1] : vector<8x32xf32> to vector<8xf32>
    %1011 = vector.shape_cast %1010 : vector<8xf32> to vector<8x1xf32>
    %1012 = arith.mulf %996, %1004 : vector<8x32xf32>
    %cst_250 = arith.constant dense<0.000000e+00> : vector<8xf32>
    %1013 = vector.multi_reduction <add>, %1012, %cst_250 [1] : vector<8x32xf32> to vector<8xf32>
    %1014 = vector.shape_cast %1013 : vector<8xf32> to vector<8x1xf32>
    %1015 = arith.mulf %996, %1005 : vector<8x32xf32>
    %cst_251 = arith.constant dense<0.000000e+00> : vector<8xf32>
    %1016 = vector.multi_reduction <add>, %1015, %cst_251 [1] : vector<8x32xf32> to vector<8xf32>
    %1017 = vector.shape_cast %1016 : vector<8xf32> to vector<8x1xf32>
    %1018 = arith.maximumf %1011, %1014 : vector<8x1xf32>
    %1019 = arith.maximumf %1018, %1017 : vector<8x1xf32>
    %1020 = arith.subf %1011, %1019 : vector<8x1xf32>
    %1021 = math.exp %1020 : vector<8x1xf32>
    %1022 = arith.subf %1014, %1019 : vector<8x1xf32>
    %1023 = math.exp %1022 : vector<8x1xf32>
    %1024 = arith.subf %1017, %1019 : vector<8x1xf32>
    %1025 = math.exp %1024 : vector<8x1xf32>
    %1026 = arith.addf %1021, %1023 : vector<8x1xf32>
    %1027 = arith.addf %1026, %1025 : vector<8x1xf32>
    %1028 = vector.broadcast %1021 : vector<8x1xf32> to vector<8x32xf32>
    %1029 = arith.mulf %1028, %1006 : vector<8x32xf32>
    %1030 = vector.broadcast %1023 : vector<8x1xf32> to vector<8x32xf32>
    %1031 = arith.mulf %1030, %1007 : vector<8x32xf32>
    %1032 = arith.addf %1029, %1031 : vector<8x32xf32>
    %1033 = vector.broadcast %1025 : vector<8x1xf32> to vector<8x32xf32>
    %1034 = arith.mulf %1033, %1008 : vector<8x32xf32>
    %1035 = arith.addf %1032, %1034 : vector<8x32xf32>
    %1036 = vector.broadcast %1027 : vector<8x1xf32> to vector<8x32xf32>
    %1037 = arith.divf %1035, %1036 : vector<8x32xf32>
    %1038 = arith.mulf %999, %1003 : vector<8x32xf32>
    %cst_252 = arith.constant dense<0.000000e+00> : vector<8xf32>
    %1039 = vector.multi_reduction <add>, %1038, %cst_252 [1] : vector<8x32xf32> to vector<8xf32>
    %1040 = vector.shape_cast %1039 : vector<8xf32> to vector<8x1xf32>
    %1041 = arith.mulf %999, %1004 : vector<8x32xf32>
    %cst_253 = arith.constant dense<0.000000e+00> : vector<8xf32>
    %1042 = vector.multi_reduction <add>, %1041, %cst_253 [1] : vector<8x32xf32> to vector<8xf32>
    %1043 = vector.shape_cast %1042 : vector<8xf32> to vector<8x1xf32>
    %1044 = arith.mulf %999, %1005 : vector<8x32xf32>
    %cst_254 = arith.constant dense<0.000000e+00> : vector<8xf32>
    %1045 = vector.multi_reduction <add>, %1044, %cst_254 [1] : vector<8x32xf32> to vector<8xf32>
    %1046 = vector.shape_cast %1045 : vector<8xf32> to vector<8x1xf32>
    %1047 = arith.maximumf %1040, %1043 : vector<8x1xf32>
    %1048 = arith.maximumf %1047, %1046 : vector<8x1xf32>
    %1049 = arith.subf %1040, %1048 : vector<8x1xf32>
    %1050 = math.exp %1049 : vector<8x1xf32>
    %1051 = arith.subf %1043, %1048 : vector<8x1xf32>
    %1052 = math.exp %1051 : vector<8x1xf32>
    %1053 = arith.subf %1046, %1048 : vector<8x1xf32>
    %1054 = math.exp %1053 : vector<8x1xf32>
    %1055 = arith.addf %1050, %1052 : vector<8x1xf32>
    %1056 = arith.addf %1055, %1054 : vector<8x1xf32>
    %1057 = vector.broadcast %1050 : vector<8x1xf32> to vector<8x32xf32>
    %1058 = arith.mulf %1057, %1006 : vector<8x32xf32>
    %1059 = vector.broadcast %1052 : vector<8x1xf32> to vector<8x32xf32>
    %1060 = arith.mulf %1059, %1007 : vector<8x32xf32>
    %1061 = arith.addf %1058, %1060 : vector<8x32xf32>
    %1062 = vector.broadcast %1054 : vector<8x1xf32> to vector<8x32xf32>
    %1063 = arith.mulf %1062, %1008 : vector<8x32xf32>
    %1064 = arith.addf %1061, %1063 : vector<8x32xf32>
    %1065 = vector.broadcast %1056 : vector<8x1xf32> to vector<8x32xf32>
    %1066 = arith.divf %1064, %1065 : vector<8x32xf32>
    %1067 = arith.mulf %1002, %1003 : vector<8x32xf32>
    %cst_255 = arith.constant dense<0.000000e+00> : vector<8xf32>
    %1068 = vector.multi_reduction <add>, %1067, %cst_255 [1] : vector<8x32xf32> to vector<8xf32>
    %1069 = vector.shape_cast %1068 : vector<8xf32> to vector<8x1xf32>
    %1070 = arith.mulf %1002, %1004 : vector<8x32xf32>
    %cst_256 = arith.constant dense<0.000000e+00> : vector<8xf32>
    %1071 = vector.multi_reduction <add>, %1070, %cst_256 [1] : vector<8x32xf32> to vector<8xf32>
    %1072 = vector.shape_cast %1071 : vector<8xf32> to vector<8x1xf32>
    %1073 = arith.mulf %1002, %1005 : vector<8x32xf32>
    %cst_257 = arith.constant dense<0.000000e+00> : vector<8xf32>
    %1074 = vector.multi_reduction <add>, %1073, %cst_257 [1] : vector<8x32xf32> to vector<8xf32>
    %1075 = vector.shape_cast %1074 : vector<8xf32> to vector<8x1xf32>
    %1076 = arith.maximumf %1069, %1072 : vector<8x1xf32>
    %1077 = arith.maximumf %1076, %1075 : vector<8x1xf32>
    %1078 = arith.subf %1069, %1077 : vector<8x1xf32>
    %1079 = math.exp %1078 : vector<8x1xf32>
    %1080 = arith.subf %1072, %1077 : vector<8x1xf32>
    %1081 = math.exp %1080 : vector<8x1xf32>
    %1082 = arith.subf %1075, %1077 : vector<8x1xf32>
    %1083 = math.exp %1082 : vector<8x1xf32>
    %1084 = arith.addf %1079, %1081 : vector<8x1xf32>
    %1085 = arith.addf %1084, %1083 : vector<8x1xf32>
    %1086 = vector.broadcast %1079 : vector<8x1xf32> to vector<8x32xf32>
    %1087 = arith.mulf %1086, %1006 : vector<8x32xf32>
    %1088 = vector.broadcast %1081 : vector<8x1xf32> to vector<8x32xf32>
    %1089 = arith.mulf %1088, %1007 : vector<8x32xf32>
    %1090 = arith.addf %1087, %1089 : vector<8x32xf32>
    %1091 = vector.broadcast %1083 : vector<8x1xf32> to vector<8x32xf32>
    %1092 = arith.mulf %1091, %1008 : vector<8x32xf32>
    %1093 = arith.addf %1090, %1092 : vector<8x32xf32>
    %1094 = vector.broadcast %1085 : vector<8x1xf32> to vector<8x32xf32>
    %1095 = arith.divf %1093, %1094 : vector<8x32xf32>
    %1096 = tpu.concatenate %731, %833, %935, %1037 in 1 : vector<8x32xf32>, vector<8x32xf32>, vector<8x32xf32>, vector<8x32xf32> -> vector<8x128xf32>
    %cst_258 = arith.constant dense<0.000000e+00> : vector<8x128xf32>
    %1097 = tpu.matmul %1096, %667, %cst_258 {dimension_numbers = #tpu.dot_dimension_numbers<[1], [0], [0], [1], [0, 0, 1, 1], [], []>} : vector<8x128xf32>, vector<128x128xf32>, vector<8x128xf32> -> vector<8x128xf32>
    %1098 = vector.broadcast %669 : vector<1x128xf32> to vector<8x128xf32>
    %1099 = arith.addf %1097, %1098 : vector<8x128xf32>
    %1100 = arith.addf %521, %1099 : vector<8x128xf32>
    %c1_259 = arith.constant 1 : index
    %c0_260 = arith.constant 0 : index
    %c0_261 = arith.constant 0 : index
    %1101 = vector.load %arg18[%c1_259, %c0_260, %c0_261] : memref<2x1x128xf32, #tpu.memory_space<vmem>>, vector<1x1x128xf32>
    %1102 = vector.shape_cast %1101 : vector<1x1x128xf32> to vector<1x128xf32>
    %c1_262 = arith.constant 1 : index
    %c0_263 = arith.constant 0 : index
    %c0_264 = arith.constant 0 : index
    %1103 = vector.load %arg19[%c1_262, %c0_263, %c0_264] : memref<2x1x128xf32, #tpu.memory_space<vmem>>, vector<1x1x128xf32>
    %1104 = vector.shape_cast %1103 : vector<1x1x128xf32> to vector<1x128xf32>
    %cst_265 = arith.constant dense<0.000000e+00> : vector<8xf32>
    %1105 = vector.multi_reduction <add>, %1100, %cst_265 [1] : vector<8x128xf32> to vector<8xf32>
    %1106 = vector.shape_cast %1105 : vector<8xf32> to vector<8x1xf32>
    %cst_266 = arith.constant 1.280000e+02 : f32
    %1107 = vector.broadcast %cst_266 : f32 to vector<8x1xf32>
    %1108 = arith.divf %1106, %1107 : vector<8x1xf32>
    %1109 = vector.broadcast %1108 : vector<8x1xf32> to vector<8x128xf32>
    %1110 = arith.subf %1100, %1109 : vector<8x128xf32>
    %1111 = arith.mulf %1110, %1110 : vector<8x128xf32>
    %cst_267 = arith.constant dense<0.000000e+00> : vector<8xf32>
    %1112 = vector.multi_reduction <add>, %1111, %cst_267 [1] : vector<8x128xf32> to vector<8xf32>
    %1113 = vector.shape_cast %1112 : vector<8xf32> to vector<8x1xf32>
    %cst_268 = arith.constant 1.280000e+02 : f32
    %1114 = vector.broadcast %cst_268 : f32 to vector<8x1xf32>
    %1115 = arith.divf %1113, %1114 : vector<8x1xf32>
    %cst_269 = arith.constant 9.99999974E-6 : f32
    %1116 = vector.broadcast %cst_269 : f32 to vector<8x1xf32>
    %1117 = arith.addf %1115, %1116 : vector<8x1xf32>
    %1118 = math.rsqrt %1117 : vector<8x1xf32>
    %1119 = vector.broadcast %1118 : vector<8x1xf32> to vector<8x128xf32>
    %1120 = arith.mulf %1110, %1119 : vector<8x128xf32>
    %1121 = vector.broadcast %1102 : vector<1x128xf32> to vector<8x128xf32>
    %1122 = arith.mulf %1120, %1121 : vector<8x128xf32>
    %1123 = vector.broadcast %1104 : vector<1x128xf32> to vector<8x128xf32>
    %1124 = arith.addf %1122, %1123 : vector<8x128xf32>
    %c1_270 = arith.constant 1 : index
    %c0_271 = arith.constant 0 : index
    %c0_272 = arith.constant 0 : index
    %1125 = vector.load %arg14[%c1_270, %c0_271, %c0_272] : memref<2x128x256xf32, #tpu.memory_space<vmem>>, vector<1x128x256xf32>
    %1126 = vector.shape_cast %1125 : vector<1x128x256xf32> to vector<128x256xf32>
    %c1_273 = arith.constant 1 : index
    %c0_274 = arith.constant 0 : index
    %c0_275 = arith.constant 0 : index
    %1127 = vector.load %arg15[%c1_273, %c0_274, %c0_275] : memref<2x1x256xf32, #tpu.memory_space<vmem>>, vector<1x1x256xf32>
    %1128 = vector.shape_cast %1127 : vector<1x1x256xf32> to vector<1x256xf32>
    %cst_276 = arith.constant dense<0.000000e+00> : vector<8x256xf32>
    %1129 = tpu.matmul %1124, %1126, %cst_276 {dimension_numbers = #tpu.dot_dimension_numbers<[1], [0], [0], [1], [0, 0, 1, 1], [], []>} : vector<8x128xf32>, vector<128x256xf32>, vector<8x256xf32> -> vector<8x256xf32>
    %1130 = vector.broadcast %1128 : vector<1x256xf32> to vector<8x256xf32>
    %1131 = arith.addf %1129, %1130 : vector<8x256xf32>
    %cst_277 = arith.constant 0.000000e+00 : f32
    %1132 = vector.broadcast %cst_277 : f32 to vector<8x256xf32>
    %1133 = arith.maximumf %1131, %1132 : vector<8x256xf32>
    %c1_278 = arith.constant 1 : index
    %c0_279 = arith.constant 0 : index
    %c0_280 = arith.constant 0 : index
    %1134 = vector.load %arg16[%c1_278, %c0_279, %c0_280] : memref<2x256x128xf32, #tpu.memory_space<vmem>>, vector<1x256x128xf32>
    %1135 = vector.shape_cast %1134 : vector<1x256x128xf32> to vector<256x128xf32>
    %c1_281 = arith.constant 1 : index
    %c0_282 = arith.constant 0 : index
    %c0_283 = arith.constant 0 : index
    %1136 = vector.load %arg17[%c1_281, %c0_282, %c0_283] : memref<2x1x128xf32, #tpu.memory_space<vmem>>, vector<1x1x128xf32>
    %1137 = vector.shape_cast %1136 : vector<1x1x128xf32> to vector<1x128xf32>
    %cst_284 = arith.constant dense<0.000000e+00> : vector<8x128xf32>
    %1138 = tpu.matmul %1133, %1135, %cst_284 {dimension_numbers = #tpu.dot_dimension_numbers<[1], [0], [0], [1], [0, 0, 1, 1], [], []>} : vector<8x256xf32>, vector<256x128xf32>, vector<8x128xf32> -> vector<8x128xf32>
    %1139 = vector.broadcast %1137 : vector<1x128xf32> to vector<8x128xf32>
    %1140 = arith.addf %1138, %1139 : vector<8x128xf32>
    %1141 = arith.addf %1124, %1140 : vector<8x128xf32>
    %c1_285 = arith.constant 1 : index
    %c0_286 = arith.constant 0 : index
    %c0_287 = arith.constant 0 : index
    %1142 = vector.load %arg20[%c1_285, %c0_286, %c0_287] : memref<2x1x128xf32, #tpu.memory_space<vmem>>, vector<1x1x128xf32>
    %1143 = vector.shape_cast %1142 : vector<1x1x128xf32> to vector<1x128xf32>
    %c1_288 = arith.constant 1 : index
    %c0_289 = arith.constant 0 : index
    %c0_290 = arith.constant 0 : index
    %1144 = vector.load %arg21[%c1_288, %c0_289, %c0_290] : memref<2x1x128xf32, #tpu.memory_space<vmem>>, vector<1x1x128xf32>
    %1145 = vector.shape_cast %1144 : vector<1x1x128xf32> to vector<1x128xf32>
    %cst_291 = arith.constant dense<0.000000e+00> : vector<8xf32>
    %1146 = vector.multi_reduction <add>, %1141, %cst_291 [1] : vector<8x128xf32> to vector<8xf32>
    %1147 = vector.shape_cast %1146 : vector<8xf32> to vector<8x1xf32>
    %cst_292 = arith.constant 1.280000e+02 : f32
    %1148 = vector.broadcast %cst_292 : f32 to vector<8x1xf32>
    %1149 = arith.divf %1147, %1148 : vector<8x1xf32>
    %1150 = vector.broadcast %1149 : vector<8x1xf32> to vector<8x128xf32>
    %1151 = arith.subf %1141, %1150 : vector<8x128xf32>
    %1152 = arith.mulf %1151, %1151 : vector<8x128xf32>
    %cst_293 = arith.constant dense<0.000000e+00> : vector<8xf32>
    %1153 = vector.multi_reduction <add>, %1152, %cst_293 [1] : vector<8x128xf32> to vector<8xf32>
    %1154 = vector.shape_cast %1153 : vector<8xf32> to vector<8x1xf32>
    %cst_294 = arith.constant 1.280000e+02 : f32
    %1155 = vector.broadcast %cst_294 : f32 to vector<8x1xf32>
    %1156 = arith.divf %1154, %1155 : vector<8x1xf32>
    %cst_295 = arith.constant 9.99999974E-6 : f32
    %1157 = vector.broadcast %cst_295 : f32 to vector<8x1xf32>
    %1158 = arith.addf %1156, %1157 : vector<8x1xf32>
    %1159 = math.rsqrt %1158 : vector<8x1xf32>
    %1160 = vector.broadcast %1159 : vector<8x1xf32> to vector<8x128xf32>
    %1161 = arith.mulf %1151, %1160 : vector<8x128xf32>
    %1162 = vector.broadcast %1143 : vector<1x128xf32> to vector<8x128xf32>
    %1163 = arith.mulf %1161, %1162 : vector<8x128xf32>
    %1164 = vector.broadcast %1145 : vector<1x128xf32> to vector<8x128xf32>
    %1165 = arith.addf %1163, %1164 : vector<8x128xf32>
    %1166 = tpu.concatenate %760, %862, %964, %1066 in 1 : vector<8x32xf32>, vector<8x32xf32>, vector<8x32xf32>, vector<8x32xf32> -> vector<8x128xf32>
    %cst_296 = arith.constant dense<0.000000e+00> : vector<8x128xf32>
    %1167 = tpu.matmul %1166, %667, %cst_296 {dimension_numbers = #tpu.dot_dimension_numbers<[1], [0], [0], [1], [0, 0, 1, 1], [], []>} : vector<8x128xf32>, vector<128x128xf32>, vector<8x128xf32> -> vector<8x128xf32>
    %1168 = vector.broadcast %669 : vector<1x128xf32> to vector<8x128xf32>
    %1169 = arith.addf %1167, %1168 : vector<8x128xf32>
    %1170 = arith.addf %591, %1169 : vector<8x128xf32>
    %c1_297 = arith.constant 1 : index
    %c0_298 = arith.constant 0 : index
    %c0_299 = arith.constant 0 : index
    %1171 = vector.load %arg18[%c1_297, %c0_298, %c0_299] : memref<2x1x128xf32, #tpu.memory_space<vmem>>, vector<1x1x128xf32>
    %1172 = vector.shape_cast %1171 : vector<1x1x128xf32> to vector<1x128xf32>
    %c1_300 = arith.constant 1 : index
    %c0_301 = arith.constant 0 : index
    %c0_302 = arith.constant 0 : index
    %1173 = vector.load %arg19[%c1_300, %c0_301, %c0_302] : memref<2x1x128xf32, #tpu.memory_space<vmem>>, vector<1x1x128xf32>
    %1174 = vector.shape_cast %1173 : vector<1x1x128xf32> to vector<1x128xf32>
    %cst_303 = arith.constant dense<0.000000e+00> : vector<8xf32>
    %1175 = vector.multi_reduction <add>, %1170, %cst_303 [1] : vector<8x128xf32> to vector<8xf32>
    %1176 = vector.shape_cast %1175 : vector<8xf32> to vector<8x1xf32>
    %cst_304 = arith.constant 1.280000e+02 : f32
    %1177 = vector.broadcast %cst_304 : f32 to vector<8x1xf32>
    %1178 = arith.divf %1176, %1177 : vector<8x1xf32>
    %1179 = vector.broadcast %1178 : vector<8x1xf32> to vector<8x128xf32>
    %1180 = arith.subf %1170, %1179 : vector<8x128xf32>
    %1181 = arith.mulf %1180, %1180 : vector<8x128xf32>
    %cst_305 = arith.constant dense<0.000000e+00> : vector<8xf32>
    %1182 = vector.multi_reduction <add>, %1181, %cst_305 [1] : vector<8x128xf32> to vector<8xf32>
    %1183 = vector.shape_cast %1182 : vector<8xf32> to vector<8x1xf32>
    %cst_306 = arith.constant 1.280000e+02 : f32
    %1184 = vector.broadcast %cst_306 : f32 to vector<8x1xf32>
    %1185 = arith.divf %1183, %1184 : vector<8x1xf32>
    %cst_307 = arith.constant 9.99999974E-6 : f32
    %1186 = vector.broadcast %cst_307 : f32 to vector<8x1xf32>
    %1187 = arith.addf %1185, %1186 : vector<8x1xf32>
    %1188 = math.rsqrt %1187 : vector<8x1xf32>
    %1189 = vector.broadcast %1188 : vector<8x1xf32> to vector<8x128xf32>
    %1190 = arith.mulf %1180, %1189 : vector<8x128xf32>
    %1191 = vector.broadcast %1172 : vector<1x128xf32> to vector<8x128xf32>
    %1192 = arith.mulf %1190, %1191 : vector<8x128xf32>
    %1193 = vector.broadcast %1174 : vector<1x128xf32> to vector<8x128xf32>
    %1194 = arith.addf %1192, %1193 : vector<8x128xf32>
    %c1_308 = arith.constant 1 : index
    %c0_309 = arith.constant 0 : index
    %c0_310 = arith.constant 0 : index
    %1195 = vector.load %arg14[%c1_308, %c0_309, %c0_310] : memref<2x128x256xf32, #tpu.memory_space<vmem>>, vector<1x128x256xf32>
    %1196 = vector.shape_cast %1195 : vector<1x128x256xf32> to vector<128x256xf32>
    %c1_311 = arith.constant 1 : index
    %c0_312 = arith.constant 0 : index
    %c0_313 = arith.constant 0 : index
    %1197 = vector.load %arg15[%c1_311, %c0_312, %c0_313] : memref<2x1x256xf32, #tpu.memory_space<vmem>>, vector<1x1x256xf32>
    %1198 = vector.shape_cast %1197 : vector<1x1x256xf32> to vector<1x256xf32>
    %cst_314 = arith.constant dense<0.000000e+00> : vector<8x256xf32>
    %1199 = tpu.matmul %1194, %1196, %cst_314 {dimension_numbers = #tpu.dot_dimension_numbers<[1], [0], [0], [1], [0, 0, 1, 1], [], []>} : vector<8x128xf32>, vector<128x256xf32>, vector<8x256xf32> -> vector<8x256xf32>
    %1200 = vector.broadcast %1198 : vector<1x256xf32> to vector<8x256xf32>
    %1201 = arith.addf %1199, %1200 : vector<8x256xf32>
    %cst_315 = arith.constant 0.000000e+00 : f32
    %1202 = vector.broadcast %cst_315 : f32 to vector<8x256xf32>
    %1203 = arith.maximumf %1201, %1202 : vector<8x256xf32>
    %c1_316 = arith.constant 1 : index
    %c0_317 = arith.constant 0 : index
    %c0_318 = arith.constant 0 : index
    %1204 = vector.load %arg16[%c1_316, %c0_317, %c0_318] : memref<2x256x128xf32, #tpu.memory_space<vmem>>, vector<1x256x128xf32>
    %1205 = vector.shape_cast %1204 : vector<1x256x128xf32> to vector<256x128xf32>
    %c1_319 = arith.constant 1 : index
    %c0_320 = arith.constant 0 : index
    %c0_321 = arith.constant 0 : index
    %1206 = vector.load %arg17[%c1_319, %c0_320, %c0_321] : memref<2x1x128xf32, #tpu.memory_space<vmem>>, vector<1x1x128xf32>
    %1207 = vector.shape_cast %1206 : vector<1x1x128xf32> to vector<1x128xf32>
    %cst_322 = arith.constant dense<0.000000e+00> : vector<8x128xf32>
    %1208 = tpu.matmul %1203, %1205, %cst_322 {dimension_numbers = #tpu.dot_dimension_numbers<[1], [0], [0], [1], [0, 0, 1, 1], [], []>} : vector<8x256xf32>, vector<256x128xf32>, vector<8x128xf32> -> vector<8x128xf32>
    %1209 = vector.broadcast %1207 : vector<1x128xf32> to vector<8x128xf32>
    %1210 = arith.addf %1208, %1209 : vector<8x128xf32>
    %1211 = arith.addf %1194, %1210 : vector<8x128xf32>
    %c1_323 = arith.constant 1 : index
    %c0_324 = arith.constant 0 : index
    %c0_325 = arith.constant 0 : index
    %1212 = vector.load %arg20[%c1_323, %c0_324, %c0_325] : memref<2x1x128xf32, #tpu.memory_space<vmem>>, vector<1x1x128xf32>
    %1213 = vector.shape_cast %1212 : vector<1x1x128xf32> to vector<1x128xf32>
    %c1_326 = arith.constant 1 : index
    %c0_327 = arith.constant 0 : index
    %c0_328 = arith.constant 0 : index
    %1214 = vector.load %arg21[%c1_326, %c0_327, %c0_328] : memref<2x1x128xf32, #tpu.memory_space<vmem>>, vector<1x1x128xf32>
    %1215 = vector.shape_cast %1214 : vector<1x1x128xf32> to vector<1x128xf32>
    %cst_329 = arith.constant dense<0.000000e+00> : vector<8xf32>
    %1216 = vector.multi_reduction <add>, %1211, %cst_329 [1] : vector<8x128xf32> to vector<8xf32>
    %1217 = vector.shape_cast %1216 : vector<8xf32> to vector<8x1xf32>
    %cst_330 = arith.constant 1.280000e+02 : f32
    %1218 = vector.broadcast %cst_330 : f32 to vector<8x1xf32>
    %1219 = arith.divf %1217, %1218 : vector<8x1xf32>
    %1220 = vector.broadcast %1219 : vector<8x1xf32> to vector<8x128xf32>
    %1221 = arith.subf %1211, %1220 : vector<8x128xf32>
    %1222 = arith.mulf %1221, %1221 : vector<8x128xf32>
    %cst_331 = arith.constant dense<0.000000e+00> : vector<8xf32>
    %1223 = vector.multi_reduction <add>, %1222, %cst_331 [1] : vector<8x128xf32> to vector<8xf32>
    %1224 = vector.shape_cast %1223 : vector<8xf32> to vector<8x1xf32>
    %cst_332 = arith.constant 1.280000e+02 : f32
    %1225 = vector.broadcast %cst_332 : f32 to vector<8x1xf32>
    %1226 = arith.divf %1224, %1225 : vector<8x1xf32>
    %cst_333 = arith.constant 9.99999974E-6 : f32
    %1227 = vector.broadcast %cst_333 : f32 to vector<8x1xf32>
    %1228 = arith.addf %1226, %1227 : vector<8x1xf32>
    %1229 = math.rsqrt %1228 : vector<8x1xf32>
    %1230 = vector.broadcast %1229 : vector<8x1xf32> to vector<8x128xf32>
    %1231 = arith.mulf %1221, %1230 : vector<8x128xf32>
    %1232 = vector.broadcast %1213 : vector<1x128xf32> to vector<8x128xf32>
    %1233 = arith.mulf %1231, %1232 : vector<8x128xf32>
    %1234 = vector.broadcast %1215 : vector<1x128xf32> to vector<8x128xf32>
    %1235 = arith.addf %1233, %1234 : vector<8x128xf32>
    %1236 = tpu.concatenate %789, %891, %993, %1095 in 1 : vector<8x32xf32>, vector<8x32xf32>, vector<8x32xf32>, vector<8x32xf32> -> vector<8x128xf32>
    %cst_334 = arith.constant dense<0.000000e+00> : vector<8x128xf32>
    %1237 = tpu.matmul %1236, %667, %cst_334 {dimension_numbers = #tpu.dot_dimension_numbers<[1], [0], [0], [1], [0, 0, 1, 1], [], []>} : vector<8x128xf32>, vector<128x128xf32>, vector<8x128xf32> -> vector<8x128xf32>
    %1238 = vector.broadcast %669 : vector<1x128xf32> to vector<8x128xf32>
    %1239 = arith.addf %1237, %1238 : vector<8x128xf32>
    %1240 = arith.addf %661, %1239 : vector<8x128xf32>
    %c1_335 = arith.constant 1 : index
    %c0_336 = arith.constant 0 : index
    %c0_337 = arith.constant 0 : index
    %1241 = vector.load %arg18[%c1_335, %c0_336, %c0_337] : memref<2x1x128xf32, #tpu.memory_space<vmem>>, vector<1x1x128xf32>
    %1242 = vector.shape_cast %1241 : vector<1x1x128xf32> to vector<1x128xf32>
    %c1_338 = arith.constant 1 : index
    %c0_339 = arith.constant 0 : index
    %c0_340 = arith.constant 0 : index
    %1243 = vector.load %arg19[%c1_338, %c0_339, %c0_340] : memref<2x1x128xf32, #tpu.memory_space<vmem>>, vector<1x1x128xf32>
    %1244 = vector.shape_cast %1243 : vector<1x1x128xf32> to vector<1x128xf32>
    %cst_341 = arith.constant dense<0.000000e+00> : vector<8xf32>
    %1245 = vector.multi_reduction <add>, %1240, %cst_341 [1] : vector<8x128xf32> to vector<8xf32>
    %1246 = vector.shape_cast %1245 : vector<8xf32> to vector<8x1xf32>
    %cst_342 = arith.constant 1.280000e+02 : f32
    %1247 = vector.broadcast %cst_342 : f32 to vector<8x1xf32>
    %1248 = arith.divf %1246, %1247 : vector<8x1xf32>
    %1249 = vector.broadcast %1248 : vector<8x1xf32> to vector<8x128xf32>
    %1250 = arith.subf %1240, %1249 : vector<8x128xf32>
    %1251 = arith.mulf %1250, %1250 : vector<8x128xf32>
    %cst_343 = arith.constant dense<0.000000e+00> : vector<8xf32>
    %1252 = vector.multi_reduction <add>, %1251, %cst_343 [1] : vector<8x128xf32> to vector<8xf32>
    %1253 = vector.shape_cast %1252 : vector<8xf32> to vector<8x1xf32>
    %cst_344 = arith.constant 1.280000e+02 : f32
    %1254 = vector.broadcast %cst_344 : f32 to vector<8x1xf32>
    %1255 = arith.divf %1253, %1254 : vector<8x1xf32>
    %cst_345 = arith.constant 9.99999974E-6 : f32
    %1256 = vector.broadcast %cst_345 : f32 to vector<8x1xf32>
    %1257 = arith.addf %1255, %1256 : vector<8x1xf32>
    %1258 = math.rsqrt %1257 : vector<8x1xf32>
    %1259 = vector.broadcast %1258 : vector<8x1xf32> to vector<8x128xf32>
    %1260 = arith.mulf %1250, %1259 : vector<8x128xf32>
    %1261 = vector.broadcast %1242 : vector<1x128xf32> to vector<8x128xf32>
    %1262 = arith.mulf %1260, %1261 : vector<8x128xf32>
    %1263 = vector.broadcast %1244 : vector<1x128xf32> to vector<8x128xf32>
    %1264 = arith.addf %1262, %1263 : vector<8x128xf32>
    %c1_346 = arith.constant 1 : index
    %c0_347 = arith.constant 0 : index
    %c0_348 = arith.constant 0 : index
    %1265 = vector.load %arg14[%c1_346, %c0_347, %c0_348] : memref<2x128x256xf32, #tpu.memory_space<vmem>>, vector<1x128x256xf32>
    %1266 = vector.shape_cast %1265 : vector<1x128x256xf32> to vector<128x256xf32>
    %c1_349 = arith.constant 1 : index
    %c0_350 = arith.constant 0 : index
    %c0_351 = arith.constant 0 : index
    %1267 = vector.load %arg15[%c1_349, %c0_350, %c0_351] : memref<2x1x256xf32, #tpu.memory_space<vmem>>, vector<1x1x256xf32>
    %1268 = vector.shape_cast %1267 : vector<1x1x256xf32> to vector<1x256xf32>
    %cst_352 = arith.constant dense<0.000000e+00> : vector<8x256xf32>
    %1269 = tpu.matmul %1264, %1266, %cst_352 {dimension_numbers = #tpu.dot_dimension_numbers<[1], [0], [0], [1], [0, 0, 1, 1], [], []>} : vector<8x128xf32>, vector<128x256xf32>, vector<8x256xf32> -> vector<8x256xf32>
    %1270 = vector.broadcast %1268 : vector<1x256xf32> to vector<8x256xf32>
    %1271 = arith.addf %1269, %1270 : vector<8x256xf32>
    %cst_353 = arith.constant 0.000000e+00 : f32
    %1272 = vector.broadcast %cst_353 : f32 to vector<8x256xf32>
    %1273 = arith.maximumf %1271, %1272 : vector<8x256xf32>
    %c1_354 = arith.constant 1 : index
    %c0_355 = arith.constant 0 : index
    %c0_356 = arith.constant 0 : index
    %1274 = vector.load %arg16[%c1_354, %c0_355, %c0_356] : memref<2x256x128xf32, #tpu.memory_space<vmem>>, vector<1x256x128xf32>
    %1275 = vector.shape_cast %1274 : vector<1x256x128xf32> to vector<256x128xf32>
    %c1_357 = arith.constant 1 : index
    %c0_358 = arith.constant 0 : index
    %c0_359 = arith.constant 0 : index
    %1276 = vector.load %arg17[%c1_357, %c0_358, %c0_359] : memref<2x1x128xf32, #tpu.memory_space<vmem>>, vector<1x1x128xf32>
    %1277 = vector.shape_cast %1276 : vector<1x1x128xf32> to vector<1x128xf32>
    %cst_360 = arith.constant dense<0.000000e+00> : vector<8x128xf32>
    %1278 = tpu.matmul %1273, %1275, %cst_360 {dimension_numbers = #tpu.dot_dimension_numbers<[1], [0], [0], [1], [0, 0, 1, 1], [], []>} : vector<8x256xf32>, vector<256x128xf32>, vector<8x128xf32> -> vector<8x128xf32>
    %1279 = vector.broadcast %1277 : vector<1x128xf32> to vector<8x128xf32>
    %1280 = arith.addf %1278, %1279 : vector<8x128xf32>
    %1281 = arith.addf %1264, %1280 : vector<8x128xf32>
    %c1_361 = arith.constant 1 : index
    %c0_362 = arith.constant 0 : index
    %c0_363 = arith.constant 0 : index
    %1282 = vector.load %arg20[%c1_361, %c0_362, %c0_363] : memref<2x1x128xf32, #tpu.memory_space<vmem>>, vector<1x1x128xf32>
    %1283 = vector.shape_cast %1282 : vector<1x1x128xf32> to vector<1x128xf32>
    %c1_364 = arith.constant 1 : index
    %c0_365 = arith.constant 0 : index
    %c0_366 = arith.constant 0 : index
    %1284 = vector.load %arg21[%c1_364, %c0_365, %c0_366] : memref<2x1x128xf32, #tpu.memory_space<vmem>>, vector<1x1x128xf32>
    %1285 = vector.shape_cast %1284 : vector<1x1x128xf32> to vector<1x128xf32>
    %cst_367 = arith.constant dense<0.000000e+00> : vector<8xf32>
    %1286 = vector.multi_reduction <add>, %1281, %cst_367 [1] : vector<8x128xf32> to vector<8xf32>
    %1287 = vector.shape_cast %1286 : vector<8xf32> to vector<8x1xf32>
    %cst_368 = arith.constant 1.280000e+02 : f32
    %1288 = vector.broadcast %cst_368 : f32 to vector<8x1xf32>
    %1289 = arith.divf %1287, %1288 : vector<8x1xf32>
    %1290 = vector.broadcast %1289 : vector<8x1xf32> to vector<8x128xf32>
    %1291 = arith.subf %1281, %1290 : vector<8x128xf32>
    %1292 = arith.mulf %1291, %1291 : vector<8x128xf32>
    %cst_369 = arith.constant dense<0.000000e+00> : vector<8xf32>
    %1293 = vector.multi_reduction <add>, %1292, %cst_369 [1] : vector<8x128xf32> to vector<8xf32>
    %1294 = vector.shape_cast %1293 : vector<8xf32> to vector<8x1xf32>
    %cst_370 = arith.constant 1.280000e+02 : f32
    %1295 = vector.broadcast %cst_370 : f32 to vector<8x1xf32>
    %1296 = arith.divf %1294, %1295 : vector<8x1xf32>
    %cst_371 = arith.constant 9.99999974E-6 : f32
    %1297 = vector.broadcast %cst_371 : f32 to vector<8x1xf32>
    %1298 = arith.addf %1296, %1297 : vector<8x1xf32>
    %1299 = math.rsqrt %1298 : vector<8x1xf32>
    %1300 = vector.broadcast %1299 : vector<8x1xf32> to vector<8x128xf32>
    %1301 = arith.mulf %1291, %1300 : vector<8x128xf32>
    %1302 = vector.broadcast %1283 : vector<1x128xf32> to vector<8x128xf32>
    %1303 = arith.mulf %1301, %1302 : vector<8x128xf32>
    %1304 = vector.broadcast %1285 : vector<1x128xf32> to vector<8x128xf32>
    %1305 = arith.addf %1303, %1304 : vector<8x128xf32>
    %1306 = tpu.concatenate %1165, %1235, %1305 in 1 : vector<8x128xf32>, vector<8x128xf32>, vector<8x128xf32> -> vector<8x384xf32>
    %c0_372 = arith.constant 0 : index
    %c0_373 = arith.constant 0 : index
    %1307 = vector.load %arg22[%c0_372, %c0_373] : memref<8x384xf32, #tpu.memory_space<vmem>>, vector<8x384xf32>
    tpu.vector_store %arg22[%c0_372, %c0_373], %1306 {strides = array<i32>} : memref<8x384xf32, #tpu.memory_space<vmem>>, vector<8x384xf32>,
    return
  }
  func.func @transform_0(%arg0: i32) -> (i32, i32) {
    %c0_i32 = arith.constant 0 : i32
    %c0_i32_0 = arith.constant 0 : i32
    return %arg0, %c0_i32 : i32, i32
  }
  func.func @transform_1(%arg0: i32) -> (i32, i32) {
    %c0_i32 = arith.constant 0 : i32
    %c0_i32_0 = arith.constant 0 : i32
    return %arg0, %c0_i32 : i32, i32
  }
  func.func @transform_2(%arg0: i32) -> (i32, i32) {
    %c0_i32 = arith.constant 0 : i32
    %c0_i32_0 = arith.constant 0 : i32
    return %arg0, %c0_i32 : i32, i32
  }
  func.func @transform_3(%arg0: i32) -> (i32, i32) {
    %c0_i32 = arith.constant 0 : i32
    %c0_i32_0 = arith.constant 0 : i32
    %c0_i32_1 = arith.constant 0 : i32
    return %c0_i32, %c0_i32_0 : i32, i32
  }
  func.func @transform_4(%arg0: i32) -> (i32, i32) {
    %c0_i32 = arith.constant 0 : i32
    %c0_i32_0 = arith.constant 0 : i32
    %c0_i32_1 = arith.constant 0 : i32
    return %c0_i32, %c0_i32_0 : i32, i32
  }
  func.func @transform_5(%arg0: i32) -> (i32, i32) {
    %c0_i32 = arith.constant 0 : i32
    %c0_i32_0 = arith.constant 0 : i32
    %c0_i32_1 = arith.constant 0 : i32
    return %c0_i32, %c0_i32_0 : i32, i32
  }
  func.func @transform_6(%arg0: i32) -> (i32, i32) {
    %c0_i32 = arith.constant 0 : i32
    %c0_i32_0 = arith.constant 0 : i32
    %c0_i32_1 = arith.constant 0 : i32
    return %c0_i32, %c0_i32_0 : i32, i32
  }
  func.func @transform_7(%arg0: i32) -> (i32, i32) {
    %c0_i32 = arith.constant 0 : i32
    %c0_i32_0 = arith.constant 0 : i32
    %c0_i32_1 = arith.constant 0 : i32
    return %c0_i32, %c0_i32_0 : i32, i32
  }
  func.func @transform_8(%arg0: i32) -> (i32, i32) {
    %c0_i32 = arith.constant 0 : i32
    %c0_i32_0 = arith.constant 0 : i32
    %c0_i32_1 = arith.constant 0 : i32
    return %c0_i32, %c0_i32_0 : i32, i32
  }
  func.func @transform_9(%arg0: i32) -> (i32, i32, i32) {
    %c0_i32 = arith.constant 0 : i32
    %c0_i32_0 = arith.constant 0 : i32
    %c0_i32_1 = arith.constant 0 : i32
    %c0_i32_2 = arith.constant 0 : i32
    return %c0_i32, %c0_i32_0, %c0_i32_1 : i32, i32, i32
  }
  func.func @transform_10(%arg0: i32) -> (i32, i32, i32) {
    %c0_i32 = arith.constant 0 : i32
    %c0_i32_0 = arith.constant 0 : i32
    %c0_i32_1 = arith.constant 0 : i32
    %c0_i32_2 = arith.constant 0 : i32
    return %c0_i32, %c0_i32_0, %c0_i32_1 : i32, i32, i32
  }
  func.func @transform_11(%arg0: i32) -> (i32, i32, i32) {
    %c0_i32 = arith.constant 0 : i32
    %c0_i32_0 = arith.constant 0 : i32
    %c0_i32_1 = arith.constant 0 : i32
    %c0_i32_2 = arith.constant 0 : i32
    return %c0_i32, %c0_i32_0, %c0_i32_1 : i32, i32, i32
  }
  func.func @transform_12(%arg0: i32) -> (i32, i32, i32) {
    %c0_i32 = arith.constant 0 : i32
    %c0_i32_0 = arith.constant 0 : i32
    %c0_i32_1 = arith.constant 0 : i32
    %c0_i32_2 = arith.constant 0 : i32
    return %c0_i32, %c0_i32_0, %c0_i32_1 : i32, i32, i32
  }
  func.func @transform_13(%arg0: i32) -> (i32, i32, i32) {
    %c0_i32 = arith.constant 0 : i32
    %c0_i32_0 = arith.constant 0 : i32
    %c0_i32_1 = arith.constant 0 : i32
    %c0_i32_2 = arith.constant 0 : i32
    return %c0_i32, %c0_i32_0, %c0_i32_1 : i32, i32, i32
  }
  func.func @transform_14(%arg0: i32) -> (i32, i32, i32) {
    %c0_i32 = arith.constant 0 : i32
    %c0_i32_0 = arith.constant 0 : i32
    %c0_i32_1 = arith.constant 0 : i32
    %c0_i32_2 = arith.constant 0 : i32
    return %c0_i32, %c0_i32_0, %c0_i32_1 : i32, i32, i32
  }
  func.func @transform_15(%arg0: i32) -> (i32, i32, i32) {
    %c0_i32 = arith.constant 0 : i32
    %c0_i32_0 = arith.constant 0 : i32
    %c0_i32_1 = arith.constant 0 : i32
    %c0_i32_2 = arith.constant 0 : i32
    return %c0_i32, %c0_i32_0, %c0_i32_1 : i32, i32, i32
  }
  func.func @transform_16(%arg0: i32) -> (i32, i32, i32) {
    %c0_i32 = arith.constant 0 : i32
    %c0_i32_0 = arith.constant 0 : i32
    %c0_i32_1 = arith.constant 0 : i32
    %c0_i32_2 = arith.constant 0 : i32
    return %c0_i32, %c0_i32_0, %c0_i32_1 : i32, i32, i32
  }
  func.func @transform_17(%arg0: i32) -> (i32, i32, i32) {
    %c0_i32 = arith.constant 0 : i32
    %c0_i32_0 = arith.constant 0 : i32
    %c0_i32_1 = arith.constant 0 : i32
    %c0_i32_2 = arith.constant 0 : i32
    return %c0_i32, %c0_i32_0, %c0_i32_1 : i32, i32, i32
  }
  func.func @transform_18(%arg0: i32) -> (i32, i32, i32) {
    %c0_i32 = arith.constant 0 : i32
    %c0_i32_0 = arith.constant 0 : i32
    %c0_i32_1 = arith.constant 0 : i32
    %c0_i32_2 = arith.constant 0 : i32
    return %c0_i32, %c0_i32_0, %c0_i32_1 : i32, i32, i32
  }
  func.func @transform_19(%arg0: i32) -> (i32, i32, i32) {
    %c0_i32 = arith.constant 0 : i32
    %c0_i32_0 = arith.constant 0 : i32
    %c0_i32_1 = arith.constant 0 : i32
    %c0_i32_2 = arith.constant 0 : i32
    return %c0_i32, %c0_i32_0, %c0_i32_1 : i32, i32, i32
  }
  func.func @transform_20(%arg0: i32) -> (i32, i32, i32) {
    %c0_i32 = arith.constant 0 : i32
    %c0_i32_0 = arith.constant 0 : i32
    %c0_i32_1 = arith.constant 0 : i32
    %c0_i32_2 = arith.constant 0 : i32
    return %c0_i32, %c0_i32_0, %c0_i32_1 : i32, i32, i32
  }
  func.func @transform_21(%arg0: i32) -> (i32, i32) {
    %c0_i32 = arith.constant 0 : i32
    %c0_i32_0 = arith.constant 0 : i32
    return %arg0, %c0_i32 : i32, i32
  }
}

</mosaic_0001>

<bundles_post_ra>
// kernel: fwd.1
= control target key start
LH: loop header
LB: loop body
LE: loop exit
PB: predicated region body
PF: predicated region fallthrough
CT: control target
= control target key end

     0   :  { %s7369_s0 = inlined_call_operand.vmem [shape: f32[16,256], index: 0, kind: input, shape index: {}]   ;;  %s7370_s1 = inlined_call_operand.vmem [shape: f32[16,256], index: 1, kind: input, shape index: {}]   ;;  %s7371_s2 = inlined_call_operand.vmem [shape: f32[16,128], index: 2, kind: input, shape index: {}]   ;;  %s7372_s3 = inlined_call_operand.hbm [shape: f32[256,128], index: 3, kind: input, shape index: {}]   ;;  %s7373_s4 = inlined_call_operand.vmem [shape: f32[1,128], index: 4, kind: input, shape index: {}]   ;;  %s7374_s5 = inlined_call_operand.hbm [shape: f32[256,128], index: 5, kind: input, shape index: {}]   ;;  %s7375_s6 = inlined_call_operand.vmem [shape: f32[1,128], index: 6, kind: input, shape index: {}]   ;;  %s7376_s7 = inlined_call_operand.vmem [shape: f32[128,128], index: 7, kind: input, shape index: {}]   ;;  %s7377_s8 = inlined_call_operand.vmem [shape: f32[1,128], index: 8, kind: input, shape index: {}]   ;;  %s7378_s9 = inlined_call_operand.hbm [shape: f32[2,128,384], index: 9, kind: input, shape index: {}]   ;;  %s7379_s10 = inlined_call_operand.vmem [shape: f32[2,1,384], index: 10, kind: input, shape index: {}]   ;;  %s7380_s11 = inlined_call_operand.hbm [shape: f32[2,128,128], index: 11, kind: input, shape index: {}]   ;;  %s7381_s12 = inlined_call_operand.vmem [shape: f32[2,1,128], index: 12, kind: input, shape index: {}]   ;;  %s7382_s13 = inlined_call_operand.hbm [shape: f32[2,128,256], index: 13, kind: input, shape index: {}]   ;;  %s7383_s14 = inlined_call_operand.vmem [shape: f32[2,1,256], index: 14, kind: input, shape index: {}]   ;;  %s7384_s15 = inlined_call_operand.hbm [shape: f32[2,256,128], index: 15, kind: input, shape index: {}]   ;;  %s7385_s16 = inlined_call_operand.vmem [shape: f32[2,1,128], index: 16, kind: input, shape index: {}]   ;;  %s7386_s17 = inlined_call_operand.vmem [shape: f32[2,1,128], index: 17, kind: input, shape index: {}]   ;;  %s7387_s18 = inlined_call_operand.vmem [shape: f32[2,1,128], index: 18, kind: input, shape index: {}]   ;;  %s7388_s19 = inlined_call_operand.vmem [shape: f32[2,1,128], index: 19, kind: input, shape index: {}]   ;;  %s7389_s20 = inlined_call_operand.vmem [shape: f32[2,1,128], index: 20, kind: input, shape index: {}]   ;;  %s7390_s21 = inlined_call_operand.hbm [shape: f32[16,384], index: 21, kind: output, shape index: {}]  }
   0x1   :  { %7484 = sst [smem:[#allocation61_spill]] %s7369_s0 }
   0x2   :  { %7485 = sst [smem:[#allocation62_spill]] %s7370_s1 }
   0x3   :  { %7486 = sst [smem:[#allocation63_spill]] %s7371_s2 }
   0x4   :  { %7487 = sst [smem:[#allocation64_spill]] %s7372_s3 }
   0x5   :  { %7488 = sst [smem:[#allocation65_spill]] %s7373_s4 }
   0x6   :  { %7489 = sst [smem:[#allocation66_spill]] %s7374_s5 }
   0x7   :  { %7490 = sst [smem:[#allocation67_spill]] %s7378_s9 }
   0x8   :  { %7491 = sst [smem:[#allocation68_spill]] %s7380_s11 }
   0x9   :  { %7492 = sst [smem:[#allocation69_spill]] %s7389_s20 }
   0xa   :  { %7493 = sst [smem:[#allocation70_spill]] %s7390_s21 }
   0xb   :  { %26 = vsyncpa [#allocation3], 0 }
   0xc   :  { %27 = vsyncpa [#allocation6], 0 }
   0xd   :  { %28 = vsyncpa [#allocation9], 0 }
   0xe   :  { %29 = vsyncpa [#allocation12], 0 }
   0xf   :  { %30 = vsyncpa [#allocation4], 0 }
  0x10   :  { %32 = vsyncpa [#allocation4 + $0x1], 0  ;;  %s4770_s2 = smov 0   ;;  %s4772_s25 = smov 0  }
  0x11   :  { %s4774_s26 = smov 0   ;;  %s4776_s27 = smov 0  }
  0x12 LB: > { %7494 = sst [smem:[#allocation19_spill]] %s4630_s2  ;;  %s4791_s3 = sadd.s32 4294967295, %s4642_s27   ;;  %s4642_s27 = sphi %s4776_s27, %s7672_s27   ;;  %s4638_s26 = sphi %s4774_s26, %s7675_s26   ;;  %s4634_s25 = sphi %s4772_s25, %s7674_s25   ;;  %s4630_s2 = sphi %s4770_s2, %s7673_s2  }
  0x13   : > { %7495 = sst [smem:[#allocation20_spill]] %s4634_s25  ;;  %s3984_s28 = sadd.s32 4294967294, %s4642_s27  }
  0x14   : > { %7496 = sst [smem:[#allocation21_spill]] %s4638_s26  ;;  %s4795_s29 = sadd.s32 1, %s4642_s27  }
  0x15   : > { %7497 = sst [smem:[#allocation22_spill]] %s4642_s27  ;;  %s501_s0 = sadd.s32 1, %s4638_s26 }
  0x16   : > { %7498 = sst [smem:[#allocation23_spill]] %s4795_s29  ;;  %s498_s4 = ssub.s32 %s4642_s27, %s4795_s29 }
  0x17   : > { %p511_p0 = scmp.ne.s32.totalorder %s4638_s26, %s4634_s25  ;;  %p499_p1 = scmp.eq.s32.totalorder %s498_s4, 0 }
  0x18   : > { %p512_p2 = scmp.eq.s32.totalorder %s4791_s3, 1  ;;  %p517_p3 = scmp.ne.s32.totalorder %s4634_s25, %s4630_s2 }
  0x19   : > { %p518_p4 = scmp.eq.s32.totalorder %s3984_s28, 1  ;;  %p3985_p7 = scmp.ge.s32.totalorder %s4642_s27, 1 }
  0x1a   : > { %s4806_s30 = scalar_select %p499_p1, %s4638_s26, %s501_s0  }
  0x1b   : > { %p4808_p5 = por %p512_p2, %p511_p0  ;;  %p4812_p6 = por %p518_p4, %p517_p3 }
  0x1c   : > { %7499 = sst [smem:[#allocation24_spill]] %s4806_s30  ;;  %p525_p8 = scmp.lt.s32.totalorder %s4642_s27, 3 }
  0x1d   : > { %s7500_s5 = scalar_select %p4808_p5, 1, 0 }
  0x1e   : > { %s7502_s22 = scalar_select %p4812_p6, 1, 0 }
  0x1f   : > { %7501 = sst [smem:[#allocation25_spill]] %s7500_s5  ;;  %p4069_p9 = scmp.eq.s32.totalorder %s4791_s3, 0 }
  0x20   : > { %7503 = sst [smem:[#allocation26_spill]] %s7502_s22  ;;  %p4819_p10 = pnand %p3985_p7, %p525_p8 }
  0x21   : > { %s7505_s28 = sld [smem:[#allocation66_spill]]  ;;  %s4644_s22 = smov [#allocation5]  }
  0x22   : > { %p4046_p11 = pneg %p4819_p10  ;;  %s7506_s11 = sld [smem:[#allocation68_spill]] }
  0x23   : > { %s555_s2 = sshll.u32 %s4644_s22, 4  ;;  %s7403_s1 = smov 128   ;;  %s556_s2 = int_to_ptr.vmem [resolvable:$true] %s555_s2 }
  0x24   : > { %p4833_p12 = pnand %p4069_p9, %p4046_p11  ;;  %s7404_s24 = smov 8  }
  0x25   : > { %s4647_s30 = smov [#allocation8]   ;;  %s7508_s27 = sld [smem:[#allocation64_spill]] }
  0x26   : > { %s7509_s9 = sld [smem:[#allocation67_spill]]  ;;  %s4648_s20 = smov [#allocation2]  }
  0x27   : > { %s553_s0 = sshll.u32 %s7505_s28, 4  ;;  %s595_s28 = sshll.u32 %s4647_s30, 4  ;;  %s554_s0 = int_to_ptr.hbm [resolvable:$true] %s553_s0  ;;  %s596_s28 = int_to_ptr.vmem [resolvable:$true] %s595_s28 }
  0x28   : > { %s593_s26 = sshll.u32 %s7506_s11, 4  ;;  %s4649_s11 = smov [#allocation7]   ;;  %s594_s26 = int_to_ptr.hbm [resolvable:$true] %s593_s26 }
  0x29   : > { %4052 = dma.hbm_to_vmem [thread:$0]  (!%p4833_p12), %s554_s0, 4096, %s556_s2, [#allocation6], %s7403_s1, %s7403_s1, %s7404_s24  }
  0x2a   : > { %4058 = dma.hbm_to_vmem [thread:$0]  (!%p4833_p12), %s594_s26, 4096, %s596_s28, [#allocation9], %s7403_s1, %s7403_s1, %s7404_s24  }
  0x2b   : > { %s536_s5 = sshll.u32 %s7508_s27, 4  ;;  %s538_s2 = sshll.u32 %s4648_s20, 4  ;;  %s537_s5 = int_to_ptr.hbm [resolvable:$true] %s536_s5  ;;  %s539_s2 = int_to_ptr.vmem [resolvable:$true] %s538_s2 }
  0x2c   : > { %s576_s25 = sshll.u32 %s7509_s9, 4  ;;  %s578_s27 = sshll.u32 %s4649_s11, 4  ;;  %s577_s25 = int_to_ptr.hbm [resolvable:$true] %s576_s25  ;;  %s579_s27 = int_to_ptr.vmem [resolvable:$true] %s578_s27 }
  0x2d   : > { %4049 = dma.hbm_to_vmem [thread:$0]  (!%p4833_p12), %s537_s5, 4096, %s539_s2, [#allocation3], %s7403_s1, %s7403_s1, %s7404_s24  }
  0x2e   : > { %s4650_s0 = smov 384   ;;  %s4651_s26 = smov 24  }
  0x2f   : > { %4055 = dma.hbm_to_vmem [thread:$0]  (!%p4833_p12), %s577_s25, 12288, %s579_s27, [#allocation6], %s4650_s0, %s4650_s0, %s4651_s26  }
  0x30   : > { %s610_s20 = sshll.u32 %s7382_s13, 4  ;;  %s4652_s28 = smov [#allocation10]   ;;  %s611_s20 = int_to_ptr.hbm [resolvable:$true] %s610_s20 }
  0x31   : > { %s612_s4 = sshll.u32 %s4652_s28, 4  ;;  %s627_s5 = sshll.u32 %s7384_s15, 4  ;;  %s613_s4 = int_to_ptr.vmem [resolvable:$true] %s612_s4  ;;  %s628_s5 = int_to_ptr.hbm [resolvable:$true] %s627_s5 }
  0x32   : > { %s4653_s2 = smov 256   ;;  %s4654_s11 = smov 16  }
  0x33   : > { %4061 = dma.hbm_to_vmem [thread:$0]  (!%p4833_p12), %s611_s20, 8192, %s613_s4, [#allocation9], %s4653_s2, %s4653_s2, %s4654_s11  }
  0x34   : > { %s4655_s1 = smov [#allocation11]   ;;  %s7510_s25 = smov 8  }
  0x35   : > { %s629_s24 = sshll.u32 %s4655_s1, 4  ;;  %s7511_s27 = smov 128   ;;  %s630_s24 = int_to_ptr.vmem [resolvable:$true] %s629_s24 }
  0x36   : > { %4064 = dma.hbm_to_vmem [thread:$0]  (!%p4833_p12), %s628_s5, 8192, %s630_s24, [#allocation12], %s7511_s27, %s7511_s27, %s7510_s25  }
  0x37   : > { %683 = sbr.rel (%p4819_p10) target bundleno = 4728 (0x1278), region = 104 }
  0x3c   : > { %4609 = dma.done.wait (%p4069_p9), [#allocation3], 4096  }
  0x3d   : > { %4611 = vsyncadd (%p4069_p9), [#allocation3], 4294963200 }
  0x3e   : > { %4613 = dma.done.wait (%p4069_p9), [#allocation6], 16384  }
  0x3f   : > { %4615 = vsyncadd (%p4069_p9), [#allocation6], 4294950912 }
  0x40   : > { %4617 = dma.done.wait (%p4069_p9), [#allocation9], 12288  }
  0x41   : > { %4619 = vsyncadd (%p4069_p9), [#allocation9], 4294955008 }
  0x42   : > { %4621 = dma.done.wait (%p4069_p9), [#allocation12], 8192  }
  0x43   : > { %4623 = vsyncadd (%p4069_p9), [#allocation12], 4294959104  ;;  %v809_v0 = vld [vmem:[#allocation2 + $0x78] sm:$0xff]  ;;  %v808_v2 = vld [vmem:[#allocation2 + $0x70] sm:$0xff]  ;;  %p778_p13 = scmp.lt.s32.totalorder %s4791_s3, 1  ;;  %s7512_s24 = sld [smem:[#allocation61_spill]] }
  0x44   : > { %v887_v1 = vld [vmem:[#allocation5 + $0x78] sm:$0xff]  ;;  %830 = vmatpush.msra.mxu0 %v809_v0  ;;  %v886_v4 = vld [vmem:[#allocation5 + $0x70] sm:$0xff]  ;;  %v807_v6 = vld [vmem:[#allocation2 + $0x68] sm:$0xff]  ;;  %s7513_s30 = sld [smem:[#allocation62_spill]]  ;;  %vm1246_vm0 = vcmask 261120   ;;  %s4019_s21 = smul.u32 24, %s4791_s3 }
  0x45   : > { %908 = vmatpush.msra.mxu2 %v887_v1  ;;  %v825_v3 = vld [vmem:[#allocation2 + $0xf8] sm:$0xff]  ;;  %v824_v7 = vld [vmem:[#allocation2 + $0xf0] sm:$0xff]  ;;  %v885_v8 = vld [vmem:[#allocation5 + $0x68] sm:$0xff]  ;;  %s4895_s9 = scalar_select %p778_p13, %s4791_s3, 1 }
  0x46   : > { %v903_v5 = vld [vmem:[#allocation5 + $0xf8] sm:$0xff]  ;;  %850 = vmatpush.msra.mxu1 %v825_v3  ;;  %831 = vmatpush.msra.mxu0 %v808_v2  ;;  %v902_v9 = vld [vmem:[#allocation5 + $0xf0] sm:$0xff]  ;;  %v823_v10 = vld [vmem:[#allocation2 + $0xe8] sm:$0xff]  ;;  %s7515_s2 = sld [smem:[#allocation65_spill]] }
  0x47   : > { %928 = vmatpush.msra.mxu3 %v903_v5  ;;  %909 = vmatpush.msra.mxu2 %v886_v4  ;;  %v806_v11 = vld [vmem:[#allocation2 + $0x60] sm:$0xff]  ;;  %v901_v13 = vld [vmem:[#allocation5 + $0xe8] sm:$0xff]  ;;  %v805_v16 = vld [vmem:[#allocation2 + $0x58] sm:$0xff]  ;;  %s4016_s29 = sshll.u32 %s4895_s9, 4  ;;  %s4004_s23 = sshll.u32 %s4895_s9, 3 }
  0x48   : > { %851 = vmatpush.msra.mxu1 %v824_v7  ;;  %v884_v12 = vld [vmem:[#allocation5 + $0x60] sm:$0xff]  ;;  %832 = vmatpush.msra.mxu0 %v807_v6  ;;  %v883_v17 = vld [vmem:[#allocation5 + $0x58] sm:$0xff]  ;;  %v804_v20 = vld [vmem:[#allocation2 + $0x50] sm:$0xff]  ;;  %s4657_s9 = smov 64   ;;  %s7603_s4 = sld [smem:[#allocation69_spill]] }
  0x49   : > { %929 = vmatpush.msra.mxu3 %v902_v9  ;;  %910 = vmatpush.msra.mxu2 %v885_v8  ;;  %v822_v14 = vld [vmem:[#allocation2 + $0xe0] sm:$0xff]  ;;  %v821_v18 = vld [vmem:[#allocation2 + $0xd8] sm:$0xff]  ;;  %v882_v21 = vld [vmem:[#allocation5 + $0x50] sm:$0xff]  ;;  %s782_s0 = scalar_lea.vmem %s7512_s24, %s4016_s29  ;;  %s4656_s24 = smov 32  }
  0x4a   : > { %v900_v15 = vld [vmem:[#allocation5 + $0xe0] sm:$0xff]  ;;  %852 = vmatpush.msra.mxu1 %v823_v10  ;;  %833 = vmatpush.msra.mxu0 %v806_v11  ;;  %v899_v19 = vld [vmem:[#allocation5 + $0xd8] sm:$0xff]  ;;  %v820_v22 = vld [vmem:[#allocation2 + $0xd0] sm:$0xff]  ;;  %s787_s20 = scalar_lea.vmem %s7513_s30, %s4016_s29  ;;  %s7514_s30 = sld [smem:[#allocation63_spill]] }
  0x4b   : > { %930 = vmatpush.msra.mxu3 %v901_v13  ;;  %911 = vmatpush.msra.mxu2 %v884_v12  ;;  %v898_v23 = vld [vmem:[#allocation5 + $0xd0] sm:$0xff]  ;;  %v803_v24 = vld [vmem:[#allocation2 + $0x48] sm:$0xff]  ;;  %v802_v28 = vld [vmem:[#allocation2 + $0x40] sm:$0xff]  ;;  %s7665_s28 = sld [smem:[#allocation20_spill]] }
  0x4c   : > { %853 = vmatpush.msra.mxu1 %v822_v14  ;;  %834 = vmatpush.msra.mxu0 %v805_v16  ;;  %v881_v25 = vld [vmem:[#allocation5 + $0x48] sm:$0xff]  ;;  %v880_v29 = vld [vmem:[#allocation5 + $0x40] sm:$0xff]  ;;  %v801_v32 = vld [vmem:[#allocation2 + $0x38] sm:$0xff] }
  0x4d   : > { %931 = vmatpush.msra.mxu3 %v900_v15  ;;  %912 = vmatpush.msra.mxu2 %v883_v17  ;;  %v819_v26 = vld [vmem:[#allocation2 + $0xc8] sm:$0xff]  ;;  %v818_v30 = vld [vmem:[#allocation2 + $0xc0] sm:$0xff]  ;;  %v879_v33 = vld [vmem:[#allocation5 + $0x38] sm:$0xff] }
  0x4e   : > { %854 = vmatpush.msra.mxu1 %v821_v18  ;;  %835 = vmatpush.msra.mxu0 %v804_v20  ;;  %v897_v27 = vld [vmem:[#allocation5 + $0xc8] sm:$0xff]  ;;  %v896_v31 = vld [vmem:[#allocation5 + $0xc0] sm:$0xff]  ;;  %v817_v34 = vld [vmem:[#allocation2 + $0xb8] sm:$0xff] }
  0x4f   : > { %932 = vmatpush.msra.mxu3 %v899_v19  ;;  %913 = vmatpush.msra.mxu2 %v882_v21  ;;  %v895_v35 = vld [vmem:[#allocation5 + $0xb8] sm:$0xff]  ;;  %v800_v36 = vld [vmem:[#allocation2 + $0x30] sm:$0xff]  ;;  %v799_v40 = vld [vmem:[#allocation2 + $0x28] sm:$0xff] }
  0x50   : > { %855 = vmatpush.msra.mxu1 %v820_v22  ;;  %836 = vmatpush.msra.mxu0 %v803_v24  ;;  %v878_v37 = vld [vmem:[#allocation5 + $0x30] sm:$0xff]  ;;  %v877_v41 = vld [vmem:[#allocation5 + $0x28] sm:$0xff]  ;;  %v798_v44 = vld [vmem:[#allocation2 + $0x20] sm:$0xff] }
  0x51   : > { %933 = vmatpush.msra.mxu3 %v898_v23  ;;  %914 = vmatpush.msra.mxu2 %v881_v25  ;;  %v816_v38 = vld [vmem:[#allocation2 + $0xb0] sm:$0xff]  ;;  %v815_v42 = vld [vmem:[#allocation2 + $0xa8] sm:$0xff]  ;;  %v876_v45 = vld [vmem:[#allocation5 + $0x20] sm:$0xff]  ;;  %s775_s22 = sand.u32 1, %s7665_s28  }
  0x52   : > { %856 = vmatpush.msra.mxu1 %v819_v26  ;;  %837 = vmatpush.msra.mxu0 %v802_v28  ;;  %v894_v39 = vld [vmem:[#allocation5 + $0xb0] sm:$0xff]  ;;  %v893_v43 = vld [vmem:[#allocation5 + $0xa8] sm:$0xff]  ;;  %v814_v46 = vld [vmem:[#allocation2 + $0xa0] sm:$0xff]  ;;  %s4018_s11 = smul.u32 24, %s775_s22  ;;  %s3825_s3 = scalar_lea.sflag [#allocation4], %s775_s22 }
  0x53   : > { %934 = vmatpush.msra.mxu3 %v897_v27  ;;  %915 = vmatpush.msra.mxu2 %v880_v29  ;;  %v892_v47 = vld [vmem:[#allocation5 + $0xa0] sm:$0xff]  ;;  %v797_v48 = vld [vmem:[#allocation2 + $0x18] sm:$0xff]  ;;  %v796_v52 = vld [vmem:[#allocation2 + $0x10] sm:$0xff] }
  0x54   : > { %857 = vmatpush.msra.mxu1 %v818_v30  ;;  %838 = vmatpush.msra.mxu0 %v801_v32  ;;  %v875_v49 = vld [vmem:[#allocation5 + $0x18] sm:$0xff]  ;;  %v874_v53 = vld [vmem:[#allocation5 + $0x10] sm:$0xff]  ;;  %v795_v54 = vld [vmem:[#allocation2 + $0x8] sm:$0xff]  ;;  %s7305_s29 = scalar_lea.vmem [#allocation13], %s4018_s11 }
  0x55   : > { %935 = vmatpush.msra.mxu3 %v896_v31  ;;  %916 = vmatpush.msra.mxu2 %v879_v33  ;;  %v813_v50 = vld [vmem:[#allocation2 + $0x98] sm:$0xff]  ;;  %v812_v55 = vld [vmem:[#allocation2 + $0x90] sm:$0xff]  ;;  %v873_v56 = vld [vmem:[#allocation5 + $0x8] sm:$0xff] }
  0x56   : > { %858 = vmatpush.msra.mxu1 %v817_v34  ;;  %839 = vmatpush.msra.mxu0 %v800_v36  ;;  %v891_v51 = vld [vmem:[#allocation5 + $0x98] sm:$0xff]  ;;  %v890_v57 = vld [vmem:[#allocation5 + $0x90] sm:$0xff]  ;;  %v794_v58 = vld [vmem:[#allocation2] sm:$0xff] }
  0x57   : > { %936 = vmatpush.msra.mxu3 %v895_v35  ;;  %917 = vmatpush.msra.mxu2 %v878_v37  ;;  %v811_v59 = vld [vmem:[#allocation2 + $0x88] sm:$0xff]  ;;  %v872_v60 = vld [vmem:[#allocation5] sm:$0xff]  ;;  %v964_v0 = vld [vmem:[%s7376_s7 + $0x78] sm:$0xff] }
  0x58   : > { %859 = vmatpush.msra.mxu1 %v816_v38  ;;  %840 = vmatpush.msra.mxu0 %v799_v40  ;;  %v889_v61 = vld [vmem:[#allocation5 + $0x88] sm:$0xff]  ;;  %v792_v62 = vld [vmem:[%s782_s0] sm:$0xff]  ;;  %v963_v5 = vld [vmem:[%s7376_s7 + $0x70] sm:$0xff] }
  0x59   : > { %937 = vmatpush.msra.mxu3 %v894_v39  ;;  %918 = vmatpush.msra.mxu2 %v877_v41  ;;  %v870_v63 = vld [vmem:[%s787_s20] sm:$0xff]  ;;  %v793_v3 = vld [vmem:[%s782_s0 + $0x8] sm:$0xff]  ;;  %v4912_v7 = vld [vmem:[#allocation7 + $0x170] sm:$0xff]  ;;  %s4658_s0 = smov 96  }
  0x5a   : > { %860 = vmatpush.msra.mxu1 %v815_v42  ;;  %841 = vmatpush.msra.mxu0 %v798_v44  ;;  %v810_v1 = vld [vmem:[#allocation2 + $0x80] sm:$0xff]  ;;  %v871_v4 = vld [vmem:[%s787_s20 + $0x8] sm:$0xff]  ;;  %v4917_v9 = vld [vmem:[#allocation7 + $0x150] sm:$0xff]  ;;  %s791_s20 = scalar_lea.vmem %s7514_s30, %s4004_s23 }
  0x5b   : > { %938 = vmatpush.msra.mxu3 %v893_v43  ;;  %919 = vmatpush.msra.mxu2 %v876_v45  ;;  %v888_v2 = vld [vmem:[#allocation5 + $0x80] sm:$0xff]  ;;  %v4910_v6 = vld [vmem:[#allocation7 + $0x168] sm:$0xff]  ;;  %v4919_v10 = vld [vmem:[#allocation7 + $0x158] sm:$0xff] }
  0x5c   : > { %861 = vmatpush.msra.mxu1 %v814_v46  ;;  %842 = vmatpush.msra.mxu0 %v797_v48  ;;  %v962_v8 = vld [vmem:[%s7376_s7 + $0x68] sm:$0xff]  ;;  %v961_v11 = vld [vmem:[%s7376_s7 + $0x60] sm:$0xff]  ;;  %v4926_v12 = vld [vmem:[#allocation7 + $0x138] sm:$0xff] }
  0x5d   : > { %939 = vmatpush.msra.mxu3 %v892_v47  ;;  %920 = vmatpush.msra.mxu2 %v875_v49  ;;  %v4928_v13 = vld [vmem:[#allocation7 + $0x140] sm:$0xff]  ;;  %v960_v14 = vld [vmem:[%s7376_s7 + $0x58] sm:$0xff]  ;;  %v4939_v17 = vld [vmem:[#allocation7 + $0x128] sm:$0xff] }
  0x5e   : > { %862 = vmatpush.msra.mxu1 %v813_v50  ;;  %843 = vmatpush.msra.mxu0 %v796_v52  ;;  %v4935_v15 = vld [vmem:[#allocation7 + $0x178] sm:$0xff]  ;;  %v4937_v16 = vld [vmem:[#allocation7 + $0x120] sm:$0xff]  ;;  %v959_v19 = vld [vmem:[%s7376_s7 + $0x50] sm:$0xff] }
  0x5f   : > { %940 = vmatpush.msra.mxu3 %v891_v51  ;;  %921 = vmatpush.msra.mxu2 %v874_v53  ;;  %v4942_v18 = vld [vmem:[#allocation7 + $0x160] sm:$0xff]  ;;  %v4949_v20 = vld [vmem:[#allocation7 + $0x148] sm:$0xff]  ;;  %v4953_v22 = vld [vmem:[#allocation7 + $0x110] sm:$0xff] }
  0x60   : > { %863 = vmatpush.msra.mxu1 %v812_v55  ;;  %844 = vmatpush.msra.mxu0 %v795_v54  ;;  %v4951_v21 = vld [vmem:[#allocation7 + $0x108] sm:$0xff]  ;;  %v4961_v24 = vld [vmem:[#allocation7 + $0x130] sm:$0xff]  ;;  %v957_v25 = vld [vmem:[%s7376_s7 + $0x40] sm:$0xff] }
  0x61   : > { %941 = vmatpush.msra.mxu3 %v890_v57  ;;  %922 = vmatpush.msra.mxu2 %v873_v56  ;;  %v958_v23 = vld [vmem:[%s7376_s7 + $0x48] sm:$0xff]  ;;  %v4966_v26 = vld [vmem:[#allocation7 + $0xf0] sm:$0xff]  ;;  %v4968_v27 = vld [vmem:[#allocation7 + $0xf8] sm:$0xff] }
  0x62   : > { %864 = vmatpush.msra.mxu1 %v811_v59  ;;  %845 = vmatpush.msra.mxu0 %v794_v58  ;;  %v4973_v28 = vld [vmem:[#allocation7 + $0x118] sm:$0xff]  ;;  %v4977_v30 = vld [vmem:[#allocation7 + $0xe0] sm:$0xff]  ;;  %v4989_v34 = vld [vmem:[#allocation7 + $0xc8] sm:$0xff] }
  0x63   : > { %942 = vmatpush.msra.mxu3 %v889_v61  ;;  %923 = vmatpush.msra.mxu2 %v872_v60  ;;  %v4975_v29 = vld [vmem:[#allocation7 + $0xd8] sm:$0xff]  ;;  %v4985_v32 = vld [vmem:[#allocation7 + $0x100] sm:$0xff]  ;;  %v955_v35 = vld [vmem:[%s7376_s7 + $0x30] sm:$0xff] }
  0x64   : > { %846 = vmatmul.f32.vlgmr.msra.gmra.mxu0 %v792_v62  ;;  %924 = vmatmul.f32.vlgmr.msra.gmra.mxu2 %v870_v63  ;;  %v956_v31 = vld [vmem:[%s7376_s7 + $0x38] sm:$0xff]  ;;  %v4987_v33 = vld [vmem:[#allocation7 + $0xc0] sm:$0xff]  ;;  %v4997_v36 = vld [vmem:[#allocation7 + $0xe8] sm:$0xff] }
  0x65   : > { %969 = vmatpush.msrb.mxu0 %v964_v0  ;;  %865 = vmatpush.msra.mxu1 %v810_v1  ;;  %v4999_v37 = vld [vmem:[#allocation7 + $0xa8] sm:$0xff]  ;;  %v5001_v38 = vld [vmem:[#allocation7 + $0xb0] sm:$0xff]  ;;  %v5013_v42 = vld [vmem:[#allocation7 + $0x98] sm:$0xff] }
  0x66   : > { %943 = vmatpush.msra.mxu3 %v888_v2  ;;  %866 = vmatmul.f32.vlgmr.msra.gmra.mxu1 %v793_v3  ;;  %v954_v39 = vld [vmem:[%s7376_s7 + $0x28] sm:$0xff]  ;;  %v5009_v40 = vld [vmem:[#allocation7 + $0xd0] sm:$0xff]  ;;  %v953_v43 = vld [vmem:[%s7376_s7 + $0x20] sm:$0xff] }
  0x67   : > { %944 = vmatmul.f32.vlgmr.msra.gmra.mxu3 %v871_v4  ;;  %970 = vmatpush.msrb.mxu0 %v963_v5  ;;  %v5011_v41 = vld [vmem:[#allocation7 + $0x90] sm:$0xff]  ;;  %v5021_v44 = vld [vmem:[#allocation7 + $0xb8] sm:$0xff]  ;;  %v5025_v46 = vld [vmem:[#allocation7 + $0x80] sm:$0xff] }
  0x68   : > { %1062 = vmatpush.msrb.mxu1 %v4910_v6  ;;  %1082 = vmatpush.msrb.mxu2 %v4912_v7  ;;  %v5023_v45 = vld [vmem:[#allocation7 + $0x78] sm:$0xff]  ;;  %v5033_v48 = vld [vmem:[#allocation7 + $0xa0] sm:$0xff]  ;;  %v5038_v50 = vld [vmem:[#allocation7 + $0x68] sm:$0xff] }
  0x69   : > { %971 = vmatpush.msrb.mxu0 %v962_v8  ;;  %1102 = vmatpush.msrb.mxu3 %v4935_v15  ;;  %v952_v47 = vld [vmem:[%s7376_s7 + $0x18] sm:$0xff]  ;;  %v5036_v49 = vld [vmem:[#allocation7 + $0x60] sm:$0xff]  ;;  %v951_v51 = vld [vmem:[%s7376_s7 + $0x10] sm:$0xff] }
  0x6a   : > { %1063 = vmatpush.msrb.mxu1 %v4917_v9  ;;  %1083 = vmatpush.msrb.mxu2 %v4919_v10  ;;  %v5046_v52 = vld [vmem:[#allocation7 + $0x88] sm:$0xff]  ;;  %v5050_v54 = vld [vmem:[#allocation7 + $0x50] sm:$0xff]  ;;  %v5065_v58 = vld [vmem:[#allocation7 + $0x38] sm:$0xff] }
  0x6b   : > { %972 = vmatpush.msrb.mxu0 %v961_v11  ;;  %1103 = vmatpush.msrb.mxu3 %v4942_v18  ;;  %v5048_v53 = vld [vmem:[#allocation7 + $0x48] sm:$0xff]  ;;  %v5061_v56 = vld [vmem:[#allocation7 + $0x70] sm:$0xff]  ;;  %v949_v59 = vld [vmem:[%s7376_s7] sm:$0xff] }
  0x6c   : > { %1064 = vmatpush.msrb.mxu1 %v4926_v12  ;;  %1084 = vmatpush.msrb.mxu2 %v4928_v13  ;;  %v950_v55 = vld [vmem:[%s7376_s7 + $0x8] sm:$0xff]  ;;  %v5063_v57 = vld [vmem:[#allocation7 + $0x30] sm:$0xff]  ;;  %v5073_v60 = vld [vmem:[#allocation7 + $0x58] sm:$0xff] }
  0x6d   : > { %973 = vmatpush.msrb.mxu0 %v960_v14  ;;  %1104 = vmatpush.msrb.mxu3 %v4949_v20  ;;  %v948_v61 = vld [vmem:[%s791_s20] sm:$0xff]  ;;  %v5075_v62 = vld [vmem:[#allocation7 + $0x18] sm:$0xff]  ;;  %v5090_v2 = vld [vmem:[#allocation7 + $0x8] sm:$0xff] }
  0x6e   : > { %1065 = vmatpush.msrb.mxu1 %v4937_v16  ;;  %1085 = vmatpush.msrb.mxu2 %v4939_v17  ;;  %v5080_v63 = vld [vmem:[#allocation7 + $0x20] sm:$0xff]  ;;  %v994_v3 = vld [vmem:[#allocation7 + $0x28] sm:$0xff]  ;;  %v991_v4 = vld [vmem:[#allocation7 + $0x10] sm:$0xff] }
  0x6f   : > { %974 = vmatpush.msrb.mxu0 %v959_v19  ;;  %1105 = vmatpush.msrb.mxu3 %v4961_v24  ;;  %v5082_v0 = vld [vmem:[#allocation7] sm:$0xff] }
  0x70   : > { %1066 = vmatpush.msrb.mxu1 %v4951_v21  ;;  %1086 = vmatpush.msrb.mxu2 %v4953_v22  ;;  %v5085_v1 = vld [vmem:[#allocation7 + $0x40] sm:$0xff] }
  0x71   : > { %975 = vmatpush.msrb.mxu0 %v958_v23  ;;  %1106 = vmatpush.msrb.mxu3 %v4973_v28  ;;  %v4130_v5 = vld [vmem:[%s7515_s2] ss:$0 sm:$0xff]  ;;  %s3838_s2 = sshll.u32 %s7305_s29, 4  ;;  %s3839_s2 = int_to_ptr.vmem [resolvable:$true] %s3838_s2 }
  0x72   : > { %1067 = vmatpush.msrb.mxu1 %v4966_v26  ;;  %1087 = vmatpush.msrb.mxu2 %v4968_v27 }
  0x73   : > { %976 = vmatpush.msrb.mxu0 %v957_v25  ;;  %1107 = vmatpush.msrb.mxu3 %v4985_v32 }
  0x74   : > { %1068 = vmatpush.msrb.mxu1 %v4975_v29  ;;  %1088 = vmatpush.msrb.mxu2 %v4977_v30 }
  0x75   : > { %977 = vmatpush.msrb.mxu0 %v956_v31  ;;  %1108 = vmatpush.msrb.mxu3 %v4997_v36 }
  0x76   : > { %1069 = vmatpush.msrb.mxu1 %v4987_v33  ;;  %1089 = vmatpush.msrb.mxu2 %v4989_v34 }
  0x77   : > { %978 = vmatpush.msrb.mxu0 %v955_v35  ;;  %1109 = vmatpush.msrb.mxu3 %v5009_v40 }
  0x78   : > { %1070 = vmatpush.msrb.mxu1 %v4999_v37  ;;  %1090 = vmatpush.msrb.mxu2 %v5001_v38 }
  0x79   : > { %979 = vmatpush.msrb.mxu0 %v954_v39  ;;  %1110 = vmatpush.msrb.mxu3 %v5021_v44 }
  0x7a   : > { %1071 = vmatpush.msrb.mxu1 %v5011_v41  ;;  %1091 = vmatpush.msrb.mxu2 %v5013_v42 }
  0x7b   : > { %980 = vmatpush.msrb.mxu0 %v953_v43  ;;  %1111 = vmatpush.msrb.mxu3 %v5033_v48 }
  0x7c   : > { %1072 = vmatpush.msrb.mxu1 %v5023_v45  ;;  %1092 = vmatpush.msrb.mxu2 %v5025_v46 }
  0x7d   : > { %981 = vmatpush.msrb.mxu0 %v952_v47  ;;  %1112 = vmatpush.msrb.mxu3 %v5046_v52 }
  0x7e   : > { %1073 = vmatpush.msrb.mxu1 %v5036_v49  ;;  %1093 = vmatpush.msrb.mxu2 %v5038_v50 }
  0x7f   : > { %982 = vmatpush.msrb.mxu0 %v951_v51  ;;  %1113 = vmatpush.msrb.mxu3 %v5061_v56 }
  0x80   : > { %1074 = vmatpush.msrb.mxu1 %v5048_v53  ;;  %1094 = vmatpush.msrb.mxu2 %v5050_v54 }
  0x81   : > { %983 = vmatpush.msrb.mxu0 %v950_v55  ;;  %1114 = vmatpush.msrb.mxu3 %v5073_v60 }
  0x82   : > { %1075 = vmatpush.msrb.mxu1 %v5063_v57  ;;  %1095 = vmatpush.msrb.mxu2 %v5065_v58 }
  0x83   : > { %984 = vmatpush.msrb.mxu0 %v949_v59  ;;  %1115 = vmatpush.msrb.mxu3 %v5085_v1 }
  0x84   : > { %985 = vmatmul.f32.vlgmr.msrb.gmra.mxu0 %v948_v61  ;;  %1076 = vmatpush.msrb.mxu1 %v5075_v62 }
  0x85   : > { %1122 = vmatpush.msra.mxu0 %v4910_v6  ;;  %1096 = vmatpush.msrb.mxu2 %v5080_v63 }
  0x86   : > { %1077 = vmatpush.msrb.mxu1 %v5082_v0  ;;  %1116 = vmatpush.msrb.mxu3 %v994_v3 }
  0x87   : > { %1123 = vmatpush.msra.mxu0 %v4917_v9  ;;  %1097 = vmatpush.msrb.mxu2 %v5090_v2 }
  0x88   : > { %1142 = vmatpush.msra.mxu1 %v4912_v7  ;;  %1117 = vmatpush.msrb.mxu3 %v991_v4 }
  0x89   : > { %1124 = vmatpush.msra.mxu0 %v4926_v12  ;;  %1162 = vmatpush.msra.mxu2 %v4935_v15 }
  0x8a   : > { %1143 = vmatpush.msra.mxu1 %v4919_v10  ;;  %1182 = vmatpush.msra.mxu3 %v4910_v6 }
  0x8b   : > { %1125 = vmatpush.msra.mxu0 %v4937_v16  ;;  %1163 = vmatpush.msra.mxu2 %v4942_v18 }
  0x8c   : > { %1144 = vmatpush.msra.mxu1 %v4928_v13  ;;  %1183 = vmatpush.msra.mxu3 %v4917_v9 }
  0x8d   : > { %1126 = vmatpush.msra.mxu0 %v4951_v21  ;;  %1164 = vmatpush.msra.mxu2 %v4949_v20 }
  0x8e   : > { %1145 = vmatpush.msra.mxu1 %v4939_v17  ;;  %1184 = vmatpush.msra.mxu3 %v4926_v12 }
  0x8f   : > { %1127 = vmatpush.msra.mxu0 %v4966_v26  ;;  %1165 = vmatpush.msra.mxu2 %v4961_v24 }
  0x90   : > { %1146 = vmatpush.msra.mxu1 %v4953_v22  ;;  %1185 = vmatpush.msra.mxu3 %v4937_v16 }
  0x91   : > { %1128 = vmatpush.msra.mxu0 %v4975_v29  ;;  %1166 = vmatpush.msra.mxu2 %v4973_v28 }
  0x92   : > { %1147 = vmatpush.msra.mxu1 %v4968_v27  ;;  %1186 = vmatpush.msra.mxu3 %v4951_v21 }
  0x93   : > { %1129 = vmatpush.msra.mxu0 %v4987_v33  ;;  %1167 = vmatpush.msra.mxu2 %v4985_v32 }
  0x94   : > { %1148 = vmatpush.msra.mxu1 %v4977_v30  ;;  %1187 = vmatpush.msra.mxu3 %v4966_v26 }
  0x95   : > { %1130 = vmatpush.msra.mxu0 %v4999_v37  ;;  %1168 = vmatpush.msra.mxu2 %v4997_v36 }
  0x96   : > { %1149 = vmatpush.msra.mxu1 %v4989_v34  ;;  %1188 = vmatpush.msra.mxu3 %v4975_v29 }
  0x97   : > { %1131 = vmatpush.msra.mxu0 %v5011_v41  ;;  %1169 = vmatpush.msra.mxu2 %v5009_v40 }
  0x98   : > { %1150 = vmatpush.msra.mxu1 %v5001_v38  ;;  %1189 = vmatpush.msra.mxu3 %v4987_v33 }
  0x99   : > { %1132 = vmatpush.msra.mxu0 %v5023_v45  ;;  %1170 = vmatpush.msra.mxu2 %v5021_v44 }
  0x9a   : > { %1151 = vmatpush.msra.mxu1 %v5013_v42  ;;  %1190 = vmatpush.msra.mxu3 %v4999_v37 }
  0x9b   : > { %1133 = vmatpush.msra.mxu0 %v5036_v49  ;;  %1171 = vmatpush.msra.mxu2 %v5033_v48 }
  0x9c   : > { %1152 = vmatpush.msra.mxu1 %v5025_v46  ;;  %1191 = vmatpush.msra.mxu3 %v5011_v41 }
  0x9d   : > { %1134 = vmatpush.msra.mxu0 %v5048_v53  ;;  %1172 = vmatpush.msra.mxu2 %v5046_v52 }
  0x9e   : > { %1153 = vmatpush.msra.mxu1 %v5038_v50  ;;  %1192 = vmatpush.msra.mxu3 %v5023_v45 }
  0x9f   : > { %1135 = vmatpush.msra.mxu0 %v5063_v57  ;;  %1173 = vmatpush.msra.mxu2 %v5061_v56 }
  0xa0   : > { %1154 = vmatpush.msra.mxu1 %v5050_v54  ;;  %1193 = vmatpush.msra.mxu3 %v5036_v49 }
  0xa1   : > { %1136 = vmatpush.msra.mxu0 %v5075_v62  ;;  %1174 = vmatpush.msra.mxu2 %v5073_v60 }
  0xa2   : > { %1155 = vmatpush.msra.mxu1 %v5065_v58  ;;  %1194 = vmatpush.msra.mxu3 %v5048_v53 }
  0xa3   : > { %1137 = vmatpush.msra.mxu0 %v5082_v0  ;;  %1175 = vmatpush.msra.mxu2 %v5085_v1 }
  0xa4   : > { %1156 = vmatpush.msra.mxu1 %v5080_v63  ;;  %1195 = vmatpush.msra.mxu3 %v5063_v57 }
  0xa5   : > { %1202 = vmatpush.msrb.mxu0 %v4912_v7  ;;  %1176 = vmatpush.msra.mxu2 %v994_v3 }
  0xa6   : > { %1157 = vmatpush.msra.mxu1 %v5090_v2  ;;  %1196 = vmatpush.msra.mxu3 %v5075_v62 }
  0xa7   : > { %1203 = vmatpush.msrb.mxu0 %v4919_v10  ;;  %1177 = vmatpush.msra.mxu2 %v991_v4  ;;  %v4131_v10 = vld [vmem:[%s7375_s6] ss:$0 sm:$0xff] }
  0xa8   : > { %1197 = vmatpush.msra.mxu3 %v5082_v0 }
  0xa9   : > { %1204 = vmatpush.msrb.mxu0 %v4928_v13 }
  0xab   : > { %1205 = vmatpush.msrb.mxu0 %v4939_v17 }
  0xad   : > { %1206 = vmatpush.msrb.mxu0 %v4953_v22 }
  0xaf   : > { %1207 = vmatpush.msrb.mxu0 %v4968_v27 }
  0xb1   : > { %1208 = vmatpush.msrb.mxu0 %v4977_v30 }
  0xb3   : > { %1209 = vmatpush.msrb.mxu0 %v4989_v34 }
  0xb5   : > { %1210 = vmatpush.msrb.mxu0 %v5001_v38 }
  0xb7   : > { %1211 = vmatpush.msrb.mxu0 %v5013_v42 }
  0xb9   : > { %1212 = vmatpush.msrb.mxu0 %v5025_v46 }
  0xbb   : > { %1213 = vmatpush.msrb.mxu0 %v5038_v50 }
  0xbd   : > { %1214 = vmatpush.msrb.mxu0 %v5050_v54 }
  0xbf   : > { %1215 = vmatpush.msrb.mxu0 %v5065_v58 }
  0xc1   : > { %1216 = vmatpush.msrb.mxu0 %v5080_v63 }
  0xc3   : > { %1217 = vmatpush.msrb.mxu0 %v5090_v2 }
  0xe1   : > { %v847_v6 = vpop.f32.mrf.mxu0 }
  0xe2   : > { %v848_v7 = vadd.f32 %v4130_v5, %v847_v6 }
  0xe3   : > { %v867_v8 = vpop.f32.mrf.mxu1 }
  0xe4   : > { %v5175_v9 = vadd.f32 %v867_v8, %v848_v7 }
  0xe6   : > { %1078 = vmatmul.f32.vlgmr.msrb.gmra.mxu1 %v5175_v9  ;;  %1098 = vmatmul.f32.vlgmr.msrb.gmra.mxu2 %v5175_v9 }
  0xe7   : > { %1118 = vmatmul.f32.vlgmr.msrb.gmra.mxu3 %v5175_v9  ;;  %v925_v11 = vpop.f32.mrf.mxu2  ;;  %1222 = vmatpush.msrb.mxu1 %v4935_v15  ;;  %v4132_v15 = vld [vmem:[%s7377_s8] ss:$0 sm:$0xff] }
  0xe8   : > { %v926_v12 = vadd.f32 %v4131_v10, %v925_v11 }
  0xe9   : > { %1223 = vmatpush.msrb.mxu1 %v4942_v18  ;;  %v5213_v18 = vld [vmem:[%s7379_s10] sm:$0x7] }
  0xea   : > { %v945_v13 = vpop.f32.mrf.mxu3  ;;  %v1056_v19 = vperm.slane %v5213_v18, 0  ;;  %v1057_v22 = vperm.slane %v5213_v18, 1 }
  0xeb   : > { %v5185_v14 = vadd.f32 %v945_v13, %v926_v12  ;;  %1224 = vmatpush.msrb.mxu1 %v4949_v20 }
  0xed   : > { %7516 = vst [vmem:[#allocation27_spill] sm:$0xff] %v5185_v14  ;;  %1138 = vmatmul.f32.vlgmr.msra.gmra.mxu0 %v5185_v14  ;;  %1225 = vmatpush.msrb.mxu1 %v4961_v24 }
  0xee   : > { %1158 = vmatmul.f32.vlgmr.msra.gmra.mxu1 %v5185_v14  ;;  %1178 = vmatmul.f32.vlgmr.msra.gmra.mxu2 %v5185_v14  ;;  %v5557_v14 = vld [vmem:[#allocation10 + $0x38] sm:$0xff] }
  0xef   : > { %1226 = vmatpush.msrb.mxu1 %v4973_v28  ;;  %7546 = vst [vmem:[#allocation57_spill] sm:$0xff] %v5557_v14 }
  0xf1   : > { %1227 = vmatpush.msrb.mxu1 %v4985_v32 }
  0xf3   : > { %1228 = vmatpush.msrb.mxu1 %v4997_v36 }
  0xf5   : > { %1229 = vmatpush.msrb.mxu1 %v5009_v40 }
  0xf7   : > { %1230 = vmatpush.msrb.mxu1 %v5021_v44 }
  0xf9   : > { %1231 = vmatpush.msrb.mxu1 %v5033_v48 }
  0xfb   : > { %1232 = vmatpush.msrb.mxu1 %v5046_v52 }
  0xfd   : > { %1233 = vmatpush.msrb.mxu1 %v5061_v56 }
  0xff   : > { %1234 = vmatpush.msrb.mxu1 %v5073_v60 }
 0x101   : > { %v986_v16 = vpop.f32.mrf.mxu0  ;;  %1235 = vmatpush.msrb.mxu1 %v5085_v1 }
 0x102   : > { %v5205_v17 = vadd.f32 %v4132_v15, %v986_v16  ;;  %v1058_v16 = vperm.slane %v5213_v18, 2 }
 0x103   : > { %1236 = vmatpush.msrb.mxu1 %v994_v3 }
 0x104   : > { %7517 = vst [vmem:[#allocation28_spill] sm:$0xff] %v5205_v17  ;;  %1198 = vmatmul.f32.vlgmr.msra.gmra.mxu3 %v5205_v17  ;;  %1218 = vmatmul.f32.vlgmr.msrb.gmra.mxu0 %v5205_v17 }
 0x105   : > { %1237 = vmatpush.msrb.mxu1 %v991_v4 }
 0x106   : > { %1238 = vmatmul.f32.vlgmr.msrb.gmra.mxu1 %v5205_v17 }
 0x163   : > { %v1079_v20 = vpop.f32.mrf.mxu1 }
 0x164   : > { %v1080_v21 = vadd.f32 %v1079_v20, %v1056_v19 }
 0x166   : > { %v1242_v24 = vmul.f32 0.17677669, %v1080_v21 }
 0x169   : > { %v1099_v23 = vpop.f32.mrf.mxu2 }
 0x16a   : > { %v1100_v25 = vadd.f32 %v1099_v23, %v1057_v22  ;;  %v1139_v26 = vpop.f32.mrf.mxu0  ;;  %v5226_v35 = vpop.f32.mrf.mxu3 }
 0x16b   : > { %v1140_v27 = vadd.f32 %v1139_v26, %v1056_v19  ;;  %v1159_v28 = vpop.f32.mrf.mxu1  ;;  %v5262_v20 = vadd.f32 %v5226_v35, %v1058_v16 }
 0x16c   : > { %v1245_v29 = vmul.f32 %v1242_v24, %v1100_v25  ;;  %v1160_v31 = vadd.f32 %v1159_v28, %v1057_v22 }
 0x16d   : > { %v1243_v30 = vmul.f32 0.17677669, %v1140_v27 }
 0x16e   : > { %1696 = vrot.lane.b32.xlu2 %v1245_v29, %s4656_s24  ;;  %1543 = vrot.lane.b32.xlu1 %v1245_v29, %s4657_s9  ;;  %v1250_v34 = vmul.f32 %v1242_v24, %v1160_v31  ;;  %v1247_v47 = vsel %vm1246_vm0, %v1245_v29, 0.0 }
 0x16f   : > { %v5219_v32 = vmul.f32 %v1243_v30, %v1100_v25  ;;  %v5221_v33 = vmul.f32 %v1243_v30, %v1160_v31  ;;  %1382 = vrot.lane.b32.xlu0 %v1245_v29, %s4658_s0 }
 0x170   : > { %v1251_v46 = vsel %vm1246_vm0, %v1250_v34, 0.0 }
 0x176   : > { %1549 = vrot.lane.b32.xlu1 %v1250_v34, %s4657_s9 }
 0x177   : > { %1389 = vrot.lane.b32.xlu0 %v1250_v34, %s4658_s0 }
 0x17f   : > { %1702 = vrot.lane.b32.xlu0 %v1250_v34, %s4656_s24 }
 0x181   : > { %v1219_v36 = vpop.f32.mrf.mxu0 }
 0x182   : > { %v1220_v37 = vadd.f32 %v1219_v36, %v1057_v22 }
 0x183   : > { %v1239_v21 = vpop.f32.mrf.mxu1 }
 0x184   : > { %v1254_v38 = vmul.f32 %v1242_v24, %v1220_v37  ;;  %v5229_v39 = vmul.f32 %v1243_v30, %v1220_v37  ;;  %v5267_v27 = vadd.f32 %v1239_v21, %v1058_v16 }
 0x186   : > { %1396 = vrot.lane.b32.xlu2 %v1254_v38, %s4658_s0  ;;  %v1255_v48 = vsel %vm1246_vm0, %v1254_v38, 0.0 }
 0x187   : > { %v1199_v40 = vpop.f32.mrf.mxu3 }
 0x188   : > { %v1200_v41 = vadd.f32 %v1199_v40, %v1056_v19  ;;  %v1179_v19 = vpop.f32.mrf.mxu2 }
 0x189   : > { %v5264_v23 = vadd.f32 %v1179_v19, %v1058_v16 }
 0x18a   : > { %v1244_v42 = vmul.f32 0.17677669, %v1200_v41 }
 0x18b   : > { %7521 = vst [vmem:[#allocation32_spill] sm:$0xff] %v5264_v23 }
 0x18c   : > { %v5232_v43 = vmul.f32 %v1244_v42, %v1100_v25  ;;  %v5234_v44 = vmul.f32 %v1244_v42, %v1160_v31  ;;  %v5236_v45 = vmul.f32 %v1244_v42, %v1220_v37  ;;  %v1296_v37 = vsel %vm1246_vm0, %v5221_v33, 0.0 }
 0x18e   : > { %7518 = vst [vmem:[#allocation29_spill] sm:$0xff] %v5232_v43  ;;  %1708 = vrot.lane.b32.xlu2 %v1254_v38, %s4656_s24 }
 0x18f   : > { %7519 = vst [vmem:[#allocation30_spill] sm:$0xff] %v5234_v44 }
 0x190   : > { %7520 = vst [vmem:[#allocation31_spill] sm:$0xff] %v5236_v45 }
 0x1a0   : > { %1252 = vadd.xlane.f32.xlu1 %v1251_v46 }
 0x1a9   : > { %1248 = vadd.xlane.f32.xlu0 %v1247_v47 }
 0x1b7   : > { %1256 = vadd.xlane.f32.xlu2 %v1255_v48 }
 0x1b9   : > { %1555 = vrot.lane.b32.xlu1 %v1254_v38, %s4657_s9 }
 0x1c8   : > { %v1697_v49 = vpop.permute.xlu2 %1696 }
 0x1c9   : > { %v1699_v54 = vsel %vm1246_vm0, %v1697_v49, 0.0 }
 0x1e0   : > { %v1544_v50 = vpop.permute.xlu1 %1543  ;;  %v1397_v55 = vpop.permute.xlu2 %1396 }
 0x1e1   : > { %v1383_v51 = vpop.permute.xlu0 %1382  ;;  %v1546_v52 = vsel %vm1246_vm0, %v1544_v50, 0.0  ;;  %v1399_v58 = vsel %vm1246_vm0, %v1397_v55, 0.0 }
 0x1e2   : > { %v1385_v53 = vsel %vm1246_vm0, %v1383_v51, 0.0  ;;  %1547 = vadd.xlane.f32.xlu0 %v1546_v52 }
 0x1e3   : > { %1386 = vadd.xlane.f32.xlu2 %v1385_v53  ;;  %1700 = vadd.xlane.f32.xlu1 %v1699_v54 }
 0x1e8   : > { %v1550_v56 = vpop.permute.xlu1 %1549  ;;  %v1709_v61 = vpop.permute.xlu2 %1708 }
 0x1e9   : > { %v1390_v57 = vpop.permute.xlu0 %1389  ;;  %v1552_v59 = vsel %vm1246_vm0, %v1550_v56, 0.0  ;;  %v1711_v0 = vsel %vm1246_vm0, %v1709_v61, 0.0 }
 0x1ea   : > { %v1392_v60 = vsel %vm1246_vm0, %v1390_v57, 0.0  ;;  %1400 = vadd.xlane.f32.xlu0 %v1399_v58 }
 0x1eb   : > { %1393 = vadd.xlane.f32.xlu2 %v1392_v60  ;;  %1553 = vadd.xlane.f32.xlu1 %v1552_v59 }
 0x1f1   : > { %v1703_v62 = vpop.permute.xlu0 %1702 }
 0x1f2   : > { %v1705_v63 = vsel %vm1246_vm0, %v1703_v62, 0.0 }
 0x1f3   : > { %1706 = vadd.xlane.f32.xlu2 %v1705_v63  ;;  %1712 = vadd.xlane.f32.xlu1 %v1711_v0 }
 0x20b   : > { %1594 = vrot.lane.b32.xlu2 %v5219_v32, %s4657_s9 }
 0x20c   : > { %1443 = vrot.lane.b32.xlu1 %v5221_v33, %s4658_s0 }
 0x213   : > { %v1253_v1 = vpop.xlane.xlu1 %1252 }
 0x214   : > { %1450 = vrot.lane.b32.xlu1 %v5229_v39, %s4658_s0 }
 0x21c   : > { %1606 = vrot.lane.b32.xlu1 %v5229_v39, %s4657_s9  ;;  %v1249_v2 = vpop.xlane.xlu0 %1248 }
 0x21d   : > { %v1258_v3 = vmax.f32 %v1249_v2, %v1253_v1 }
 0x22a   : > { %v1257_v4 = vpop.xlane.xlu2 %1256 }
 0x22b   : > { %v1259_v5 = vmax.f32 %v1258_v3, %v1257_v4  ;;  %v1556_v6 = vpop.permute.xlu1 %1555 }
 0x22c   : > { %v1558_v7 = vsel %vm1246_vm0, %v1556_v6, 0.0 }
 0x22d   : > { %v1260_v8 = vsub.f32 %v1249_v2, %v1259_v5  ;;  %v1263_v10 = vsub.f32 %v1253_v1, %v1259_v5  ;;  %v1266_v11 = vsub.f32 %v1257_v4, %v1259_v5  ;;  %1559 = vadd.xlane.f32.xlu0 %v1558_v7 }
 0x22f   : > { %v1261_v12 = vmul.f32 1.442695, %v1260_v8  ;;  %v1264_v13 = vmul.f32 1.442695, %v1263_v10  ;;  %v1267_v15 = vmul.f32 1.442695, %v1266_v11 }
 0x231   : > { %4145 = vpow2.f32 %v1261_v12 }
 0x232   : > { %4147 = vpow2.f32 %v1264_v13 }
 0x233   : > { %4149 = vpow2.f32 %v1267_v15 }
 0x237   : > { %v4146_v22 = vpop.eup %4145 }
 0x238   : > { %v4148_v24 = vpop.eup %4147  ;;  %v1271_v25 = vmul.f32 %v4146_v22, %v5262_v20 }
 0x239   : > { %v4150_v26 = vpop.eup %4149  ;;  %v1269_v28 = vadd.f32 %v4148_v24, %v4146_v22  ;;  %v1272_v29 = vmul.f32 %v4148_v24, %v5264_v23 }
 0x23a   : > { %v1274_v31 = vmul.f32 %v4150_v26, %v5267_v27 }
 0x23b   : > { %v1270_v18 = vadd.f32 %v4150_v26, %v1269_v28  ;;  %v1273_v30 = vadd.f32 %v1272_v29, %v1271_v25 }
 0x23d   : > { %v1275_v34 = vadd.f32 %v1274_v31, %v1273_v30  ;;  %4151 = vrcp.f32 %v1270_v18  ;;  %v1287_v40 = vand.u32 2147483648, %v1270_v18  ;;  %v1285_v42 = vand.u32 2147483647, %v1270_v18 }
 0x23e   : > { %vm1281_vm2 = vweird.f32 %v1270_v18 }
 0x23f   : > { %v1288_v47 = vor.u32 1.1754944e-38, %v1287_v40  ;;  %vm1286_vm4 = vcmp.eq.f32.partialorder %v1285_v42, 8.507059e+37 }
 0x241   : > { %1436 = vrot.lane.b32.xlu0 %v5219_v32, %s4658_s0 }
 0x243   : > { %v4152_v35 = vpop.eup %4151 }
 0x244   : > { %v1277_v36 = vmul.f32 %v4152_v35, %v1270_v18  ;;  %vm1282_vm1 = vweird.f32 %v4152_v35 }
 0x245   : > { %vm1283_vm3 = vmor %vm1281_vm2, %vm1282_vm1  ;;  %vm1850_vm2 = vcmask 523264  }
 0x246   : > { %v1278_v38 = vsub.f32 1.0, %v1277_v36  ;;  %1297 = vadd.xlane.f32.xlu1 %v1296_v37 }
 0x248   : > { %v1279_v41 = vmul.f32 %v4152_v35, %v1278_v38 }
 0x249   : > { %1600 = vrot.lane.b32.xlu0 %v5221_v33, %s4657_s9 }
 0x24a   : > { %v1280_v46 = vadd.f32 %v4152_v35, %v1279_v41  ;;  %v5295_v41 = vld [vmem:[#allocation8 + $0x78] sm:$0xff] }
 0x24b   : > { %1857 = vmatpush.msrb.mxu2 %v5295_v41 }
 0x24c   : > { %v1284_v48 = vsel %vm1283_vm3, %v4152_v35, %v1280_v46  ;;  %v5298_v46 = vld [vmem:[#allocation8 + $0x70] sm:$0xff]  ;;  %vm1852_vm3 = vcmask 785408  }
 0x24d   : > { %v1289_v49 = vsel %vm1286_vm4, %v1288_v47, %v1284_v48  ;;  %1858 = vmatpush.msrb.mxu2 %v5298_v46 }
 0x24e   : > { %v1290_v50 = vmul.f32 %v1289_v49, %v1275_v34  ;;  %v5301_v49 = vld [vmem:[#allocation8 + $0x68] sm:$0xff] }
 0x24f   : > { %1859 = vmatpush.msrb.mxu2 %v5301_v49 }
 0x251   : > { %1747 = vrot.lane.b32.xlu0 %v5219_v32, %s4656_s24 }
 0x255   : > { %v5279_v52 = vpop.xlane.xlu0 %1547 }
 0x256   : > { %v1387_v51 = vpop.xlane.xlu2 %1386  ;;  %v1701_v57 = vpop.xlane.xlu1 %1700 }
 0x259   : > { %1759 = vrot.lane.b32.xlu0 %v5229_v39, %s4656_s24 }
 0x25d   : > { %v1401_v55 = vpop.xlane.xlu0 %1400 }
 0x25e   : > { %v1394_v53 = vpop.xlane.xlu2 %1393  ;;  %v5283_v1 = vpop.xlane.xlu1 %1553 }
 0x25f   : > { %v1402_v54 = vmax.f32 %v1387_v51, %v1394_v53 }
 0x261   : > { %v1403_v56 = vmax.f32 %v1402_v54, %v1401_v55 }
 0x263   : > { %v1404_v58 = vsub.f32 %v1387_v51, %v1403_v56  ;;  %v1407_v59 = vsub.f32 %v1394_v53, %v1403_v56  ;;  %v1410_v60 = vsub.f32 %v1401_v55, %v1403_v56  ;;  %v5305_v53 = vld [vmem:[#allocation8 + $0x60] sm:$0xff]  ;;  %v5308_v55 = vld [vmem:[#allocation8 + $0x58] sm:$0xff] }
 0x264   : > { %1860 = vmatpush.msrb.mxu2 %v5305_v53 }
 0x265   : > { %v1405_v61 = vmul.f32 1.442695, %v1404_v58  ;;  %v1408_v62 = vmul.f32 1.442695, %v1407_v59  ;;  %v1411_v63 = vmul.f32 1.442695, %v1410_v60 }
 0x266   : > { %v1707_v0 = vpop.xlane.xlu2 %1706  ;;  %v1713_v16 = vpop.xlane.xlu1 %1712  ;;  %1861 = vmatpush.msrb.mxu2 %v5308_v55  ;;  %v5314_v58 = vld [vmem:[#allocation8 + $0x48] sm:$0xff]  ;;  %v5317_v60 = vld [vmem:[#allocation8 + $0x40] sm:$0xff] }
 0x267   : > { %4153 = vpow2.f32 %v1405_v61  ;;  %v1714_v34 = vmax.f32 %v1701_v57, %v1707_v0 }
 0x268   : > { %4155 = vpow2.f32 %v1408_v62  ;;  %v5320_v62 = vld [vmem:[#allocation8 + $0x38] sm:$0xff] }
 0x269   : > { %4157 = vpow2.f32 %v1411_v63  ;;  %v1715_v40 = vmax.f32 %v1714_v34, %v1713_v16  ;;  %v5322_v63 = vld [vmem:[#allocation8 + $0x30] sm:$0xff] }
 0x26b   : > { %v1716_v42 = vsub.f32 %v1701_v57, %v1715_v40  ;;  %v1719_v47 = vsub.f32 %v1707_v0, %v1715_v40  ;;  %v1722_v56 = vsub.f32 %v1713_v16, %v1715_v40  ;;  %v5311_v57 = vld [vmem:[#allocation8 + $0x50] sm:$0xff] }
 0x26c   : > { %1862 = vmatpush.msrb.mxu2 %v5311_v57 }
 0x26d   : > { %v4154_v2 = vpop.eup %4153  ;;  %v1717_v51 = vmul.f32 1.442695, %v1716_v42  ;;  %v1720_v54 = vmul.f32 1.442695, %v1719_v47  ;;  %v1723_v59 = vmul.f32 1.442695, %v1722_v56 }
 0x26e   : > { %v4156_v3 = vpop.eup %4155  ;;  %v1415_v4 = vmul.f32 %v4154_v2, %v5262_v20  ;;  %v1595_v5 = vpop.permute.xlu2 %1594  ;;  %1863 = vmatpush.msrb.mxu2 %v5314_v58 }
 0x26f   : > { %v4158_v6 = vpop.eup %4157  ;;  %v1413_v7 = vadd.f32 %v4156_v3, %v4154_v2  ;;  %v1416_v8 = vmul.f32 %v4156_v3, %v5264_v23  ;;  %v1597_v10 = vsel %vm1246_vm0, %v1595_v5, 0.0  ;;  %v5325_v2 = vld [vmem:[#allocation8 + $0x28] sm:$0xff]  ;;  %v1561_v5 = vmax.f32 %v5279_v52, %v5283_v1 }
 0x270   : > { %1598 = vadd.xlane.f32.xlu1 %v1597_v10  ;;  %v1418_v13 = vmul.f32 %v4158_v6, %v5267_v27  ;;  %1864 = vmatpush.msrb.mxu2 %v5317_v60 }
 0x271   : > { %v1414_v11 = vadd.f32 %v4158_v6, %v1413_v7  ;;  %v1417_v12 = vadd.f32 %v1416_v8, %v1415_v4  ;;  %v5328_v4 = vld [vmem:[#allocation8 + $0x20] sm:$0xff]  ;;  %v5333_v7 = vld [vmem:[#allocation8 + $0x18] sm:$0xff] }
 0x272   : > { %1865 = vmatpush.msrb.mxu2 %v5320_v62 }
 0x273   : > { %v1419_v15 = vadd.f32 %v1418_v13, %v1417_v12  ;;  %4159 = vrcp.f32 %v1414_v11  ;;  %v1431_v24 = vand.u32 2147483648, %v1414_v11  ;;  %v1429_v28 = vand.u32 2147483647, %v1414_v11  ;;  %v5336_v12 = vld [vmem:[#allocation8 + $0x10] sm:$0xff] }
 0x274   : > { %vm1425_vm6 = vweird.f32 %v1414_v11  ;;  %4161 = vpow2.f32 %v1717_v51  ;;  %1866 = vmatpush.msrb.mxu2 %v5322_v63 }
 0x275   : > { %v1432_v18 = vor.u32 1.1754944e-38, %v1431_v24  ;;  %vm1430_vm8 = vcmp.eq.f32.partialorder %v1429_v28, 8.507059e+37  ;;  %4163 = vpow2.f32 %v1720_v54 }
 0x276   : > { %4165 = vpow2.f32 %v1723_v59  ;;  %1867 = vmatpush.msrb.mxu2 %v5325_v2 }
 0x278   : > { %1868 = vmatpush.msrb.mxu2 %v5328_v4 }
 0x279   : > { %v4160_v19 = vpop.eup %4159 }
 0x27a   : > { %v1421_v21 = vmul.f32 %v4160_v19, %v1414_v11  ;;  %vm1426_vm5 = vweird.f32 %v4160_v19  ;;  %v4162_v61 = vpop.eup %4161  ;;  %1869 = vmatpush.msrb.mxu2 %v5333_v7 }
 0x27b   : > { %vm1427_vm7 = vmor %vm1425_vm6, %vm1426_vm5  ;;  %v4164_v0 = vpop.eup %4163  ;;  %v1727_v51 = vmul.f32 %v4162_v61, %v5262_v20 }
 0x27c   : > { %v1422_v22 = vsub.f32 1.0, %v1421_v21  ;;  %v1725_v3 = vadd.f32 %v4164_v0, %v4162_v61  ;;  %v4166_v8 = vpop.eup %4165  ;;  %1870 = vmatpush.msrb.mxu2 %v5336_v12  ;;  %v1728_v54 = vmul.f32 %v4164_v0, %v5264_v23 }
 0x27e   : > { %v5289_v25 = vpop.permute.xlu1 %1443  ;;  %v1423_v26 = vmul.f32 %v4160_v19, %v1422_v22  ;;  %v1726_v11 = vadd.f32 %v4166_v8, %v1725_v3 }
 0x280   : > { %v1424_v29 = vadd.f32 %v4160_v19, %v1423_v26  ;;  %4167 = vrcp.f32 %v1726_v11  ;;  %v5344_v26 = vld [vmem:[#allocation8] sm:$0xff]  ;;  %vm1737_vm10 = vweird.f32 %v1726_v11 }
 0x282   : > { %v1428_v30 = vsel %vm1427_vm7, %v4160_v19, %v1424_v29  ;;  %v5341_v19 = vld [vmem:[#allocation8 + $0x8] sm:$0xff] }
 0x283   : > { %v1433_v31 = vsel %vm1430_vm8, %v1432_v18, %v1428_v30  ;;  %1871 = vmatpush.msrb.mxu2 %v5341_v19 }
 0x284   : > { %v1434_v35 = vmul.f32 %v1433_v31, %v1419_v15 }
 0x285   : > { %1872 = vmatpush.msrb.mxu2 %v5344_v26 }
 0x286   : > { %v1451_v36 = vpop.permute.xlu1 %1450  ;;  %v5292_v37 = vsel %vm1246_vm0, %v1290_v50, %v1434_v35 }
 0x287   : > { %v1453_v38 = vsel %vm1246_vm0, %v1451_v36, 0.0 }
 0x288   : > { %1454 = vadd.xlane.f32.xlu1 %v1453_v38 }
 0x28e   : > { %v1607_v48 = vpop.permute.xlu1 %1606 }
 0x28f   : > { %v1609_v50 = vsel %vm1246_vm0, %v1607_v48, 0.0 }
 0x290   : > { %1610 = vadd.xlane.f32.xlu1 %v1609_v50 }
 0x2a0   : > { %v1560_v6 = vpop.xlane.xlu0 %1559 }
 0x2a1   : > { %v1562_v10 = vmax.f32 %v1561_v5, %v1560_v6  ;;  %v1743_v5 = vand.u32 2147483648, %v1726_v11 }
 0x2a3   : > { %v1563_v13 = vsub.f32 %v5279_v52, %v1562_v10  ;;  %v1566_v15 = vsub.f32 %v5283_v1, %v1562_v10  ;;  %v1569_v16 = vsub.f32 %v1560_v6, %v1562_v10  ;;  %v4168_v52 = vpop.eup %4167  ;;  %v1741_v10 = vand.u32 2147483647, %v1726_v11 }
 0x2a4   : > { %v1733_v18 = vmul.f32 %v4168_v52, %v1726_v11  ;;  %vm1738_vm9 = vweird.f32 %v4168_v52 }
 0x2a5   : > { %v1564_v21 = vmul.f32 1.442695, %v1563_v13  ;;  %v1567_v22 = vmul.f32 1.442695, %v1566_v15  ;;  %v1570_v24 = vmul.f32 1.442695, %v1569_v16  ;;  %vm1739_vm12 = vmor %vm1737_vm10, %vm1738_vm9 }
 0x2a6   : > { %v1734_v35 = vsub.f32 1.0, %v1733_v18  ;;  %vm1742_vm15 = vcmp.eq.f32.partialorder %v1741_v10, 8.507059e+37 }
 0x2a7   : > { %4169 = vpow2.f32 %v1564_v21  ;;  %v1729_v21 = vadd.f32 %v1728_v54, %v1727_v51 }
 0x2a8   : > { %4171 = vpow2.f32 %v1567_v22  ;;  %v1735_v38 = vmul.f32 %v4168_v52, %v1734_v35 }
 0x2a9   : > { %1645 = vrot.lane.b32.xlu1 %v5232_v43, %s4657_s9  ;;  %4173 = vpow2.f32 %v1570_v24  ;;  %v1744_v24 = vor.u32 1.1754944e-38, %v1743_v5 }
 0x2aa   : > { %v1736_v56 = vadd.f32 %v4168_v52, %v1735_v38 }
 0x2ac   : > { %v1740_v22 = vsel %vm1739_vm12, %v4168_v52, %v1736_v56 }
 0x2ad   : > { %v4170_v1 = vpop.eup %4169  ;;  %v1745_v11 = vsel %vm1742_vm15, %v1744_v24, %v1740_v22  ;;  %v1446_v22 = vsel %vm1246_vm0, %v5289_v25, 0.0 }
 0x2ae   : > { %v4172_v28 = vpop.eup %4171  ;;  %v1574_v42 = vmul.f32 %v4170_v1, %v5262_v20 }
 0x2af   : > { %v1572_v29 = vadd.f32 %v4172_v28, %v4170_v1  ;;  %v4174_v30 = vpop.eup %4173  ;;  %v1575_v47 = vmul.f32 %v4172_v28, %v5264_v23  ;;  %v1730_v1 = vmul.f32 %v4166_v8, %v5267_v27 }
 0x2b0   : > { %v1577_v61 = vmul.f32 %v4174_v30, %v5267_v27 }
 0x2b1   : > { %v1573_v31 = vadd.f32 %v4174_v30, %v1572_v29  ;;  %v1576_v13 = vadd.f32 %v1575_v47, %v1574_v42 }
 0x2b3   : > { %4175 = vrcp.f32 %v1573_v31  ;;  %v1437_v34 = vpop.permute.xlu0 %1436  ;;  %v1590_v6 = vand.u32 2147483648, %v1573_v31  ;;  %v1588_v16 = vand.u32 2147483647, %v1573_v31  ;;  %vm1584_vm13 = vweird.f32 %v1573_v31 }
 0x2b4   : > { %v1439_v36 = vsel %vm1246_vm0, %v1437_v34, 0.0  ;;  %v1578_v29 = vadd.f32 %v1577_v61, %v1576_v13  ;;  %v1300_v61 = vsel %vm1246_vm0, %v5229_v39, 0.0 }
 0x2b5   : > { %1440 = vadd.xlane.f32.xlu0 %v1439_v36  ;;  %v1591_v28 = vor.u32 1.1754944e-38, %v1590_v6  ;;  %vm1589_vm1 = vcmp.eq.f32.partialorder %v1588_v16, 8.507059e+37  ;;  %v1731_v36 = vadd.f32 %v1730_v1, %v1729_v21 }
 0x2b7   : > { %v1746_v30 = vmul.f32 %v1745_v11, %v1731_v36 }
 0x2b9   : > { %v4176_v40 = vpop.eup %4175  ;;  %v5412_v36 = vpop.xlane.xlu1 %1297 }
 0x2ba   : > { %v1580_v48 = vmul.f32 %v4176_v40, %v1573_v31  ;;  %vm1585_vm11 = vweird.f32 %v4176_v40 }
 0x2bb   : > { %v1601_v50 = vpop.permute.xlu0 %1600  ;;  %vm1586_vm14 = vmor %vm1584_vm13, %vm1585_vm11 }
 0x2bc   : > { %v1603_v59 = vsel %vm1246_vm0, %v1601_v50, 0.0  ;;  %v1581_v3 = vsub.f32 1.0, %v1580_v48  ;;  %v5380_v50 = vld [vmem:[%s7381_s12] ss:$0 sm:$0xff] }
 0x2bd   : > { %1604 = vadd.xlane.f32.xlu0 %v1603_v59  ;;  %7522 = vst [vmem:[#allocation33_spill] sm:$0xff] %v5380_v50 }
 0x2be   : > { %v1582_v15 = vmul.f32 %v4176_v40, %v1581_v3 }
 0x2c0   : > { %v1583_v0 = vadd.f32 %v4176_v40, %v1582_v15 }
 0x2c2   : > { %v1587_v18 = vsel %vm1586_vm14, %v4176_v40, %v1583_v0  ;;  %v4659_v0 = vmov 128.0  }
 0x2c3   : > { %v1748_v34 = vpop.permute.xlu0 %1747  ;;  %v1592_v35 = vsel %vm1589_vm1, %v1591_v28, %v1587_v18  ;;  %4177 = vrcp.f32 %v4659_v0 }
 0x2c4   : > { %v1750_v52 = vsel %vm1246_vm0, %v1748_v34, 0.0  ;;  %v1593_v38 = vmul.f32 %v1592_v35, %v1578_v29 }
 0x2c5   : > { %1751 = vadd.xlane.f32.xlu0 %v1750_v52 }
 0x2c6   : > { %v1851_v8 = vsel %vm1850_vm2, %v5292_v37, %v1593_v38 }
 0x2c7   : > { %v1853_v31 = vsel %vm1852_vm3, %v1851_v8, %v1746_v30  ;;  %v5416_v30 = vld [vmem:[#allocation10 + $0xf0] sm:$0xff]  ;;  %v5418_v8 = vld [vmem:[#allocation10 + $0xe0] sm:$0xff] }
 0x2c8   : > { %1873 = vmatmul.f32.vlgmr.msrb.gmra.mxu2 %v1853_v31  ;;  %7524 = vst [vmem:[#allocation35_spill] sm:$0xff] %v5416_v30  ;;  %1953 = vmatpush.msrb.mxu3 %v5416_v30  ;;  %v5421_v31 = vld [vmem:[#allocation10 + $0xd0] sm:$0xff] }
 0x2c9   : > { %v4178_v24 = vpop.eup %4177  ;;  %7525 = vst [vmem:[#allocation36_spill] sm:$0xff] %v5418_v8 }
 0x2ca   : > { %vm1887_vm4 = vweird.f32 %v4178_v24  ;;  %7526 = vst [vmem:[#allocation37_spill] sm:$0xff] %v5421_v31  ;;  %1954 = vmatpush.msrb.mxu3 %v5418_v8 }
 0x2cb   : > { %v1760_v42 = vpop.permute.xlu0 %1759 }
 0x2cc   : > { %v1762_v40 = vsel %vm1246_vm0, %v1760_v42, 0.0  ;;  %v5424_v42 = vld [vmem:[#allocation10 + $0xc0] sm:$0xff]  ;;  %1955 = vmatpush.msrb.mxu3 %v5421_v31 }
 0x2cd   : > { %1763 = vadd.xlane.f32.xlu0 %v1762_v40  ;;  %7527 = vst [vmem:[#allocation38_spill] sm:$0xff] %v5424_v42 }
 0x2ce   : > { %1956 = vmatpush.msrb.mxu3 %v5424_v42 }
 0x2e1   : > { %1490 = vrot.lane.b32.xlu0 %v5232_v43, %s4658_s0 }
 0x2e3   : > { %v1599_v52 = vpop.xlane.xlu1 %1598 }
 0x2e9   : > { %1651 = vrot.lane.b32.xlu0 %v5234_v44, %s4657_s9 }
 0x2f1   : > { %1798 = vrot.lane.b32.xlu0 %v5232_v43, %s4656_s24  ;;  %v5540_v43 = vld [vmem:[#allocation10 + $0x58] sm:$0xff] }
 0x2f2   : > { %7544 = vst [vmem:[#allocation55_spill] sm:$0xff] %v5540_v43 }
 0x2f9   : > { %1810 = vrot.lane.b32.xlu0 %v5236_v45, %s4656_s24 }
 0x2fb   : > { %v5426_v40 = vpop.xlane.xlu1 %1454 }
 0x328   : > { %v5371_v37 = vpop.xlane.xlu0 %1440 }
 0x330   : > { %v5373_v47 = vpop.xlane.xlu0 %1604 }
 0x338   : > { %v5375_v48 = vpop.xlane.xlu0 %1751 }
 0x340   : > { %v5382_v51 = vpop.xlane.xlu0 %1763 }
 0x34b   : > { %v1874_v54 = vpop.f32.mrf.mxu2 }
 0x34c   : > { %v1875_v56 = vadd.f32 %v5380_v50, %v1874_v54  ;;  %v5429_v54 = vld [vmem:[#allocation10 + $0xb0] sm:$0xff]  ;;  %v5559_v50 = vld [vmem:[#allocation10 + $0x28] sm:$0xff] }
 0x34d   : > { %7528 = vst [vmem:[#allocation39_spill] sm:$0xff] %v5429_v54  ;;  %1957 = vmatpush.msrb.mxu3 %v5429_v54 }
 0x34e   : > { %v1877_v59 = vadd.f32 %v1875_v56, %v5175_v9  ;;  %v1292_v9 = vsel %vm1246_vm0, %v5219_v32, 0.0  ;;  %v5432_v56 = vld [vmem:[#allocation10 + $0xa0] sm:$0xff]  ;;  %7547 = vst [vmem:[#allocation58_spill] sm:$0xff] %v5559_v50 }
 0x34f   : > { %7529 = vst [vmem:[#allocation40_spill] sm:$0xff] %v5432_v56  ;;  %1958 = vmatpush.msrb.mxu3 %v5432_v56 }
 0x350   : > { %1880 = vadd.xlane.f32.xlu2 %v1877_v59 }
 0x353   : > { %v1491_v3 = vpop.permute.xlu0 %1490 }
 0x354   : > { %v1493_v5 = vsel %vm1246_vm0, %v1491_v3, 0.0  ;;  %v5437_v3 = vld [vmem:[#allocation10 + $0x90] sm:$0xff] }
 0x355   : > { %1494 = vadd.xlane.f32.xlu0 %v1493_v5  ;;  %7530 = vst [vmem:[#allocation41_spill] sm:$0xff] %v5437_v3  ;;  %v1612_v5 = vmax.f32 %v1599_v52, %v5373_v47  ;;  %1959 = vmatpush.msrb.mxu3 %v5437_v3 }
 0x35b   : > { %v1652_v6 = vpop.permute.xlu0 %1651 }
 0x35c   : > { %v1654_v10 = vsel %vm1246_vm0, %v1652_v6, 0.0  ;;  %v5441_v6 = vld [vmem:[#allocation10 + $0x80] sm:$0xff] }
 0x35d   : > { %1655 = vadd.xlane.f32.xlu0 %v1654_v10  ;;  %7531 = vst [vmem:[#allocation42_spill] sm:$0xff] %v5441_v6  ;;  %v5444_v10 = vld [vmem:[#allocation10 + $0x70] sm:$0xff]  ;;  %1960 = vmatpush.msrb.mxu3 %v5441_v6 }
 0x35e   : > { %7532 = vst [vmem:[#allocation43_spill] sm:$0xff] %v5444_v10 }
 0x35f   : > { %1961 = vmatpush.msrb.mxu3 %v5444_v10 }
 0x363   : > { %v1799_v13 = vpop.permute.xlu0 %1798 }
 0x364   : > { %v1801_v15 = vsel %vm1246_vm0, %v1799_v13, 0.0  ;;  %v1611_v13 = vpop.xlane.xlu1 %1610 }
 0x365   : > { %1802 = vadd.xlane.f32.xlu0 %v1801_v15  ;;  %v1613_v15 = vmax.f32 %v1612_v5, %v1611_v13 }
 0x367   : > { %v1617_v0 = vsub.f32 %v5373_v47, %v1613_v15  ;;  %v5470_v47 = vld [vmem:[#allocation10 + $0x30] sm:$0xff] }
 0x368   : > { %1753 = vrot.lane.b32.xlu2 %v5221_v33, %s4656_s24  ;;  %v1883_v33 = vmul.f32 128.0, %v4178_v24 }
 0x36a   : > { %v1884_v1 = vsub.f32 1.0, %v1883_v33  ;;  %v1341_v33 = vsel %vm1246_vm0, %v5234_v44, 0.0 }
 0x36b   : > { %v1811_v16 = vpop.permute.xlu0 %1810 }
 0x36c   : > { %v1813_v21 = vsel %vm1246_vm0, %v1811_v16, 0.0  ;;  %v1885_v28 = vmul.f32 %v4178_v24, %v1884_v1  ;;  %v5448_v16 = vld [vmem:[#allocation10 + $0x60] sm:$0xff] }
 0x36d   : > { %1814 = vadd.xlane.f32.xlu0 %v1813_v21  ;;  %7533 = vst [vmem:[#allocation44_spill] sm:$0xff] %v5448_v16  ;;  %1962 = vmatpush.msrb.mxu3 %v5448_v16 }
 0x36e   : > { %v1886_v18 = vadd.f32 %v4178_v24, %v1885_v28  ;;  %v5464_v28 = vld [vmem:[#allocation10 + $0x40] sm:$0xff] }
 0x370   : > { %v5398_v11 = vsel %vm1887_vm4, %v4178_v24, %v1886_v18 }
 0x371   : > { %7523 = vst [vmem:[#allocation34_spill] sm:$0xff] %v5398_v11 }
 0x391   : > { %1293 = vadd.xlane.f32.xlu2 %v1292_v9  ;;  %v1614_v9 = vsub.f32 %v1599_v52, %v1613_v15  ;;  %v1646_v52 = vpop.permute.xlu1 %1645 }
 0x393   : > { %v1615_v18 = vmul.f32 1.442695, %v1614_v9 }
 0x395   : > { %4179 = vpow2.f32 %v1615_v18  ;;  %v5494_v18 = vld [vmem:[#allocation10] sm:$0xff] }
 0x399   : > { %1447 = vadd.xlane.f32.xlu2 %v1446_v22 }
 0x3a1   : > { %1301 = vadd.xlane.f32.xlu2 %v1300_v61  ;;  %v5455_v61 = vld [vmem:[#allocation10 + $0x50] sm:$0xff] }
 0x3a2   : > { %7534 = vst [vmem:[#allocation45_spill] sm:$0xff] %v5455_v61  ;;  %1963 = vmatpush.msrb.mxu3 %v5455_v61 }
 0x3a4   : > { %1964 = vmatpush.msrb.mxu3 %v5464_v28 }
 0x3a6   : > { %1965 = vmatpush.msrb.mxu3 %v5470_v47 }
 0x3c3   : > { %v1881_v29 = vpop.xlane.xlu2 %1880 }
 0x3c4   : > { %v1889_v32 = vmul.f32 %v5398_v11, %v1881_v29  ;;  %v5467_v29 = vld [vmem:[#allocation10 + $0xf8] sm:$0xff] }
 0x3c5   : > { %1973 = vmatpush.msra.mxu0 %v5467_v29 }
 0x3c6   : > { %v5402_v35 = vsub.f32 %v1877_v59, %v1889_v32  ;;  %v1618_v32 = vmul.f32 1.442695, %v1617_v0 }
 0x3c8   : > { %v1891_v39 = vmul.f32 %v5402_v35, %v5402_v35  ;;  %4181 = vpow2.f32 %v1618_v32  ;;  %v5497_v32 = vld [vmem:[#allocation10 + $0xb8] sm:$0xff] }
 0x3c9   : > { %7538 = vst [vmem:[#allocation49_spill] sm:$0xff] %v5497_v32 }
 0x3cb   : > { %v1754_v34 = vpop.permute.xlu2 %1753 }
 0x3cc   : > { %v1756_v25 = vsel %vm1246_vm0, %v1754_v34, 0.0  ;;  %v1620_v34 = vsub.f32 %v1611_v13, %v1613_v15  ;;  %v5485_v13 = vld [vmem:[#allocation10 + $0x10] sm:$0xff] }
 0x3cd   : > { %1757 = vadd.xlane.f32.xlu2 %v1756_v25 }
 0x3ce   : > { %v1621_v15 = vmul.f32 1.442695, %v1620_v34 }
 0x3d0   : > { %4183 = vpow2.f32 %v1621_v15 }
 0x3d5   : > { %1892 = vadd.xlane.f32.xlu2 %v1891_v39  ;;  %v5474_v39 = vld [vmem:[#allocation10 + $0xe8] sm:$0xff] }
 0x3d6   : > { %7535 = vst [vmem:[#allocation46_spill] sm:$0xff] %v5474_v39  ;;  %1974 = vmatpush.msra.mxu0 %v5474_v39 }
 0x3ed   : > { %1497 = vrot.lane.b32.xlu2 %v5234_v44, %s4658_s0 }
 0x3f5   : > { %1504 = vrot.lane.b32.xlu2 %v5236_v45, %s4658_s0 }
 0x3fd   : > { %1657 = vrot.lane.b32.xlu2 %v5236_v45, %s4657_s9 }
 0x404   : > { %v5414_v38 = vpop.xlane.xlu2 %1293 }
 0x405   : > { %v1303_v22 = vmax.f32 %v5414_v38, %v5412_v36 }
 0x40c   : > { %v5434_v59 = vpop.xlane.xlu2 %1447 }
 0x40d   : > { %v1456_v24 = vmax.f32 %v5371_v37, %v5434_v59 }
 0x40f   : > { %v1457_v25 = vmax.f32 %v1456_v24, %v5426_v40  ;;  %v5490_v24 = vld [vmem:[#allocation10 + $0xc8] sm:$0xff] }
 0x410   : > { %7537 = vst [vmem:[#allocation48_spill] sm:$0xff] %v5490_v24 }
 0x411   : > { %v1458_v0 = vsub.f32 %v5371_v37, %v1457_v25  ;;  %v1464_v15 = vsub.f32 %v5426_v40, %v1457_v25 }
 0x413   : > { %v1459_v37 = vmul.f32 1.442695, %v1458_v0  ;;  %v5523_v0 = vld [vmem:[#allocation10 + $0x78] sm:$0xff] }
 0x414   : > { %v5450_v21 = vpop.xlane.xlu2 %1301  ;;  %7542 = vst [vmem:[#allocation53_spill] sm:$0xff] %v5523_v0 }
 0x415   : > { %v1304_v1 = vmax.f32 %v1303_v22, %v5450_v21  ;;  %v5478_v22 = vld [vmem:[#allocation10 + $0x20] sm:$0xff] }
 0x416   : > { %1966 = vmatpush.msrb.mxu3 %v5478_v22 }
 0x417   : > { %v1305_v5 = vsub.f32 %v5414_v38, %v1304_v1  ;;  %v1308_v9 = vsub.f32 %v5412_v36, %v1304_v1  ;;  %v1648_v38 = vsel %vm1246_vm0, %v1646_v52, 0.0  ;;  %v1461_v36 = vsub.f32 %v5434_v59, %v1457_v25  ;;  %v5502_v59 = vld [vmem:[#allocation10 + $0xa8] sm:$0xff]  ;;  %v5504_v52 = vpop.eup %4179 }
 0x418   : > { %1967 = vmatpush.msrb.mxu3 %v5485_v13  ;;  %v1311_v34 = vsub.f32 %v5450_v21, %v1304_v1  ;;  %7539 = vst [vmem:[#allocation50_spill] sm:$0xff] %v5502_v59  ;;  %v5515_v1 = vld [vmem:[#allocation10 + $0x88] sm:$0xff]  ;;  %v1465_v25 = vmul.f32 1.442695, %v1464_v15 }
 0x419   : > { %v1306_v17 = vmul.f32 1.442695, %v1305_v5  ;;  %v1309_v45 = vmul.f32 1.442695, %v1308_v9  ;;  %v1462_v5 = vmul.f32 1.442695, %v1461_v36  ;;  %v5508_v9 = vpop.eup %4181 }
 0x41a   : > { %1968 = vmatpush.msrb.mxu3 %v5494_v18  ;;  %v1312_v21 = vmul.f32 1.442695, %v1311_v34  ;;  %7541 = vst [vmem:[#allocation52_spill] sm:$0xff] %v5515_v1 }
 0x41b   : > { %4185 = vpow2.f32 %v1306_v17  ;;  %v1623_v17 = vadd.f32 %v5508_v9, %v5504_v52 }
 0x41c   : > { %2105 = vmatpush.msra.mxu3 %v5295_v41  ;;  %4187 = vpow2.f32 %v1309_v45  ;;  %v5521_v45 = vpop.eup %4183 }
 0x41d   : > { %4189 = vpow2.f32 %v1459_v37  ;;  %v5531_v37 = vld [vmem:[#allocation10 + $0x68] sm:$0xff]  ;;  %v5534_v34 = vadd.f32 %v5521_v45, %v1623_v17 }
 0x41e   : > { %2106 = vmatpush.msra.mxu3 %v5298_v46  ;;  %4191 = vpow2.f32 %v1462_v5  ;;  %7543 = vst [vmem:[#allocation54_spill] sm:$0xff] %v5531_v37 }
 0x41f   : > { %4193 = vpow2.f32 %v1312_v21  ;;  %v5548_v21 = vld [vmem:[#allocation10 + $0x48] sm:$0xff]  ;;  %vm1635_vm6 = vweird.f32 %v5534_v34 }
 0x420   : > { %2107 = vmatpush.msra.mxu3 %v5301_v49  ;;  %4195 = vpow2.f32 %v1465_v25  ;;  %7545 = vst [vmem:[#allocation56_spill] sm:$0xff] %v5548_v21 }
 0x421   : > { %v5525_v40 = vpop.eup %4185  ;;  %4197 = vrcp.f32 %v5534_v34 }
 0x422   : > { %2108 = vmatpush.msra.mxu3 %v5305_v53  ;;  %v5529_v36 = vpop.eup %4187 }
 0x423   : > { %v5538_v5 = vpop.eup %4189  ;;  %v1314_v44 = vadd.f32 %v5529_v36, %v5525_v40 }
 0x424   : > { %2109 = vmatpush.msra.mxu3 %v5308_v55  ;;  %v5542_v15 = vpop.eup %4191 }
 0x425   : > { %v5553_v17 = vpop.eup %4193  ;;  %v1467_v25 = vadd.f32 %v5542_v15, %v5538_v5 }
 0x426   : > { %1342 = vadd.xlane.f32.xlu2 %v1341_v33  ;;  %v5482_v33 = vld [vmem:[#allocation10 + $0xd8] sm:$0xff]  ;;  %2110 = vmatpush.msra.mxu3 %v5311_v57 }
 0x427   : > { %7536 = vst [vmem:[#allocation47_spill] sm:$0xff] %v5482_v33  ;;  %1975 = vmatpush.msra.mxu0 %v5482_v33 }
 0x428   : > { %2111 = vmatpush.msra.mxu3 %v5314_v58 }
 0x429   : > { %1976 = vmatpush.msra.mxu0 %v5490_v24 }
 0x42a   : > { %2112 = vmatpush.msra.mxu3 %v5317_v60 }
 0x42b   : > { %1977 = vmatpush.msra.mxu0 %v5497_v32 }
 0x42c   : > { %2113 = vmatpush.msra.mxu3 %v5320_v62 }
 0x42d   : > { %1978 = vmatpush.msra.mxu0 %v5502_v59  ;;  %v5577_v59 = vld [vmem:[#allocation10 + $0x8] sm:$0xff] }
 0x42e   : > { %1649 = vadd.xlane.f32.xlu2 %v1648_v38  ;;  %v5510_v38 = vld [vmem:[#allocation10 + $0x98] sm:$0xff]  ;;  %2114 = vmatpush.msra.mxu3 %v5322_v63 }
 0x42f   : > { %7540 = vst [vmem:[#allocation51_spill] sm:$0xff] %v5510_v38  ;;  %1979 = vmatpush.msra.mxu0 %v5510_v38 }
 0x430   : > { %2115 = vmatpush.msra.mxu3 %v5325_v2 }
 0x431   : > { %1980 = vmatpush.msra.mxu0 %v5515_v1  ;;  %v5569_v1 = vpop.eup %4195 }
 0x432   : > { %v5574_v38 = vadd.f32 %v5569_v1, %v1467_v25  ;;  %2116 = vmatpush.msra.mxu3 %v5328_v4 }
 0x433   : > { %1981 = vmatpush.msra.mxu0 %v5523_v0  ;;  %v5567_v0 = vld [vmem:[#allocation10 + $0x18] sm:$0xff] }
 0x434   : > { %7548 = vst [vmem:[#allocation59_spill] sm:$0xff] %v5567_v0  ;;  %2117 = vmatpush.msra.mxu3 %v5333_v7  ;;  %vm1479_vm10 = vweird.f32 %v5574_v38 }
 0x435   : > { %1982 = vmatpush.msra.mxu0 %v5531_v37 }
 0x436   : > { %2118 = vmatpush.msra.mxu3 %v5336_v12 }
 0x437   : > { %1983 = vmatpush.msra.mxu0 %v5540_v43  ;;  %v5562_v43 = vadd.f32 %v5553_v17, %v1314_v44 }
 0x438   : > { %2119 = vmatpush.msra.mxu3 %v5341_v19 }
 0x439   : > { %1984 = vmatpush.msra.mxu0 %v5548_v21  ;;  %4199 = vrcp.f32 %v5562_v43  ;;  %vm1326_vm11 = vweird.f32 %v5562_v43 }
 0x43a   : > { %4201 = vrcp.f32 %v5574_v38  ;;  %2120 = vmatpush.msra.mxu3 %v5344_v26 }
 0x43b   : > { %1985 = vmatpush.msra.mxu0 %v5557_v14  ;;  %v5579_v14 = vpop.eup %4197 }
 0x43c   : > { %v1631_v33 = vmul.f32 %v5579_v14, %v5534_v34  ;;  %vm1636_vm5 = vweird.f32 %v5579_v14 }
 0x43d   : > { %1986 = vmatpush.msra.mxu0 %v5559_v50  ;;  %vm5650_vm7 = vmor %vm1635_vm6, %vm1636_vm5 }
 0x43f   : > { %1987 = vmatpush.msra.mxu0 %v5567_v0 }
 0x440   : > { %v1758_v37 = vpop.xlane.xlu2 %1757 }
 0x441   : > { %v1765_v21 = vmax.f32 %v5375_v48, %v1758_v37  ;;  %1988 = vmatpush.msra.mxu0 %v5577_v59 }
 0x443   : > { %v1766_v44 = vmax.f32 %v1765_v21, %v5382_v51  ;;  %2148 = vmatpush.msrb.mxu0 %v5416_v30 }
 0x445   : > { %v1767_v32 = vsub.f32 %v5375_v48, %v1766_v44  ;;  %v1770_v50 = vsub.f32 %v1758_v37, %v1766_v44  ;;  %v1773_v24 = vsub.f32 %v5382_v51, %v1766_v44  ;;  %2149 = vmatpush.msrb.mxu0 %v5418_v8  ;;  %v5595_v51 = vpop.eup %4199 }
 0x446   : > { %vm1327_vm8 = vweird.f32 %v5595_v51 }
 0x447   : > { %v1768_v21 = vmul.f32 1.442695, %v1767_v32  ;;  %v1771_v25 = vmul.f32 1.442695, %v1770_v50  ;;  %v1774_v0 = vmul.f32 1.442695, %v1773_v24  ;;  %2150 = vmatpush.msrb.mxu0 %v5421_v31  ;;  %v5602_v24 = vpop.eup %4201  ;;  %vm5688_vm14 = vmor %vm1326_vm11, %vm1327_vm8 }
 0x448   : > { %v1893_v39 = vpop.xlane.xlu2 %1892  ;;  %v1632_v32 = vsub.f32 1.0, %v1631_v33  ;;  %v1475_v44 = vmul.f32 %v5602_v24, %v5574_v38  ;;  %vm1480_vm12 = vweird.f32 %v5602_v24 }
 0x449   : > { %4203 = vpow2.f32 %v1768_v21  ;;  %v1894_v48 = vmul.f32 %v1893_v39, %v5398_v11  ;;  %v1322_v39 = vmul.f32 %v5595_v51, %v5562_v43  ;;  %2151 = vmatpush.msrb.mxu0 %v5424_v42  ;;  %v1641_v42 = vand.u32 2147483648, %v5534_v34  ;;  %vm5724_vm5 = vmor %vm1479_vm10, %vm1480_vm12 }
 0x44a   : > { %4205 = vpow2.f32 %v1771_v25  ;;  %v1633_v33 = vmul.f32 %v5579_v14, %v1632_v32  ;;  %v1625_v32 = vmul.f32 %v5504_v52, %v5262_v20 }
 0x44b   : > { %v5598_v50 = vadd.f32 1e-05, %v1894_v48  ;;  %4207 = vpow2.f32 %v1774_v0  ;;  %2152 = vmatpush.msrb.mxu0 %v5429_v54  ;;  %v1323_v25 = vsub.f32 1.0, %v1322_v39  ;;  %v1626_v54 = vmul.f32 %v5508_v9, %v5264_v23 }
 0x44c   : > { %v1469_v39 = vmul.f32 %v5538_v5, %v5262_v20  ;;  %v5638_v8 = vadd.f32 %v5579_v14, %v1633_v33  ;;  %v1476_v9 = vsub.f32 1.0, %v1475_v44 }
 0x44d   : > { %4209 = vrsqrt.f32 %v5598_v50  ;;  %2153 = vmatpush.msrb.mxu0 %v5432_v56  ;;  %v1324_v30 = vmul.f32 %v5595_v51, %v1323_v25  ;;  %v5646_v5 = vadd.f32 %v1626_v54, %v1625_v32  ;;  %v5659_v25 = vmul.f32 %v5569_v1, %v5267_v27 }
 0x44e   : > { %v5665_v32 = vor.u32 1.1754944e-38, %v1641_v42  ;;  %v1317_v1 = vmul.f32 %v5529_v36, %v5264_v23  ;;  %v1330_v36 = vand.u32 2147483647, %v5562_v43  ;;  %vm1902_vm13 = vweird.f32 %v5598_v50 }
 0x44f   : > { %v5609_v37 = vpop.eup %4203  ;;  %2154 = vmatpush.msrb.mxu0 %v5437_v3  ;;  %v1325_v54 = vadd.f32 %v5595_v51, %v1324_v30 }
 0x450   : > { %v5613_v0 = vpop.eup %4205  ;;  %v5617_v21 = vpop.permute.xlu2 %1497  ;;  %vm1331_vm4 = vcmp.eq.f32.partialorder %v1330_v36, 8.507059e+37 }
 0x451   : > { %7549 = vst [vmem:[#allocation60_spill] sm:$0xff] %v5617_v21  ;;  %v1776_v48 = vadd.f32 %v5613_v0, %v5609_v37  ;;  %v5622_v11 = vpop.eup %4207  ;;  %v1470_v21 = vmul.f32 %v5542_v15, %v5264_v23  ;;  %2155 = vmatpush.msrb.mxu0 %v5441_v6 }
 0x453   : > { %v4210_v31 = vpop.eup %4209  ;;  %v5635_v56 = vadd.f32 %v5622_v11, %v1776_v48  ;;  %v5655_v44 = vadd.f32 %v1470_v21, %v1469_v39  ;;  %2156 = vmatpush.msrb.mxu0 %v5444_v10  ;;  %v1477_v21 = vmul.f32 %v5602_v24, %v1476_v9  ;;  %v1483_v39 = vand.u32 2147483647, %v5574_v38 }
 0x454   : > { %v1897_v52 = vmul.f32 %v4210_v31, %v5598_v50  ;;  %vm1903_vm9 = vweird.f32 %v4210_v31  ;;  %v5700_v50 = vld [vmem:[%s7386_s17] ss:$0 sm:$0xff] }
 0x455   : > { %4211 = vrcp.f32 %v5635_v56  ;;  %2157 = vmatpush.msrb.mxu0 %v5448_v16  ;;  %vm1904_vm15 = vmor %vm1902_vm13, %vm1903_vm9  ;;  %vm5705_vm1 = vcmp.eq.f32.partialorder %v1483_v39, 8.507059e+37  ;;  %v1792_v36 = vand.u32 2147483647, %v5635_v56  ;;  %vm1788_vm8 = vweird.f32 %v5635_v56 }
 0x456   : > { %v1898_v15 = vmul.f32 %v4210_v31, %v1897_v52  ;;  %v1316_v52 = vmul.f32 %v5525_v40, %v5262_v20  ;;  %v1485_v40 = vand.u32 2147483648, %v5574_v38 }
 0x457   : > { %2158 = vmatpush.msrb.mxu0 %v5455_v61  ;;  %vm1793_vm10 = vcmp.eq.f32.partialorder %v1792_v36, 8.507059e+37  ;;  %v7558_v61 = vand.u32 2147483647, %v5534_v34  ;;  %v5849_v36 = vld [vmem:[#allocation11 + $0x88] sm:$0xff] }
 0x458   : > { %v1899_v6 = vmul.f32 0.5, %v1898_v15  ;;  %v1505_v48 = vpop.permute.xlu2 %1504  ;;  %v1332_v15 = vand.u32 2147483648, %v5562_v43  ;;  %v1318_v16 = vadd.f32 %v1317_v1, %v1316_v52  ;;  %v1319_v43 = vmul.f32 %v5553_v17, %v5267_v27 }
 0x459   : > { %v1507_v3 = vsel %vm1246_vm0, %v1505_v48, 0.0  ;;  %2159 = vmatpush.msrb.mxu0 %v5464_v28  ;;  %v1778_v17 = vmul.f32 %v5609_v37, %v5262_v20  ;;  %v1779_v52 = vmul.f32 %v5613_v0, %v5264_v23  ;;  %vm1640_vm11 = vcmp.eq.f32.partialorder %v7558_v61, 8.507059e+37  ;;  %v2001_v37 = vld [vmem:[#allocation11 + $0x30] sm:$0xff] }
 0x45a   : > { %v1900_v42 = vsub.f32 1.5, %v1899_v6  ;;  %1508 = vadd.xlane.f32.xlu2 %v1507_v3  ;;  %v1478_v6 = vadd.f32 %v5602_v24, %v1477_v21  ;;  %v1486_v3 = vor.u32 1.1754944e-38, %v1485_v40  ;;  %v1781_v40 = vmul.f32 %v5622_v11, %v5267_v27 }
 0x45b   : > { %v4212_v9 = vpop.eup %4211  ;;  %2160 = vmatpush.msrb.mxu0 %v5470_v47 }
 0x45c   : > { %v1901_v30 = vmul.f32 %v4210_v31, %v1900_v42  ;;  %v1784_v48 = vmul.f32 %v4212_v9, %v5635_v56  ;;  %v1329_v42 = vsel %vm5688_vm14, %v5595_v51, %v1325_v54  ;;  %v5718_v51 = vld [vmem:[%s7387_s18] ss:$0 sm:$0xff]  ;;  %v1333_v54 = vor.u32 1.1754944e-38, %v1332_v15 }
 0x45d   : > { %v1482_v0 = vsel %vm5724_vm5, %v5602_v24, %v1478_v6  ;;  %vm1789_vm6 = vweird.f32 %v4212_v9  ;;  %2161 = vmatpush.msrb.mxu0 %v5478_v22  ;;  %v1473_v24 = vadd.f32 %v5659_v25, %v5655_v44 }
 0x45e   : > { %v1905_v21 = vsel %vm1904_vm15, %v4210_v31, %v1901_v30  ;;  %v1785_v1 = vsub.f32 1.0, %v1784_v48  ;;  %v1794_v31 = vand.u32 2147483648, %v5635_v56  ;;  %v1334_v30 = vsel %vm1331_vm4, %v1333_v54, %v1329_v42  ;;  %vm1790_vm9 = vmor %vm1788_vm8, %vm1789_vm6  ;;  %v5837_v54 = vld [vmem:[#allocation11 + $0xa0] sm:$0xff] }
 0x45f   : > { %v1906_v10 = vmul.f32 %v1905_v21, %v5402_v35  ;;  %v1320_v48 = vadd.f32 %v1319_v43, %v1318_v16  ;;  %v1780_v21 = vadd.f32 %v1779_v52, %v1778_v17  ;;  %2162 = vmatpush.msrb.mxu0 %v5485_v13  ;;  %v1628_v56 = vmul.f32 %v5521_v45, %v5267_v27  ;;  %v2002_v52 = vld [vmem:[#allocation11 + $0x38] sm:$0xff] }
 0x460   : > { %v1658_v35 = vpop.permute.xlu2 %1657  ;;  %v1786_v39 = vmul.f32 %v4212_v9, %v1785_v1  ;;  %v1487_v1 = vsel %vm5705_vm1, %v1486_v3, %v1482_v0  ;;  %v7559_v42 = vsel %vm5650_vm7, %v5579_v14, %v5638_v8  ;;  %v5829_v8 = vld [vmem:[#allocation11 + $0xb0] sm:$0xff]  ;;  %v1996_v3 = vld [vmem:[#allocation11 + $0x8] sm:$0xff] }
 0x461   : > { %v1660_v15 = vsel %vm1246_vm0, %v1658_v35, 0.0  ;;  %v1910_v38 = vmul.f32 %v5700_v50, %v1906_v10  ;;  %v1795_v10 = vor.u32 1.1754944e-38, %v1794_v31  ;;  %v1335_v16 = vmul.f32 %v1334_v30, %v1320_v48  ;;  %2163 = vmatpush.msrb.mxu0 %v5494_v18  ;;  %v5841_v31 = vld [vmem:[#allocation11 + $0x98] sm:$0xff]  ;;  %v2000_v35 = vld [vmem:[#allocation11 + $0x28] sm:$0xff]  ;;  %v5845_v0 = vld [vmem:[#allocation11 + $0x90] sm:$0xff] }
 0x462   : > { %1661 = vadd.xlane.f32.xlu2 %v1660_v15  ;;  %v1787_v23 = vadd.f32 %v4212_v9, %v1786_v39  ;;  %v1488_v25 = vmul.f32 %v1487_v1, %v1473_v24  ;;  %v1782_v11 = vadd.f32 %v1781_v40, %v1780_v21  ;;  %v1999_v39 = vld [vmem:[#allocation11 + $0x20] sm:$0xff]  ;;  %v1998_v15 = vld [vmem:[#allocation11 + $0x18] sm:$0xff]  ;;  %v1997_v30 = vld [vmem:[#allocation11 + $0x10] sm:$0xff] }
 0x463   : > { %v5741_v6 = vadd.f32 %v5718_v51, %v1910_v38  ;;  %v5853_v38 = vld [vmem:[#allocation11 + $0x80] sm:$0xff]  ;;  %v7560_v21 = vld [vmem:[#allocation46_spill] sm:$0xff]  ;;  %v7561_v24 = vld [vmem:[#allocation47_spill] sm:$0xff] }
 0x464   : > { %v1791_v43 = vsel %vm1790_vm9, %v4212_v9, %v1787_v23  ;;  %v1643_v23 = vsel %vm1640_vm11, %v5665_v32, %v7559_v42  ;;  %v1629_v9 = vadd.f32 %v1628_v56, %v5646_v5  ;;  %v2102_v34 = vsel %vm1246_vm0, %v1335_v16, %v1488_v25  ;;  %v2003_v5 = vld [vmem:[#allocation11 + $0x40] sm:$0xff]  ;;  %v5833_v32 = vld [vmem:[#allocation11 + $0xa8] sm:$0xff]  ;;  %v7562_v1 = vld [vmem:[#allocation48_spill] sm:$0xff] }
 0x465   : > { %1969 = vmatmul.f32.vlgmr.msrb.gmra.mxu3 %v5741_v6  ;;  %1989 = vmatmul.f32.vlgmr.msra.gmra.mxu0 %v5741_v6  ;;  %v1796_v44 = vsel %vm1793_vm10, %v1795_v10, %v1791_v43  ;;  %v1995_v48 = vld [vmem:[#allocation11] sm:$0xff]  ;;  %v7564_v16 = vld [vmem:[#allocation50_spill] sm:$0xff]  ;;  %v7565_v40 = vld [vmem:[#allocation51_spill] sm:$0xff] }
 0x466   : > { %2256 = vmatpush.msra.mxu0 %v5295_v41  ;;  %v1797_v45 = vmul.f32 %v1796_v44, %v1782_v11  ;;  %v1644_v17 = vmul.f32 %v1643_v23, %v1629_v9  ;;  %v5780_v41 = vld [vmem:[#allocation11 + $0xf8] sm:$0xff]  ;;  %v7563_v10 = vld [vmem:[#allocation49_spill] sm:$0xff]  ;;  %v7568_v25 = vld [vmem:[#allocation54_spill] sm:$0xff] }
 0x467   : > { %2051 = vmatpush.msra.mxu2 %v5780_v41  ;;  %2210 = vmatpush.msrb.mxu3 %v5780_v41  ;;  %v1947_v43 = vld [vmem:[%s7383_s14] sm:$0x3]  ;;  %v7566_v56 = vld [vmem:[#allocation52_spill] sm:$0xff]  ;;  %v7569_v11 = vld [vmem:[#allocation55_spill] sm:$0xff] }
 0x468   : > { %2257 = vmatpush.msra.mxu0 %v5298_v46  ;;  %v2103_v33 = vsel %vm1850_vm2, %v2102_v34, %v1644_v17  ;;  %v5782_v46 = vld [vmem:[#allocation11 + $0xf0] sm:$0xff]  ;;  %v5877_v61 = vperm.slane %v1947_v43, 1  ;;  %v7567_v44 = vld [vmem:[#allocation53_spill] sm:$0xff]  ;;  %v7570_v34 = vld [vmem:[#allocation56_spill] sm:$0xff] }
 0x469   : > { %v2104_v14 = vsel %vm1852_vm3, %v2103_v33, %v1797_v45  ;;  %2052 = vmatpush.msra.mxu2 %v5782_v46  ;;  %2211 = vmatpush.msrb.mxu3 %v5782_v46  ;;  %v5883_v45 = vperm.slane %v1947_v43, 0  ;;  %v7571_v17 = vld [vmem:[#allocation57_spill] sm:$0xff]  ;;  %v7591_v43 = vld [vmem:[#allocation34_spill] sm:$0xff] }
 0x46a   : > { %2258 = vmatpush.msra.mxu0 %v5301_v49  ;;  %v5786_v49 = vld [vmem:[#allocation11 + $0xe8] sm:$0xff] }
 0x46b   : > { %2053 = vmatpush.msra.mxu2 %v5786_v49  ;;  %2212 = vmatpush.msrb.mxu3 %v5786_v49 }
 0x46c   : > { %2259 = vmatpush.msra.mxu0 %v5305_v53  ;;  %v5794_v53 = vld [vmem:[#allocation11 + $0x78] sm:$0xff] }
 0x46d   : > { %2121 = vmatmul.f32.vlgmr.msra.gmra.mxu3 %v2104_v14  ;;  %2031 = vmatpush.msra.mxu1 %v5794_v53 }
 0x46e   : > { %2260 = vmatpush.msra.mxu0 %v5308_v55  ;;  %v5796_v55 = vld [vmem:[#allocation11 + $0xe0] sm:$0xff] }
 0x46f   : > { %2054 = vmatpush.msra.mxu2 %v5796_v55  ;;  %2213 = vmatpush.msrb.mxu3 %v5796_v55 }
 0x470   : > { %2261 = vmatpush.msra.mxu0 %v5311_v57  ;;  %v5798_v57 = vld [vmem:[#allocation11 + $0x70] sm:$0xff] }
 0x471   : > { %2032 = vmatpush.msra.mxu1 %v5798_v57 }
 0x472   : > { %2262 = vmatpush.msra.mxu0 %v5314_v58  ;;  %v5802_v58 = vld [vmem:[#allocation11 + $0xd8] sm:$0xff] }
 0x473   : > { %2055 = vmatpush.msra.mxu2 %v5802_v58  ;;  %2214 = vmatpush.msrb.mxu3 %v5802_v58 }
 0x474   : > { %2263 = vmatpush.msra.mxu0 %v5317_v60  ;;  %v5804_v60 = vld [vmem:[#allocation11 + $0x68] sm:$0xff] }
 0x475   : > { %2033 = vmatpush.msra.mxu1 %v5804_v60 }
 0x476   : > { %2264 = vmatpush.msra.mxu0 %v5320_v62  ;;  %v5806_v62 = vld [vmem:[#allocation11 + $0xd0] sm:$0xff] }
 0x477   : > { %2056 = vmatpush.msra.mxu2 %v5806_v62  ;;  %2215 = vmatpush.msrb.mxu3 %v5806_v62 }
 0x478   : > { %2265 = vmatpush.msra.mxu0 %v5322_v63  ;;  %v5811_v63 = vld [vmem:[#allocation11 + $0x60] sm:$0xff] }
 0x479   : > { %2034 = vmatpush.msra.mxu1 %v5811_v63 }
 0x47a   : > { %2266 = vmatpush.msra.mxu0 %v5325_v2  ;;  %v5813_v2 = vld [vmem:[#allocation11 + $0xc8] sm:$0xff] }
 0x47b   : > { %2057 = vmatpush.msra.mxu2 %v5813_v2  ;;  %2216 = vmatpush.msrb.mxu3 %v5813_v2 }
 0x47c   : > { %2267 = vmatpush.msra.mxu0 %v5328_v4  ;;  %v2006_v4 = vld [vmem:[#allocation11 + $0x58] sm:$0xff] }
 0x47d   : > { %2035 = vmatpush.msra.mxu1 %v2006_v4 }
 0x47e   : > { %2268 = vmatpush.msra.mxu0 %v5333_v7  ;;  %v5822_v7 = vld [vmem:[#allocation11 + $0xc0] sm:$0xff] }
 0x47f   : > { %2058 = vmatpush.msra.mxu2 %v5822_v7  ;;  %2217 = vmatpush.msrb.mxu3 %v5822_v7 }
 0x480   : > { %2269 = vmatpush.msra.mxu0 %v5336_v12  ;;  %v2005_v12 = vld [vmem:[#allocation11 + $0x50] sm:$0xff] }
 0x481   : > { %2036 = vmatpush.msra.mxu1 %v2005_v12 }
 0x482   : > { %2270 = vmatpush.msra.mxu0 %v5341_v19  ;;  %v5825_v19 = vld [vmem:[#allocation11 + $0xb8] sm:$0xff] }
 0x483   : > { %2059 = vmatpush.msra.mxu2 %v5825_v19  ;;  %2218 = vmatpush.msrb.mxu3 %v5825_v19 }
 0x484   : > { %2271 = vmatpush.msra.mxu0 %v5344_v26  ;;  %v2004_v26 = vld [vmem:[#allocation11 + $0x48] sm:$0xff] }
 0x485   : > { %2037 = vmatpush.msra.mxu1 %v2004_v26  ;;  %2060 = vmatpush.msra.mxu2 %v5829_v8 }
 0x486   : > { %2219 = vmatpush.msrb.mxu3 %v5829_v8 }
 0x487   : > { %2038 = vmatpush.msra.mxu1 %v2003_v5  ;;  %2061 = vmatpush.msra.mxu2 %v5833_v32 }
 0x488   : > { %2220 = vmatpush.msrb.mxu3 %v5833_v32 }
 0x489   : > { %2039 = vmatpush.msra.mxu1 %v2002_v52  ;;  %2062 = vmatpush.msra.mxu2 %v5837_v54 }
 0x48a   : > { %2221 = vmatpush.msrb.mxu3 %v5837_v54 }
 0x48b   : > { %2040 = vmatpush.msra.mxu1 %v2001_v37  ;;  %2063 = vmatpush.msra.mxu2 %v5841_v31 }
 0x48c   : > { %2222 = vmatpush.msrb.mxu3 %v5841_v31 }
 0x48d   : > { %2041 = vmatpush.msra.mxu1 %v2000_v35  ;;  %2064 = vmatpush.msra.mxu2 %v5845_v0 }
 0x48e   : > { %2223 = vmatpush.msrb.mxu3 %v5845_v0 }
 0x48f   : > { %2042 = vmatpush.msra.mxu1 %v1999_v39  ;;  %2065 = vmatpush.msra.mxu2 %v5849_v36 }
 0x490   : > { %2224 = vmatpush.msrb.mxu3 %v5849_v36 }
 0x491   : > { %2043 = vmatpush.msra.mxu1 %v1998_v15  ;;  %2066 = vmatpush.msra.mxu2 %v5853_v38 }
 0x492   : > { %2225 = vmatpush.msrb.mxu3 %v5853_v38 }
 0x493   : > { %2190 = vmatpush.msrb.mxu2 %v5794_v53  ;;  %2044 = vmatpush.msra.mxu1 %v1997_v30 }
 0x494   : > { %2341 = vmatpush.msra.mxu3 %v5794_v53  ;;  %v7572_v53 = vld [vmem:[#allocation58_spill] sm:$0xff] }
 0x495   : > { %2191 = vmatpush.msrb.mxu2 %v5798_v57  ;;  %2045 = vmatpush.msra.mxu1 %v1996_v3 }
 0x496   : > { %2342 = vmatpush.msra.mxu3 %v5798_v57 }
 0x497   : > { %2192 = vmatpush.msrb.mxu2 %v5804_v60  ;;  %2046 = vmatpush.msra.mxu1 %v1995_v48 }
 0x498   : > { %2343 = vmatpush.msra.mxu3 %v5804_v60  ;;  %v7573_v60 = vld [vmem:[#allocation59_spill] sm:$0xff] }
 0x499   : > { %2168 = vmatpush.msrb.mxu1 %v5467_v29  ;;  %2193 = vmatpush.msrb.mxu2 %v5811_v63 }
 0x49a   : > { %2344 = vmatpush.msra.mxu3 %v5811_v63  ;;  %v7574_v63 = vld [vmem:[#allocation35_spill] sm:$0xff] }
 0x49b   : > { %2169 = vmatpush.msrb.mxu1 %v7560_v21  ;;  %2194 = vmatpush.msrb.mxu2 %v2006_v4 }
 0x49c   : > { %2345 = vmatpush.msra.mxu3 %v2006_v4 }
 0x49d   : > { %2170 = vmatpush.msrb.mxu1 %v7561_v24  ;;  %2195 = vmatpush.msrb.mxu2 %v2005_v12 }
 0x49e   : > { %2346 = vmatpush.msra.mxu3 %v2005_v12  ;;  %v7575_v12 = vld [vmem:[#allocation33_spill] sm:$0xff] }
 0x49f   : > { %2171 = vmatpush.msrb.mxu1 %v7562_v1  ;;  %2196 = vmatpush.msrb.mxu2 %v2004_v26 }
 0x4a0   : > { %2347 = vmatpush.msra.mxu3 %v2004_v26 }
 0x4a1   : > { %2172 = vmatpush.msrb.mxu1 %v7563_v10  ;;  %2197 = vmatpush.msrb.mxu2 %v2003_v5 }
 0x4a2   : > { %2348 = vmatpush.msra.mxu3 %v2003_v5  ;;  %v7576_v5 = vld [vmem:[#allocation36_spill] sm:$0xff] }
 0x4a3   : > { %2173 = vmatpush.msrb.mxu1 %v7564_v16  ;;  %2198 = vmatpush.msrb.mxu2 %v2002_v52 }
 0x4a4   : > { %2349 = vmatpush.msra.mxu3 %v2002_v52 }
 0x4a5   : > { %2174 = vmatpush.msrb.mxu1 %v7565_v40  ;;  %2199 = vmatpush.msrb.mxu2 %v2001_v37 }
 0x4a6   : > { %2350 = vmatpush.msra.mxu3 %v2001_v37  ;;  %v7578_v37 = vld [vmem:[#allocation37_spill] sm:$0xff] }
 0x4a7   : > { %2175 = vmatpush.msrb.mxu1 %v7566_v56  ;;  %2200 = vmatpush.msrb.mxu2 %v2000_v35 }
 0x4a8   : > { %2351 = vmatpush.msra.mxu3 %v2000_v35  ;;  %v7579_v35 = vld [vmem:[#allocation38_spill] sm:$0xff] }
 0x4a9   : > { %2176 = vmatpush.msrb.mxu1 %v7567_v44  ;;  %2201 = vmatpush.msrb.mxu2 %v1999_v39 }
 0x4aa   : > { %2352 = vmatpush.msra.mxu3 %v1999_v39  ;;  %v7580_v39 = vld [vmem:[#allocation39_spill] sm:$0xff] }
 0x4ab   : > { %2177 = vmatpush.msrb.mxu1 %v7568_v25  ;;  %2202 = vmatpush.msrb.mxu2 %v1998_v15 }
 0x4ac   : > { %2353 = vmatpush.msra.mxu3 %v1998_v15  ;;  %v7581_v15 = vld [vmem:[#allocation40_spill] sm:$0xff] }
 0x4ad   : > { %2178 = vmatpush.msrb.mxu1 %v7569_v11  ;;  %2203 = vmatpush.msrb.mxu2 %v1997_v30 }
 0x4ae   : > { %2354 = vmatpush.msra.mxu3 %v1997_v30  ;;  %v7582_v30 = vld [vmem:[#allocation41_spill] sm:$0xff] }
 0x4af   : > { %2179 = vmatpush.msrb.mxu1 %v7570_v34  ;;  %2204 = vmatpush.msrb.mxu2 %v1996_v3 }
 0x4b0   : > { %2355 = vmatpush.msra.mxu3 %v1996_v3  ;;  %v7583_v3 = vld [vmem:[#allocation42_spill] sm:$0xff] }
 0x4b1   : > { %2180 = vmatpush.msrb.mxu1 %v7571_v17  ;;  %2205 = vmatpush.msrb.mxu2 %v1995_v48 }
 0x4b2   : > { %2356 = vmatpush.msra.mxu3 %v1995_v48  ;;  %v7584_v48 = vld [vmem:[#allocation43_spill] sm:$0xff] }
 0x4b3   : > { %2181 = vmatpush.msrb.mxu1 %v7572_v53 }
 0x4b5   : > { %2182 = vmatpush.msrb.mxu1 %v7573_v60 }
 0x4b7   : > { %2183 = vmatpush.msrb.mxu1 %v5577_v59 }
 0x4e2   : > { %v1990_v42 = vpop.f32.mrf.mxu0 }
 0x4e3   : > { %v1991_v23 = vadd.f32 %v1990_v42, %v5877_v61 }
 0x4e5   : > { %v1994_v9 = vmax.f32 %v1991_v23, 0.0 }
 0x4e7   : > { %2067 = vmatmul.f32.vlgmr.msra.gmra.mxu2 %v1994_v9 }
 0x4e8   : > { %v1970_v33 = vpop.f32.mrf.mxu3  ;;  %2319 = vmatpush.msra.mxu2 %v5467_v29  ;;  %v7577_v29 = vld [vmem:[#allocation27_spill] sm:$0xff] }
 0x4e9   : > { %v1971_v14 = vadd.f32 %v1970_v33, %v5883_v45  ;;  %v1343_v33 = vpop.xlane.xlu2 %1342 }
 0x4ea   : > { %2320 = vmatpush.msra.mxu2 %v7560_v21  ;;  %v7585_v21 = vld [vmem:[#allocation44_spill] sm:$0xff] }
 0x4eb   : > { %v1993_v57 = vmax.f32 %v1971_v14, 0.0 }
 0x4ec   : > { %2321 = vmatpush.msra.mxu2 %v7561_v24  ;;  %v7586_v24 = vld [vmem:[#allocation45_spill] sm:$0xff] }
 0x4ed   : > { %2047 = vmatmul.f32.vlgmr.msra.gmra.mxu1 %v1993_v57  ;;  %v1495_v57 = vpop.xlane.xlu0 %1494 }
 0x4ee   : > { %2299 = vmatpush.msra.mxu1 %v7574_v63  ;;  %2322 = vmatpush.msra.mxu2 %v7562_v1  ;;  %v7587_v1 = vld [vmem:[#allocation30_spill] sm:$0xff] }
 0x4f0   : > { %v2122_v4 = vpop.f32.mrf.mxu3  ;;  %2300 = vmatpush.msra.mxu1 %v7576_v5  ;;  %2323 = vmatpush.msra.mxu2 %v7563_v10  ;;  %v7588_v10 = vld [vmem:[#allocation29_spill] sm:$0xff] }
 0x4f1   : > { %v2123_v26 = vadd.f32 %v7575_v12, %v2122_v4  ;;  %v1650_v14 = vpop.xlane.xlu2 %1649 }
 0x4f2   : > { %2301 = vmatpush.msra.mxu1 %v7578_v37  ;;  %2324 = vmatpush.msra.mxu2 %v7564_v16  ;;  %v1337_v16 = vsel %vm1246_vm0, %v7588_v10, 0.0 }
 0x4f3   : > { %v2125_v52 = vadd.f32 %v2123_v26, %v7577_v29 }
 0x4f4   : > { %2302 = vmatpush.msra.mxu1 %v7579_v35  ;;  %2325 = vmatpush.msra.mxu2 %v7565_v40 }
 0x4f5   : > { %2126 = vadd.xlane.f32.xlu1 %v2125_v52  ;;  %v1656_v4 = vpop.xlane.xlu0 %1655 }
 0x4f6   : > { %2303 = vmatpush.msra.mxu1 %v7580_v39  ;;  %2326 = vmatpush.msra.mxu2 %v7566_v56  ;;  %v1663_v26 = vmax.f32 %v1650_v14, %v1656_v4 }
 0x4f8   : > { %2304 = vmatpush.msra.mxu1 %v7581_v15  ;;  %2327 = vmatpush.msra.mxu2 %v7567_v44 }
 0x4fa   : > { %2305 = vmatpush.msra.mxu1 %v7582_v30  ;;  %2328 = vmatpush.msra.mxu2 %v7568_v25  ;;  %v5940_v25 = vld [vmem:[%s7385_s16] ss:$0 sm:$0xff] }
 0x4fc   : > { %2306 = vmatpush.msra.mxu1 %v7583_v3  ;;  %2329 = vmatpush.msra.mxu2 %v7569_v11 }
 0x4fe   : > { %2307 = vmatpush.msra.mxu1 %v7584_v48  ;;  %2330 = vmatpush.msra.mxu2 %v7570_v34 }
 0x500   : > { %2308 = vmatpush.msra.mxu1 %v7585_v21  ;;  %2331 = vmatpush.msra.mxu2 %v7571_v17 }
 0x502   : > { %2309 = vmatpush.msra.mxu1 %v7586_v24  ;;  %2332 = vmatpush.msra.mxu2 %v7572_v53 }
 0x504   : > { %2310 = vmatpush.msra.mxu1 %v5464_v28  ;;  %2333 = vmatpush.msra.mxu2 %v7573_v60  ;;  %v7589_v28 = vld [vmem:[#allocation60_spill] sm:$0xff]  ;;  %v1509_v60 = vpop.xlane.xlu2 %1508 }
 0x505   : > { %v1500_v40 = vsel %vm1246_vm0, %v7589_v28, 0.0 }
 0x506   : > { %2311 = vmatpush.msra.mxu1 %v5470_v47  ;;  %2334 = vmatpush.msra.mxu2 %v5577_v59  ;;  %v7590_v47 = vld [vmem:[#allocation31_spill] sm:$0xff] }
 0x507   : > { %v1345_v59 = vsel %vm1246_vm0, %v7590_v47, 0.0 }
 0x508   : > { %2312 = vmatpush.msra.mxu1 %v5478_v22 }
 0x50a   : > { %2313 = vmatpush.msra.mxu1 %v5485_v13 }
 0x50c   : > { %2314 = vmatpush.msra.mxu1 %v5494_v18  ;;  %v1662_v12 = vpop.xlane.xlu2 %1661 }
 0x50d   : > { %v1664_v5 = vmax.f32 %v1663_v26, %v1662_v12 }
 0x50e   : > { %1804 = vrot.lane.b32.xlu1 %v7587_v1, %s4656_s24 }
 0x50f   : > { %v1668_v35 = vsub.f32 %v1656_v4, %v1664_v5  ;;  %v1671_v3 = vsub.f32 %v1662_v12, %v1664_v5 }
 0x511   : > { %v1669_v30 = vmul.f32 1.442695, %v1668_v35  ;;  %v1672_v1 = vmul.f32 1.442695, %v1671_v3 }
 0x538   : > { %1338 = vadd.xlane.f32.xlu1 %v1337_v16 }
 0x540   : > { %1501 = vadd.xlane.f32.xlu1 %v1500_v40 }
 0x548   : > { %1346 = vadd.xlane.f32.xlu1 %v1345_v59 }
 0x568   : > { %v2127_v22 = vpop.xlane.xlu1 %2126 }
 0x569   : > { %v2128_v13 = vmul.f32 %v2127_v22, %v7591_v43 }
 0x56a   : > { %v2048_v42 = vpop.f32.mrf.mxu1  ;;  %v2068_v9 = vpop.f32.mrf.mxu2 }
 0x56b   : > { %v5935_v44 = vsub.f32 %v2125_v52, %v2128_v13  ;;  %v2049_v23 = vadd.f32 %v5940_v25, %v2048_v42  ;;  %v1665_v52 = vsub.f32 %v1650_v14, %v1664_v5 }
 0x56d   : > { %v2130_v11 = vmul.f32 %v5935_v44, %v5935_v44  ;;  %v2069_v34 = vadd.f32 %v2068_v9, %v2049_v23 }
 0x56f   : > { %v5946_v17 = vadd.f32 %v2069_v34, %v5741_v6  ;;  %v1666_v6 = vmul.f32 1.442695, %v1665_v52  ;;  %v1803_v34 = vpop.xlane.xlu0 %1802 }
 0x571   : > { %4213 = vpow2.f32 %v1666_v6 }
 0x572   : > { %4215 = vpow2.f32 %v1669_v30 }
 0x573   : > { %4217 = vpow2.f32 %v1672_v1 }
 0x577   : > { %v4214_v22 = vpop.eup %4213 }
 0x580   : > { %v1805_v56 = vpop.permute.xlu1 %1804 }
 0x581   : > { %v1807_v18 = vsel %vm1246_vm0, %v1805_v56, 0.0  ;;  %v4216_v56 = vpop.eup %4215 }
 0x582   : > { %1808 = vadd.xlane.f32.xlu1 %v1807_v18  ;;  %v1674_v23 = vadd.f32 %v4216_v56, %v4214_v22 }
 0x58a   : > { %2131 = vadd.xlane.f32.xlu1 %v2130_v11  ;;  %v5949_v11 = vpop.eup %4217 }
 0x592   : > { %2074 = vadd.xlane.f32.xlu1 %v5946_v17 }
 0x5ab   : > { %v1339_v53 = vpop.xlane.xlu1 %1338 }
 0x5ac   : > { %v1348_v37 = vmax.f32 %v1339_v53, %v1343_v33 }
 0x5b3   : > { %v1502_v63 = vpop.xlane.xlu1 %1501 }
 0x5b4   : > { %v1510_v39 = vmax.f32 %v1495_v57, %v1502_v63 }
 0x5b6   : > { %v1511_v48 = vmax.f32 %v1510_v39, %v1509_v60 }
 0x5b8   : > { %v1512_v10 = vsub.f32 %v1495_v57, %v1511_v48  ;;  %v1515_v16 = vsub.f32 %v1502_v63, %v1511_v48  ;;  %v1518_v18 = vsub.f32 %v1509_v60, %v1511_v48 }
 0x5ba   : > { %v1513_v47 = vmul.f32 1.442695, %v1512_v10  ;;  %v1516_v13 = vmul.f32 1.442695, %v1515_v16 }
 0x5bb   : > { %v1347_v29 = vpop.xlane.xlu1 %1346 }
 0x5bc   : > { %v1349_v15 = vmax.f32 %v1348_v37, %v1347_v29  ;;  %v1815_v37 = vpop.xlane.xlu0 %1814 }
 0x5be   : > { %v1350_v21 = vsub.f32 %v1339_v53, %v1349_v15  ;;  %v1353_v24 = vsub.f32 %v1343_v33, %v1349_v15  ;;  %v1356_v59 = vsub.f32 %v1347_v29, %v1349_v15  ;;  %v1519_v33 = vmul.f32 1.442695, %v1518_v18 }
 0x5bf   : > { %v5956_v53 = vadd.f32 %v5949_v11, %v1674_v23 }
 0x5c0   : > { %v1351_v28 = vmul.f32 1.442695, %v1350_v21  ;;  %v1354_v40 = vmul.f32 1.442695, %v1353_v24  ;;  %v1357_v42 = vmul.f32 1.442695, %v1356_v59 }
 0x5c1   : > { %vm1686_vm12 = vweird.f32 %v5956_v53 }
 0x5c2   : > { %4219 = vpow2.f32 %v1351_v28 }
 0x5c3   : > { %4221 = vpow2.f32 %v1354_v40 }
 0x5c4   : > { %4223 = vpow2.f32 %v1513_v47 }
 0x5c5   : > { %4225 = vpow2.f32 %v1516_v13 }
 0x5c6   : > { %4227 = vpow2.f32 %v1357_v42 }
 0x5c7   : > { %4229 = vpow2.f32 %v1519_v33 }
 0x5c8   : > { %v5951_v9 = vpop.eup %4219  ;;  %4231 = vrcp.f32 %v5956_v53 }
 0x5c9   : > { %v5953_v14 = vpop.eup %4221 }
 0x5ca   : > { %v4224_v57 = vpop.eup %4223  ;;  %v1359_v60 = vadd.f32 %v5953_v14, %v5951_v9 }
 0x5cb   : > { %v4226_v63 = vpop.eup %4225 }
 0x5cc   : > { %v5961_v4 = vpop.eup %4227  ;;  %v1521_v12 = vadd.f32 %v4226_v63, %v4224_v57 }
 0x5cd   : > { %v5964_v26 = vadd.f32 %v5961_v4, %v1359_v60  ;;  %v4230_v52 = vpop.eup %4229 }
 0x5ce   : > { %v5966_v35 = vadd.f32 %v4230_v52, %v1521_v12  ;;  %v5968_v15 = vpop.eup %4231 }
 0x5cf   : > { %4233 = vrcp.f32 %v5964_v26  ;;  %v1682_v48 = vmul.f32 %v5968_v15, %v5956_v53  ;;  %vm1687_vm7 = vweird.f32 %v5968_v15  ;;  %vm1371_vm4 = vweird.f32 %v5964_v26 }
 0x5d0   : > { %4235 = vrcp.f32 %v5966_v35  ;;  %vm6007_vm13 = vmor %vm1686_vm12, %vm1687_vm7  ;;  %vm1533_vm1 = vweird.f32 %v5966_v35 }
 0x5d1   : > { %v1683_v47 = vsub.f32 1.0, %v1682_v48 }
 0x5d3   : > { %v1684_v42 = vmul.f32 %v5968_v15, %v1683_v47 }
 0x5d5   : > { %v5975_v28 = vpop.eup %4233 }
 0x5d6   : > { %v5977_v59 = vpop.eup %4235  ;;  %v1367_v13 = vmul.f32 %v5975_v28, %v5964_v26  ;;  %vm1372_vm14 = vweird.f32 %v5975_v28 }
 0x5d7   : > { %vm1534_vm5 = vweird.f32 %v5977_v59  ;;  %vm6034_vm8 = vmor %vm1371_vm4, %vm1372_vm14 }
 0x5d8   : > { %v1368_v60 = vsub.f32 1.0, %v1367_v13  ;;  %vm6054_vm11 = vmor %vm1533_vm1, %vm1534_vm5 }
 0x5da   : > { %v1369_v47 = vmul.f32 %v5975_v28, %v1368_v60  ;;  %v1526_v60 = vmul.f32 %v4230_v52, %v5267_v27 }
 0x5f5   : > { %v1809_v5 = vpop.xlane.xlu1 %1808 }
 0x5f6   : > { %v1816_v29 = vmax.f32 %v1803_v34, %v1809_v5 }
 0x5f8   : > { %v1817_v39 = vmax.f32 %v1816_v29, %v1815_v37 }
 0x5fa   : > { %v1818_v6 = vsub.f32 %v1803_v34, %v1817_v39  ;;  %v1821_v30 = vsub.f32 %v1809_v5, %v1817_v39  ;;  %v1824_v3 = vsub.f32 %v1815_v37, %v1817_v39  ;;  %v1529_v34 = vmul.f32 %v5977_v59, %v5966_v35  ;;  %v7592_v39 = vld [vmem:[#allocation32_spill] sm:$0xff] }
 0x5fb   : > { %v1676_v37 = vmul.f32 %v4214_v22, %v5262_v20  ;;  %v1524_v22 = vmul.f32 %v4226_v63, %v7592_v39  ;;  %v1690_v63 = vand.u32 2147483647, %v5956_v53 }
 0x5fc   : > { %v1819_v21 = vmul.f32 1.442695, %v1818_v6  ;;  %v1822_v24 = vmul.f32 1.442695, %v1821_v30  ;;  %v1825_v1 = vmul.f32 1.442695, %v1824_v3  ;;  %v1677_v6 = vmul.f32 %v4216_v56, %v7592_v39 }
 0x5fd   : > { %v2132_v10 = vpop.xlane.xlu1 %2131  ;;  %v1692_v30 = vand.u32 2147483648, %v5956_v53  ;;  %v1530_v56 = vsub.f32 1.0, %v1529_v34  ;;  %v1537_v53 = vand.u32 2147483647, %v5966_v35  ;;  %vm1691_vm4 = vcmp.eq.f32.partialorder %v1690_v63, 8.507059e+37 }
 0x5fe   : > { %4237 = vpow2.f32 %v1819_v21  ;;  %v2133_v16 = vmul.f32 %v2132_v10, %v7591_v43 }
 0x5ff   : > { %4239 = vpow2.f32 %v1822_v24  ;;  %v5997_v24 = vadd.f32 %v5968_v15, %v1684_v42  ;;  %v6011_v42 = vadd.f32 %v1677_v6, %v1676_v37  ;;  %v6018_v34 = vor.u32 1.1754944e-38, %v1692_v30 }
 0x600   : > { %v2134_v40 = vadd.f32 1e-05, %v2133_v16  ;;  %4241 = vpow2.f32 %v1825_v1  ;;  %v1523_v1 = vmul.f32 %v4224_v57, %v5262_v20  ;;  %v1361_v37 = vmul.f32 %v5951_v9, %v5262_v20 }
 0x601   : > { %v1362_v6 = vmul.f32 %v5953_v14, %v7592_v39  ;;  %v1375_v30 = vand.u32 2147483647, %v5964_v26  ;;  %v1377_v9 = vand.u32 2147483648, %v5964_v26  ;;  %vm1538_vm12 = vcmp.eq.f32.partialorder %v1537_v53, 8.507059e+37 }
 0x602   : > { %4243 = vrsqrt.f32 %v2134_v40  ;;  %vm2141_vm6 = vweird.f32 %v2134_v40 }
 0x603   : > { %vm1376_vm10 = vcmp.eq.f32.partialorder %v1375_v30, 8.507059e+37 }
 0x604   : > { %v4238_v18 = vpop.eup %4237 }
 0x605   : > { %v4240_v23 = vpop.eup %4239  ;;  %v2075_v33 = vpop.xlane.xlu1 %2074 }
 0x606   : > { %v1827_v12 = vadd.f32 %v4240_v23, %v4238_v18  ;;  %v2076_v5 = vmul.f32 %v2075_v33, %v7591_v43  ;;  %v5985_v29 = vpop.eup %4241  ;;  %v1525_v33 = vadd.f32 %v1524_v22, %v1523_v1 }
 0x607   : > { %v1832_v1 = vmul.f32 %v5985_v29, %v5267_v27 }
 0x608   : > { %v4244_v3 = vpop.eup %4243  ;;  %v5991_v48 = vadd.f32 %v5985_v29, %v1827_v12  ;;  %v5994_v21 = vsub.f32 %v5946_v17, %v2076_v5  ;;  %v1531_v5 = vmul.f32 %v5977_v59, %v1530_v56 }
 0x609   : > { %v2136_v10 = vmul.f32 %v4244_v3, %v2134_v40  ;;  %vm2142_vm15 = vweird.f32 %v4244_v3  ;;  %v1539_v40 = vand.u32 2147483648, %v5966_v35 }
 0x60a   : > { %7593 = vst [vmem:[#allocation46_spill] sm:$0xff] %v5994_v21  ;;  %4245 = vrcp.f32 %v5991_v48  ;;  %v2078_v16 = vmul.f32 %v5994_v21, %v5994_v21  ;;  %v1532_v22 = vadd.f32 %v5977_v59, %v1531_v5  ;;  %vm2143_vm9 = vmor %vm2141_vm6, %vm2142_vm15  ;;  %vm1839_vm14 = vweird.f32 %v5991_v48 }
 0x60b   : > { %v2137_v17 = vmul.f32 %v4244_v3, %v2136_v10  ;;  %v1370_v10 = vadd.f32 %v5975_v28, %v1369_v47  ;;  %v1363_v47 = vadd.f32 %v1362_v6, %v1361_v37  ;;  %v1378_v37 = vor.u32 1.1754944e-38, %v1377_v9 }
 0x60c   : > { %2079 = vadd.xlane.f32.xlu1 %v2078_v16 }
 0x60d   : > { %v2138_v12 = vmul.f32 0.5, %v2137_v17  ;;  %v1364_v17 = vmul.f32 %v5961_v4, %v5267_v27  ;;  %v1374_v26 = vsel %vm6034_vm8, %v5975_v28, %v1370_v10  ;;  %v1845_v28 = vand.u32 2147483648, %v5991_v48  ;;  %v6145_v4 = vld [vmem:[#allocation7 + $0x270] sm:$0xff] }
 0x60e   : > { %v1527_v10 = vadd.f32 %v1526_v60, %v1525_v33 }
 0x60f   : > { %v2139_v16 = vsub.f32 1.5, %v2138_v12  ;;  %v1829_v12 = vmul.f32 %v4238_v18, %v5262_v20  ;;  %v1536_v20 = vsel %vm6054_vm11, %v5977_v59, %v1532_v22  ;;  %v1365_v35 = vadd.f32 %v1364_v17, %v1363_v47  ;;  %v6117_v47 = vld [vmem:[#allocation7 + $0x2d0] sm:$0xff]  ;;  %v6119_v17 = vld [vmem:[#allocation7 + $0x2d8] sm:$0xff] }
 0x610   : > { %v4246_v52 = vpop.eup %4245  ;;  %v1846_v59 = vor.u32 1.1754944e-38, %v1845_v28  ;;  %v6147_v28 = vld [vmem:[#allocation7 + $0x278] sm:$0xff] }
 0x611   : > { %v2140_v14 = vmul.f32 %v4244_v3, %v2139_v16  ;;  %v1835_v56 = vmul.f32 %v4246_v52, %v5991_v48  ;;  %v1830_v16 = vmul.f32 %v4240_v23, %v7592_v39  ;;  %vm1840_vm7 = vweird.f32 %v4246_v52 }
 0x612   : > { %v1379_v39 = vsel %vm1376_vm10, %v1378_v37, %v1374_v26  ;;  %vm1841_vm15 = vmor %vm1839_vm14, %vm1840_vm7  ;;  %v6126_v26 = vld [vmem:[#allocation7 + $0x2c0] sm:$0xff] }
 0x613   : > { %v2144_v57 = vsel %vm2143_vm9, %v4244_v3, %v2140_v14  ;;  %v1836_v5 = vsub.f32 1.0, %v1835_v56  ;;  %v1540_v3 = vor.u32 1.1754944e-38, %v1539_v40  ;;  %v1380_v14 = vmul.f32 %v1379_v39, %v1365_v35  ;;  %v6113_v56 = vld [vmem:[#allocation7 + $0x2f0] sm:$0xff]  ;;  %v6131_v40 = vld [vmem:[#allocation7 + $0x2a0] sm:$0xff]  ;;  %v6162_v39 = vld [vmem:[#allocation7 + $0x248] sm:$0xff] }
 0x614   : > { %v2145_v21 = vmul.f32 %v2144_v57, %v5935_v44  ;;  %v1843_v44 = vand.u32 2147483647, %v5991_v48  ;;  %v1831_v57 = vadd.f32 %v1830_v16, %v1829_v12  ;;  %v6133_v12 = vld [vmem:[#allocation7 + $0x2a8] sm:$0xff] }
 0x615   : > { %v1837_v18 = vmul.f32 %v4246_v52, %v1836_v5  ;;  %v1541_v9 = vsel %vm1538_vm12, %v1540_v3, %v1536_v20  ;;  %v6138_v16 = vld [vmem:[#allocation7 + $0x288] sm:$0xff]  ;;  %v6140_v5 = vld [vmem:[#allocation7 + $0x290] sm:$0xff] }
 0x616   : > { %v2146_v23 = vmul.f32 %v5700_v50, %v2145_v21  ;;  %vm1844_vm1 = vcmp.eq.f32.partialorder %v1843_v44, 8.507059e+37  ;;  %v1679_v50 = vmul.f32 %v5949_v11, %v5267_v27  ;;  %v1542_v48 = vmul.f32 %v1541_v9, %v1527_v10  ;;  %v6155_v44 = vld [vmem:[#allocation7 + $0x260] sm:$0xff]  ;;  %v6169_v35 = vld [vmem:[#allocation7 + $0x228] sm:$0xff]  ;;  %v6178_v10 = vld [vmem:[#allocation7 + $0x218] sm:$0xff] }
 0x617   : > { %v1838_v6 = vadd.f32 %v4246_v52, %v1837_v18  ;;  %v1833_v60 = vadd.f32 %v1832_v1, %v1831_v57  ;;  %v6153_v18 = vld [vmem:[#allocation7 + $0x258] sm:$0xff]  ;;  %v6171_v57 = vld [vmem:[#allocation7 + $0x230] sm:$0xff]  ;;  %v6182_v9 = vld [vmem:[#allocation7 + $0x200] sm:$0xff] }
 0x618   : > { %v2147_v30 = vadd.f32 %v5718_v51, %v2146_v23  ;;  %v7600_v51 = vsel %vm6007_vm13, %v5968_v15, %v5997_v24  ;;  %v1680_v29 = vadd.f32 %v1679_v50, %v6011_v42  ;;  %v2253_v27 = vsel %vm1246_vm0, %v1380_v14, %v1542_v48  ;;  %v6160_v23 = vld [vmem:[#allocation7 + $0x240] sm:$0xff]  ;;  %v6190_v14 = vld [vmem:[#allocation7 + $0x1e8] sm:$0xff]  ;;  %v6202_v50 = vld [vmem:[#allocation7 + $0x1b0] sm:$0xff] }
 0x619   : > { %v1842_v22 = vsel %vm1841_vm15, %v4246_v52, %v1838_v6  ;;  %v1694_v33 = vsel %vm1691_vm4, %v6018_v34, %v7600_v51  ;;  %v6111_v52 = vld [vmem:[#allocation7 + $0x2e8] sm:$0xff]  ;;  %v6173_v6 = vld [vmem:[#allocation7 + $0x210] sm:$0xff] }
 0x61a   : > { %2164 = vmatmul.f32.vlgmr.msrb.gmra.mxu0 %v2147_v30  ;;  %2184 = vmatmul.f32.vlgmr.msrb.gmra.mxu1 %v2147_v30  ;;  %v1847_v21 = vsel %vm1844_vm1, %v1846_v59, %v1842_v22  ;;  %v1695_v11 = vmul.f32 %v1694_v33, %v1680_v29  ;;  %v6188_v59 = vld [vmem:[#allocation7 + $0x1e0] sm:$0xff]  ;;  %v6195_v1 = vld [vmem:[#allocation7 + $0x1c8] sm:$0xff]  ;;  %v6197_v22 = vld [vmem:[#allocation7 + $0x1d0] sm:$0xff] }
 0x61b   : > { %2361 = vmatpush.msrb.mxu0 %v5780_v41  ;;  %v1848_v53 = vmul.f32 %v1847_v21, %v1833_v60  ;;  %2481 = vmatpush.msrb.mxu1 %v6111_v52  ;;  %v6204_v21 = vld [vmem:[#allocation7 + $0x1b8] sm:$0xff]  ;;  %v6212_v29 = vld [vmem:[#allocation7 + $0x1a0] sm:$0xff] }
 0x61c   : > { %v2254_v13 = vsel %vm1850_vm2, %v2253_v27, %v1695_v11  ;;  %v6210_v60 = vld [vmem:[#allocation7 + $0x198] sm:$0xff]  ;;  %v6217_v27 = vld [vmem:[#allocation7 + $0x180] sm:$0xff]  ;;  %v6219_v11 = vld [vmem:[#allocation7 + $0x188] sm:$0xff] }
 0x61d   : > { %2362 = vmatpush.msrb.mxu0 %v5782_v46  ;;  %v2255_v63 = vsel %vm1852_vm3, %v2254_v13, %v1848_v53  ;;  %2482 = vmatpush.msrb.mxu1 %v6117_v47 }
 0x61f   : > { %2363 = vmatpush.msrb.mxu0 %v5786_v49 }
 0x621   : > { %2364 = vmatpush.msrb.mxu0 %v5796_v55 }
 0x622   : > { %2272 = vmatmul.f32.vlgmr.msra.gmra.mxu0 %v2255_v63  ;;  %v2452_v63 = vld [vmem:[#allocation7 + $0x2f8] sm:$0xff] }
 0x623   : > { %2365 = vmatpush.msrb.mxu0 %v5802_v58 }
 0x625   : > { %2366 = vmatpush.msrb.mxu0 %v5806_v62 }
 0x627   : > { %2367 = vmatpush.msrb.mxu0 %v5813_v2 }
 0x629   : > { %2368 = vmatpush.msrb.mxu0 %v5822_v7  ;;  %v4363_v7 = vld [vmem:[%s7381_s12] ss:$0 sm:$0xff] }
 0x62b   : > { %2369 = vmatpush.msrb.mxu0 %v5825_v19 }
 0x62d   : > { %2370 = vmatpush.msrb.mxu0 %v5829_v8  ;;  %v7601_v8 = vld [vmem:[#allocation28_spill] sm:$0xff] }
 0x62f   : > { %2371 = vmatpush.msrb.mxu0 %v5833_v32 }
 0x631   : > { %2372 = vmatpush.msrb.mxu0 %v5837_v54 }
 0x633   : > { %2373 = vmatpush.msrb.mxu0 %v5841_v31 }
 0x635   : > { %2374 = vmatpush.msrb.mxu0 %v5845_v0 }
 0x637   : > { %2375 = vmatpush.msrb.mxu0 %v5849_v36 }
 0x639   : > { %2376 = vmatpush.msrb.mxu0 %v5853_v38 }
 0x63b   : > { %2541 = vmatpush.msra.mxu0 %v6111_v52 }
 0x63d   : > { %2542 = vmatpush.msra.mxu0 %v6117_v47 }
 0x67f   : > { %v2080_v37 = vpop.xlane.xlu1 %2079 }
 0x680   : > { %v2081_v20 = vmul.f32 %v2080_v37, %v7591_v43 }
 0x682   : > { %v6167_v3 = vadd.f32 1e-05, %v2081_v20  ;;  %v7602_v20 = vld [vmem:[#allocation46_spill] sm:$0xff] }
 0x684   : > { %4247 = vrsqrt.f32 %v6167_v3  ;;  %vm2089_vm9 = vweird.f32 %v6167_v3 }
 0x68a   : > { %v4248_v51 = vpop.eup %4247 }
 0x68b   : > { %v2084_v13 = vmul.f32 %v4248_v51, %v6167_v3  ;;  %vm2090_vm5 = vweird.f32 %v4248_v51  ;;  %v6249_v3 = vld [vmem:[%s7388_s19] ss:$0 sm:$0xff] }
 0x68c   : > { %vm2091_vm10 = vmor %vm2089_vm9, %vm2090_vm5 }
 0x697   : > { %v2165_v41 = vpop.f32.mrf.mxu0  ;;  %v2185_v46 = vpop.f32.mrf.mxu1 }
 0x698   : > { %v2166_v49 = vadd.f32 %v2165_v41, %v5883_v45  ;;  %v2186_v55 = vadd.f32 %v2185_v46, %v5877_v61  ;;  %v2085_v41 = vmul.f32 %v4248_v51, %v2084_v13 }
 0x69a   : > { %v2188_v58 = vmax.f32 %v2166_v49, 0.0  ;;  %v2189_v62 = vmax.f32 %v2186_v55, 0.0  ;;  %v2449_v49 = vld [vmem:[#allocation7 + $0x2e0] sm:$0xff] }
 0x69c   : > { %2206 = vmatmul.f32.vlgmr.msrb.gmra.mxu2 %v2188_v58  ;;  %2226 = vmatmul.f32.vlgmr.msrb.gmra.mxu3 %v2189_v62 }
 0x69d   : > { %2501 = vmatpush.msrb.mxu2 %v6113_v56  ;;  %2521 = vmatpush.msrb.mxu3 %v2452_v63 }
 0x69f   : > { %v2273_v2 = vpop.f32.mrf.mxu0  ;;  %2502 = vmatpush.msrb.mxu2 %v6119_v17  ;;  %2522 = vmatpush.msrb.mxu3 %v2449_v49 }
 0x6a0   : > { %v2274_v19 = vadd.f32 %v4363_v7, %v2273_v2  ;;  %v2086_v2 = vmul.f32 0.5, %v2085_v41  ;;  %v2446_v41 = vld [vmem:[#allocation7 + $0x2c8] sm:$0xff] }
 0x6a1   : > { %2503 = vmatpush.msrb.mxu2 %v6126_v26  ;;  %2523 = vmatpush.msrb.mxu3 %v2446_v41 }
 0x6a2   : > { %v2276_v32 = vadd.f32 %v2274_v19, %v7601_v8 }
 0x6a3   : > { %2504 = vmatpush.msrb.mxu2 %v6133_v12 }
 0x6a4   : > { %2277 = vadd.xlane.f32.xlu2 %v2276_v32 }
 0x6a5   : > { %2505 = vmatpush.msrb.mxu2 %v6140_v5 }
 0x6a7   : > { %2506 = vmatpush.msrb.mxu2 %v6147_v28 }
 0x6a9   : > { %2507 = vmatpush.msrb.mxu2 %v6155_v44 }
 0x6ab   : > { %2508 = vmatpush.msrb.mxu2 %v6162_v39 }
 0x6ad   : > { %2509 = vmatpush.msrb.mxu2 %v6171_v57 }
 0x6af   : > { %2510 = vmatpush.msrb.mxu2 %v6178_v10 }
 0x6b1   : > { %2511 = vmatpush.msrb.mxu2 %v6182_v9 }
 0x6b3   : > { %2512 = vmatpush.msrb.mxu2 %v6190_v14 }
 0x6b5   : > { %2513 = vmatpush.msrb.mxu2 %v6197_v22 }
 0x6b7   : > { %2514 = vmatpush.msrb.mxu2 %v6204_v21 }
 0x6b9   : > { %2515 = vmatpush.msrb.mxu2 %v6212_v29 }
 0x6bb   : > { %2516 = vmatpush.msrb.mxu2 %v6219_v11 }
 0x717   : > { %v2278_v54 = vpop.xlane.xlu2 %2277 }
 0x718   : > { %v2279_v31 = vmul.f32 %v2278_v54, %v7591_v43 }
 0x71a   : > { %v6103_v0 = vsub.f32 %v2276_v32, %v2279_v31  ;;  %v2087_v32 = vsub.f32 1.5, %v2086_v2  ;;  %v2434_v2 = vld [vmem:[#allocation7 + $0x268] sm:$0xff] }
 0x71c   : > { %v2281_v36 = vmul.f32 %v6103_v0, %v6103_v0 }
 0x71e   : > { %2282 = vadd.xlane.f32.xlu0 %v2281_v36  ;;  %v2088_v36 = vmul.f32 %v4248_v51, %v2087_v32  ;;  %v2416_v32 = vld [vmem:[#allocation7 + $0x1d8] sm:$0xff] }
 0x71f   : > { %v2207_v38 = vpop.f32.mrf.mxu2  ;;  %v2227_v24 = vpop.f32.mrf.mxu3 }
 0x720   : > { %v2208_v15 = vadd.f32 %v5940_v25, %v2207_v38  ;;  %v6124_v25 = vld [vmem:[#allocation7 + $0x2b8] sm:$0xff] }
 0x721   : > { %2483 = vmatpush.msrb.mxu1 %v6124_v25  ;;  %2543 = vmatpush.msra.mxu0 %v6124_v25 }
 0x722   : > { %v2228_v42 = vadd.f32 %v2227_v24, %v2208_v15 }
 0x723   : > { %2484 = vmatpush.msrb.mxu1 %v6131_v40  ;;  %2544 = vmatpush.msra.mxu0 %v6131_v40 }
 0x724   : > { %v6108_v34 = vadd.f32 %v2228_v42, %v2147_v30  ;;  %v6180_v30 = vld [vmem:[#allocation7 + $0x1f8] sm:$0xff]  ;;  %v2092_v42 = vsel %vm2091_vm10, %v4248_v51, %v2088_v36  ;;  %v6258_v51 = vld [vmem:[%s7603_s4] ss:$0 sm:$0xff]  ;;  %v2407_v36 = vld [vmem:[#allocation7 + $0x190] sm:$0xff] }
 0x725   : > { %2485 = vmatpush.msrb.mxu1 %v6138_v16  ;;  %2545 = vmatpush.msra.mxu0 %v6138_v16 }
 0x726   : > { %2231 = vadd.xlane.f32.xlu2 %v6108_v34 }
 0x727   : > { %2486 = vmatpush.msrb.mxu1 %v6145_v4  ;;  %2546 = vmatpush.msra.mxu0 %v6145_v4 }
 0x729   : > { %2487 = vmatpush.msrb.mxu1 %v6153_v18  ;;  %2547 = vmatpush.msra.mxu0 %v6153_v18 }
 0x72b   : > { %2488 = vmatpush.msrb.mxu1 %v6160_v23  ;;  %2548 = vmatpush.msra.mxu0 %v6160_v23 }
 0x72d   : > { %2489 = vmatpush.msrb.mxu1 %v6169_v35  ;;  %2549 = vmatpush.msra.mxu0 %v6169_v35 }
 0x72f   : > { %2490 = vmatpush.msrb.mxu1 %v6173_v6  ;;  %2550 = vmatpush.msra.mxu0 %v6173_v6 }
 0x731   : > { %2491 = vmatpush.msrb.mxu1 %v6180_v30  ;;  %2551 = vmatpush.msra.mxu0 %v6180_v30 }
 0x733   : > { %2492 = vmatpush.msrb.mxu1 %v6188_v59  ;;  %2552 = vmatpush.msra.mxu0 %v6188_v59 }
 0x735   : > { %2493 = vmatpush.msrb.mxu1 %v6195_v1  ;;  %2553 = vmatpush.msra.mxu0 %v6195_v1 }
 0x737   : > { %2494 = vmatpush.msrb.mxu1 %v6202_v50  ;;  %2554 = vmatpush.msra.mxu0 %v6202_v50 }
 0x739   : > { %2495 = vmatpush.msrb.mxu1 %v6210_v60  ;;  %2555 = vmatpush.msra.mxu0 %v6210_v60 }
 0x73b   : > { %2496 = vmatpush.msrb.mxu1 %v6217_v27  ;;  %2556 = vmatpush.msra.mxu0 %v6217_v27 }
 0x791   : > { %v2283_v48 = vpop.xlane.xlu0 %2282 }
 0x792   : > { %v2284_v33 = vmul.f32 %v2283_v48, %v7591_v43  ;;  %v2093_v48 = vmul.f32 %v2092_v42, %v7602_v20 }
 0x794   : > { %v2285_v53 = vadd.f32 1e-05, %v2284_v33  ;;  %v4365_v33 = vld [vmem:[%s7387_s18] ss:$0 sm:$0xff] }
 0x796   : > { %4249 = vrsqrt.f32 %v2285_v53  ;;  %vm2292_vm6 = vweird.f32 %v2285_v53 }
 0x799   : > { %v2232_v46 = vpop.xlane.xlu2 %2231 }
 0x79a   : > { %v2233_v55 = vmul.f32 %v2232_v46, %v7591_v43  ;;  %v2443_v46 = vld [vmem:[#allocation7 + $0x2b0] sm:$0xff] }
 0x79b   : > { %2524 = vmatpush.msrb.mxu3 %v2443_v46 }
 0x79c   : > { %v4250_v58 = vpop.eup %4249  ;;  %v6231_v62 = vsub.f32 %v6108_v34, %v2233_v55  ;;  %v4364_v34 = vld [vmem:[%s7386_s17] ss:$0 sm:$0xff]  ;;  %v2440_v55 = vld [vmem:[#allocation7 + $0x298] sm:$0xff] }
 0x79d   : > { %v2287_v7 = vmul.f32 %v4250_v58, %v2285_v53  ;;  %vm2293_vm13 = vweird.f32 %v4250_v58  ;;  %2525 = vmatpush.msrb.mxu3 %v2440_v55 }
 0x79e   : > { %v2235_v19 = vmul.f32 %v6231_v62, %v6231_v62  ;;  %vm2294_vm8 = vmor %vm2292_vm6, %vm2293_vm13 }
 0x79f   : > { %v2288_v8 = vmul.f32 %v4250_v58, %v2287_v7  ;;  %v2425_v7 = vld [vmem:[#allocation7 + $0x220] sm:$0xff] }
 0x7a0   : > { %2236 = vadd.xlane.f32.xlu2 %v2235_v19  ;;  %v2422_v19 = vld [vmem:[#allocation7 + $0x208] sm:$0xff] }
 0x7a1   : > { %v2289_v54 = vmul.f32 0.5, %v2288_v8  ;;  %v2419_v8 = vld [vmem:[#allocation7 + $0x1f0] sm:$0xff] }
 0x7a3   : > { %v2290_v31 = vsub.f32 1.5, %v2289_v54  ;;  %v2413_v54 = vld [vmem:[#allocation7 + $0x1c0] sm:$0xff] }
 0x7a5   : > { %v2291_v38 = vmul.f32 %v4250_v58, %v2290_v31  ;;  %v2410_v31 = vld [vmem:[#allocation7 + $0x1a8] sm:$0xff] }
 0x7a7   : > { %v2295_v15 = vsel %vm2294_vm8, %v4250_v58, %v2291_v38  ;;  %v2437_v58 = vld [vmem:[#allocation7 + $0x280] sm:$0xff] }
 0x7a8   : > { %v2296_v24 = vmul.f32 %v2295_v15, %v6103_v0  ;;  %v2097_v0 = vmul.f32 %v6249_v3, %v2093_v48  ;;  %2526 = vmatpush.msrb.mxu3 %v2437_v58 }
 0x7aa   : > { %v2297_v37 = vmul.f32 %v4364_v34, %v2296_v24  ;;  %v6263_v13 = vadd.f32 %v6258_v51, %v2097_v0  ;;  %2527 = vmatpush.msrb.mxu3 %v2434_v2 }
 0x7ac   : > { %v6244_v53 = vadd.f32 %v4365_v33, %v2297_v37 }
 0x7ae   : > { %2315 = vmatmul.f32.vlgmr.msra.gmra.mxu1 %v6244_v53  ;;  %2335 = vmatmul.f32.vlgmr.msra.gmra.mxu2 %v6244_v53 }
 0x7af   : > { %2561 = vmatpush.msra.mxu1 %v6113_v56  ;;  %2581 = vmatpush.msra.mxu2 %v2452_v63 }
 0x7b1   : > { %2562 = vmatpush.msra.mxu1 %v6119_v17  ;;  %2582 = vmatpush.msra.mxu2 %v2449_v49 }
 0x7b3   : > { %2563 = vmatpush.msra.mxu1 %v6126_v26  ;;  %2583 = vmatpush.msra.mxu2 %v2446_v41 }
 0x7b5   : > { %2564 = vmatpush.msra.mxu1 %v6133_v12  ;;  %2584 = vmatpush.msra.mxu2 %v2443_v46 }
 0x7b6   : > { %2497 = vmatmul.f32.vlgmr.msrb.gmra.mxu1 %v6263_v13  ;;  %2517 = vmatmul.f32.vlgmr.msrb.gmra.mxu2 %v6263_v13 }
 0x7b7   : > { %2565 = vmatpush.msra.mxu1 %v6140_v5  ;;  %2585 = vmatpush.msra.mxu2 %v2440_v55 }
 0x7b9   : > { %2566 = vmatpush.msra.mxu1 %v6147_v28  ;;  %2586 = vmatpush.msra.mxu2 %v2437_v58 }
 0x7bb   : > { %2567 = vmatpush.msra.mxu1 %v6155_v44  ;;  %2587 = vmatpush.msra.mxu2 %v2434_v2 }
 0x7bd   : > { %2568 = vmatpush.msra.mxu1 %v6162_v39 }
 0x7bf   : > { %2569 = vmatpush.msra.mxu1 %v6171_v57 }
 0x7c1   : > { %2570 = vmatpush.msra.mxu1 %v6178_v10 }
 0x7c3   : > { %2571 = vmatpush.msra.mxu1 %v6182_v9 }
 0x7c5   : > { %2572 = vmatpush.msra.mxu1 %v6190_v14 }
 0x7c7   : > { %2573 = vmatpush.msra.mxu1 %v6197_v22 }
 0x7c9   : > { %2574 = vmatpush.msra.mxu1 %v6204_v21 }
 0x7cb   : > { %2575 = vmatpush.msra.mxu1 %v6212_v29 }
 0x7cd   : > { %2576 = vmatpush.msra.mxu1 %v6219_v11 }
 0x7cf   : > { %2641 = vmatpush.msrb.mxu1 %v2452_v63  ;;  %v2431_v63 = vld [vmem:[#allocation7 + $0x250] sm:$0xff] }
 0x7d0   : > { %2588 = vmatpush.msra.mxu2 %v2431_v63  ;;  %2528 = vmatpush.msrb.mxu3 %v2431_v63 }
 0x7d1   : > { %2642 = vmatpush.msrb.mxu1 %v2449_v49  ;;  %v2428_v49 = vld [vmem:[#allocation7 + $0x238] sm:$0xff] }
 0x7d2   : > { %2589 = vmatpush.msra.mxu2 %v2428_v49  ;;  %2529 = vmatpush.msrb.mxu3 %v2428_v49 }
 0x7d3   : > { %2643 = vmatpush.msrb.mxu1 %v2446_v41 }
 0x7d4   : > { %2590 = vmatpush.msra.mxu2 %v2425_v7  ;;  %2530 = vmatpush.msrb.mxu3 %v2425_v7 }
 0x7d5   : > { %2644 = vmatpush.msrb.mxu1 %v2443_v46 }
 0x7d6   : > { %2591 = vmatpush.msra.mxu2 %v2422_v19  ;;  %2531 = vmatpush.msrb.mxu3 %v2422_v19 }
 0x7d7   : > { %2645 = vmatpush.msrb.mxu1 %v2440_v55 }
 0x7d8   : > { %2592 = vmatpush.msra.mxu2 %v2419_v8  ;;  %2532 = vmatpush.msrb.mxu3 %v2419_v8 }
 0x7d9   : > { %2646 = vmatpush.msrb.mxu1 %v2437_v58 }
 0x7da   : > { %2593 = vmatpush.msra.mxu2 %v2416_v32  ;;  %2533 = vmatpush.msrb.mxu3 %v2416_v32 }
 0x7db   : > { %2647 = vmatpush.msrb.mxu1 %v2434_v2 }
 0x7dc   : > { %2594 = vmatpush.msra.mxu2 %v2413_v54  ;;  %2534 = vmatpush.msrb.mxu3 %v2413_v54 }
 0x7dd   : > { %2648 = vmatpush.msrb.mxu1 %v2431_v63 }
 0x7de   : > { %2595 = vmatpush.msra.mxu2 %v2410_v31  ;;  %2535 = vmatpush.msrb.mxu3 %v2410_v31 }
 0x7df   : > { %2649 = vmatpush.msrb.mxu1 %v2428_v49  ;;  %v6290_v49 = vld [vmem:[%s7379_s10 + $0x3] sm:$0x7] }
 0x7e0   : > { %2596 = vmatpush.msra.mxu2 %v2407_v36  ;;  %2536 = vmatpush.msrb.mxu3 %v2407_v36 }
 0x7e1   : > { %2650 = vmatpush.msrb.mxu1 %v2425_v7  ;;  %v6297_v7 = vperm.slane %v6290_v49, 0 }
 0x7e3   : > { %2651 = vmatpush.msrb.mxu1 %v2422_v19 }
 0x7e5   : > { %2652 = vmatpush.msrb.mxu1 %v2419_v8 }
 0x7e7   : > { %2653 = vmatpush.msrb.mxu1 %v2416_v32 }
 0x7e9   : > { %2654 = vmatpush.msrb.mxu1 %v2413_v54  ;;  %v6303_v54 = vperm.slane %v6290_v49, 1 }
 0x7eb   : > { %2655 = vmatpush.msrb.mxu1 %v2410_v31 }
 0x7ed   : > { %2656 = vmatpush.msrb.mxu1 %v2407_v36 }
 0x813   : > { %v2237_v38 = vpop.xlane.xlu2 %2236 }
 0x814   : > { %v2238_v15 = vmul.f32 %v2237_v38, %v7591_v43 }
 0x816   : > { %v2239_v24 = vadd.f32 1e-05, %v2238_v15 }
 0x818   : > { %4251 = vrsqrt.f32 %v2239_v24  ;;  %vm2246_vm7 = vweird.f32 %v2239_v24 }
 0x81e   : > { %v4252_v42 = vpop.eup %4251 }
 0x81f   : > { %v2241_v34 = vmul.f32 %v4252_v42, %v2239_v24  ;;  %vm2247_vm11 = vweird.f32 %v4252_v42 }
 0x820   : > { %vm2248_vm12 = vmor %vm2246_vm7, %vm2247_vm11 }
 0x821   : > { %v2242_v37 = vmul.f32 %v4252_v42, %v2241_v34 }
 0x823   : > { %v2243_v20 = vmul.f32 0.5, %v2242_v37 }
 0x825   : > { %v2244_v48 = vsub.f32 1.5, %v2243_v20 }
 0x827   : > { %v2245_v33 = vmul.f32 %v4252_v42, %v2244_v48 }
 0x829   : > { %v2249_v0 = vsel %vm2248_vm12, %v4252_v42, %v2245_v33 }
 0x82a   : > { %v2250_v41 = vmul.f32 %v2249_v0, %v6231_v62 }
 0x82b   : > { %v2316_v46 = vpop.f32.mrf.mxu1 }
 0x82c   : > { %v2317_v55 = vadd.f32 %v2316_v46, %v5883_v45  ;;  %v2251_v58 = vmul.f32 %v6249_v3, %v2250_v41 }
 0x82e   : > { %v2339_v2 = vmax.f32 %v2317_v55, 0.0  ;;  %v6285_v63 = vadd.f32 %v6258_v51, %v2251_v58 }
 0x830   : > { %7604 = vst [vmem:[#allocation47_spill] sm:$0xff] %v6285_v63  ;;  %2357 = vmatmul.f32.vlgmr.msra.gmra.mxu3 %v2339_v2  ;;  %2577 = vmatmul.f32.vlgmr.msra.gmra.mxu1 %v6285_v63 }
 0x831   : > { %2597 = vmatmul.f32.vlgmr.msra.gmra.mxu2 %v6285_v63  ;;  %v2336_v62 = vpop.f32.mrf.mxu2  ;;  %2601 = vmatpush.msra.mxu3 %v6111_v52 }
 0x832   : > { %v2337_v45 = vadd.f32 %v2336_v62, %v5877_v61 }
 0x833   : > { %v2498_v19 = vpop.f32.mrf.mxu1  ;;  %2602 = vmatpush.msra.mxu3 %v6117_v47 }
 0x834   : > { %v2340_v8 = vmax.f32 %v2337_v45, 0.0  ;;  %v2499_v32 = vadd.f32 %v2498_v19, %v6297_v7 }
 0x835   : > { %2603 = vmatpush.msra.mxu3 %v6124_v25 }
 0x836   : > { %2377 = vmatmul.f32.vlgmr.msrb.gmra.mxu0 %v2340_v8  ;;  %v6310_v52 = vmul.f32 0.17677669, %v2499_v32 }
 0x837   : > { %2621 = vmatpush.msrb.mxu0 %v6113_v56  ;;  %2604 = vmatpush.msra.mxu3 %v6131_v40 }
 0x838   : > { %2537 = vmatmul.f32.vlgmr.msrb.gmra.mxu3 %v6263_v13 }
 0x839   : > { %v2518_v61 = vpop.f32.mrf.mxu2  ;;  %2622 = vmatpush.msrb.mxu0 %v6119_v17  ;;  %2605 = vmatpush.msra.mxu3 %v6138_v16 }
 0x83a   : > { %v6313_v47 = vadd.f32 %v2518_v61, %v6303_v54 }
 0x83b   : > { %2623 = vmatpush.msrb.mxu0 %v6126_v26  ;;  %2606 = vmatpush.msra.mxu3 %v6145_v4 }
 0x83c   : > { %v2664_v56 = vmul.f32 %v6310_v52, %v6313_v47 }
 0x83d   : > { %2624 = vmatpush.msrb.mxu0 %v6133_v12  ;;  %2607 = vmatpush.msra.mxu3 %v6153_v18  ;;  %v4366_v12 = vld [vmem:[%s7385_s16] ss:$0 sm:$0xff] }
 0x83e   : > { %2800 = vrot.lane.b32.xlu1 %v2664_v56, %s4658_s0  ;;  %2557 = vmatmul.f32.vlgmr.msra.gmra.mxu0 %v6285_v63  ;;  %v6792_v63 = vld [vmem:[#allocation10 + $0x128] sm:$0xff] }
 0x83f   : > { %2625 = vmatpush.msrb.mxu0 %v6140_v5  ;;  %2608 = vmatpush.msra.mxu3 %v6160_v23  ;;  %v2665_v23 = vsel %vm1246_vm0, %v2664_v56, 0.0  ;;  %7629 = vst [vmem:[#allocation37_spill] sm:$0xff] %v6792_v63 }
 0x841   : > { %2626 = vmatpush.msrb.mxu0 %v6147_v28  ;;  %2609 = vmatpush.msra.mxu3 %v6169_v35 }
 0x843   : > { %2627 = vmatpush.msrb.mxu0 %v6155_v44  ;;  %2610 = vmatpush.msra.mxu3 %v6173_v6 }
 0x845   : > { %2628 = vmatpush.msrb.mxu0 %v6162_v39  ;;  %2611 = vmatpush.msra.mxu3 %v6180_v30 }
 0x847   : > { %2629 = vmatpush.msrb.mxu0 %v6171_v57  ;;  %2612 = vmatpush.msra.mxu3 %v6188_v59 }
 0x849   : > { %2630 = vmatpush.msrb.mxu0 %v6178_v10  ;;  %2613 = vmatpush.msra.mxu3 %v6195_v1 }
 0x84b   : > { %2631 = vmatpush.msrb.mxu0 %v6182_v9  ;;  %2614 = vmatpush.msra.mxu3 %v6202_v50 }
 0x84d   : > { %2632 = vmatpush.msrb.mxu0 %v6190_v14  ;;  %2615 = vmatpush.msra.mxu3 %v6210_v60 }
 0x84f   : > { %2633 = vmatpush.msrb.mxu0 %v6197_v22  ;;  %2616 = vmatpush.msra.mxu3 %v6217_v27 }
 0x851   : > { %2634 = vmatpush.msrb.mxu0 %v6204_v21 }
 0x853   : > { %2635 = vmatpush.msrb.mxu0 %v6212_v29 }
 0x855   : > { %2636 = vmatpush.msrb.mxu0 %v6219_v11 }
 0x8ad   : > { %v2578_v17 = vpop.f32.mrf.mxu1 }
 0x8ae   : > { %v6345_v25 = vadd.f32 %v2578_v17, %v6303_v54 }
 0x8b0   : > { %v6349_v26 = vmul.f32 %v6310_v52, %v6345_v25  ;;  %v2801_v18 = vpop.permute.xlu1 %2800 }
 0x8b1   : > { %v2803_v44 = vsel %vm1246_vm0, %v2801_v18, 0.0 }
 0x8b2   : > { %2967 = vrot.lane.b32.xlu1 %v6349_v26, %s4657_s9  ;;  %2807 = vrot.lane.b32.xlu2 %v6349_v26, %s4658_s0  ;;  %v2669_v45 = vsel %vm1246_vm0, %v6349_v26, 0.0 }
 0x8b3   : > { %v2358_v40 = vpop.f32.mrf.mxu3  ;;  %v2378_v5 = vpop.f32.mrf.mxu0 }
 0x8b4   : > { %v2359_v16 = vadd.f32 %v4366_v12, %v2358_v40 }
 0x8b6   : > { %v2379_v4 = vadd.f32 %v2378_v5, %v2359_v16 }
 0x8b8   : > { %v2381_v28 = vadd.f32 %v2379_v4, %v6244_v53 }
 0x8ba   : > { %2382 = vadd.xlane.f32.xlu0 %v2381_v28  ;;  %3120 = vrot.lane.b32.xlu1 %v6349_v26, %s4656_s24 }
 0x8bb   : > { %3114 = vrot.lane.b32.xlu2 %v2664_v56, %s4656_s24  ;;  %v2558_v36 = vpop.f32.mrf.mxu0  ;;  %v6375_v38 = vpop.f32.mrf.mxu3 }
 0x8bc   : > { %v2559_v41 = vadd.f32 %v2558_v36, %v6297_v7  ;;  %v6436_v36 = vld [vmem:[#allocation8 + $0xe0] sm:$0xff] }
 0x8be   : > { %v2662_v46 = vmul.f32 0.17677669, %v2559_v41  ;;  %v6452_v41 = vld [vmem:[#allocation8 + $0xc8] sm:$0xff] }
 0x8c0   : > { %v6392_v55 = vmul.f32 %v2662_v46, %v6313_v47  ;;  %v6405_v61 = vmul.f32 %v2662_v46, %v6345_v25 }
 0x8c2   : > { %v2714_v12 = vsel %vm1246_vm0, %v6405_v61, 0.0 }
 0x8e4   : > { %2804 = vadd.xlane.f32.xlu2 %v2803_v44  ;;  %2666 = vadd.xlane.f32.xlu1 %v2665_v23 }
 0x90c   : > { %v2808_v39 = vpop.permute.xlu2 %2807 }
 0x90d   : > { %v2810_v35 = vsel %vm1246_vm0, %v2808_v39, 0.0 }
 0x90e   : > { %2811 = vadd.xlane.f32.xlu1 %v2810_v35 }
 0x915   : > { %v3115_v2 = vpop.permute.xlu2 %3114 }
 0x916   : > { %v3117_v62 = vsel %vm1246_vm0, %v3115_v2, 0.0 }
 0x924   : > { %v2968_v15 = vpop.permute.xlu1 %2967 }
 0x925   : > { %v2970_v58 = vsel %vm1246_vm0, %v2968_v15, 0.0 }
 0x92c   : > { %v3121_v48 = vpop.permute.xlu1 %3120 }
 0x92d   : > { %v2383_v57 = vpop.xlane.xlu0 %2382  ;;  %v3123_v0 = vsel %vm1246_vm0, %v3121_v48, 0.0 }
 0x92e   : > { %v2384_v6 = vmul.f32 %v2383_v57, %v7591_v43 }
 0x930   : > { %v2385_v10 = vsub.f32 %v2381_v28, %v2384_v6 }
 0x932   : > { %v2386_v30 = vmul.f32 %v2385_v10, %v2385_v10 }
 0x934   : > { %2387 = vadd.xlane.f32.xlu0 %v2386_v30 }
 0x948   : > { %2961 = vrot.lane.b32.xlu0 %v2664_v56, %s4657_s9 }
 0x957   : > { %v6401_v8 = vpop.xlane.xlu2 %2804  ;;  %v2667_v16 = vpop.xlane.xlu1 %2666 }
 0x981   : > { %v6424_v4 = vpop.xlane.xlu1 %2811 }
 0x9a7   : > { %v2388_v9 = vpop.xlane.xlu0 %2387 }
 0x9a8   : > { %v2389_v59 = vmul.f32 %v2388_v9, %v7591_v43 }
 0x9aa   : > { %v2390_v14 = vadd.f32 1e-05, %v2389_v59 }
 0x9ac   : > { %4253 = vrsqrt.f32 %v2390_v14  ;;  %vm2397_vm15 = vweird.f32 %v2390_v14 }
 0x9b2   : > { %v4254_v1 = vpop.eup %4253 }
 0x9b3   : > { %v2392_v22 = vmul.f32 %v4254_v1, %v2390_v14  ;;  %vm2398_vm14 = vweird.f32 %v4254_v1 }
 0x9b4   : > { %vm2399_vm1 = vmor %vm2397_vm15, %vm2398_vm14 }
 0x9b5   : > { %v2393_v50 = vmul.f32 %v4254_v1, %v2392_v22 }
 0x9b7   : > { %v2394_v21 = vmul.f32 0.5, %v2393_v50  ;;  %v6427_v50 = vld [vmem:[#allocation8 + $0xf8] sm:$0xff] }
 0x9b8   : > { %3273 = vmatpush.msrb.mxu2 %v6427_v50 }
 0x9b9   : > { %v2395_v60 = vsub.f32 1.5, %v2394_v21 }
 0x9ba   : > { %v2962_v19 = vpop.permute.xlu0 %2961 }
 0x9bb   : > { %v2396_v29 = vmul.f32 %v4254_v1, %v2395_v60  ;;  %v6430_v60 = vld [vmem:[#allocation8 + $0xf0] sm:$0xff] }
 0x9bc   : > { %3274 = vmatpush.msrb.mxu2 %v6430_v60 }
 0x9bd   : > { %v2400_v27 = vsel %vm2399_vm1, %v4254_v1, %v2396_v29 }
 0x9be   : > { %v2401_v11 = vmul.f32 %v2400_v27, %v2385_v10 }
 0x9c0   : > { %v2402_v53 = vmul.f32 %v6249_v3, %v2401_v11  ;;  %v6433_v11 = vld [vmem:[#allocation8 + $0xe8] sm:$0xff] }
 0x9c1   : > { %3275 = vmatpush.msrb.mxu2 %v6433_v11 }
 0x9c2   : > { %v6370_v31 = vadd.f32 %v6258_v51, %v2402_v53 }
 0x9c3   : > { %3276 = vmatpush.msrb.mxu2 %v6436_v36 }
 0x9c4   : > { %7605 = vst [vmem:[#allocation48_spill] sm:$0xff] %v6370_v31  ;;  %2617 = vmatmul.f32.vlgmr.msra.gmra.mxu3 %v6370_v31  ;;  %2637 = vmatmul.f32.vlgmr.msrb.gmra.mxu0 %v6370_v31 }
 0x9c5   : > { %2657 = vmatmul.f32.vlgmr.msrb.gmra.mxu1 %v6370_v31 }
 0xa41   : > { %v2638_v24 = vpop.f32.mrf.mxu0 }
 0xa42   : > { %v2639_v42 = vadd.f32 %v2638_v24, %v6303_v54 }
 0xa44   : > { %v2672_v34 = vmul.f32 %v6310_v52, %v2639_v42  ;;  %v2717_v17 = vmul.f32 %v2662_v46, %v2639_v42 }
 0xa46   : > { %3126 = vrot.lane.b32.xlu2 %v2672_v34, %s4656_s24  ;;  %2814 = vrot.lane.b32.xlu0 %v2672_v34, %s4658_s0  ;;  %v2673_v3 = vsel %vm1246_vm0, %v2672_v34, 0.0 }
 0xa47   : > { %v2618_v51 = vpop.f32.mrf.mxu3  ;;  %2674 = vadd.xlane.f32.xlu1 %v2673_v3  ;;  %v6442_v3 = vld [vmem:[#allocation8 + $0xd8] sm:$0xff] }
 0xa48   : > { %v2619_v37 = vadd.f32 %v2618_v51, %v6297_v7  ;;  %v2964_v7 = vsel %vm1246_vm0, %v2962_v19, 0.0  ;;  %3277 = vmatpush.msrb.mxu2 %v6442_v3 }
 0xa4a   : > { %v6383_v20 = vmul.f32 0.17677669, %v2619_v37 }
 0xa4c   : > { %v6386_v33 = vmul.f32 %v6383_v20, %v2639_v42 }
 0xa4e   : > { %2973 = vrot.lane.b32.xlu0 %v2672_v34, %s4657_s9  ;;  %v2718_v34 = vsel %vm1246_vm0, %v2717_v17, 0.0 }
 0xa4f   : > { %3124 = vadd.xlane.f32.xlu1 %v3123_v0  ;;  %v6449_v0 = vld [vmem:[#allocation8 + $0xd0] sm:$0xff] }
 0xa50   : > { %3278 = vmatpush.msrb.mxu2 %v6449_v0 }
 0xa52   : > { %3279 = vmatpush.msrb.mxu2 %v6452_v41 }
 0xa68   : > { %3012 = vrot.lane.b32.xlu1 %v6392_v55, %s4657_s9 }
 0xa6f   : > { %2971 = vadd.xlane.f32.xlu2 %v2970_v58  ;;  %v2820_v58 = vmax.f32 %v6401_v8, %v6424_v4 }
 0xa77   : > { %3118 = vadd.xlane.f32.xlu2 %v3117_v62  ;;  %v6459_v62 = vld [vmem:[#allocation8 + $0xc0] sm:$0xff] }
 0xa78   : > { %2670 = vadd.xlane.f32.xlu0 %v2669_v45  ;;  %3280 = vmatpush.msrb.mxu2 %v6459_v62 }
 0xa80   : > { %2965 = vadd.xlane.f32.xlu0 %v2964_v7 }
 0xaa0   : > { %v3127_v32 = vpop.permute.xlu2 %3126 }
 0xaa1   : > { %v3129_v54 = vsel %vm1246_vm0, %v3127_v32, 0.0  ;;  %v6464_v32 = vld [vmem:[#allocation8 + $0xb8] sm:$0xff] }
 0xaa2   : > { %3130 = vadd.xlane.f32.xlu2 %v3129_v54  ;;  %3281 = vmatpush.msrb.mxu2 %v6464_v32 }
 0xab8   : > { %v2815_v52 = vpop.permute.xlu0 %2814 }
 0xab9   : > { %v2817_v56 = vsel %vm1246_vm0, %v2815_v52, 0.0 }
 0xaba   : > { %2818 = vadd.xlane.f32.xlu0 %v2817_v56  ;;  %2861 = vrot.lane.b32.xlu2 %v6405_v61, %s4658_s0  ;;  %v2675_v44 = vpop.xlane.xlu1 %2674  ;;  %v6472_v56 = vld [vmem:[#allocation8 + $0xb0] sm:$0xff] }
 0xabb   : > { %3282 = vmatpush.msrb.mxu2 %v6472_v56 }
 0xac0   : > { %v2974_v26 = vpop.permute.xlu0 %2973 }
 0xac1   : > { %v2976_v40 = vsel %vm1246_vm0, %v2974_v26, 0.0 }
 0xac2   : > { %2977 = vadd.xlane.f32.xlu0 %v2976_v40  ;;  %2868 = vrot.lane.b32.xlu2 %v2717_v17, %s4658_s0  ;;  %v3125_v6 = vpop.xlane.xlu1 %3124 }
 0xaca   : > { %3024 = vrot.lane.b32.xlu2 %v2717_v17, %s4657_s9 }
 0xad6   : > { %2854 = vrot.lane.b32.xlu0 %v6392_v55, %s4658_s0 }
 0xade   : > { %3018 = vrot.lane.b32.xlu0 %v6405_v61, %s4657_s9 }
 0xae2   : > { %v6422_v5 = vpop.xlane.xlu2 %2971 }
 0xae6   : > { %3165 = vrot.lane.b32.xlu0 %v6392_v55, %s4656_s24 }
 0xaea   : > { %v3119_v28 = vpop.xlane.xlu2 %3118 }
 0xaeb   : > { %v2671_v18 = vpop.xlane.xlu0 %2670  ;;  %v3132_v30 = vmax.f32 %v3119_v28, %v3125_v6 }
 0xaec   : > { %v2676_v23 = vmax.f32 %v2667_v16, %v2671_v18 }
 0xaee   : > { %3177 = vrot.lane.b32.xlu0 %v2717_v17, %s4656_s24  ;;  %v2677_v39 = vmax.f32 %v2676_v23, %v2675_v44 }
 0xaf0   : > { %v2678_v57 = vsub.f32 %v2667_v16, %v2677_v39  ;;  %v2681_v10 = vsub.f32 %v2671_v18, %v2677_v39  ;;  %v2684_v21 = vsub.f32 %v2675_v44, %v2677_v39  ;;  %v6478_v16 = vld [vmem:[#allocation8 + $0xa8] sm:$0xff]  ;;  %v6485_v39 = vld [vmem:[#allocation8 + $0xa0] sm:$0xff] }
 0xaf1   : > { %3283 = vmatpush.msrb.mxu2 %v6478_v16 }
 0xaf2   : > { %v2679_v9 = vmul.f32 1.442695, %v2678_v57  ;;  %v2682_v1 = vmul.f32 1.442695, %v2681_v10  ;;  %v2685_v53 = vmul.f32 1.442695, %v2684_v21 }
 0xaf3   : > { %2715 = vadd.xlane.f32.xlu2 %v2714_v12  ;;  %v6438_v15 = vpop.xlane.xlu0 %2965  ;;  %3284 = vmatpush.msrb.mxu2 %v6485_v39  ;;  %v6494_v10 = vld [vmem:[#allocation8 + $0x90] sm:$0xff] }
 0xaf4   : > { %4255 = vpow2.f32 %v2679_v9 }
 0xaf5   : > { %4257 = vpow2.f32 %v2682_v1  ;;  %v6502_v1 = vld [vmem:[#allocation8 + $0x88] sm:$0xff] }
 0xaf6   : > { %4259 = vpow2.f32 %v2685_v53 }
 0xafa   : > { %v6444_v51 = vpop.eup %4255 }
 0xafb   : > { %v6447_v37 = vpop.eup %4257 }
 0xafc   : > { %v2687_v46 = vadd.f32 %v6447_v37, %v6444_v51  ;;  %v6462_v19 = vpop.eup %4259 }
 0xafe   : > { %v6469_v52 = vadd.f32 %v6462_v19, %v2687_v46 }
 0xb00   : > { %vm2699_vm13 = vweird.f32 %v6469_v52 }
 0xb15   : > { %v3131_v35 = vpop.xlane.xlu2 %3130 }
 0xb16   : > { %v3133_v59 = vmax.f32 %v3132_v30, %v3131_v35 }
 0xb18   : > { %v3134_v29 = vsub.f32 %v3119_v28, %v3133_v59  ;;  %v3137_v27 = vsub.f32 %v3125_v6, %v3133_v59  ;;  %v3140_v48 = vsub.f32 %v3131_v35, %v3133_v59 }
 0xb1a   : > { %v3135_v24 = vmul.f32 1.442695, %v3134_v29  ;;  %v3138_v42 = vmul.f32 1.442695, %v3137_v27  ;;  %v3141_v2 = vmul.f32 1.442695, %v3140_v48  ;;  %v2598_v48 = vpop.f32.mrf.mxu2 }
 0xb1c   : > { %4261 = vpow2.f32 %v3135_v24 }
 0xb1d   : > { %v2862_v14 = vpop.permute.xlu2 %2861  ;;  %4263 = vpow2.f32 %v3138_v42  ;;  %v6509_v42 = vld [vmem:[#allocation8 + $0x80] sm:$0xff] }
 0xb1e   : > { %v2864_v22 = vsel %vm1246_vm0, %v2862_v14, 0.0  ;;  %4265 = vpow2.f32 %v3141_v2 }
 0xb1f   : > { %2865 = vadd.xlane.f32.xlu2 %v2864_v22  ;;  %4267 = vrcp.f32 %v6469_v52 }
 0xb22   : > { %v6466_v54 = vpop.eup %4261 }
 0xb23   : > { %v6474_v17 = vpop.eup %4263 }
 0xb24   : > { %v3143_v44 = vadd.f32 %v6474_v17, %v6466_v54  ;;  %v6492_v57 = vpop.eup %4265 }
 0xb25   : > { %v6504_v22 = vpop.eup %4267 }
 0xb26   : > { %v6497_v30 = vadd.f32 %v6492_v57, %v3143_v44  ;;  %v2695_v46 = vmul.f32 %v6504_v22, %v6469_v52  ;;  %vm2700_vm4 = vweird.f32 %v6504_v22 }
 0xb27   : > { %2719 = vadd.xlane.f32.xlu2 %v2718_v34  ;;  %vm6558_vm6 = vmor %vm2699_vm13, %vm2700_vm4 }
 0xb28   : > { %vm3155_vm11 = vweird.f32 %v6497_v30 }
 0xb2d   : > { %v2819_v45 = vpop.xlane.xlu0 %2818 }
 0xb2e   : > { %v2821_v7 = vmax.f32 %v2820_v58, %v2819_v45 }
 0xb30   : > { %v2822_v26 = vsub.f32 %v6401_v8, %v2821_v7  ;;  %v2825_v40 = vsub.f32 %v6424_v4, %v2821_v7  ;;  %v2828_v12 = vsub.f32 %v2819_v45, %v2821_v7  ;;  %v2979_v8 = vmax.f32 %v6438_v15, %v6422_v5  ;;  %v6489_v4 = vld [vmem:[#allocation8 + $0x98] sm:$0xff] }
 0xb31   : > { %3285 = vmatpush.msrb.mxu2 %v6489_v4  ;;  %v2696_v7 = vsub.f32 1.0, %v2695_v46 }
 0xb32   : > { %v2823_v28 = vmul.f32 1.442695, %v2822_v26  ;;  %v2826_v18 = vmul.f32 1.442695, %v2825_v40  ;;  %v2829_v23 = vmul.f32 1.442695, %v2828_v12 }
 0xb33   : > { %3286 = vmatpush.msrb.mxu2 %v6494_v10 }
 0xb34   : > { %4269 = vpow2.f32 %v2823_v28 }
 0xb35   : > { %4271 = vpow2.f32 %v2826_v18  ;;  %v2978_v35 = vpop.xlane.xlu0 %2977  ;;  %3287 = vmatpush.msrb.mxu2 %v6502_v1  ;;  %v2658_v18 = vpop.f32.mrf.mxu1 }
 0xb36   : > { %v2980_v6 = vmax.f32 %v2979_v8, %v2978_v35  ;;  %4273 = vpow2.f32 %v2829_v23  ;;  %v2697_v8 = vmul.f32 %v6504_v22, %v2696_v7 }
 0xb37   : > { %4275 = vrcp.f32 %v6497_v30  ;;  %3288 = vmatpush.msrb.mxu2 %v6509_v42 }
 0xb38   : > { %v2981_v9 = vsub.f32 %v6438_v15, %v2980_v6  ;;  %v2984_v59 = vsub.f32 %v6422_v5, %v2980_v6  ;;  %v2987_v14 = vsub.f32 %v2978_v35, %v2980_v6  ;;  %v2477_v5 = vperm.slane %v6290_v49, 2 }
 0xb3a   : > { %v4270_v21 = vpop.eup %4269  ;;  %v2982_v29 = vmul.f32 1.442695, %v2981_v9  ;;  %v2985_v27 = vmul.f32 1.442695, %v2984_v59  ;;  %v2988_v24 = vmul.f32 1.442695, %v2987_v14  ;;  %v6520_v2 = vadd.f32 %v2598_v48, %v2477_v5 }
 0xb3b   : > { %v4272_v53 = vpop.eup %4271  ;;  %v6523_v45 = vadd.f32 %v6375_v38, %v2477_v5  ;;  %v6537_v6 = vadd.f32 %v2658_v18, %v2477_v5  ;;  %v2705_v14 = vand.u32 2147483648, %v6469_v52  ;;  %v2698_v48 = vadd.f32 %v6504_v22, %v2697_v8 }
 0xb3c   : > { %v2831_v15 = vadd.f32 %v4272_v53, %v4270_v21  ;;  %4277 = vpow2.f32 %v2982_v29  ;;  %v6512_v34 = vpop.eup %4273  ;;  %7606 = vst [vmem:[#allocation49_spill] sm:$0xff] %v6520_v2  ;;  %v2690_v12 = vmul.f32 %v6447_v37, %v6520_v2  ;;  %v2703_v37 = vand.u32 2147483647, %v6469_v52 }
 0xb3d   : > { %4279 = vpow2.f32 %v2985_v27  ;;  %v6526_v49 = vpop.eup %4275  ;;  %v2689_v40 = vmul.f32 %v6444_v51, %v6523_v45  ;;  %v2692_v29 = vmul.f32 %v6462_v19, %v6537_v6  ;;  %v2706_v19 = vor.u32 1.1754944e-38, %v2705_v14 }
 0xb3e   : > { %v6518_v58 = vadd.f32 %v6512_v34, %v2831_v15  ;;  %4281 = vpow2.f32 %v2988_v24  ;;  %v3151_v23 = vmul.f32 %v6526_v49, %v6497_v30  ;;  %vm6552_vm5 = vcmp.eq.f32.partialorder %v2703_v37, 8.507059e+37 }
 0xb3f   : > { %v2691_v9 = vadd.f32 %v2690_v12, %v2689_v40  ;;  %v2833_v12 = vmul.f32 %v4270_v21, %v6523_v45  ;;  %v2834_v18 = vmul.f32 %v4272_v53, %v6520_v2  ;;  %v2702_v52 = vsel %vm6558_vm6, %v6504_v22, %v2698_v48 }
 0xb40   : > { %4283 = vrcp.f32 %v6518_v58  ;;  %v3152_v24 = vsub.f32 1.0, %v3151_v23  ;;  %vm2843_vm9 = vweird.f32 %v6518_v58  ;;  %v2847_v14 = vand.u32 2147483647, %v6518_v58 }
 0xb41   : > { %v2693_v46 = vadd.f32 %v2692_v29, %v2691_v9  ;;  %v2849_v9 = vand.u32 2147483648, %v6518_v58  ;;  %v3146_v22 = vmul.f32 %v6474_v17, %v6520_v2  ;;  %vm3156_vm7 = vweird.f32 %v6526_v49 }
 0xb42   : > { %v4278_v26 = vpop.eup %4277  ;;  %v3153_v23 = vmul.f32 %v6526_v49, %v3152_v24  ;;  %v2836_v17 = vmul.f32 %v6512_v34, %v6537_v6  ;;  %vm2848_vm12 = vcmp.eq.f32.partialorder %v2847_v14, 8.507059e+37  ;;  %vm6594_vm15 = vmor %vm3155_vm11, %vm3156_vm7  ;;  %v2707_v34 = vsel %vm6552_vm5, %v2706_v19, %v2702_v52 }
 0xb43   : > { %v4280_v28 = vpop.eup %4279  ;;  %v2992_v53 = vmul.f32 %v4278_v26, %v6523_v45 }
 0xb44   : > { %v2990_v44 = vadd.f32 %v4280_v28, %v4278_v26  ;;  %v6534_v38 = vpop.eup %4281  ;;  %v2993_v37 = vmul.f32 %v4280_v28, %v6520_v2  ;;  %v2835_v26 = vadd.f32 %v2834_v18, %v2833_v12 }
 0xb45   : > { %v2995_v14 = vmul.f32 %v6534_v38, %v6537_v6 }
 0xb46   : > { %v4284_v35 = vpop.eup %4283  ;;  %v6540_v59 = vadd.f32 %v6534_v38, %v2990_v44  ;;  %v2994_v44 = vadd.f32 %v2993_v37, %v2992_v53 }
 0xb47   : > { %v2839_v51 = vmul.f32 %v4284_v35, %v6518_v58  ;;  %vm2844_vm8 = vweird.f32 %v4284_v35  ;;  %v3154_v58 = vadd.f32 %v6526_v49, %v3153_v23 }
 0xb48   : > { %4285 = vrcp.f32 %v6540_v59  ;;  %v2855_v27 = vpop.permute.xlu0 %2854  ;;  %vm6574_vm10 = vmor %vm2843_vm9, %vm2844_vm8  ;;  %v3008_v12 = vand.u32 2147483648, %v6540_v59  ;;  %v3006_v23 = vand.u32 2147483647, %v6540_v59  ;;  %vm3002_vm1 = vweird.f32 %v6540_v59 }
 0xb49   : > { %v2840_v15 = vsub.f32 1.0, %v2839_v51  ;;  %v2857_v5 = vsel %vm1246_vm0, %v2855_v27, 0.0  ;;  %v3145_v51 = vmul.f32 %v6466_v54, %v6523_v45  ;;  %v3159_v54 = vand.u32 2147483647, %v6497_v30 }
 0xb4a   : > { %2858 = vadd.xlane.f32.xlu0 %v2857_v5  ;;  %v2850_v5 = vor.u32 1.1754944e-38, %v2849_v9  ;;  %v2837_v9 = vadd.f32 %v2836_v17, %v2835_v26  ;;  %v3158_v37 = vsel %vm6594_vm15, %v6526_v49, %v3154_v58  ;;  %v3148_v27 = vmul.f32 %v6492_v57, %v6537_v6 }
 0xb4b   : > { %v2841_v40 = vmul.f32 %v4284_v35, %v2840_v15  ;;  %v3147_v53 = vadd.f32 %v3146_v22, %v3145_v51  ;;  %v3009_v26 = vor.u32 1.1754944e-38, %v3008_v12  ;;  %vm3160_vm13 = vcmp.eq.f32.partialorder %v3159_v54, 8.507059e+37 }
 0xb4c   : > { %v2996_v7 = vadd.f32 %v2995_v14, %v2994_v44  ;;  %vm3007_vm5 = vcmp.eq.f32.partialorder %v3006_v23, 8.507059e+37  ;;  %v2708_v49 = vmul.f32 %v2707_v34, %v2693_v46  ;;  %v6615_v46 = vmul.f32 %v6383_v20, %v6345_v25  ;;  %v2869_v23 = vpop.permute.xlu2 %2868 }
 0xb4d   : > { %v2842_v8 = vadd.f32 %v4284_v35, %v2841_v40  ;;  %v3161_v40 = vand.u32 2147483648, %v6497_v30  ;;  %v2710_v25 = vsel %vm1246_vm0, %v6392_v55, 0.0 }
 0xb4e   : > { %v4286_v21 = vpop.eup %4285  ;;  %7615 = vst [vmem:[#allocation50_spill] sm:$0xff] %v6615_v46 }
 0xb4f   : > { %v2998_v29 = vmul.f32 %v4286_v21, %v6540_v59  ;;  %v2846_v28 = vsel %vm6574_vm10, %v4284_v35, %v2842_v8  ;;  %vm3003_vm14 = vweird.f32 %v4286_v21  ;;  %v3162_v30 = vor.u32 1.1754944e-38, %v3161_v40  ;;  %v4139_v40 = vld [vmem:[%s7381_s12 + $0x1] ss:$0 sm:$0xff] }
 0xb50   : > { %v3019_v24 = vpop.permute.xlu0 %3018  ;;  %v2851_v18 = vsel %vm2848_vm12, %v2850_v5, %v2846_v28  ;;  %vm3004_vm4 = vmor %vm3002_vm1, %vm3003_vm14  ;;  %v3149_v28 = vadd.f32 %v3148_v27, %v3147_v53  ;;  %v2871_v8 = vsel %vm1246_vm0, %v2869_v23, 0.0 }
 0xb51   : > { %v3021_v15 = vsel %vm1246_vm0, %v3019_v24, 0.0  ;;  %v2999_v48 = vsub.f32 1.0, %v2998_v29  ;;  %v2852_v24 = vmul.f32 %v2851_v18, %v2837_v9  ;;  %v3163_v52 = vsel %vm3160_vm13, %v3162_v30, %v3158_v37  ;;  %v3013_v18 = vpop.permute.xlu1 %3012 }
 0xb52   : > { %3022 = vadd.xlane.f32.xlu0 %v3021_v15  ;;  %v3164_v59 = vmul.f32 %v3163_v52, %v3149_v28  ;;  %v6668_v28 = vld [vmem:[#allocation10 + $0x1a0] sm:$0xff] }
 0xb53   : > { %v3000_v35 = vmul.f32 %v4286_v21, %v2999_v48  ;;  %v3267_v15 = vsel %vm1246_vm0, %v2708_v49, %v2852_v24  ;;  %v2759_v48 = vsel %vm1246_vm0, %v6615_v46, 0.0  ;;  %7620 = vst [vmem:[#allocation55_spill] sm:$0xff] %v6668_v28 }
 0xb54   : > { %v3025_v9 = vpop.permute.xlu2 %3024 }
 0xb55   : > { %v3001_v29 = vadd.f32 %v4286_v21, %v3000_v35  ;;  %v3015_v35 = vsel %vm1246_vm0, %v3013_v18, 0.0  ;;  %v3027_v34 = vsel %vm1246_vm0, %v3025_v9, 0.0  ;;  %v6694_v9 = vld [vmem:[#allocation10 + $0x140] sm:$0xff] }
 0xb57   : > { %v3005_v19 = vsel %vm3004_vm4, %v4286_v21, %v3001_v29 }
 0xb58   : > { %v3166_v51 = vpop.permute.xlu0 %3165  ;;  %v3010_v22 = vsel %vm3007_vm5, %v3009_v26, %v3005_v19  ;;  %v6652_v26 = vld [vmem:[#allocation10 + $0x1f0] sm:$0xff] }
 0xb59   : > { %v3168_v38 = vsel %vm1246_vm0, %v3166_v51, 0.0  ;;  %v3011_v58 = vmul.f32 %v3010_v22, %v2996_v7  ;;  %3366 = vmatpush.msrb.mxu3 %v6652_v26  ;;  %v6655_v7 = vld [vmem:[#allocation10 + $0x1e0] sm:$0xff]  ;;  %v6657_v19 = vld [vmem:[#allocation10 + $0x1d0] sm:$0xff] }
 0xb5a   : > { %3169 = vadd.xlane.f32.xlu0 %v3168_v38  ;;  %7616 = vst [vmem:[#allocation51_spill] sm:$0xff] %v6655_v7  ;;  %v6662_v51 = vld [vmem:[#allocation10 + $0x1c0] sm:$0xff]  ;;  %v6665_v22 = vld [vmem:[#allocation10 + $0x1b0] sm:$0xff] }
 0xb5b   : > { %v3268_v57 = vsel %vm1850_vm2, %v3267_v15, %v3011_v58  ;;  %7617 = vst [vmem:[#allocation52_spill] sm:$0xff] %v6657_v19  ;;  %3367 = vmatpush.msrb.mxu3 %v6655_v7  ;;  %v6671_v38 = vld [vmem:[#allocation10 + $0x190] sm:$0xff] }
 0xb5c   : > { %v3269_v5 = vsel %vm1852_vm3, %v3268_v57, %v3164_v59  ;;  %7618 = vst [vmem:[#allocation53_spill] sm:$0xff] %v6662_v51  ;;  %v6674_v59 = vld [vmem:[#allocation10 + $0x180] sm:$0xff] }
 0xb5d   : > { %3289 = vmatmul.f32.vlgmr.msrb.gmra.mxu2 %v3269_v5  ;;  %3368 = vmatpush.msrb.mxu3 %v6657_v19  ;;  %7619 = vst [vmem:[#allocation54_spill] sm:$0xff] %v6665_v22  ;;  %v6679_v5 = vld [vmem:[#allocation10 + $0x170] sm:$0xff] }
 0xb5e   : > { %7621 = vst [vmem:[#allocation56_spill] sm:$0xff] %v6671_v38 }
 0xb5f   : > { %3369 = vmatpush.msrb.mxu3 %v6662_v51 }
 0xb60   : > { %v3178_v54 = vpop.permute.xlu0 %3177 }
 0xb61   : > { %v3180_v21 = vsel %vm1246_vm0, %v3178_v54, 0.0  ;;  %3370 = vmatpush.msrb.mxu3 %v6665_v22 }
 0xb62   : > { %3181 = vadd.xlane.f32.xlu0 %v3180_v21 }
 0xb63   : > { %3371 = vmatpush.msrb.mxu3 %v6668_v28 }
 0xb65   : > { %3372 = vmatpush.msrb.mxu3 %v6671_v38 }
 0xb66   : > { %v2716_v24 = vpop.xlane.xlu2 %2715 }
 0xb67   : > { %3373 = vmatpush.msrb.mxu3 %v6674_v59 }
 0xb69   : > { %3374 = vmatpush.msrb.mxu3 %v6679_v5 }
 0xb6a   : > { %2760 = vadd.xlane.f32.xlu0 %v2759_v48 }
 0xb92   : > { %v2866_v49 = vpop.xlane.xlu2 %2865 }
 0xb9a   : > { %v2720_v54 = vpop.xlane.xlu2 %2719 }
 0xbbd   : > { %v2859_v58 = vpop.xlane.xlu0 %2858 }
 0xbbe   : > { %v2874_v48 = vmax.f32 %v2859_v58, %v2866_v49 }
 0xbe0   : > { %v3290_v17 = vpop.f32.mrf.mxu2 }
 0xbe1   : > { %v3291_v44 = vadd.f32 %v4139_v40, %v3290_v17  ;;  %v6683_v40 = vld [vmem:[#allocation10 + $0x160] sm:$0xff]  ;;  %v3023_v17 = vpop.xlane.xlu0 %3022 }
 0xbe2   : > { %7622 = vst [vmem:[#allocation57_spill] sm:$0xff] %v6683_v40  ;;  %3375 = vmatpush.msrb.mxu3 %v6683_v40 }
 0xbe3   : > { %v3293_v12 = vadd.f32 %v3291_v44, %v6263_v13  ;;  %v6632_v13 = vmul.f32 %v6383_v20, %v6313_v47  ;;  %v2763_v20 = vsel %vm1246_vm0, %v6386_v33, 0.0 }
 0xbe5   : > { %3298 = vadd.xlane.f32.xlu1 %v3293_v12  ;;  %v2755_v55 = vsel %vm1246_vm0, %v6632_v13, 0.0 }
 0xbfe   : > { %3171 = vrot.lane.b32.xlu1 %v6405_v61, %s4656_s24 }
 0xc28   : > { %2711 = vadd.xlane.f32.xlu1 %v2710_v25 }
 0xc30   : > { %3016 = vadd.xlane.f32.xlu1 %v3015_v35  ;;  %v6688_v35 = vld [vmem:[#allocation10 + $0x150] sm:$0xff] }
 0xc31   : > { %7623 = vst [vmem:[#allocation58_spill] sm:$0xff] %v6688_v35  ;;  %3376 = vmatpush.msrb.mxu3 %v6688_v35 }
 0xc33   : > { %3377 = vmatpush.msrb.mxu3 %v6694_v9 }
 0xc38   : > { %2872 = vadd.xlane.f32.xlu1 %v2871_v8 }
 0xc40   : > { %3028 = vadd.xlane.f32.xlu1 %v3027_v34 }
 0xc48   : > { %2756 = vadd.xlane.f32.xlu1 %v2755_v55 }
 0xc58   : > { %v3299_v61 = vpop.xlane.xlu1 %3298 }
 0xc59   : > { %v3300_v53 = vmul.f32 %v3299_v61, %v7591_v43  ;;  %v6697_v61 = vld [vmem:[#allocation10 + $0x1f8] sm:$0xff] }
 0xc5a   : > { %3386 = vmatpush.msra.mxu0 %v6697_v61 }
 0xc5b   : > { %v6640_v29 = vsub.f32 %v3293_v12, %v3300_v53 }
 0xc5d   : > { %v3302_v47 = vmul.f32 %v6640_v29, %v6640_v29 }
 0xc61   : > { %2908 = vrot.lane.b32.xlu1 %v6632_v13, %s4658_s0 }
 0xc70   : > { %v3172_v37 = vpop.permute.xlu1 %3171 }
 0xc71   : > { %v3174_v14 = vsel %vm1246_vm0, %v3172_v37, 0.0 }
 0xc72   : > { %3175 = vadd.xlane.f32.xlu2 %v3174_v14  ;;  %v6700_v14 = vld [vmem:[#allocation10 + $0x130] sm:$0xff] }
 0xc73   : > { %3378 = vmatpush.msrb.mxu3 %v6700_v14 }
 0xc7a   : > { %3303 = vadd.xlane.f32.xlu2 %v3302_v47 }
 0xc82   : > { %2764 = vadd.xlane.f32.xlu2 %v2763_v20  ;;  %v6703_v20 = vld [vmem:[#allocation10 + $0x1e8] sm:$0xff] }
 0xc83   : > { %3387 = vmatpush.msra.mxu0 %v6703_v20 }
 0xc9a   : > { %2915 = vrot.lane.b32.xlu2 %v6615_v46, %s4658_s0 }
 0xc9b   : > { %v2712_v30 = vpop.xlane.xlu1 %2711 }
 0xc9c   : > { %v2721_v15 = vmax.f32 %v2712_v30, %v2716_v24 }
 0xc9e   : > { %v2722_v21 = vmax.f32 %v2721_v15, %v2720_v54 }
 0xca0   : > { %v2723_v44 = vsub.f32 %v2712_v30, %v2722_v21  ;;  %v2726_v12 = vsub.f32 %v2716_v24, %v2722_v21  ;;  %v2729_v55 = vsub.f32 %v2720_v54, %v2722_v21  ;;  %v6707_v24 = vld [vmem:[#allocation10 + $0x120] sm:$0xff] }
 0xca1   : > { %3379 = vmatpush.msrb.mxu3 %v6707_v24 }
 0xca2   : > { %3063 = vrot.lane.b32.xlu2 %v6632_v13, %s4657_s9  ;;  %v2724_v34 = vmul.f32 1.442695, %v2723_v44  ;;  %v2727_v53 = vmul.f32 1.442695, %v2726_v12  ;;  %v2730_v15 = vmul.f32 1.442695, %v2729_v55 }
 0xca3   : > { %v6650_v27 = vpop.xlane.xlu1 %3016  ;;  %v6723_v55 = vld [vmem:[#allocation10 + $0x1b8] sm:$0xff] }
 0xca4   : > { %v3030_v25 = vmax.f32 %v6650_v27, %v3023_v17  ;;  %4287 = vpow2.f32 %v2724_v34 }
 0xca5   : > { %4289 = vpow2.f32 %v2727_v53 }
 0xca6   : > { %4291 = vpow2.f32 %v2730_v15 }
 0xcab   : > { %v6660_v52 = vpop.xlane.xlu1 %2872 }
 0xcac   : > { %v2875_v18 = vmax.f32 %v2874_v48, %v6660_v52 }
 0xcae   : > { %v2876_v37 = vsub.f32 %v2859_v58, %v2875_v18  ;;  %v2879_v47 = vsub.f32 %v2866_v49, %v2875_v18  ;;  %v6710_v58 = vld [vmem:[#allocation10 + $0x1d8] sm:$0xff]  ;;  %v6713_v49 = vld [vmem:[#allocation10 + $0x110] sm:$0xff]  ;;  %v2882_v53 = vsub.f32 %v6660_v52, %v2875_v18 }
 0xcaf   : > { %3388 = vmatpush.msra.mxu0 %v6710_v58  ;;  %3380 = vmatpush.msrb.mxu3 %v6713_v49  ;;  %v6737_v52 = vld [vmem:[#allocation10 + $0x198] sm:$0xff] }
 0xcb0   : > { %v2877_v21 = vmul.f32 1.442695, %v2876_v37  ;;  %v2880_v48 = vmul.f32 1.442695, %v2879_v47  ;;  %v6727_v37 = vpop.eup %4287  ;;  %v2883_v18 = vmul.f32 1.442695, %v2882_v53 }
 0xcb1   : > { %v6733_v15 = vpop.eup %4289  ;;  %v6767_v53 = vld [vmem:[#allocation10 + $0x158] sm:$0xff] }
 0xcb2   : > { %4293 = vpow2.f32 %v2877_v21  ;;  %7626 = vst [vmem:[#allocation33_spill] sm:$0xff] %v6767_v53 }
 0xcb3   : > { %v6677_v57 = vpop.xlane.xlu1 %3028  ;;  %4295 = vpow2.f32 %v2880_v48  ;;  %v6751_v48 = vld [vmem:[#allocation10 + $0x178] sm:$0xff] }
 0xcb4   : > { %v3031_v23 = vmax.f32 %v3030_v25, %v6677_v57  ;;  %7624 = vst [vmem:[#allocation59_spill] sm:$0xff] %v6751_v48 }
 0xcb6   : > { %v3032_v30 = vsub.f32 %v6650_v27, %v3031_v23  ;;  %v3035_v54 = vsub.f32 %v3023_v17, %v3031_v23  ;;  %v6716_v27 = vld [vmem:[#allocation10 + $0x1c8] sm:$0xff]  ;;  %v6719_v17 = vld [vmem:[#allocation10 + $0x100] sm:$0xff]  ;;  %v3038_v47 = vsub.f32 %v6677_v57, %v3031_v23 }
 0xcb7   : > { %3389 = vmatpush.msra.mxu0 %v6716_v27  ;;  %3381 = vmatpush.msrb.mxu3 %v6719_v17  ;;  %v6745_v23 = vld [vmem:[#allocation10 + $0x188] sm:$0xff] }
 0xcb8   : > { %v3033_v44 = vmul.f32 1.442695, %v3032_v30  ;;  %v3036_v25 = vmul.f32 1.442695, %v3035_v54  ;;  %v6731_v30 = vld [vmem:[#allocation10 + $0x1a8] sm:$0xff]  ;;  %v6740_v54 = vpop.eup %4291 }
 0xcb9   : > { %3390 = vmatpush.msra.mxu0 %v6723_v55  ;;  %3522 = vmatpush.msra.mxu3 %v6427_v50  ;;  %v2732_v50 = vadd.f32 %v6733_v15, %v6727_v37  ;;  %v3039_v57 = vmul.f32 1.442695, %v3038_v47  ;;  %v6747_v21 = vpop.eup %4293 }
 0xcba   : > { %4297 = vpow2.f32 %v3033_v44 }
 0xcbb   : > { %v6692_v8 = vpop.xlane.xlu1 %2756  ;;  %3391 = vmatpush.msra.mxu0 %v6731_v30  ;;  %4299 = vpow2.f32 %v3036_v25  ;;  %3523 = vmatpush.msra.mxu3 %v6430_v60  ;;  %v4296_v60 = vpop.eup %4295 }
 0xcbc   : > { %4301 = vpow2.f32 %v2883_v18 }
 0xcbd   : > { %3392 = vmatpush.msra.mxu0 %v6737_v52  ;;  %3524 = vmatpush.msra.mxu3 %v6433_v11  ;;  %v6759_v11 = vadd.f32 %v6740_v54, %v2732_v50  ;;  %4303 = vpow2.f32 %v3039_v57  ;;  %v6785_v57 = vld [vmem:[#allocation10 + $0x138] sm:$0xff] }
 0xcbe   : > { %7628 = vst [vmem:[#allocation27_spill] sm:$0xff] %v6785_v57 }
 0xcbf   : > { %3393 = vmatpush.msra.mxu0 %v6745_v23  ;;  %3525 = vmatpush.msra.mxu3 %v6436_v36  ;;  %v2885_v36 = vadd.f32 %v4296_v60, %v6747_v21  ;;  %4305 = vrcp.f32 %v6759_v11  ;;  %vm2744_vm6 = vweird.f32 %v6759_v11 }
 0xcc0   : > { %v6753_v44 = vpop.eup %4297 }
 0xcc1   : > { %3394 = vmatpush.msra.mxu0 %v6751_v48  ;;  %v6756_v25 = vpop.eup %4299  ;;  %3526 = vmatpush.msra.mxu3 %v6442_v3  ;;  %v6774_v3 = vld [vmem:[#allocation10 + $0x148] sm:$0xff] }
 0xcc2   : > { %v3041_v47 = vadd.f32 %v6756_v25, %v6753_v44  ;;  %7627 = vst [vmem:[#allocation36_spill] sm:$0xff] %v6774_v3  ;;  %v6776_v18 = vpop.eup %4301 }
 0xcc3   : > { %3527 = vmatpush.msra.mxu3 %v6449_v0  ;;  %v6779_v50 = vpop.eup %4303  ;;  %v6782_v0 = vadd.f32 %v6776_v18, %v2885_v36 }
 0xcc4   : > { %v6788_v31 = vadd.f32 %v6779_v50, %v3041_v47  ;;  %v6799_v47 = vld [vmem:[#allocation10 + $0x118] sm:$0xff] }
 0xcc5   : > { %3528 = vmatpush.msra.mxu3 %v6452_v41  ;;  %v6795_v36 = vpop.eup %4305  ;;  %4307 = vrcp.f32 %v6782_v0  ;;  %7630 = vst [vmem:[#allocation38_spill] sm:$0xff] %v6799_v47  ;;  %vm2897_vm9 = vweird.f32 %v6782_v0 }
 0xcc6   : > { %4309 = vrcp.f32 %v6788_v31  ;;  %vm2745_vm8 = vweird.f32 %v6795_v36  ;;  %vm3053_vm1 = vweird.f32 %v6788_v31 }
 0xcc7   : > { %3529 = vmatpush.msra.mxu3 %v6459_v62  ;;  %vm6899_vm11 = vmor %vm2744_vm6, %vm2745_vm8 }
 0xcc9   : > { %3530 = vmatpush.msra.mxu3 %v6464_v32 }
 0xccb   : > { %3531 = vmatpush.msra.mxu3 %v6472_v56 }
 0xccd   : > { %3532 = vmatpush.msra.mxu3 %v6478_v16 }
 0xccf   : > { %3533 = vmatpush.msra.mxu3 %v6485_v39  ;;  %v2888_v39 = vmul.f32 %v4296_v60, %v6520_v2  ;;  %v2750_v60 = vand.u32 2147483648, %v6759_v11 }
 0xcd1   : > { %3534 = vmatpush.msra.mxu3 %v6489_v4  ;;  %v2734_v4 = vmul.f32 %v6727_v37, %v6523_v45 }
 0xcd3   : > { %v2909_v12 = vpop.permute.xlu1 %2908  ;;  %3535 = vmatpush.msra.mxu3 %v6494_v10 }
 0xcd4   : > { %v2911_v34 = vsel %vm1246_vm0, %v2909_v12, 0.0  ;;  %v3170_v12 = vpop.xlane.xlu0 %3169 }
 0xcd5   : > { %2912 = vadd.xlane.f32.xlu0 %v2911_v34  ;;  %v6762_v34 = vld [vmem:[#allocation10 + $0x168] sm:$0xff]  ;;  %3536 = vmatpush.msra.mxu3 %v6502_v1 }
 0xcd6   : > { %7625 = vst [vmem:[#allocation35_spill] sm:$0xff] %v6762_v34  ;;  %3395 = vmatpush.msra.mxu0 %v6762_v34  ;;  %v6804_v34 = vld [vmem:[#allocation10 + $0x108] sm:$0xff] }
 0xcd7   : > { %3537 = vmatpush.msra.mxu3 %v6509_v42 }
 0xcd8   : > { %3396 = vmatpush.msra.mxu0 %v6767_v53 }
 0xcda   : > { %3397 = vmatpush.msra.mxu0 %v6774_v3 }
 0xcdc   : > { %3398 = vmatpush.msra.mxu0 %v6785_v57  ;;  %v3182_v3 = vpop.xlane.xlu0 %3181 }
 0xcde   : > { %3399 = vmatpush.msra.mxu0 %v6792_v63  ;;  %v2740_v63 = vmul.f32 %v6795_v36, %v6759_v11 }
 0xce0   : > { %3400 = vmatpush.msra.mxu0 %v6799_v47 }
 0xce2   : > { %3401 = vmatpush.msra.mxu0 %v6804_v34 }
 0xce4   : > { %3565 = vmatpush.msrb.mxu0 %v6652_v26 }
 0xce5   : > { %v3176_v46 = vpop.xlane.xlu2 %3175 }
 0xce6   : > { %v3183_v41 = vmax.f32 %v3170_v12, %v3176_v46  ;;  %3566 = vmatpush.msrb.mxu0 %v6655_v7 }
 0xce8   : > { %v3184_v62 = vmax.f32 %v3183_v41, %v3182_v3  ;;  %3567 = vmatpush.msrb.mxu0 %v6657_v19 }
 0xcea   : > { %v3185_v57 = vsub.f32 %v3170_v12, %v3184_v62  ;;  %v3188_v32 = vsub.f32 %v3176_v46, %v3184_v62  ;;  %v3191_v53 = vsub.f32 %v3182_v3, %v3184_v62  ;;  %v6811_v12 = vpop.eup %4307  ;;  %v2887_v3 = vmul.f32 %v6747_v21, %v6523_v45  ;;  %3568 = vmatpush.msrb.mxu0 %v6662_v51 }
 0xceb   : > { %v6816_v46 = vpop.eup %4309  ;;  %v2735_v62 = vmul.f32 %v6733_v15, %v6520_v2  ;;  %vm2898_vm10 = vweird.f32 %v6811_v12 }
 0xcec   : > { %v3186_v41 = vmul.f32 1.442695, %v3185_v57  ;;  %v3189_v56 = vmul.f32 1.442695, %v3188_v32  ;;  %v3192_v48 = vmul.f32 1.442695, %v3191_v53  ;;  %v3049_v21 = vmul.f32 %v6816_v46, %v6788_v31  ;;  %3569 = vmatpush.msrb.mxu0 %v6665_v22  ;;  %vm6925_vm15 = vmor %vm2897_vm9, %vm2898_vm10 }
 0xced   : > { %v3304_v47 = vpop.xlane.xlu2 %3303  ;;  %v2741_v57 = vsub.f32 1.0, %v2740_v63  ;;  %v2761_v63 = vpop.xlane.xlu0 %2760  ;;  %v2889_v10 = vadd.f32 %v2888_v39, %v2887_v3  ;;  %vm3054_vm7 = vweird.f32 %v6816_v46 }
 0xcee   : > { %4311 = vpow2.f32 %v3186_v41  ;;  %v3305_v16 = vmul.f32 %v3304_v47, %v7591_v43  ;;  %v2893_v47 = vmul.f32 %v6811_v12, %v6782_v0  ;;  %v2766_v32 = vmax.f32 %v6692_v8, %v2761_v63  ;;  %3570 = vmatpush.msrb.mxu0 %v6668_v28  ;;  %vm6939_vm5 = vmor %vm3053_vm1, %vm3054_vm7 }
 0xcef   : > { %4313 = vpow2.f32 %v3189_v56  ;;  %v2742_v37 = vmul.f32 %v6795_v36, %v2741_v57  ;;  %v6849_v56 = vadd.f32 %v2735_v62, %v2734_v4  ;;  %v2748_v43 = vand.u32 2147483647, %v6759_v11 }
 0xcf0   : > { %v6821_v53 = vadd.f32 1e-05, %v3305_v16  ;;  %4315 = vpow2.f32 %v3192_v48  ;;  %v6842_v48 = vmul.f32 %v6740_v54, %v6537_v6  ;;  %v2890_v16 = vmul.f32 %v6776_v18, %v6537_v6  ;;  %3571 = vmatpush.msrb.mxu0 %v6671_v38 }
 0xcf1   : > { %v2894_v3 = vsub.f32 1.0, %v2893_v47  ;;  %v3050_v51 = vsub.f32 1.0, %v3049_v21  ;;  %v6863_v62 = vadd.f32 %v6795_v36, %v2742_v37  ;;  %v6866_v18 = vor.u32 1.1754944e-38, %v2750_v60 }
 0xcf2   : > { %4317 = vrsqrt.f32 %v6821_v53  ;;  %v6860_v4 = vadd.f32 %v2890_v16, %v2889_v10  ;;  %v2901_v60 = vand.u32 2147483647, %v6782_v0  ;;  %3572 = vmatpush.msrb.mxu0 %v6674_v59  ;;  %vm3313_vm4 = vweird.f32 %v6821_v53 }
 0xcf3   : > { %v2895_v16 = vmul.f32 %v6811_v12, %v2894_v3  ;;  %v3051_v7 = vmul.f32 %v6816_v46, %v3050_v51  ;;  %v3044_v3 = vmul.f32 %v6756_v25, %v6520_v2  ;;  %vm6933_vm13 = vcmp.eq.f32.partialorder %v2748_v43, 8.507059e+37 }
 0xcf4   : > { %v6838_v15 = vpop.eup %4311  ;;  %3573 = vmatpush.msrb.mxu0 %v6679_v5  ;;  %vm6913_vm14 = vcmp.eq.f32.partialorder %v2901_v60, 8.507059e+37 }
 0xcf5   : > { %v6847_v41 = vpop.eup %4313  ;;  %v2765_v39 = vpop.xlane.xlu2 %2764  ;;  %v6904_v25 = vadd.f32 %v6816_v46, %v3051_v7  ;;  %v3196_v43 = vmul.f32 %v6838_v15, %v6523_v45 }
 0xcf6   : > { %v3194_v54 = vadd.f32 %v6847_v41, %v6838_v15  ;;  %v2767_v57 = vmax.f32 %v2766_v32, %v2765_v39  ;;  %v6858_v22 = vpop.eup %4315  ;;  %3574 = vmatpush.msrb.mxu0 %v6683_v40 }
 0xcf7   : > { %v3199_v11 = vmul.f32 %v6858_v22, %v6537_v6 }
 0xcf8   : > { %v6868_v47 = vpop.eup %4317  ;;  %v6871_v32 = vadd.f32 %v6858_v22, %v3194_v54  ;;  %v2768_v21 = vsub.f32 %v6692_v8, %v2767_v57  ;;  %v2771_v19 = vsub.f32 %v2761_v63, %v2767_v57  ;;  %v2774_v37 = vsub.f32 %v2765_v39, %v2767_v57  ;;  %3575 = vmatpush.msrb.mxu0 %v6688_v35 }
 0xcf9   : > { %v3308_v10 = vmul.f32 %v6868_v47, %v6821_v53  ;;  %v3043_v8 = vmul.f32 %v6753_v44, %v6523_v45  ;;  %v2903_v39 = vand.u32 2147483648, %v6782_v0  ;;  %v2896_v44 = vadd.f32 %v6811_v12, %v2895_v16  ;;  %v6956_v53 = vld [vmem:[%s7386_s17 + $0x1] ss:$0 sm:$0xff] }
 0xcfa   : > { %4319 = vrcp.f32 %v6871_v32  ;;  %v2769_v28 = vmul.f32 1.442695, %v2768_v21  ;;  %v2772_v54 = vmul.f32 1.442695, %v2771_v19  ;;  %v2775_v38 = vmul.f32 1.442695, %v2774_v37  ;;  %3576 = vmatpush.msrb.mxu0 %v6694_v9 }
 0xcfb   : > { %v3309_v63 = vmul.f32 %v6868_v47, %v3308_v10  ;;  %v3057_v19 = vand.u32 2147483647, %v6788_v31  ;;  %v3059_v21 = vand.u32 2147483648, %v6788_v31  ;;  %vm3314_vm12 = vweird.f32 %v6868_v47 }
 0xcfc   : > { %4321 = vpow2.f32 %v2769_v28  ;;  %v3045_v7 = vadd.f32 %v3044_v3, %v3043_v8  ;;  %vm3315_vm8 = vmor %vm3313_vm4, %vm3314_vm12  ;;  %v2900_v3 = vsel %vm6925_vm15, %v6811_v12, %v2896_v44  ;;  %3577 = vmatpush.msrb.mxu0 %v6700_v14  ;;  %vm3206_vm10 = vweird.f32 %v6871_v32 }
 0xcfd   : > { %v3310_v51 = vmul.f32 0.5, %v3309_v63  ;;  %4323 = vpow2.f32 %v2772_v54  ;;  %v2916_v57 = vpop.permute.xlu2 %2915  ;;  %v3046_v54 = vmul.f32 %v6779_v50, %v6537_v6  ;;  %vm6943_vm6 = vcmp.eq.f32.partialorder %v3057_v19, 8.507059e+37 }
 0xcfe   : > { %4325 = vpow2.f32 %v2775_v38  ;;  %v2918_v10 = vsel %vm1246_vm0, %v2916_v57, 0.0  ;;  %v3056_v19 = vsel %vm6939_vm5, %v6816_v46, %v6904_v25  ;;  %v3060_v57 = vor.u32 1.1754944e-38, %v3059_v21  ;;  %v6975_v46 = vld [vmem:[%s7387_s18 + $0x1] ss:$0 sm:$0xff]  ;;  %3578 = vmatpush.msrb.mxu0 %v6707_v24 }
 0xcff   : > { %v3311_v37 = vsub.f32 1.5, %v3310_v51  ;;  %2919 = vadd.xlane.f32.xlu0 %v2918_v10  ;;  %v2904_v51 = vor.u32 1.1754944e-38, %v2903_v39  ;;  %v3197_v10 = vmul.f32 %v6847_v41, %v6520_v2  ;;  %v3212_v21 = vand.u32 2147483648, %v6871_v32 }
 0xd00   : > { %v6917_v16 = vpop.eup %4319  ;;  %3579 = vmatpush.msrb.mxu0 %v6713_v49  ;;  %v2738_v22 = vadd.f32 %v6842_v48, %v6849_v56 }
 0xd01   : > { %v3312_v60 = vmul.f32 %v6868_v47, %v3311_v37  ;;  %v3202_v31 = vmul.f32 %v6917_v16, %v6871_v32  ;;  %vm3207_vm9 = vweird.f32 %v6917_v16 }
 0xd02   : > { %v4322_v39 = vpop.eup %4321  ;;  %vm3208_vm7 = vmor %vm3206_vm10, %vm3207_vm9  ;;  %3580 = vmatpush.msrb.mxu0 %v6719_v17 }
 0xd03   : > { %v4324_v15 = vpop.eup %4323  ;;  %v3316_v37 = vsel %vm3315_vm8, %v6868_v47, %v3312_v60  ;;  %v2779_v38 = vmul.f32 %v4322_v39, %v6523_v45  ;;  %v3203_v35 = vsub.f32 1.0, %v3202_v31 }
 0xd04   : > { %v4326_v40 = vpop.eup %4325  ;;  %v3317_v12 = vmul.f32 %v3316_v37, %v6640_v29  ;;  %v2777_v44 = vadd.f32 %v4324_v15, %v4322_v39  ;;  %v2780_v63 = vmul.f32 %v4324_v15, %v6520_v2  ;;  %v3210_v29 = vand.u32 2147483647, %v6871_v32 }
 0xd05   : > { %v2782_v41 = vmul.f32 %v4326_v40, %v6537_v6  ;;  %v3064_v47 = vpop.permute.xlu2 %3063  ;;  %v3204_v25 = vmul.f32 %v6917_v16, %v3203_v35  ;;  %v3198_v15 = vadd.f32 %v3197_v10, %v3196_v43  ;;  %v2905_v37 = vsel %vm6913_vm14, %v2904_v51, %v2900_v3 }
 0xd06   : > { %v2778_v60 = vadd.f32 %v4326_v40, %v2777_v44  ;;  %v2781_v50 = vadd.f32 %v2780_v63, %v2779_v38  ;;  %v3066_v31 = vsel %vm1246_vm0, %v3064_v47, 0.0  ;;  %v3321_v39 = vmul.f32 %v6956_v53, %v3317_v12  ;;  %v4369_v12 = vld [vmem:[#allocation8 + $0xe8] sm:$0xff] }
 0xd07   : > { %3067 = vadd.xlane.f32.xlu2 %v3066_v31  ;;  %v3205_v2 = vadd.f32 %v6917_v16, %v3204_v25  ;;  %v3213_v38 = vor.u32 1.1754944e-38, %v3212_v21  ;;  %v3061_v43 = vsel %vm6943_vm6, %v3060_v57, %v3056_v19  ;;  %vm3211_vm12 = vcmp.eq.f32.partialorder %v3210_v29, 8.507059e+37  ;;  %v4372_v25 = vld [vmem:[#allocation8 + $0xd0] sm:$0xff]  ;;  %v4373_v31 = vld [vmem:[#allocation8 + $0xc8] sm:$0xff] }
 0xd08   : > { %v2783_v35 = vadd.f32 %v2782_v41, %v2781_v50  ;;  %4327 = vrcp.f32 %v2778_v60  ;;  %v6991_v40 = vadd.f32 %v6975_v46, %v3321_v39  ;;  %v3047_v32 = vadd.f32 %v3046_v54, %v3045_v7  ;;  %v4367_v54 = vld [vmem:[#allocation8 + $0xf8] sm:$0xff] }
 0xd09   : > { %v3209_v51 = vsel %vm3208_vm7, %v6917_v16, %v3205_v2  ;;  %v7643_v3 = vsel %vm6899_vm11, %v6795_v36, %v6863_v62  ;;  %v2906_v2 = vmul.f32 %v2905_v37, %v6860_v4  ;;  %v3200_v16 = vadd.f32 %v3199_v11, %v3198_v15  ;;  %v4368_v36 = vld [vmem:[#allocation8 + $0xf0] sm:$0xff]  ;;  %v4370_v4 = vld [vmem:[#allocation8 + $0xe0] sm:$0xff]  ;;  %v4371_v41 = vld [vmem:[#allocation8 + $0xd8] sm:$0xff] }
 0xd0a   : > { %3382 = vmatmul.f32.vlgmr.msrb.gmra.mxu3 %v6991_v40  ;;  %3402 = vmatmul.f32.vlgmr.msra.gmra.mxu0 %v6991_v40  ;;  %v2752_v0 = vsel %vm6933_vm13, %v6866_v18, %v7643_v3  ;;  %v3214_v19 = vsel %vm3211_vm12, %v3213_v38, %v3209_v51  ;;  %v3062_v7 = vmul.f32 %v3061_v43, %v3047_v32  ;;  %v2795_v44 = vand.u32 2147483648, %v2778_v60  ;;  %v4374_v37 = vld [vmem:[#allocation8 + $0xc0] sm:$0xff]  ;;  %v4375_v38 = vld [vmem:[#allocation8 + $0xb8] sm:$0xff]  ;;  %v4376_v43 = vld [vmem:[#allocation8 + $0xb0] sm:$0xff] }
 0xd0b   : > { %3673 = vmatpush.msra.mxu0 %v4367_v54  ;;  %v2753_v28 = vmul.f32 %v2752_v0, %v2738_v22  ;;  %v3215_v57 = vmul.f32 %v3214_v19, %v3200_v16  ;;  %v2793_v21 = vand.u32 2147483647, %v2778_v60  ;;  %vm2789_vm14 = vweird.f32 %v2778_v60  ;;  %v4378_v11 = vld [vmem:[#allocation8 + $0xa0] sm:$0xff]  ;;  %v4379_v51 = vld [vmem:[#allocation8 + $0x98] sm:$0xff]  ;;  %v4380_v32 = vld [vmem:[#allocation8 + $0x90] sm:$0xff] }
 0xd0c   : > { %v2796_v29 = vor.u32 1.1754944e-38, %v2795_v44  ;;  %v7024_v3 = vld [vmem:[#allocation11 + $0x1f8] sm:$0xff]  ;;  %v7031_v0 = vld [vmem:[#allocation11 + $0x1e8] sm:$0xff]  ;;  %v7040_v19 = vld [vmem:[#allocation11 + $0x1e0] sm:$0xff] }
 0xd0d   : > { %3674 = vmatpush.msra.mxu0 %v4368_v36  ;;  %v3519_v18 = vsel %vm1246_vm0, %v2753_v28, %v2906_v2  ;;  %vm2794_vm1 = vcmp.eq.f32.partialorder %v2793_v21, 8.507059e+37  ;;  %3466 = vmatpush.msra.mxu2 %v7024_v3  ;;  %v7046_v22 = vld [vmem:[#allocation11 + $0x1d8] sm:$0xff]  ;;  %v7050_v2 = vld [vmem:[#allocation11 + $0x1d0] sm:$0xff]  ;;  %v7055_v16 = vld [vmem:[#allocation11 + $0x160] sm:$0xff] }
 0xd0e   : > { %v4328_v10 = vpop.eup %4327  ;;  %v3520_v8 = vsel %vm1850_vm2, %v3519_v18, %v3062_v7  ;;  %3627 = vmatpush.msrb.mxu3 %v7024_v3  ;;  %v7057_v7 = vld [vmem:[#allocation11 + $0x1c8] sm:$0xff]  ;;  %v7065_v54 = vld [vmem:[#allocation11 + $0x158] sm:$0xff]  ;;  %v7067_v28 = vld [vmem:[#allocation11 + $0x1c0] sm:$0xff] }
 0xd0f   : > { %v2785_v62 = vmul.f32 %v4328_v10, %v2778_v60  ;;  %3675 = vmatpush.msra.mxu0 %v4369_v12  ;;  %v3521_v56 = vsel %vm1852_vm3, %v3520_v8, %v3215_v57  ;;  %vm2790_vm11 = vweird.f32 %v4328_v10  ;;  %v4377_v60 = vld [vmem:[#allocation8 + $0xa8] sm:$0xff]  ;;  %v7069_v57 = vld [vmem:[#allocation11 + $0x150] sm:$0xff]  ;;  %v3417_v18 = vld [vmem:[#allocation11 + $0x140] sm:$0xff] }
 0xd10   : > { %vm2791_vm15 = vmor %vm2789_vm14, %vm2790_vm11  ;;  %v7076_v36 = vld [vmem:[#allocation11 + $0x148] sm:$0xff]  ;;  %v3416_v12 = vld [vmem:[#allocation11 + $0x138] sm:$0xff] }
 0xd11   : > { %v2786_v48 = vsub.f32 1.0, %v2785_v62  ;;  %3676 = vmatpush.msra.mxu0 %v4370_v4  ;;  %v7078_v62 = vld [vmem:[#allocation11 + $0x1b0] sm:$0xff]  ;;  %v7083_v8 = vld [vmem:[#allocation11 + $0x1a8] sm:$0xff]  ;;  %v7094_v4 = vld [vmem:[#allocation11 + $0x198] sm:$0xff] }
 0xd12   : > { %3538 = vmatmul.f32.vlgmr.msra.gmra.mxu3 %v3521_v56  ;;  %v3415_v56 = vld [vmem:[#allocation11 + $0x130] sm:$0xff]  ;;  %v3414_v44 = vld [vmem:[#allocation11 + $0x128] sm:$0xff]  ;;  %v3413_v21 = vld [vmem:[#allocation11 + $0x120] sm:$0xff] }
 0xd13   : > { %2922 = vrot.lane.b32.xlu0 %v6386_v33, %s4658_s0  ;;  %v2787_v63 = vmul.f32 %v4328_v10, %v2786_v48  ;;  %3677 = vmatpush.msra.mxu0 %v4371_v41  ;;  %v7090_v48 = vld [vmem:[#allocation11 + $0x1a0] sm:$0xff]  ;;  %v7102_v41 = vld [vmem:[#allocation11 + $0x188] sm:$0xff] }
 0xd15   : > { %v2788_v47 = vadd.f32 %v4328_v10, %v2787_v63  ;;  %3678 = vmatpush.msra.mxu0 %v4372_v25  ;;  %v7099_v63 = vld [vmem:[#allocation11 + $0x190] sm:$0xff]  ;;  %v7104_v25 = vld [vmem:[#allocation11 + $0x180] sm:$0xff] }
 0xd17   : > { %v2792_v50 = vsel %vm2791_vm15, %v4328_v10, %v2788_v47  ;;  %3679 = vmatpush.msra.mxu0 %v4373_v31  ;;  %v7071_v10 = vld [vmem:[#allocation11 + $0x1b8] sm:$0xff]  ;;  %v7113_v31 = vld [vmem:[#allocation11 + $0x100] sm:$0xff] }
 0xd18   : > { %v2797_v39 = vsel %vm2794_vm1, %v2796_v29, %v2792_v50  ;;  %v3412_v47 = vld [vmem:[#allocation11 + $0x118] sm:$0xff]  ;;  %v3411_v29 = vld [vmem:[#allocation11 + $0x110] sm:$0xff]  ;;  %v3410_v50 = vld [vmem:[#allocation11 + $0x108] sm:$0xff] }
 0xd19   : > { %v7020_v15 = vmul.f32 %v2797_v39, %v2783_v35  ;;  %3680 = vmatpush.msra.mxu0 %v4374_v37  ;;  %v7026_v35 = vld [vmem:[#allocation11 + $0x1f0] sm:$0xff] }
 0xd1a   : > { %3467 = vmatpush.msra.mxu2 %v7026_v35  ;;  %3628 = vmatpush.msrb.mxu3 %v7026_v35 }
 0xd1b   : > { %3681 = vmatpush.msra.mxu0 %v4375_v38 }
 0xd1c   : > { %3468 = vmatpush.msra.mxu2 %v7031_v0  ;;  %3629 = vmatpush.msrb.mxu3 %v7031_v0 }
 0xd1d   : > { %3682 = vmatpush.msra.mxu0 %v4376_v43  ;;  %v4009_v43 = vld [vmem:[%s7383_s14 + $0x2] sm:$0x3] }
 0xd1e   : > { %3469 = vmatpush.msra.mxu2 %v7040_v19  ;;  %3630 = vmatpush.msrb.mxu3 %v7040_v19 }
 0xd1f   : > { %3216 = vrot.lane.b32.xlu2 %v6632_v13, %s4656_s24  ;;  %3683 = vmatpush.msra.mxu0 %v4377_v60  ;;  %v7038_v13 = vld [vmem:[#allocation11 + $0x178] sm:$0xff] }
 0xd20   : > { %3446 = vmatpush.msra.mxu1 %v7038_v13  ;;  %3470 = vmatpush.msra.mxu2 %v7046_v22 }
 0xd21   : > { %3684 = vmatpush.msra.mxu0 %v4378_v11  ;;  %3631 = vmatpush.msrb.mxu3 %v7046_v22 }
 0xd22   : > { %3471 = vmatpush.msra.mxu2 %v7050_v2 }
 0xd23   : > { %3685 = vmatpush.msra.mxu0 %v4379_v51  ;;  %3632 = vmatpush.msrb.mxu3 %v7050_v2  ;;  %v7146_v51 = vperm.slane %v4009_v43, 1 }
 0xd24   : > { %3472 = vmatpush.msra.mxu2 %v7057_v7 }
 0xd25   : > { %3686 = vmatpush.msra.mxu0 %v4380_v32  ;;  %3633 = vmatpush.msrb.mxu3 %v7057_v7 }
 0xd26   : > { %3473 = vmatpush.msra.mxu2 %v7067_v28 }
 0xd27   : > { %3687 = vmatpush.msra.mxu0 %v6502_v1  ;;  %v7042_v1 = vld [vmem:[#allocation11 + $0x170] sm:$0xff]  ;;  %3634 = vmatpush.msrb.mxu3 %v7067_v28 }
 0xd28   : > { %3447 = vmatpush.msra.mxu1 %v7042_v1  ;;  %3474 = vmatpush.msra.mxu2 %v7071_v10 }
 0xd29   : > { %3688 = vmatpush.msra.mxu0 %v6509_v42  ;;  %v7048_v42 = vld [vmem:[#allocation11 + $0x168] sm:$0xff]  ;;  %3635 = vmatpush.msrb.mxu3 %v7071_v10 }
 0xd2a   : > { %3448 = vmatpush.msra.mxu1 %v7048_v42  ;;  %3475 = vmatpush.msra.mxu2 %v7078_v62 }
 0xd2b   : > { %3636 = vmatpush.msrb.mxu3 %v7078_v62 }
 0xd2c   : > { %3449 = vmatpush.msra.mxu1 %v7055_v16  ;;  %3476 = vmatpush.msra.mxu2 %v7083_v8 }
 0xd2d   : > { %3637 = vmatpush.msrb.mxu3 %v7083_v8 }
 0xd2e   : > { %3450 = vmatpush.msra.mxu1 %v7065_v54  ;;  %3477 = vmatpush.msra.mxu2 %v7090_v48 }
 0xd2f   : > { %3638 = vmatpush.msrb.mxu3 %v7090_v48 }
 0xd30   : > { %3451 = vmatpush.msra.mxu1 %v7069_v57  ;;  %3478 = vmatpush.msra.mxu2 %v7094_v4 }
 0xd31   : > { %3639 = vmatpush.msrb.mxu3 %v7094_v4 }
 0xd32   : > { %3452 = vmatpush.msra.mxu1 %v7076_v36  ;;  %3479 = vmatpush.msra.mxu2 %v7099_v63 }
 0xd33   : > { %3640 = vmatpush.msrb.mxu3 %v7099_v63 }
 0xd34   : > { %3453 = vmatpush.msra.mxu1 %v3417_v18  ;;  %3480 = vmatpush.msra.mxu2 %v7102_v41 }
 0xd35   : > { %3641 = vmatpush.msrb.mxu3 %v7102_v41 }
 0xd36   : > { %3454 = vmatpush.msra.mxu1 %v3416_v12  ;;  %3481 = vmatpush.msra.mxu2 %v7104_v25 }
 0xd37   : > { %3642 = vmatpush.msrb.mxu3 %v7104_v25 }
 0xd38   : > { %3455 = vmatpush.msra.mxu1 %v3415_v56  ;;  %3607 = vmatpush.msrb.mxu2 %v7038_v13 }
 0xd39   : > { %3758 = vmatpush.msra.mxu3 %v7038_v13  ;;  %v7644_v13 = vld [vmem:[#allocation59_spill] sm:$0xff] }
 0xd3a   : > { %3456 = vmatpush.msra.mxu1 %v3414_v44  ;;  %3608 = vmatpush.msrb.mxu2 %v7042_v1 }
 0xd3b   : > { %3759 = vmatpush.msra.mxu3 %v7042_v1 }
 0xd3c   : > { %3457 = vmatpush.msra.mxu1 %v3413_v21  ;;  %3609 = vmatpush.msrb.mxu2 %v7048_v42 }
 0xd3d   : > { %3760 = vmatpush.msra.mxu3 %v7048_v42 }
 0xd3e   : > { %3458 = vmatpush.msra.mxu1 %v3412_v47  ;;  %3610 = vmatpush.msrb.mxu2 %v7055_v16 }
 0xd3f   : > { %3761 = vmatpush.msra.mxu3 %v7055_v16  ;;  %v7645_v16 = vld [vmem:[#allocation35_spill] sm:$0xff] }
 0xd40   : > { %3459 = vmatpush.msra.mxu1 %v3411_v29  ;;  %3611 = vmatpush.msrb.mxu2 %v7065_v54 }
 0xd41   : > { %3762 = vmatpush.msra.mxu3 %v7065_v54 }
 0xd42   : > { %3460 = vmatpush.msra.mxu1 %v3410_v50  ;;  %3612 = vmatpush.msrb.mxu2 %v7069_v57 }
 0xd43   : > { %3763 = vmatpush.msra.mxu3 %v7069_v57  ;;  %v7646_v57 = vld [vmem:[#allocation33_spill] sm:$0xff] }
 0xd44   : > { %3461 = vmatpush.msra.mxu1 %v7113_v31  ;;  %3613 = vmatpush.msrb.mxu2 %v7076_v36 }
 0xd45   : > { %3764 = vmatpush.msra.mxu3 %v7076_v36 }
 0xd46   : > { %3585 = vmatpush.msrb.mxu1 %v6697_v61  ;;  %3614 = vmatpush.msrb.mxu2 %v3417_v18 }
 0xd47   : > { %3765 = vmatpush.msra.mxu3 %v3417_v18  ;;  %v7153_v18 = vperm.slane %v4009_v43, 0 }
 0xd48   : > { %v7120_v39 = vpop.xlane.xlu0 %2912  ;;  %3586 = vmatpush.msrb.mxu1 %v6703_v20  ;;  %3615 = vmatpush.msrb.mxu2 %v3416_v12 }
 0xd49   : > { %3766 = vmatpush.msra.mxu3 %v3416_v12  ;;  %v7647_v12 = vld [vmem:[#allocation36_spill] sm:$0xff] }
 0xd4a   : > { %3587 = vmatpush.msrb.mxu1 %v6710_v58  ;;  %3616 = vmatpush.msrb.mxu2 %v3415_v56 }
 0xd4b   : > { %3767 = vmatpush.msra.mxu3 %v3415_v56 }
 0xd4c   : > { %3588 = vmatpush.msrb.mxu1 %v6716_v27  ;;  %3617 = vmatpush.msrb.mxu2 %v3414_v44 }
 0xd4d   : > { %3768 = vmatpush.msra.mxu3 %v3414_v44  ;;  %v7648_v44 = vld [vmem:[#allocation27_spill] sm:$0xff] }
 0xd4e   : > { %3589 = vmatpush.msrb.mxu1 %v6723_v55  ;;  %3618 = vmatpush.msrb.mxu2 %v3413_v21 }
 0xd4f   : > { %3769 = vmatpush.msra.mxu3 %v3413_v21 }
 0xd50   : > { %3590 = vmatpush.msrb.mxu1 %v6731_v30  ;;  %3619 = vmatpush.msrb.mxu2 %v3412_v47 }
 0xd51   : > { %3770 = vmatpush.msra.mxu3 %v3412_v47  ;;  %v7649_v47 = vld [vmem:[#allocation37_spill] sm:$0xff] }
 0xd52   : > { %3591 = vmatpush.msrb.mxu1 %v6737_v52  ;;  %3620 = vmatpush.msrb.mxu2 %v3411_v29 }
 0xd53   : > { %3771 = vmatpush.msra.mxu3 %v3411_v29  ;;  %v7650_v29 = vld [vmem:[#allocation38_spill] sm:$0xff] }
 0xd54   : > { %3592 = vmatpush.msrb.mxu1 %v6745_v23  ;;  %3621 = vmatpush.msrb.mxu2 %v3410_v50 }
 0xd55   : > { %3772 = vmatpush.msra.mxu3 %v3410_v50 }
 0xd56   : > { %3593 = vmatpush.msrb.mxu1 %v7644_v13  ;;  %3622 = vmatpush.msrb.mxu2 %v7113_v31 }
 0xd57   : > { %3773 = vmatpush.msra.mxu3 %v7113_v31 }
 0xd58   : > { %3594 = vmatpush.msrb.mxu1 %v7645_v16 }
 0xd5a   : > { %3595 = vmatpush.msrb.mxu1 %v7646_v57 }
 0xd5c   : > { %3596 = vmatpush.msrb.mxu1 %v7647_v12 }
 0xd5e   : > { %3597 = vmatpush.msrb.mxu1 %v7648_v44 }
 0xd60   : > { %3598 = vmatpush.msrb.mxu1 %v7649_v47 }
 0xd62   : > { %3599 = vmatpush.msrb.mxu1 %v7650_v29 }
 0xd64   : > { %3600 = vmatpush.msrb.mxu1 %v6804_v34 }
 0xd72   : > { %v7136_v38 = vpop.xlane.xlu0 %2919 }
 0xd7a   : > { %v7130_v37 = vpop.xlane.xlu2 %3067 }
 0xd82   : > { %v3217_v60 = vpop.permute.xlu2 %3216 }
 0xd83   : > { %v3219_v11 = vsel %vm1246_vm0, %v3217_v60, 0.0  ;;  %v7170_v60 = vld [vmem:[%s7381_s12 + $0x1] ss:$0 sm:$0xff] }
 0xd84   : > { %3220 = vadd.xlane.f32.xlu2 %v3219_v11  ;;  %v7652_v11 = vld [vmem:[#allocation47_spill] sm:$0xff] }
 0xd85   : > { %v2923_v32 = vpop.permute.xlu0 %2922 }
 0xd86   : > { %v2925_v1 = vsel %vm1246_vm0, %v2923_v32, 0.0  ;;  %v7653_v32 = vld [vmem:[#allocation52_spill] sm:$0xff] }
 0xd87   : > { %v3403_v42 = vpop.f32.mrf.mxu0  ;;  %2926 = vadd.xlane.f32.xlu1 %v2925_v1  ;;  %v7656_v1 = vld [vmem:[#allocation55_spill] sm:$0xff] }
 0xd88   : > { %v3404_v54 = vadd.f32 %v3403_v42, %v7146_v51  ;;  %v7658_v42 = vld [vmem:[#allocation56_spill] sm:$0xff] }
 0xd8a   : > { %v3407_v36 = vmax.f32 %v3404_v54, 0.0 }
 0xd8c   : > { %3482 = vmatmul.f32.vlgmr.msra.gmra.mxu2 %v3407_v36 }
 0xd8d   : > { %v3383_v56 = vpop.f32.mrf.mxu3  ;;  %3736 = vmatpush.msra.mxu2 %v6697_v61  ;;  %v7651_v61 = vld [vmem:[#allocation51_spill] sm:$0xff] }
 0xd8e   : > { %v3384_v21 = vadd.f32 %v3383_v56, %v7153_v18 }
 0xd8f   : > { %3737 = vmatpush.msra.mxu2 %v6703_v20 }
 0xd90   : > { %v3406_v43 = vmax.f32 %v3384_v21, 0.0 }
 0xd91   : > { %3738 = vmatpush.msra.mxu2 %v6710_v58  ;;  %v7655_v58 = vld [vmem:[#allocation54_spill] sm:$0xff] }
 0xd92   : > { %3462 = vmatmul.f32.vlgmr.msra.gmra.mxu1 %v3406_v43 }
 0xd93   : > { %3716 = vmatpush.msra.mxu1 %v6652_v26  ;;  %3739 = vmatpush.msra.mxu2 %v6716_v27  ;;  %v7654_v26 = vld [vmem:[#allocation53_spill] sm:$0xff]  ;;  %v7657_v27 = vld [vmem:[#allocation50_spill] sm:$0xff] }
 0xd95   : > { %v3539_v50 = vpop.f32.mrf.mxu3  ;;  %3717 = vmatpush.msra.mxu1 %v7651_v61  ;;  %3740 = vmatpush.msra.mxu2 %v6723_v55  ;;  %v7659_v55 = vld [vmem:[#allocation57_spill] sm:$0xff] }
 0xd96   : > { %v3540_v31 = vadd.f32 %v7170_v60, %v3539_v50 }
 0xd97   : > { %3718 = vmatpush.msra.mxu1 %v7653_v32  ;;  %3741 = vmatpush.msra.mxu2 %v6731_v30  ;;  %v7660_v30 = vld [vmem:[#allocation58_spill] sm:$0xff] }
 0xd98   : > { %v7176_v20 = vadd.f32 %v3540_v31, %v7652_v11 }
 0xd99   : > { %3719 = vmatpush.msra.mxu1 %v7654_v26  ;;  %3742 = vmatpush.msra.mxu2 %v6737_v52 }
 0xd9a   : > { %3543 = vadd.xlane.f32.xlu0 %v7176_v20 }
 0xd9b   : > { %3720 = vmatpush.msra.mxu1 %v7655_v58  ;;  %3743 = vmatpush.msra.mxu2 %v6745_v23 }
 0xd9d   : > { %3721 = vmatpush.msra.mxu1 %v7656_v1  ;;  %3744 = vmatpush.msra.mxu2 %v7644_v13 }
 0xd9f   : > { %3722 = vmatpush.msra.mxu1 %v7658_v42  ;;  %3745 = vmatpush.msra.mxu2 %v7645_v16 }
 0xda0   : > { %3069 = vrot.lane.b32.xlu1 %v7657_v27, %s4657_s9 }
 0xda1   : > { %3723 = vmatpush.msra.mxu1 %v6674_v59  ;;  %3746 = vmatpush.msra.mxu2 %v7646_v57  ;;  %v2928_v59 = vmax.f32 %v7120_v39, %v7136_v38 }
 0xda3   : > { %3724 = vmatpush.msra.mxu1 %v6679_v5  ;;  %3747 = vmatpush.msra.mxu2 %v7647_v12 }
 0xda5   : > { %3725 = vmatpush.msra.mxu1 %v7659_v55  ;;  %3748 = vmatpush.msra.mxu2 %v7648_v44 }
 0xda7   : > { %3726 = vmatpush.msra.mxu1 %v7660_v30  ;;  %3749 = vmatpush.msra.mxu2 %v7649_v47  ;;  %v7223_v47 = vld [vmem:[%s7385_s16 + $0x1] ss:$0 sm:$0xff] }
 0xda8   : > { %3075 = vrot.lane.b32.xlu1 %v6386_v33, %s4657_s9 }
 0xda9   : > { %3727 = vmatpush.msra.mxu1 %v6694_v9  ;;  %3750 = vmatpush.msra.mxu2 %v7650_v29 }
 0xdab   : > { %3728 = vmatpush.msra.mxu1 %v6700_v14  ;;  %3751 = vmatpush.msra.mxu2 %v6804_v34 }
 0xdad   : > { %3729 = vmatpush.msra.mxu1 %v6707_v24 }
 0xdae   : > { %3222 = vrot.lane.b32.xlu0 %v7657_v27, %s4656_s24 }
 0xdaf   : > { %3730 = vmatpush.msra.mxu1 %v6713_v49 }
 0xdb0   : > { %3228 = vrot.lane.b32.xlu1 %v6386_v33, %s4656_s24  ;;  %s7667_s24 = sld [smem:[#allocation70_spill]] }
 0xdb1   : > { %3731 = vmatpush.msra.mxu1 %v6719_v17 }
 0xdb6   : > { %s3836_s5 = scalar_lea.hbm %s7667_s24, %s4019_s21  ;;  %s4584_s26 = scalar_lea.hbm %s7667_s24, 48 }
 0xdb7   : > { %s3840_s11 = sshll.u32 %s3836_s5, 4  ;;  %s3841_s11 = int_to_ptr.hbm [resolvable:$true] %s3840_s11 }
 0xdb8   : > { %s4578_s25 = sshra.s32 %s3841_s11, 4  ;;  %s4579_s25 = int_to_ptr.hbm [resolvable:$true] %s4578_s25 }
 0xdb9   : > { %s4580_s27 = scalar_lea.hbm %s4579_s25, 24  ;;  %p4585_p3 = scmp.lt.s32.totalorder %s4579_s25, %s7667_s24 }
 0xdba   : > { %p4581_p0 = scmp.ne.s32.totalorder %s4579_s25, %s4580_s27  ;;  %p4586_p4 = scmp.lt.s32.totalorder %s4584_s26, %s4580_s27 }
 0xdbc   : > { %p4582_p1 = pnand %p4581_p0, %p4808_p5  ;;  %p4587_p7 = por %p4586_p4, %p4585_p3 }
 0xdbe   : > { %p4583_p2 = pneg %p4582_p1 }
 0xdc0   : > { %p4588_p8 = pnand %p4587_p7, %p4583_p2 }
 0xdfa   : > { %v2927_v5 = vpop.xlane.xlu1 %2926 }
 0xdfb   : > { %v2929_v9 = vmax.f32 %v2928_v59, %v2927_v5 }
 0xdfd   : > { %v2930_v14 = vsub.f32 %v7120_v39, %v2929_v9  ;;  %v2933_v52 = vsub.f32 %v7136_v38, %v2929_v9  ;;  %v2936_v23 = vsub.f32 %v2927_v5, %v2929_v9  ;;  %v7661_v38 = vld [vmem:[#allocation49_spill] sm:$0xff] }
 0xdff   : > { %v2931_v24 = vmul.f32 1.442695, %v2930_v14  ;;  %v2934_v13 = vmul.f32 1.442695, %v2933_v52  ;;  %v2937_v34 = vmul.f32 1.442695, %v2936_v23 }
 0xe00   : > { %v7662_v52 = vld [vmem:[#allocation34_spill] sm:$0xff] }
 0xe01   : > { %4329 = vpow2.f32 %v2931_v24 }
 0xe02   : > { %4331 = vpow2.f32 %v2934_v13 }
 0xe03   : > { %4333 = vpow2.f32 %v2937_v34 }
 0xe07   : > { %v4330_v33 = vpop.eup %4329 }
 0xe08   : > { %v4332_v49 = vpop.eup %4331  ;;  %v2941_v39 = vmul.f32 %v4330_v33, %v6523_v45 }
 0xe09   : > { %v2939_v16 = vadd.f32 %v4332_v49, %v4330_v33  ;;  %v4334_v17 = vpop.eup %4333  ;;  %v2942_v56 = vmul.f32 %v4332_v49, %v7661_v38 }
 0xe0a   : > { %v2944_v32 = vmul.f32 %v4334_v17, %v6537_v6 }
 0xe0b   : > { %v2940_v54 = vadd.f32 %v4334_v17, %v2939_v16  ;;  %v2943_v50 = vadd.f32 %v2942_v56, %v2941_v39 }
 0xe0d   : > { %4335 = vrcp.f32 %v2940_v54  ;;  %v2957_v29 = vand.u32 2147483648, %v2940_v54  ;;  %v3544_v31 = vpop.xlane.xlu0 %3543  ;;  %v2955_v11 = vand.u32 2147483647, %v2940_v54  ;;  %vm2951_vm13 = vweird.f32 %v2940_v54 }
 0xe0e   : > { %v2945_v55 = vadd.f32 %v2944_v32, %v2943_v50  ;;  %v3545_v23 = vmul.f32 %v3544_v31, %v7662_v52 }
 0xe0f   : > { %v3463_v43 = vpop.f32.mrf.mxu1  ;;  %v2958_v42 = vor.u32 1.1754944e-38, %v2957_v29  ;;  %vm2956_vm6 = vcmp.eq.f32.partialorder %v2955_v11, 8.507059e+37  ;;  %v3483_v59 = vpop.f32.mrf.mxu2 }
 0xe10   : > { %v3464_v26 = vadd.f32 %v7223_v47, %v3463_v43  ;;  %v7237_v17 = vsub.f32 %v7176_v20, %v3545_v23 }
 0xe12   : > { %v3070_v57 = vpop.permute.xlu1 %3069  ;;  %v3484_v9 = vadd.f32 %v3483_v59, %v3464_v26 }
 0xe13   : > { %v4336_v36 = vpop.eup %4335  ;;  %v3072_v12 = vsel %vm1246_vm0, %v3070_v57, 0.0 }
 0xe14   : > { %v2947_v44 = vmul.f32 %v4336_v36, %v2940_v54  ;;  %3073 = vadd.xlane.f32.xlu0 %v3072_v12  ;;  %vm2952_vm4 = vweird.f32 %v4336_v36  ;;  %v3486_v33 = vadd.f32 %v3484_v9, %v6991_v40  ;;  %v3547_v54 = vmul.f32 %v7237_v17, %v7237_v17 }
 0xe15   : > { %vm2953_vm5 = vmor %vm2951_vm13, %vm2952_vm4 }
 0xe16   : > { %v2948_v21 = vsub.f32 1.0, %v2947_v44 }
 0xe18   : > { %v2949_v61 = vmul.f32 %v4336_v36, %v2948_v21 }
 0xe1a   : > { %v3076_v58 = vpop.permute.xlu1 %3075  ;;  %v2950_v1 = vadd.f32 %v4336_v36, %v2949_v61 }
 0xe1b   : > { %v3078_v27 = vsel %vm1246_vm0, %v3076_v58, 0.0 }
 0xe1c   : > { %3079 = vadd.xlane.f32.xlu0 %v3078_v27  ;;  %v2954_v30 = vsel %vm2953_vm5, %v4336_v36, %v2950_v1  ;;  %v3221_v36 = vpop.xlane.xlu2 %3220 }
 0xe1d   : > { %v2959_v5 = vsel %vm2956_vm6, %v2958_v42, %v2954_v30 }
 0xe1e   : > { %v2960_v14 = vmul.f32 %v2959_v5, %v2945_v55 }
 0xe20   : > { %v3223_v24 = vpop.permute.xlu0 %3222  ;;  %v7231_v13 = vsel %vm1246_vm0, %v7020_v15, %v2960_v14 }
 0xe21   : > { %v3225_v34 = vsel %vm1246_vm0, %v3223_v24, 0.0 }
 0xe22   : > { %v3229_v49 = vpop.permute.xlu1 %3228  ;;  %3226 = vadd.xlane.f32.xlu1 %v3225_v34 }
 0xe23   : > { %v3231_v16 = vsel %vm1246_vm0, %v3229_v49, 0.0 }
 0xe24   : > { %3491 = vadd.xlane.f32.xlu0 %v3486_v33  ;;  %3232 = vadd.xlane.f32.xlu2 %v3231_v16 }
 0xe2a   : > { %3548 = vadd.xlane.f32.xlu1 %v3547_v54 }
 0xe87   : > { %v3074_v57 = vpop.xlane.xlu0 %3073 }
 0xe88   : > { %v3081_v15 = vmax.f32 %v7130_v37, %v3074_v57 }
 0xe8f   : > { %v3080_v12 = vpop.xlane.xlu0 %3079 }
 0xe90   : > { %v3082_v39 = vmax.f32 %v3081_v15, %v3080_v12 }
 0xe92   : > { %v3083_v40 = vsub.f32 %v7130_v37, %v3082_v39  ;;  %v3086_v56 = vsub.f32 %v3074_v57, %v3082_v39  ;;  %v3089_v44 = vsub.f32 %v3080_v12, %v3082_v39 }
 0xe94   : > { %v3084_v21 = vmul.f32 1.442695, %v3083_v40  ;;  %v3087_v43 = vmul.f32 1.442695, %v3086_v56  ;;  %v3090_v20 = vmul.f32 1.442695, %v3089_v44 }
 0xe95   : > { %v3227_v29 = vpop.xlane.xlu1 %3226 }
 0xe96   : > { %4337 = vpow2.f32 %v3084_v21  ;;  %v3234_v50 = vmax.f32 %v3221_v36, %v3227_v29 }
 0xe97   : > { %4339 = vpow2.f32 %v3087_v43  ;;  %v3233_v31 = vpop.xlane.xlu2 %3232  ;;  %v3492_v61 = vpop.xlane.xlu0 %3491 }
 0xe98   : > { %v3235_v11 = vmax.f32 %v3234_v50, %v3233_v31  ;;  %v3493_v32 = vmul.f32 %v3492_v61, %v7662_v52  ;;  %4341 = vpow2.f32 %v3090_v20 }
 0xe9a   : > { %v3236_v26 = vsub.f32 %v3221_v36, %v3235_v11  ;;  %v3239_v58 = vsub.f32 %v3227_v29, %v3235_v11  ;;  %v3242_v1 = vsub.f32 %v3233_v31, %v3235_v11  ;;  %v7244_v27 = vsub.f32 %v3486_v33, %v3493_v32 }
 0xe9c   : > { %v4338_v37 = vpop.eup %4337  ;;  %v3237_v42 = vmul.f32 1.442695, %v3236_v26  ;;  %v3240_v55 = vmul.f32 1.442695, %v3239_v58  ;;  %v3495_v30 = vmul.f32 %v7244_v27, %v7244_v27  ;;  %v3243_v5 = vmul.f32 1.442695, %v3242_v1 }
 0xe9d   : > { %v4340_v59 = vpop.eup %4339  ;;  %v3549_v9 = vpop.xlane.xlu1 %3548  ;;  %v3094_v50 = vmul.f32 %v4338_v37, %v6523_v45 }
 0xe9e   : > { %v3092_v14 = vadd.f32 %v4340_v59, %v4338_v37  ;;  %4343 = vpow2.f32 %v3237_v42  ;;  %v3550_v23 = vmul.f32 %v3549_v9, %v7662_v52  ;;  %3496 = vadd.xlane.f32.xlu2 %v3495_v30  ;;  %v4342_v24 = vpop.eup %4341  ;;  %v3095_v61 = vmul.f32 %v4340_v59, %v7661_v38 }
 0xe9f   : > { %4345 = vpow2.f32 %v3240_v55 }
 0xea0   : > { %v3093_v34 = vadd.f32 %v4342_v24, %v3092_v14  ;;  %v3551_v49 = vadd.f32 1e-05, %v3550_v23  ;;  %4347 = vpow2.f32 %v3243_v5  ;;  %v3096_v59 = vadd.f32 %v3095_v61, %v3094_v50 }
 0xea2   : > { %4349 = vrcp.f32 %v3093_v34  ;;  %vm3558_vm8 = vweird.f32 %v3551_v49  ;;  %vm3104_vm9 = vweird.f32 %v3093_v34  ;;  %v3108_v26 = vand.u32 2147483647, %v3093_v34 }
 0xea3   : > { %4351 = vrsqrt.f32 %v3551_v49  ;;  %v3110_v42 = vand.u32 2147483648, %v3093_v34 }
 0xea4   : > { %v4344_v33 = vpop.eup %4343  ;;  %vm3109_vm1 = vcmp.eq.f32.partialorder %v3108_v26, 8.507059e+37 }
 0xea5   : > { %v4346_v16 = vpop.eup %4345  ;;  %v3247_v55 = vmul.f32 %v4344_v33, %v6523_v45 }
 0xea6   : > { %v3245_v54 = vadd.f32 %v4346_v16, %v4344_v33  ;;  %v4348_v57 = vpop.eup %4347  ;;  %v3248_v30 = vmul.f32 %v4346_v16, %v7661_v38  ;;  %v3097_v38 = vmul.f32 %v4342_v24, %v6537_v6 }
 0xea8   : > { %v4350_v15 = vpop.eup %4349  ;;  %v3246_v36 = vadd.f32 %v4348_v57, %v3245_v54  ;;  %v3249_v33 = vadd.f32 %v3248_v30, %v3247_v55 }
 0xea9   : > { %v4352_v12 = vpop.eup %4351  ;;  %v3100_v39 = vmul.f32 %v4350_v15, %v3093_v34  ;;  %vm3105_vm7 = vweird.f32 %v4350_v15 }
 0xeaa   : > { %4353 = vrcp.f32 %v3246_v36  ;;  %v3553_v40 = vmul.f32 %v4352_v12, %v3551_v49  ;;  %vm3559_vm0 = vweird.f32 %v4352_v12  ;;  %v3263_v9 = vand.u32 2147483648, %v3246_v36  ;;  %vm7255_vm11 = vmor %vm3104_vm9, %vm3105_vm7 }
 0xeab   : > { %v3101_v56 = vsub.f32 1.0, %v3100_v39  ;;  %vm3560_vm10 = vmor %vm3558_vm8, %vm3559_vm0  ;;  %v3261_v23 = vand.u32 2147483647, %v3246_v36  ;;  %vm3257_vm14 = vweird.f32 %v3246_v36  ;;  %v3250_v39 = vmul.f32 %v4348_v57, %v6537_v6 }
 0xeac   : > { %v3554_v44 = vmul.f32 %v4352_v12, %v3553_v40 }
 0xead   : > { %v3102_v43 = vmul.f32 %v4350_v15, %v3101_v56  ;;  %vm3262_vm4 = vcmp.eq.f32.partialorder %v3261_v23, 8.507059e+37  ;;  %v3251_v24 = vadd.f32 %v3250_v39, %v3249_v33  ;;  %v4383_v39 = vld [vmem:[%s7387_s18 + $0x1] ss:$0 sm:$0xff] }
 0xeae   : > { %v3555_v21 = vmul.f32 0.5, %v3554_v44 }
 0xeaf   : > { %v3103_v32 = vadd.f32 %v4350_v15, %v3102_v43 }
 0xeb0   : > { %v4354_v20 = vpop.eup %4353  ;;  %v3556_v29 = vsub.f32 1.5, %v3555_v21 }
 0xeb1   : > { %v3253_v31 = vmul.f32 %v4354_v20, %v3246_v36  ;;  %vm3258_vm12 = vweird.f32 %v4354_v20  ;;  %v3107_v54 = vsel %vm7255_vm11, %v4350_v15, %v3103_v32 }
 0xeb2   : > { %v3557_v11 = vmul.f32 %v4352_v12, %v3556_v29  ;;  %vm3259_vm15 = vmor %vm3257_vm14, %vm3258_vm12  ;;  %v7666_v29 = vld [vmem:[#allocation48_spill] sm:$0xff] }
 0xeb3   : > { %v3254_v58 = vsub.f32 1.0, %v3253_v31 }
 0xeb4   : > { %v3561_v1 = vsel %vm3560_vm10, %v4352_v12, %v3557_v11  ;;  %v3264_v12 = vor.u32 1.1754944e-38, %v3263_v9 }
 0xeb5   : > { %v3562_v5 = vmul.f32 %v3561_v1, %v7237_v17  ;;  %v3255_v37 = vmul.f32 %v4354_v20, %v3254_v58  ;;  %v3111_v17 = vor.u32 1.1754944e-38, %v3110_v42 }
 0xeb7   : > { %v3563_v49 = vmul.f32 %v6956_v53, %v3562_v5  ;;  %v3256_v45 = vadd.f32 %v4354_v20, %v3255_v37  ;;  %v3112_v40 = vsel %vm3109_vm1, %v3111_v17, %v3107_v54  ;;  %v3098_v53 = vadd.f32 %v3097_v38, %v3096_v59 }
 0xeb9   : > { %v7264_v16 = vadd.f32 %v6975_v46, %v3563_v49  ;;  %v3260_v34 = vsel %vm3259_vm15, %v4354_v20, %v3256_v45  ;;  %v3113_v36 = vmul.f32 %v3112_v40, %v3098_v53 }
 0xeba   : > { %v3265_v15 = vsel %vm3262_vm4, %v3264_v12, %v3260_v34  ;;  %v4382_v34 = vld [vmem:[%s7386_s17 + $0x1] ss:$0 sm:$0xff] }
 0xebb   : > { %3581 = vmatmul.f32.vlgmr.msrb.gmra.mxu0 %v7264_v16  ;;  %3601 = vmatmul.f32.vlgmr.msrb.gmra.mxu1 %v7264_v16  ;;  %v3266_v56 = vmul.f32 %v3265_v15, %v3251_v24  ;;  %v3671_v6 = vsel %vm1850_vm2, %v7231_v13, %v3113_v36 }
 0xebc   : > { %3778 = vmatpush.msrb.mxu0 %v7024_v3 }
 0xebd   : > { %v3672_v46 = vsel %vm1852_vm3, %v3671_v6, %v3266_v56 }
 0xebe   : > { %3779 = vmatpush.msrb.mxu0 %v7026_v35 }
 0xec0   : > { %3780 = vmatpush.msrb.mxu0 %v7031_v0 }
 0xec2   : > { %3781 = vmatpush.msrb.mxu0 %v7040_v19 }
 0xec3   : > { %3689 = vmatmul.f32.vlgmr.msra.gmra.mxu0 %v3672_v46 }
 0xec4   : > { %3782 = vmatpush.msrb.mxu0 %v7046_v22 }
 0xec6   : > { %3783 = vmatpush.msrb.mxu0 %v7050_v2 }
 0xec8   : > { %3784 = vmatpush.msrb.mxu0 %v7057_v7 }
 0xeca   : > { %3785 = vmatpush.msrb.mxu0 %v7067_v28 }
 0xecc   : > { %3786 = vmatpush.msrb.mxu0 %v7071_v10 }
 0xece   : > { %3787 = vmatpush.msrb.mxu0 %v7078_v62  ;;  %v7293_v62 = vld [vmem:[%s7388_s19 + $0x1] ss:$0 sm:$0xff] }
 0xed0   : > { %3788 = vmatpush.msrb.mxu0 %v7083_v8 }
 0xed2   : > { %3789 = vmatpush.msrb.mxu0 %v7090_v48  ;;  %v7300_v48 = vld [vmem:[%s7603_s4 + $0x1] ss:$0 sm:$0xff] }
 0xed4   : > { %3790 = vmatpush.msrb.mxu0 %v7094_v4 }
 0xed6   : > { %3791 = vmatpush.msrb.mxu0 %v7099_v63 }
 0xed8   : > { %3792 = vmatpush.msrb.mxu0 %v7102_v41 }
 0xeda   : > { %3793 = vmatpush.msrb.mxu0 %v7104_v25 }
 0xf11   : > { %v3497_v3 = vpop.xlane.xlu2 %3496 }
 0xf12   : > { %v3498_v35 = vmul.f32 %v3497_v3, %v7662_v52 }
 0xf14   : > { %v3499_v0 = vadd.f32 1e-05, %v3498_v35 }
 0xf16   : > { %4355 = vrsqrt.f32 %v3499_v0  ;;  %vm3506_vm3 = vweird.f32 %v3499_v0 }
 0xf1c   : > { %v4356_v19 = vpop.eup %4355 }
 0xf1d   : > { %v3501_v22 = vmul.f32 %v4356_v19, %v3499_v0  ;;  %vm3507_vm2 = vweird.f32 %v4356_v19 }
 0xf1e   : > { %vm3508_vm13 = vmor %vm3506_vm3, %vm3507_vm2 }
 0xf1f   : > { %v3502_v2 = vmul.f32 %v4356_v19, %v3501_v22 }
 0xf21   : > { %v3503_v7 = vmul.f32 0.5, %v3502_v2 }
 0xf23   : > { %v3504_v28 = vsub.f32 1.5, %v3503_v7 }
 0xf25   : > { %v3505_v10 = vmul.f32 %v4356_v19, %v3504_v28 }
 0xf27   : > { %v3509_v8 = vsel %vm3508_vm13, %v4356_v19, %v3505_v10 }
 0xf28   : > { %v3510_v4 = vmul.f32 %v3509_v8, %v7244_v27 }
 0xf2a   : > { %v3514_v63 = vmul.f32 %v7293_v62, %v3510_v4 }
 0xf2c   : > { %v3518_v41 = vadd.f32 %v7300_v48, %v3514_v63 }
 0xf2e   : > { %3821 = vst [vmem:[%s7305_s29] sm:$0xff] %v3518_v41 }
 0xf38   : > { %v3582_v25 = vpop.f32.mrf.mxu0  ;;  %v3602_v13 = vpop.f32.mrf.mxu1 }
 0xf39   : > { %v3583_v57 = vadd.f32 %v3582_v25, %v7153_v18  ;;  %v3603_v44 = vadd.f32 %v3602_v13, %v7146_v51 }
 0xf3b   : > { %v3605_v21 = vmax.f32 %v3583_v57, 0.0  ;;  %v3606_v43 = vmax.f32 %v3603_v44, 0.0 }
 0xf3d   : > { %3623 = vmatmul.f32.vlgmr.msrb.gmra.mxu2 %v3605_v21  ;;  %3643 = vmatmul.f32.vlgmr.msrb.gmra.mxu3 %v3606_v43 }
 0xf40   : > { %v3690_v20 = vpop.f32.mrf.mxu0 }
 0xf41   : > { %v3691_v27 = vadd.f32 %v7170_v60, %v3690_v20 }
 0xf43   : > { %v3693_v50 = vadd.f32 %v3691_v27, %v7666_v29 }
 0xf45   : > { %3694 = vadd.xlane.f32.xlu2 %v3693_v50 }
 0xfb8   : > { %v3695_v11 = vpop.xlane.xlu2 %3694 }
 0xfb9   : > { %v3696_v58 = vmul.f32 %v3695_v11, %v7662_v52 }
 0xfbb   : > { %v3697_v42 = vsub.f32 %v3693_v50, %v3696_v58 }
 0xfbd   : > { %v3698_v55 = vmul.f32 %v3697_v42, %v3697_v42 }
 0xfc0   : > { %v3624_v31 = vpop.f32.mrf.mxu2  ;;  %v3644_v32 = vpop.f32.mrf.mxu3 }
 0xfc1   : > { %v3625_v61 = vadd.f32 %v7223_v47, %v3624_v31 }
 0xfc3   : > { %v3645_v26 = vadd.f32 %v3644_v32, %v3625_v61 }
 0xfc5   : > { %v3647_v1 = vadd.f32 %v3645_v26, %v7264_v16 }
 0xfc7   : > { %3648 = vadd.xlane.f32.xlu1 %v3647_v1 }
 0xfcf   : > { %3699 = vadd.xlane.f32.xlu1 %v3698_v55 }
0x103a   : > { %v3649_v30 = vpop.xlane.xlu1 %3648 }
0x103b   : > { %v3650_v60 = vmul.f32 %v3649_v30, %v7662_v52 }
0x103d   : > { %v3651_v5 = vsub.f32 %v3647_v1, %v3650_v60 }
0x103f   : > { %v3652_v37 = vmul.f32 %v3651_v5, %v3651_v5 }
0x1041   : > { %3653 = vadd.xlane.f32.xlu0 %v3652_v37 }
0x1042   : > { %v3700_v9 = vpop.xlane.xlu1 %3699 }
0x1043   : > { %v3701_v59 = vmul.f32 %v3700_v9, %v7662_v52 }
0x1045   : > { %v3702_v14 = vadd.f32 1e-05, %v3701_v59 }
0x1047   : > { %4357 = vrsqrt.f32 %v3702_v14  ;;  %vm3709_vm6 = vweird.f32 %v3702_v14 }
0x104d   : > { %v4358_v23 = vpop.eup %4357 }
0x104e   : > { %v3704_v49 = vmul.f32 %v4358_v23, %v3702_v14  ;;  %vm3710_vm5 = vweird.f32 %v4358_v23 }
0x104f   : > { %vm3711_vm0 = vmor %vm3709_vm6, %vm3710_vm5 }
0x1050   : > { %v3705_v54 = vmul.f32 %v4358_v23, %v3704_v49 }
0x1052   : > { %v3706_v45 = vmul.f32 0.5, %v3705_v54 }
0x1054   : > { %v3707_v38 = vsub.f32 1.5, %v3706_v45 }
0x1056   : > { %v3708_v17 = vmul.f32 %v4358_v23, %v3707_v38 }
0x1058   : > { %v3712_v33 = vsel %vm3711_vm0, %v4358_v23, %v3708_v17 }
0x1059   : > { %v3713_v16 = vmul.f32 %v3712_v33, %v3697_v42 }
0x105b   : > { %v3714_v12 = vmul.f32 %v4382_v34, %v3713_v16 }
0x105d   : > { %v3715_v40 = vadd.f32 %v4383_v39, %v3714_v12 }
0x105f   : > { %3732 = vmatmul.f32.vlgmr.msra.gmra.mxu1 %v3715_v40  ;;  %3752 = vmatmul.f32.vlgmr.msra.gmra.mxu2 %v3715_v40 }
0x10b4   : > { %v3654_v53 = vpop.xlane.xlu0 %3653 }
0x10b5   : > { %v3655_v15 = vmul.f32 %v3654_v53, %v7662_v52 }
0x10b7   : > { %v3656_v24 = vadd.f32 1e-05, %v3655_v15 }
0x10b9   : > { %4359 = vrsqrt.f32 %v3656_v24  ;;  %vm3663_vm9 = vweird.f32 %v3656_v24 }
0x10bf   : > { %v4360_v36 = vpop.eup %4359 }
0x10c0   : > { %v3658_v56 = vmul.f32 %v4360_v36, %v3656_v24  ;;  %vm3664_vm8 = vweird.f32 %v4360_v36 }
0x10c1   : > { %vm3665_vm10 = vmor %vm3663_vm9, %vm3664_vm8 }
0x10c2   : > { %v3659_v6 = vmul.f32 %v4360_v36, %v3658_v56 }
0x10c4   : > { %v3660_v46 = vmul.f32 0.5, %v3659_v6 }
0x10c6   : > { %v3661_v3 = vsub.f32 1.5, %v3660_v46 }
0x10c8   : > { %v3662_v35 = vmul.f32 %v4360_v36, %v3661_v3 }
0x10ca   : > { %v3666_v0 = vsel %vm3665_vm10, %v4360_v36, %v3662_v35 }
0x10cb   : > { %v3667_v19 = vmul.f32 %v3666_v0, %v3651_v5 }
0x10cd   : > { %v3668_v22 = vmul.f32 %v7293_v62, %v3667_v19 }
0x10cf   : > { %v3669_v2 = vadd.f32 %v7300_v48, %v3668_v22 }
0x10d1   : > { %3822 = vst [vmem:[%s7305_s29 + $0x8] sm:$0xff] %v3669_v2 }
0x10dc   : > { %v3733_v7 = vpop.f32.mrf.mxu1 }
0x10dd   : > { %v3734_v28 = vadd.f32 %v3733_v7, %v7153_v18 }
0x10df   : > { %v3756_v10 = vmax.f32 %v3734_v28, 0.0 }
0x10e1   : > { %3774 = vmatmul.f32.vlgmr.msra.gmra.mxu3 %v3756_v10 }
0x10e2   : > { %v3753_v8 = vpop.f32.mrf.mxu2 }
0x10e3   : > { %v3754_v4 = vadd.f32 %v3753_v8, %v7146_v51 }
0x10e5   : > { %v3757_v63 = vmax.f32 %v3754_v4, 0.0 }
0x10e7   : > { %3794 = vmatmul.f32.vlgmr.msrb.gmra.mxu0 %v3757_v63 }
0x1164   : > { %v3775_v41 = vpop.f32.mrf.mxu3  ;;  %v3795_v13 = vpop.f32.mrf.mxu0 }
0x1165   : > { %v3776_v25 = vadd.f32 %v7223_v47, %v3775_v41 }
0x1167   : > { %v3796_v57 = vadd.f32 %v3795_v13, %v3776_v25 }
0x1169   : > { %v3798_v44 = vadd.f32 %v3796_v57, %v3715_v40 }
0x116b   : > { %3799 = vadd.xlane.f32.xlu0 %v3798_v44 }
0x11de   : > { %v3800_v21 = vpop.xlane.xlu0 %3799 }
0x11df   : > { %v3801_v43 = vmul.f32 %v3800_v21, %v7662_v52 }
0x11e1   : > { %v3802_v20 = vsub.f32 %v3798_v44, %v3801_v43 }
0x11e3   : > { %v3803_v18 = vmul.f32 %v3802_v20, %v3802_v20 }
0x11e5   : > { %3804 = vadd.xlane.f32.xlu2 %v3803_v18 }
0x1258   : > { %v3805_v27 = vpop.xlane.xlu2 %3804 }
0x1259   : > { %v3806_v29 = vmul.f32 %v3805_v27, %v7662_v52 }
0x125b   : > { %v3807_v51 = vadd.f32 1e-05, %v3806_v29 }
0x125d   : > { %4361 = vrsqrt.f32 %v3807_v51  ;;  %vm3814_vm12 = vweird.f32 %v3807_v51 }
0x1263   : > { %v4362_v50 = vpop.eup %4361 }
0x1264   : > { %v3809_v31 = vmul.f32 %v4362_v50, %v3807_v51  ;;  %vm3815_vm7 = vweird.f32 %v4362_v50 }
0x1265   : > { %vm3816_vm11 = vmor %vm3814_vm12, %vm3815_vm7 }
0x1266   : > { %v3810_v47 = vmul.f32 %v4362_v50, %v3809_v31 }
0x1268   : > { %v3811_v61 = vmul.f32 0.5, %v3810_v47 }
0x126a   : > { %v3812_v11 = vsub.f32 1.5, %v3811_v61 }
0x126c   : > { %v3813_v32 = vmul.f32 %v4362_v50, %v3812_v11 }
0x126e   : > { %v3817_v52 = vsel %vm3816_vm11, %v4362_v50, %v3813_v32 }
0x126f   : > { %v3818_v26 = vmul.f32 %v3817_v52, %v3802_v20 }
0x1271   : > { %v3819_v58 = vmul.f32 %v7293_v62, %v3818_v26 }
0x1273   : > { %v3820_v1 = vadd.f32 %v7300_v48, %v3819_v58 }
0x1275   : > { %3823 = vst [vmem:[%s7305_s29 + $0x10] sm:$0xff] %v3820_v1 }
0x1276   : > { %4591 = shalt.err (!%p4588_p8)
}
0x1277   : > { %4044 = dma.vmem_to_hbm [thread:$0]  (%p4808_p5), %s3839_s2, 384, %s3841_s11, %s3825_s3  }
0x1278 PF: > { %s7669_s28 = sld [smem:[#allocation22_spill]] }
0x1279   : > { %s7670_s22 = sld [smem:[#allocation19_spill]] }
0x127e   : > { %p4081_p9 = scmp.ge.s32.totalorder %s7669_s28, 2 }
0x127f   : > { %s3852_s30 = sand.u32 1, %s7670_s22  }
0x1280   : > { %p4066_p10 = pnand %p4081_p9, %p4812_p6  ;;  %s3853_s20 = scalar_lea.sflag [#allocation4], %s3852_s30 }
0x1282   : > { %p4067_p11 = pneg %p4066_p10 }
0x1284   : > { %4625 = dma.done.wait (%p4067_p11), %s3853_s20, 384  }
0x1285   : > { %4627 = vsyncadd (%p4067_p11), %s3853_s20, 4294966912  ;;  %s7672_s27 = sld [smem:[#allocation23_spill]] }
0x1286   : > { %s7673_s2 = sld [smem:[#allocation20_spill]] }
0x1287   : > { %s7674_s25 = sld [smem:[#allocation21_spill]] }
0x1288   : > { %s7675_s26 = sld [smem:[#allocation24_spill]] }
0x128b   : > { %p35_p12 = scmp.ge.s32.totalorder %s7672_s27, 4  }
0x128d   :  { %37 = sbr.rel (!%p35_p12) target bundleno = 18 (0x12), region = 182 }
0x1292   :  { %3859 = vsyncpa [#allocation3], 1 }
0x1293   :  { %3861 = vsyncpa [#allocation3 + $0x1], 1 }
0x1294   :  { %3862 = vsyncpa [#allocation6], 1 }
0x1295   :  { %3863 = vsyncpa [#allocation9], 1 }
0x1296   :  { %3864 = vsyncpa [#allocation12], 1 }
0x1297   :  { %3865 = vsyncpa [#allocation4], 1 }
0x1298   :  { %3867 = vsyncpa [#allocation4 + $0x1], 1 }

</bundles_post_ra>
